<compile_context>
chip_gen: v7x
topology: tpu7x:2x2x1
jax: 0.10.0
libtpu: 0.0.40
codegen_flags: <defaults>
</compile_context>

<pallas_src>
import functools
import math

import jax
import jax.numpy as jnp
from jax.experimental import pallas as pl
from jax.experimental.pallas import tpu as pltpu

# ------------------------------ config -------------------------------------
CFG = dict(NE=50, vocab_g=20, vocab_bert=30,
           d_c=32, d_g=64, k_c=8, s_c=8, k_g=16, s_g=16,
           H=32, label_size=8)
assert (CFG["d_c"] - CFG["k_c"]) // CFG["s_c"] == (CFG["d_g"] - CFG["k_g"]) // CFG["s_g"]
CFG["nw"] = (CFG["d_c"] - CFG["k_c"]) // CFG["s_c"] + 1           # 4
CFG["n"] = CFG["nw"] * CFG["k_c"] * CFG["k_g"]                    # 512


def _round_up(x, m):
    return ((x + m - 1) // m) * m


# ---------- probe: single-buffer grid-invariant operands (Buffered(1)) -------
def _probe_buffered_one():
    """Grid-invariant blocks never re-DMA, so their second pipeline buffer is pure
    VMEM waste.  Use pipeline_mode=pl.Buffered(1) when supported; otherwise fall
    back to the default (still correct, just uses a bit more VMEM)."""
    try:
        mode = pl.Buffered(1)

        def _k(x_ref, o_ref):
            o_ref[...] = x_ref[...] + 1.0

        y = pl.pallas_call(
            _k,
            out_shape=jax.ShapeDtypeStruct((16, 128), jnp.float32),
            grid=(2,),
            in_specs=[pl.BlockSpec((8, 128), lambda i: (0, 0), pipeline_mode=mode)],
            out_specs=pl.BlockSpec((8, 128), lambda i: (i, 0)),
        )(jnp.ones((8, 128), jnp.float32))
        jax.block_until_ready(y)
        return {"pipeline_mode": mode}
    except Exception:
        return {}


_CONST_SPEC_KW = _probe_buffered_one()


# ---------------------- CGS-CNN (tiny-channel convs in XLA) -----------------
def maxpool2x2(x):
    N, H, W, C = x.shape
    Ho, Wo = H // 2, W // 2
    x = x[:, :Ho * 2, :Wo * 2, :].reshape(N, Ho, 2, Wo, 2, C)
    return jnp.max(x, axis=(2, 4))


def cgs_cnn_forward(params, char_ids):
    # Per perf review: 8..64-channel convs have lane-sparse outputs, so Pallas
    # gives no advantage over XLA's conv emitter; keep them in XLA (bf16 MXU,
    # f32 accumulation).  Dropout is identity in eval mode.
    NE = CFG["NE"]
    B, Sg = char_ids.shape
    cdt = jnp.bfloat16
    emb = params["cgs_emb"][char_ids] / 255.0                      # (B,Sg,NE*NE)
    img = emb.reshape(B, Sg, NE, NE, 1)                            # NDHWC, C=1
    w3 = jnp.transpose(params["conv3d_w"], (2, 3, 4, 1, 0)).astype(cdt)   # DHWIO
    x = jax.lax.conv_general_dilated(
        img.astype(cdt), w3, window_strides=(1, 1, 1),
        padding=((1, 1), (1, 1), (1, 1)),
        dimension_numbers=("NDHWC", "DHWIO", "NDHWC"),
        preferred_element_type=jnp.float32) + params["conv3d_b"]
    x = x.reshape(B * Sg, NE, NE, 8)                               # NHWC

    def conv2d(x, w_oihw, b):
        w = jnp.transpose(w_oihw, (2, 3, 1, 0)).astype(cdt)        # HWIO
        y = jax.lax.conv_general_dilated(
            x.astype(cdt), w, window_strides=(1, 1), padding="VALID",
            dimension_numbers=("NHWC", "HWIO", "NHWC"),
            preferred_element_type=jnp.float32)
        return y + b

    x = conv2d(x, params["conv2d0_w"], params["conv2d0_b"]); x = maxpool2x2(x)   # 48->24
    x = conv2d(x, params["conv2d_w"], params["conv2d_b"]);   x = maxpool2x2(x)   # 23->11
    x = conv2d(x, params["conv2d2_w"], params["conv2d2_b"]); x = maxpool2x2(x)   # 10->5
    x = conv2d(x, params["conv2d3_w"], params["conv2d3_b"]); x = maxpool2x2(x)   # 4->2
    x_nchw = jnp.transpose(x, (0, 3, 1, 2))                        # (B*Sg,64,2,2)
    x4 = x_nchw.reshape(B * Sg, 4, 64)                             # exact torch reshape
    g = jnp.max(x4, axis=-2)
    return g.reshape(B, Sg, 64)


# ------------------------- Oos sliding window -------------------------------
def slide_window_jax(x, window, stride):
    D = x.shape[-1]
    slices = [x[:, :, i:i + window] for i in range(0, D - window + 1, stride)]
    return jnp.stack(slices, axis=2)                               # (B,S,nw,window)


# --------------------------- slice attention --------------------------------
def _expansion_matrices(nw, kc, kg, dtype=jnp.bfloat16):
    # outer[row, l] = c[row, (l//kg)%kc] * g[row, (l//(kc*kg))*kg + l%kg]
    n = nw * kc * kg
    l = jnp.arange(n)
    c_idx = (l // kg) % kc
    ec = (c_idx[None, :] == jnp.arange(kc)[:, None]).astype(dtype)          # (kc, n)
    g_idx = (l // (kc * kg)) * kg + (l % kg)
    eg = (g_idx[None, :] == jnp.arange(nw * kg)[:, None]).astype(dtype)     # (nw*kg, n)
    return ec, eg


def _slice_attn_kernel(c_ref, g_ref, ec_ref, eg_ref, wqk_ref, bqk_ref, s_ref,
                       *, nw, n, R):
    # Rows of this chunk are window-major: row i*R + r <-> ((b,s) pair r, window i).
    # Outer rows are built in VMEM only (never HBM) via 0/1 expansion matmuls.
    cpart = jnp.dot(c_ref[...], ec_ref[...], preferred_element_type=jnp.float32)   # (TM, n)
    gsmall = jnp.dot(g_ref[...], eg_ref[...], preferred_element_type=jnp.float32)  # (R, n)
    gpart = jnp.concatenate([gsmall] * nw, axis=0)       # (TM, n), aligned sublane tiles
    outer = (cpart * gpart).astype(jnp.bfloat16)

    # Fused (wq|wk) linear: one 512x1024 bf16 matmul, f32 accumulation, one epilogue.
    qk = jnp.dot(outer, wqk_ref[...], preferred_element_type=jnp.float32) + bqk_ref[...]
    # sigmoid = 1 / (1 + exp(-x)); exp + approx reciprocal stay on the EUP slot.
    qk = pl.reciprocal(1.0 + jnp.exp(-qk), approx=True)                             # (TM, 2n)

    # Scores computed here from q/k while still in VMEM (no HBM round-trip of q/k).
    q = [qk[i * R:(i + 1) * R, :n] for i in range(nw)]   # aligned 128-row / 512-lane slabs
    k = [qk[j * R:(j + 1) * R, n:] for j in range(nw)]
    inv = 1.0 / math.sqrt(57.0)                          # reference hard-codes sqrt(57)
    for i in range(nw):
        for j in range(nw):
            col = jnp.sum(q[i] * k[j], axis=-1, keepdims=True) * inv                # (R, 1)
            c0 = i * nw + j
            s_ref[:, c0:c0 + 1] = col


def slice_attention_scores(c_win, g_win, query_w, query_b, slice_w, slice_b):
    B, S, nw, kc = c_win.shape
    kg = g_win.shape[-1]
    n = nw * kc * kg
    BS = B * S

    # R = (b,s) pairs per grid step; TM = R*nw rows of outer per step.
    R = 128 if BS >= 128 else _round_up(BS, 8)
    BSp = _round_up(BS, R)
    G = BSp // R
    TM = R * nw
    M = BSp * nw

    c2 = c_win.reshape(BS, nw, kc)
    g2 = g_win.reshape(BS, nw * kg)
    if BSp != BS:
        c2 = jnp.pad(c2, ((0, BSp - BS), (0, 0), (0, 0)))
        g2 = jnp.pad(g2, ((0, BSp - BS), (0, 0)))
    # window-major ordering per chunk: chunk rows are [i*R + r]
    c_rows = (c2.reshape(G, R, nw, kc).transpose(0, 2, 1, 3)
                .reshape(M, kc).astype(jnp.bfloat16))              # (M, kc)
    g_rows = g2.astype(jnp.bfloat16)                               # (BSp, nw*kg) — no repeat

    ec, eg = _expansion_matrices(nw, kc, kg)
    wqk = jnp.concatenate([query_w.T, slice_w.T], axis=1).astype(jnp.bfloat16)   # (n, 2n)
    bqk = jnp.concatenate([query_b, slice_b]).reshape(1, 2 * n).astype(jnp.float32)

    scores = pl.pallas_call(
        functools.partial(_slice_attn_kernel, nw=nw, n=n, R=R),
        out_shape=jax.ShapeDtypeStruct((BSp, nw * nw), jnp.float32),
        grid=(G,),
        in_specs=[
            pl.BlockSpec((TM, kc), lambda i: (i, 0)),
            pl.BlockSpec((R, nw * kg), lambda i: (i, 0)),
            pl.BlockSpec((kc, n), lambda i: (0, 0), **_CONST_SPEC_KW),
            pl.BlockSpec((nw * kg, n), lambda i: (0, 0), **_CONST_SPEC_KW),
            pl.BlockSpec((n, 2 * n), lambda i: (0, 0), **_CONST_SPEC_KW),
            pl.BlockSpec((1, 2 * n), lambda i: (0, 0), **_CONST_SPEC_KW),
        ],
        out_specs=pl.BlockSpec((R, nw * nw), lambda i: (i, 0)),
        compiler_params=pltpu.CompilerParams(
            dimension_semantics=("parallel",),
            vmem_limit_bytes=40 * 1024 * 1024),
    )(c_rows, g_rows, ec, eg, wqk, bqk)
    return scores[:BS].reshape(B, S, nw, nw)


# ------------------------------- BiLSTM -------------------------------------
def _bilstm_kernel(xpf_ref, xpr_ref, whf_ref, whr_ref, hf_ref, hr_ref,
                   hf_s, cf_s, hr_s, cr_s, *, T, HP):
    @pl.when(pl.program_id(0) == 0)
    def _():
        hf_s[...] = jnp.zeros_like(hf_s)
        cf_s[...] = jnp.zeros_like(cf_s)
        hr_s[...] = jnp.zeros_like(hr_s)
        cr_s[...] = jnp.zeros_like(cr_s)

    whf = whf_ref[...]                                  # (HP, 4HP) bf16
    whr = whr_ref[...]

    def cell(gates, c_prev):                            # gates: (B, 4HP), gate-per-slab
        i = jax.nn.sigmoid(gates[:, 0 * HP:1 * HP])
        f = jax.nn.sigmoid(gates[:, 1 * HP:2 * HP])
        g = jnp.tanh(gates[:, 2 * HP:3 * HP])
        o = jax.nn.sigmoid(gates[:, 3 * HP:4 * HP])
        c = f * c_prev + i * g
        return o * jnp.tanh(c), c

    def step(tau, carry):
        gf = xpf_ref[tau] + jnp.dot(hf_s[...].astype(jnp.bfloat16), whf,
                                    preferred_element_type=jnp.float32)
        gr = xpr_ref[T - 1 - tau] + jnp.dot(hr_s[...].astype(jnp.bfloat16), whr,
                                            preferred_element_type=jnp.float32)
        hf_new, cf_new = cell(gf, cf_s[...])
        hr_new, cr_new = cell(gr, cr_s[...])
        hf_s[...] = hf_new
        cf_s[...] = cf_new
        hr_s[...] = hr_new
        cr_s[...] = cr_new
        hf_ref[tau] = hf_new
        hr_ref[T - 1 - tau] = hr_new
        return carry

    jax.lax.fori_loop(0, T, step, 0, unroll=True)


def _pack_gate_cols(w, H, HP):
    """torch (4H, In) gate-stacked weight -> (In, 4*HP): gate g occupies its own
    128-lane slab, lanes [g*HP, g*HP+H), rest zero (so padding lanes stay 0)."""
    In = w.shape[1]
    out = jnp.zeros((In, 4 * HP), jnp.float32)
    for g in range(4):
        out = out.at[:, g * HP:g * HP + H].set(w[g * H:(g + 1) * H, :].T)
    return out


def _pack_gate_bias(b, H, HP):
    out = jnp.zeros((4 * HP,), jnp.float32)
    for g in range(4):
        out = out.at[g * HP:g * HP + H].set(b[g * H:(g + 1) * H])
    return out


def bilstm_fused(x, p, H, T=8):
    """Bidirectional single-layer LSTM.  Both directions per Pallas grid step
    (reverse direction via reversed index_map), T time steps per grid iteration,
    gate-per-128-lane-slab layout, bf16 recurrent matmul with f32 accumulation."""
    B, S, F = x.shape
    HP = 128                                           # one vreg lane-width per gate slab

    wf = _pack_gate_cols(p["lstm_w_ih_f"], H, HP)      # (F, 4HP)
    wr = _pack_gate_cols(p["lstm_w_ih_r"], H, HP)
    bf = _pack_gate_bias(p["lstm_b_ih_f"] + p["lstm_b_hh_f"], H, HP)
    br = _pack_gate_bias(p["lstm_b_ih_r"] + p["lstm_b_hh_r"], H, HP)
    whf = jnp.pad(_pack_gate_cols(p["lstm_w_hh_f"], H, HP),
                  ((0, HP - H), (0, 0))).astype(jnp.bfloat16)      # (HP, 4HP)
    whr = jnp.pad(_pack_gate_cols(p["lstm_w_hh_r"], H, HP),
                  ((0, HP - H), (0, 0))).astype(jnp.bfloat16)

    # K=4 input projection is left to XLA (MXU-underfilled in Pallas); the einsum
    # produces the (S, B, 4HP) layout directly — no separate transpose round-trip.
    xpf = jnp.einsum("bsf,fh->sbh", x, wf) + bf
    xpr = jnp.einsum("bsf,fh->sbh", x, wr) + br

    Sp = _round_up(S, T)
    if Sp != S:
        # zero gate-preactivation rows keep (h,c)=(0,0) exactly, for both directions
        xpf = jnp.pad(xpf, ((0, Sp - S), (0, 0), (0, 0)))
        xpr = jnp.pad(xpr, ((0, Sp - S), (0, 0), (0, 0)))
    nblk = Sp // T

    hf, hr = pl.pallas_call(
        functools.partial(_bilstm_kernel, T=T, HP=HP),
        out_shape=(jax.ShapeDtypeStruct((Sp, B, HP), jnp.float32),
                   jax.ShapeDtypeStruct((Sp, B, HP), jnp.float32)),
        grid=(nblk,),
        in_specs=[
            pl.BlockSpec((T, B, 4 * HP), lambda i: (i, 0, 0)),
            pl.BlockSpec((T, B, 4 * HP), lambda i: (nblk - 1 - i, 0, 0)),
            pl.BlockSpec((HP, 4 * HP), lambda i: (0, 0), **_CONST_SPEC_KW),
            pl.BlockSpec((HP, 4 * HP), lambda i: (0, 0), **_CONST_SPEC_KW),
        ],
        out_specs=(pl.BlockSpec((T, B, HP), lambda i: (i, 0, 0)),
                   pl.BlockSpec((T, B, HP), lambda i: (nblk - 1 - i, 0, 0))),
        scratch_shapes=[pltpu.VMEM((B, HP), jnp.float32)] * 4,
        compiler_params=pltpu.CompilerParams(dimension_semantics=("arbitrary",)),
    )(xpf, xpr, whf, whr)

    out = jnp.concatenate([hf[:S, :, :H], hr[:S, :, :H]], axis=-1)   # (S,B,2H)
    return out.transpose(1, 0, 2)                                     # (B,S,2H)


# ------------------------------ FGN forward ---------------------------------
def fgn_forward(params, input_ids, char_input_ids, attention_mask):
    B, L = input_ids.shape
    S = L - 2
    H = CFG["H"]

    # TODO(synk): BertModel is an external dependency; replaced with a deterministic
    # embedding-lookup stub producing last_hidden_state of shape (B, L, d_c).
    last_hidden = params["bert_emb"][input_ids]
    bert_out = last_hidden[:, 1:-1, :]                               # (B,S,d_c)

    g_s = cgs_cnn_forward(params, char_input_ids)                    # (B,S,64)

    c_win = slide_window_jax(bert_out, CFG["k_c"], CFG["s_c"])       # (B,S,nw,k_c)
    g_win = slide_window_jax(g_s, CFG["k_g"], CFG["s_g"])            # (B,S,nw,k_g)

    # extended attention mask, then transpose(1,3) as in the reference
    ext = (1.0 - attention_mask[:, None, None, 2:]) * -10000.0       # (B,1,1,S)
    ext_t = jnp.transpose(ext, (0, 3, 2, 1))                         # (B,S,1,1)

    # SliceAttention: single fused Pallas kernel (outer + q/k linears + scores)
    scores = slice_attention_scores(c_win, g_win,
                                    params["query_w"], params["query_b"],
                                    params["slice_w"], params["slice_b"])
    s = scores + ext_t
    attn = jax.nn.softmax(s, axis=1)                                 # softmax over seq dim (per reference)
    # sum(attn @ outer, -1) == attn @ rowsum(outer); rowsum factorizes exactly:
    rowsum = jnp.sum(c_win, axis=-1) * jnp.sum(g_win, axis=(-2, -1))[..., None]   # (B,S,nw)
    fusion = jnp.einsum("bsij,bsj->bsi", attn, rowsum)               # (B,S,nw)

    lstm_out = bilstm_fused(fusion, params, H)                       # (B,S,2H)
    # hidden2tag: N=8 lane-sparse matmul -> plain XLA (per perf review)
    logits = jnp.einsum("bsh,lh->bsl", lstm_out, params["h2t_w"]) + params["h2t_b"]
    mask = attention_mask[:, 2:]
    # TODO(synk): CRF loss / viterbi_decode omitted — get_crf_zero_init / the CRF
    # module is not part of the provided source.
    return {"logits": logits, "mask": mask}


# ------------------------------ params init ---------------------------------
def init_params(key):
    keys = jax.random.split(key, 24)

    def nrm(k, shape, scale=0.1):
        return (scale * jax.random.normal(k, shape)).astype(jnp.float32)

    n, H, nw = CFG["n"], CFG["H"], CFG["nw"]
    p = {}
    p["cgs_emb"] = jax.random.uniform(keys[0], (CFG["vocab_g"], CFG["NE"] * CFG["NE"]),
                                      minval=0.0, maxval=255.0, dtype=jnp.float32)
    p["conv3d_w"] = nrm(keys[1], (8, 1, 3, 3, 3));   p["conv3d_b"] = jnp.zeros((8,), jnp.float32)
    p["conv2d0_w"] = nrm(keys[2], (8, 8, 3, 3));     p["conv2d0_b"] = jnp.zeros((8,), jnp.float32)
    p["conv2d_w"] = nrm(keys[3], (16, 8, 2, 2));     p["conv2d_b"] = jnp.zeros((16,), jnp.float32)
    p["conv2d2_w"] = nrm(keys[4], (32, 16, 2, 2));   p["conv2d2_b"] = jnp.zeros((32,), jnp.float32)
    p["conv2d3_w"] = nrm(keys[5], (64, 32, 2, 2));   p["conv2d3_b"] = jnp.zeros((64,), jnp.float32)
    p["bert_emb"] = nrm(keys[6], (CFG["vocab_bert"], CFG["d_c"]), 1.0)
    p["slice_w"] = nrm(keys[7], (n, n), 0.02);       p["slice_b"] = jnp.zeros((n,), jnp.float32)
    p["query_w"] = nrm(keys[8], (n, n), 0.02);       p["query_b"] = jnp.zeros((n,), jnp.float32)
    p["lstm_w_ih_f"] = nrm(keys[9], (4 * H, nw));    p["lstm_w_hh_f"] = nrm(keys[10], (4 * H, H))
    p["lstm_b_ih_f"] = jnp.zeros((4 * H,), jnp.float32)
    p["lstm_b_hh_f"] = jnp.zeros((4 * H,), jnp.float32)
    p["lstm_w_ih_r"] = nrm(keys[11], (4 * H, nw));   p["lstm_w_hh_r"] = nrm(keys[12], (4 * H, H))
    p["lstm_b_ih_r"] = jnp.zeros((4 * H,), jnp.float32)
    p["lstm_b_hh_r"] = jnp.zeros((4 * H,), jnp.float32)
    p["h2t_w"] = nrm(keys[13], (CFG["label_size"], 2 * H))
    p["h2t_b"] = jnp.zeros((CFG["label_size"],), jnp.float32)
    return p


# --------------------------------- main --------------------------------------
if __name__ == "__main__":
    key = jax.random.PRNGKey(0)
    pkey, k1, k2 = jax.random.split(key, 3)
    params = init_params(pkey)

    B, L = 2, 8
    S = L - 2
    input_ids = jax.random.randint(k1, (B, L), 0, CFG["vocab_bert"], dtype=jnp.int32)
    char_input_ids = jax.random.randint(k2, (B, S), 0, CFG["vocab_g"], dtype=jnp.int32)
    attention_mask = jnp.ones((B, L), jnp.float32).at[1, 6:].set(0.0)

    fwd = jax.jit(fgn_forward)
    out = fwd(params, input_ids, char_input_ids, attention_mask)
    jax.block_until_ready(out)

    assert out["logits"].shape == (B, S, CFG["label_size"])
    assert out["mask"].shape == (B, S)
    assert bool(jnp.all(jnp.isfinite(out["logits"])))
    print("KERNEL_OK")
</pallas_src>

<mosaic_0001>
module attributes {stable_mosaic.version = 11 : i64} {
  func.func @_k(%arg0: i32, %arg1: memref<8x128xf32, #tpu.memory_space<vmem>>, %arg2: memref<8x128xf32, #tpu.memory_space<vmem>>) attributes {dimension_semantics = [#tpu.dimension_semantics<arbitrary>], iteration_bounds = array<i64: 2>, scalar_prefetch = 0 : i64, scratch_operands = 0 : i64, tpu.core_type = #tpu.core_type<tc>, window_params = [{pipeline_mode = #tpu.pipeline_mode<synchronous>, transform_indices = @transform_0, window_bounds = array<i64: 8, 128>}, {transform_indices = @transform_1, window_bounds = array<i64: 8, 128>}]} {
    %c0 = arith.constant 0 : index
    %c0_0 = arith.constant 0 : index
    %0 = vector.load %arg1[%c0, %c0_0] : memref<8x128xf32, #tpu.memory_space<vmem>>, vector<8x128xf32>
    %cst = arith.constant 1.000000e+00 : f32
    %1 = vector.broadcast %cst : f32 to vector<8x128xf32>
    %2 = arith.addf %0, %1 : vector<8x128xf32>
    %c0_1 = arith.constant 0 : index
    %c0_2 = arith.constant 0 : index
    %3 = vector.load %arg2[%c0_1, %c0_2] : memref<8x128xf32, #tpu.memory_space<vmem>>, vector<8x128xf32>
    tpu.vector_store %arg2[%c0_1, %c0_2], %2 {strides = array<i32>} : memref<8x128xf32, #tpu.memory_space<vmem>>, vector<8x128xf32>,
    return
  }
  func.func @transform_0(%arg0: i32) -> (i32, i32) {
    %c0_i32 = arith.constant 0 : i32
    %c0_i32_0 = arith.constant 0 : i32
    %c0_i32_1 = arith.constant 0 : i32
    return %c0_i32, %c0_i32_0 : i32, i32
  }
  func.func @transform_1(%arg0: i32) -> (i32, i32) {
    %c0_i32 = arith.constant 0 : i32
    %c0_i32_0 = arith.constant 0 : i32
    return %arg0, %c0_i32 : i32, i32
  }
}

module attributes {stable_mosaic.version = 11 : i64} {
  func.func @_slice_attn_kernel(%arg0: i32, %arg1: memref<64x8xbf16, #tpu.memory_space<vmem>>, %arg2: memref<16x64xbf16, #tpu.memory_space<vmem>>, %arg3: memref<8x512xbf16, #tpu.memory_space<vmem>>, %arg4: memref<64x512xbf16, #tpu.memory_space<vmem>>, %arg5: memref<512x1024xbf16, #tpu.memory_space<vmem>>, %arg6: memref<1x1024xf32, #tpu.memory_space<vmem>>, %arg7: memref<16x16xf32, #tpu.memory_space<vmem>>) attributes {dimension_semantics = [#tpu.dimension_semantics<parallel>], iteration_bounds = array<i64: 1>, scalar_prefetch = 0 : i64, scratch_operands = 0 : i64, tpu.core_type = #tpu.core_type<tc>, window_params = [{transform_indices = @transform_0, window_bounds = array<i64: 64, 8>}, {transform_indices = @transform_1, window_bounds = array<i64: 16, 64>}, {pipeline_mode = #tpu.pipeline_mode<synchronous>, transform_indices = @transform_2, window_bounds = array<i64: 8, 512>}, {pipeline_mode = #tpu.pipeline_mode<synchronous>, transform_indices = @transform_3, window_bounds = array<i64: 64, 512>}, {pipeline_mode = #tpu.pipeline_mode<synchronous>, transform_indices = @transform_4, window_bounds = array<i64: 512, 1024>}, {pipeline_mode = #tpu.pipeline_mode<synchronous>, transform_indices = @transform_5, window_bounds = array<i64: 1, 1024>}, {transform_indices = @transform_6, window_bounds = array<i64: 16, 16>}]} {
    %c0 = arith.constant 0 : index
    %c0_0 = arith.constant 0 : index
    %0 = vector.load %arg1[%c0, %c0_0] : memref<64x8xbf16, #tpu.memory_space<vmem>>, vector<64x8xbf16>
    %c0_1 = arith.constant 0 : index
    %c0_2 = arith.constant 0 : index
    %1 = vector.load %arg3[%c0_1, %c0_2] : memref<8x512xbf16, #tpu.memory_space<vmem>>, vector<8x512xbf16>
    %cst = arith.constant dense<0.000000e+00> : vector<64x512xf32>
    %2 = tpu.matmul %0, %1, %cst {dimension_numbers = #tpu.dot_dimension_numbers<[1], [0], [0], [1], [0, 0, 1, 1], [], []>} : vector<64x8xbf16>, vector<8x512xbf16>, vector<64x512xf32> -> vector<64x512xf32>
    %c0_3 = arith.constant 0 : index
    %c0_4 = arith.constant 0 : index
    %3 = vector.load %arg2[%c0_3, %c0_4] : memref<16x64xbf16, #tpu.memory_space<vmem>>, vector<16x64xbf16>
    %c0_5 = arith.constant 0 : index
    %c0_6 = arith.constant 0 : index
    %4 = vector.load %arg4[%c0_5, %c0_6] : memref<64x512xbf16, #tpu.memory_space<vmem>>, vector<64x512xbf16>
    %cst_7 = arith.constant dense<0.000000e+00> : vector<16x512xf32>
    %5 = tpu.matmul %3, %4, %cst_7 {dimension_numbers = #tpu.dot_dimension_numbers<[1], [0], [0], [1], [0, 0, 1, 1], [], []>} : vector<16x64xbf16>, vector<64x512xbf16>, vector<16x512xf32> -> vector<16x512xf32>
    %6 = tpu.concatenate %5, %5, %5, %5 in 0 : vector<16x512xf32>, vector<16x512xf32>, vector<16x512xf32>, vector<16x512xf32> -> vector<64x512xf32>
    %7 = arith.mulf %2, %6 : vector<64x512xf32>
    %8 = arith.truncf %7 : vector<64x512xf32> to vector<64x512xbf16>
    %c0_8 = arith.constant 0 : index
    %c0_9 = arith.constant 0 : index
    %9 = vector.load %arg5[%c0_8, %c0_9] : memref<512x1024xbf16, #tpu.memory_space<vmem>>, vector<512x1024xbf16>
    %cst_10 = arith.constant dense<0.000000e+00> : vector<64x1024xf32>
    %10 = tpu.matmul %8, %9, %cst_10 {dimension_numbers = #tpu.dot_dimension_numbers<[1], [0], [0], [1], [0, 0, 1, 1], [], []>} : vector<64x512xbf16>, vector<512x1024xbf16>, vector<64x1024xf32> -> vector<64x1024xf32>
    %c0_11 = arith.constant 0 : index
    %c0_12 = arith.constant 0 : index
    %11 = vector.load %arg6[%c0_11, %c0_12] : memref<1x1024xf32, #tpu.memory_space<vmem>>, vector<1x1024xf32>
    %12 = vector.broadcast %11 : vector<1x1024xf32> to vector<64x1024xf32>
    %13 = arith.addf %10, %12 : vector<64x1024xf32>
    %cst_13 = arith.constant 0.000000e+00 : f32
    %14 = vector.broadcast %cst_13 : f32 to vector<64x1024xf32>
    %15 = arith.subf %14, %13 : vector<64x1024xf32>
    %16 = math.exp %15 : vector<64x1024xf32>
    %cst_14 = arith.constant 1.000000e+00 : f32
    %17 = vector.broadcast %cst_14 : f32 to vector<64x1024xf32>
    %18 = arith.addf %17, %16 : vector<64x1024xf32>
    %19 = tpu.reciprocal %18 {approx = true} : vector<64x1024xf32> -> vector<64x1024xf32>
    %20 = vector.extract_strided_slice %19 {offsets = [0, 0], sizes = [16, 512], strides = [1, 1]} : vector<64x1024xf32> to vector<16x512xf32>
    %21 = vector.extract_strided_slice %19 {offsets = [16, 0], sizes = [16, 512], strides = [1, 1]} : vector<64x1024xf32> to vector<16x512xf32>
    %22 = vector.extract_strided_slice %19 {offsets = [32, 0], sizes = [16, 512], strides = [1, 1]} : vector<64x1024xf32> to vector<16x512xf32>
    %23 = vector.extract_strided_slice %19 {offsets = [48, 0], sizes = [16, 512], strides = [1, 1]} : vector<64x1024xf32> to vector<16x512xf32>
    %24 = vector.extract_strided_slice %19 {offsets = [0, 512], sizes = [16, 512], strides = [1, 1]} : vector<64x1024xf32> to vector<16x512xf32>
    %25 = vector.extract_strided_slice %19 {offsets = [16, 512], sizes = [16, 512], strides = [1, 1]} : vector<64x1024xf32> to vector<16x512xf32>
    %26 = vector.extract_strided_slice %19 {offsets = [32, 512], sizes = [16, 512], strides = [1, 1]} : vector<64x1024xf32> to vector<16x512xf32>
    %27 = vector.extract_strided_slice %19 {offsets = [48, 512], sizes = [16, 512], strides = [1, 1]} : vector<64x1024xf32> to vector<16x512xf32>
    %28 = arith.mulf %20, %24 : vector<16x512xf32>
    %cst_15 = arith.constant dense<0.000000e+00> : vector<16xf32>
    %29 = vector.multi_reduction <add>, %28, %cst_15 [1] : vector<16x512xf32> to vector<16xf32>
    %30 = vector.shape_cast %29 : vector<16xf32> to vector<16x1xf32>
    %cst_16 = arith.constant 0.132453233 : f32
    %31 = vector.broadcast %cst_16 : f32 to vector<16x1xf32>
    %32 = arith.mulf %30, %31 : vector<16x1xf32>
    %c0_17 = arith.constant 0 : index
    %c0_18 = arith.constant 0 : index
    %33 = vector.load %arg7[%c0_17, %c0_18] : memref<16x16xf32, #tpu.memory_space<vmem>>, vector<16x1xf32>
    tpu.vector_store %arg7[%c0_17, %c0_18], %32 {strides = array<i32>} : memref<16x16xf32, #tpu.memory_space<vmem>>, vector<16x1xf32>,
    %34 = arith.mulf %20, %25 : vector<16x512xf32>
    %cst_19 = arith.constant dense<0.000000e+00> : vector<16xf32>
    %35 = vector.multi_reduction <add>, %34, %cst_19 [1] : vector<16x512xf32> to vector<16xf32>
    %36 = vector.shape_cast %35 : vector<16xf32> to vector<16x1xf32>
    %cst_20 = arith.constant 0.132453233 : f32
    %37 = vector.broadcast %cst_20 : f32 to vector<16x1xf32>
    %38 = arith.mulf %36, %37 : vector<16x1xf32>
    %c0_21 = arith.constant 0 : index
    %c1 = arith.constant 1 : index
    %39 = vector.load %arg7[%c0_21, %c1] : memref<16x16xf32, #tpu.memory_space<vmem>>, vector<16x1xf32>
    tpu.vector_store %arg7[%c0_21, %c1], %38 {strides = array<i32>} : memref<16x16xf32, #tpu.memory_space<vmem>>, vector<16x1xf32>,
    %40 = arith.mulf %20, %26 : vector<16x512xf32>
    %cst_22 = arith.constant dense<0.000000e+00> : vector<16xf32>
    %41 = vector.multi_reduction <add>, %40, %cst_22 [1] : vector<16x512xf32> to vector<16xf32>
    %42 = vector.shape_cast %41 : vector<16xf32> to vector<16x1xf32>
    %cst_23 = arith.constant 0.132453233 : f32
    %43 = vector.broadcast %cst_23 : f32 to vector<16x1xf32>
    %44 = arith.mulf %42, %43 : vector<16x1xf32>
    %c0_24 = arith.constant 0 : index
    %c2 = arith.constant 2 : index
    %45 = vector.load %arg7[%c0_24, %c2] : memref<16x16xf32, #tpu.memory_space<vmem>>, vector<16x1xf32>
    tpu.vector_store %arg7[%c0_24, %c2], %44 {strides = array<i32>} : memref<16x16xf32, #tpu.memory_space<vmem>>, vector<16x1xf32>,
    %46 = arith.mulf %20, %27 : vector<16x512xf32>
    %cst_25 = arith.constant dense<0.000000e+00> : vector<16xf32>
    %47 = vector.multi_reduction <add>, %46, %cst_25 [1] : vector<16x512xf32> to vector<16xf32>
    %48 = vector.shape_cast %47 : vector<16xf32> to vector<16x1xf32>
    %cst_26 = arith.constant 0.132453233 : f32
    %49 = vector.broadcast %cst_26 : f32 to vector<16x1xf32>
    %50 = arith.mulf %48, %49 : vector<16x1xf32>
    %c0_27 = arith.constant 0 : index
    %c3 = arith.constant 3 : index
    %51 = vector.load %arg7[%c0_27, %c3] : memref<16x16xf32, #tpu.memory_space<vmem>>, vector<16x1xf32>
    tpu.vector_store %arg7[%c0_27, %c3], %50 {strides = array<i32>} : memref<16x16xf32, #tpu.memory_space<vmem>>, vector<16x1xf32>,
    %52 = arith.mulf %21, %24 : vector<16x512xf32>
    %cst_28 = arith.constant dense<0.000000e+00> : vector<16xf32>
    %53 = vector.multi_reduction <add>, %52, %cst_28 [1] : vector<16x512xf32> to vector<16xf32>
    %54 = vector.shape_cast %53 : vector<16xf32> to vector<16x1xf32>
    %cst_29 = arith.constant 0.132453233 : f32
    %55 = vector.broadcast %cst_29 : f32 to vector<16x1xf32>
    %56 = arith.mulf %54, %55 : vector<16x1xf32>
    %c0_30 = arith.constant 0 : index
    %c4 = arith.constant 4 : index
    %57 = vector.load %arg7[%c0_30, %c4] : memref<16x16xf32, #tpu.memory_space<vmem>>, vector<16x1xf32>
    tpu.vector_store %arg7[%c0_30, %c4], %56 {strides = array<i32>} : memref<16x16xf32, #tpu.memory_space<vmem>>, vector<16x1xf32>,
    %58 = arith.mulf %21, %25 : vector<16x512xf32>
    %cst_31 = arith.constant dense<0.000000e+00> : vector<16xf32>
    %59 = vector.multi_reduction <add>, %58, %cst_31 [1] : vector<16x512xf32> to vector<16xf32>
    %60 = vector.shape_cast %59 : vector<16xf32> to vector<16x1xf32>
    %cst_32 = arith.constant 0.132453233 : f32
    %61 = vector.broadcast %cst_32 : f32 to vector<16x1xf32>
    %62 = arith.mulf %60, %61 : vector<16x1xf32>
    %c0_33 = arith.constant 0 : index
    %c5 = arith.constant 5 : index
    %63 = vector.load %arg7[%c0_33, %c5] : memref<16x16xf32, #tpu.memory_space<vmem>>, vector<16x1xf32>
    tpu.vector_store %arg7[%c0_33, %c5], %62 {strides = array<i32>} : memref<16x16xf32, #tpu.memory_space<vmem>>, vector<16x1xf32>,
    %64 = arith.mulf %21, %26 : vector<16x512xf32>
    %cst_34 = arith.constant dense<0.000000e+00> : vector<16xf32>
    %65 = vector.multi_reduction <add>, %64, %cst_34 [1] : vector<16x512xf32> to vector<16xf32>
    %66 = vector.shape_cast %65 : vector<16xf32> to vector<16x1xf32>
    %cst_35 = arith.constant 0.132453233 : f32
    %67 = vector.broadcast %cst_35 : f32 to vector<16x1xf32>
    %68 = arith.mulf %66, %67 : vector<16x1xf32>
    %c0_36 = arith.constant 0 : index
    %c6 = arith.constant 6 : index
    %69 = vector.load %arg7[%c0_36, %c6] : memref<16x16xf32, #tpu.memory_space<vmem>>, vector<16x1xf32>
    tpu.vector_store %arg7[%c0_36, %c6], %68 {strides = array<i32>} : memref<16x16xf32, #tpu.memory_space<vmem>>, vector<16x1xf32>,
    %70 = arith.mulf %21, %27 : vector<16x512xf32>
    %cst_37 = arith.constant dense<0.000000e+00> : vector<16xf32>
    %71 = vector.multi_reduction <add>, %70, %cst_37 [1] : vector<16x512xf32> to vector<16xf32>
    %72 = vector.shape_cast %71 : vector<16xf32> to vector<16x1xf32>
    %cst_38 = arith.constant 0.132453233 : f32
    %73 = vector.broadcast %cst_38 : f32 to vector<16x1xf32>
    %74 = arith.mulf %72, %73 : vector<16x1xf32>
    %c0_39 = arith.constant 0 : index
    %c7 = arith.constant 7 : index
    %75 = vector.load %arg7[%c0_39, %c7] : memref<16x16xf32, #tpu.memory_space<vmem>>, vector<16x1xf32>
    tpu.vector_store %arg7[%c0_39, %c7], %74 {strides = array<i32>} : memref<16x16xf32, #tpu.memory_space<vmem>>, vector<16x1xf32>,
    %76 = arith.mulf %22, %24 : vector<16x512xf32>
    %cst_40 = arith.constant dense<0.000000e+00> : vector<16xf32>
    %77 = vector.multi_reduction <add>, %76, %cst_40 [1] : vector<16x512xf32> to vector<16xf32>
    %78 = vector.shape_cast %77 : vector<16xf32> to vector<16x1xf32>
    %cst_41 = arith.constant 0.132453233 : f32
    %79 = vector.broadcast %cst_41 : f32 to vector<16x1xf32>
    %80 = arith.mulf %78, %79 : vector<16x1xf32>
    %c0_42 = arith.constant 0 : index
    %c8 = arith.constant 8 : index
    %81 = vector.load %arg7[%c0_42, %c8] : memref<16x16xf32, #tpu.memory_space<vmem>>, vector<16x1xf32>
    tpu.vector_store %arg7[%c0_42, %c8], %80 {strides = array<i32>} : memref<16x16xf32, #tpu.memory_space<vmem>>, vector<16x1xf32>,
    %82 = arith.mulf %22, %25 : vector<16x512xf32>
    %cst_43 = arith.constant dense<0.000000e+00> : vector<16xf32>
    %83 = vector.multi_reduction <add>, %82, %cst_43 [1] : vector<16x512xf32> to vector<16xf32>
    %84 = vector.shape_cast %83 : vector<16xf32> to vector<16x1xf32>
    %cst_44 = arith.constant 0.132453233 : f32
    %85 = vector.broadcast %cst_44 : f32 to vector<16x1xf32>
    %86 = arith.mulf %84, %85 : vector<16x1xf32>
    %c0_45 = arith.constant 0 : index
    %c9 = arith.constant 9 : index
    %87 = vector.load %arg7[%c0_45, %c9] : memref<16x16xf32, #tpu.memory_space<vmem>>, vector<16x1xf32>
    tpu.vector_store %arg7[%c0_45, %c9], %86 {strides = array<i32>} : memref<16x16xf32, #tpu.memory_space<vmem>>, vector<16x1xf32>,
    %88 = arith.mulf %22, %26 : vector<16x512xf32>
    %cst_46 = arith.constant dense<0.000000e+00> : vector<16xf32>
    %89 = vector.multi_reduction <add>, %88, %cst_46 [1] : vector<16x512xf32> to vector<16xf32>
    %90 = vector.shape_cast %89 : vector<16xf32> to vector<16x1xf32>
    %cst_47 = arith.constant 0.132453233 : f32
    %91 = vector.broadcast %cst_47 : f32 to vector<16x1xf32>
    %92 = arith.mulf %90, %91 : vector<16x1xf32>
    %c0_48 = arith.constant 0 : index
    %c10 = arith.constant 10 : index
    %93 = vector.load %arg7[%c0_48, %c10] : memref<16x16xf32, #tpu.memory_space<vmem>>, vector<16x1xf32>
    tpu.vector_store %arg7[%c0_48, %c10], %92 {strides = array<i32>} : memref<16x16xf32, #tpu.memory_space<vmem>>, vector<16x1xf32>,
    %94 = arith.mulf %22, %27 : vector<16x512xf32>
    %cst_49 = arith.constant dense<0.000000e+00> : vector<16xf32>
    %95 = vector.multi_reduction <add>, %94, %cst_49 [1] : vector<16x512xf32> to vector<16xf32>
    %96 = vector.shape_cast %95 : vector<16xf32> to vector<16x1xf32>
    %cst_50 = arith.constant 0.132453233 : f32
    %97 = vector.broadcast %cst_50 : f32 to vector<16x1xf32>
    %98 = arith.mulf %96, %97 : vector<16x1xf32>
    %c0_51 = arith.constant 0 : index
    %c11 = arith.constant 11 : index
    %99 = vector.load %arg7[%c0_51, %c11] : memref<16x16xf32, #tpu.memory_space<vmem>>, vector<16x1xf32>
    tpu.vector_store %arg7[%c0_51, %c11], %98 {strides = array<i32>} : memref<16x16xf32, #tpu.memory_space<vmem>>, vector<16x1xf32>,
    %100 = arith.mulf %23, %24 : vector<16x512xf32>
    %cst_52 = arith.constant dense<0.000000e+00> : vector<16xf32>
    %101 = vector.multi_reduction <add>, %100, %cst_52 [1] : vector<16x512xf32> to vector<16xf32>
    %102 = vector.shape_cast %101 : vector<16xf32> to vector<16x1xf32>
    %cst_53 = arith.constant 0.132453233 : f32
    %103 = vector.broadcast %cst_53 : f32 to vector<16x1xf32>
    %104 = arith.mulf %102, %103 : vector<16x1xf32>
    %c0_54 = arith.constant 0 : index
    %c12 = arith.constant 12 : index
    %105 = vector.load %arg7[%c0_54, %c12] : memref<16x16xf32, #tpu.memory_space<vmem>>, vector<16x1xf32>
    tpu.vector_store %arg7[%c0_54, %c12], %104 {strides = array<i32>} : memref<16x16xf32, #tpu.memory_space<vmem>>, vector<16x1xf32>,
    %106 = arith.mulf %23, %25 : vector<16x512xf32>
    %cst_55 = arith.constant dense<0.000000e+00> : vector<16xf32>
    %107 = vector.multi_reduction <add>, %106, %cst_55 [1] : vector<16x512xf32> to vector<16xf32>
    %108 = vector.shape_cast %107 : vector<16xf32> to vector<16x1xf32>
    %cst_56 = arith.constant 0.132453233 : f32
    %109 = vector.broadcast %cst_56 : f32 to vector<16x1xf32>
    %110 = arith.mulf %108, %109 : vector<16x1xf32>
    %c0_57 = arith.constant 0 : index
    %c13 = arith.constant 13 : index
    %111 = vector.load %arg7[%c0_57, %c13] : memref<16x16xf32, #tpu.memory_space<vmem>>, vector<16x1xf32>
    tpu.vector_store %arg7[%c0_57, %c13], %110 {strides = array<i32>} : memref<16x16xf32, #tpu.memory_space<vmem>>, vector<16x1xf32>,
    %112 = arith.mulf %23, %26 : vector<16x512xf32>
    %cst_58 = arith.constant dense<0.000000e+00> : vector<16xf32>
    %113 = vector.multi_reduction <add>, %112, %cst_58 [1] : vector<16x512xf32> to vector<16xf32>
    %114 = vector.shape_cast %113 : vector<16xf32> to vector<16x1xf32>
    %cst_59 = arith.constant 0.132453233 : f32
    %115 = vector.broadcast %cst_59 : f32 to vector<16x1xf32>
    %116 = arith.mulf %114, %115 : vector<16x1xf32>
    %c0_60 = arith.constant 0 : index
    %c14 = arith.constant 14 : index
    %117 = vector.load %arg7[%c0_60, %c14] : memref<16x16xf32, #tpu.memory_space<vmem>>, vector<16x1xf32>
    tpu.vector_store %arg7[%c0_60, %c14], %116 {strides = array<i32>} : memref<16x16xf32, #tpu.memory_space<vmem>>, vector<16x1xf32>,
    %118 = arith.mulf %23, %27 : vector<16x512xf32>
    %cst_61 = arith.constant dense<0.000000e+00> : vector<16xf32>
    %119 = vector.multi_reduction <add>, %118, %cst_61 [1] : vector<16x512xf32> to vector<16xf32>
    %120 = vector.shape_cast %119 : vector<16xf32> to vector<16x1xf32>
    %cst_62 = arith.constant 0.132453233 : f32
    %121 = vector.broadcast %cst_62 : f32 to vector<16x1xf32>
    %122 = arith.mulf %120, %121 : vector<16x1xf32>
    %c0_63 = arith.constant 0 : index
    %c15 = arith.constant 15 : index
    %123 = vector.load %arg7[%c0_63, %c15] : memref<16x16xf32, #tpu.memory_space<vmem>>, vector<16x1xf32>
    tpu.vector_store %arg7[%c0_63, %c15], %122 {strides = array<i32>} : memref<16x16xf32, #tpu.memory_space<vmem>>, vector<16x1xf32>,
    return
  }
  func.func @transform_0(%arg0: i32) -> (i32, i32) {
    %c0_i32 = arith.constant 0 : i32
    %c0_i32_0 = arith.constant 0 : i32
    return %arg0, %c0_i32 : i32, i32
  }
  func.func @transform_1(%arg0: i32) -> (i32, i32) {
    %c0_i32 = arith.constant 0 : i32
    %c0_i32_0 = arith.constant 0 : i32
    return %arg0, %c0_i32 : i32, i32
  }
  func.func @transform_2(%arg0: i32) -> (i32, i32) {
    %c0_i32 = arith.constant 0 : i32
    %c0_i32_0 = arith.constant 0 : i32
    %c0_i32_1 = arith.constant 0 : i32
    return %c0_i32, %c0_i32_0 : i32, i32
  }
  func.func @transform_3(%arg0: i32) -> (i32, i32) {
    %c0_i32 = arith.constant 0 : i32
    %c0_i32_0 = arith.constant 0 : i32
    %c0_i32_1 = arith.constant 0 : i32
    return %c0_i32, %c0_i32_0 : i32, i32
  }
  func.func @transform_4(%arg0: i32) -> (i32, i32) {
    %c0_i32 = arith.constant 0 : i32
    %c0_i32_0 = arith.constant 0 : i32
    %c0_i32_1 = arith.constant 0 : i32
    return %c0_i32, %c0_i32_0 : i32, i32
  }
  func.func @transform_5(%arg0: i32) -> (i32, i32) {
    %c0_i32 = arith.constant 0 : i32
    %c0_i32_0 = arith.constant 0 : i32
    %c0_i32_1 = arith.constant 0 : i32
    return %c0_i32, %c0_i32_0 : i32, i32
  }
  func.func @transform_6(%arg0: i32) -> (i32, i32) {
    %c0_i32 = arith.constant 0 : i32
    %c0_i32_0 = arith.constant 0 : i32
    return %arg0, %c0_i32 : i32, i32
  }
}

module attributes {stable_mosaic.version = 11 : i64} {
  func.func @_bilstm_kernel(%arg0: i32, %arg1: memref<8x2x512xf32, #tpu.memory_space<vmem>>, %arg2: memref<8x2x512xf32, #tpu.memory_space<vmem>>, %arg3: memref<128x512xbf16, #tpu.memory_space<vmem>>, %arg4: memref<128x512xbf16, #tpu.memory_space<vmem>>, %arg5: memref<8x2x128xf32, #tpu.memory_space<vmem>>, %arg6: memref<8x2x128xf32, #tpu.memory_space<vmem>>, %arg7: memref<2x128xf32, #tpu.memory_space<vmem>>, %arg8: memref<2x128xf32, #tpu.memory_space<vmem>>, %arg9: memref<2x128xf32, #tpu.memory_space<vmem>>, %arg10: memref<2x128xf32, #tpu.memory_space<vmem>>) attributes {dimension_semantics = [#tpu.dimension_semantics<arbitrary>], iteration_bounds = array<i64: 1>, scalar_prefetch = 0 : i64, scratch_operands = 4 : i64, tpu.core_type = #tpu.core_type<tc>, window_params = [{transform_indices = @transform_0, window_bounds = array<i64: 8, 2, 512>}, {transform_indices = @transform_1, window_bounds = array<i64: 8, 2, 512>}, {pipeline_mode = #tpu.pipeline_mode<synchronous>, transform_indices = @transform_2, window_bounds = array<i64: 128, 512>}, {pipeline_mode = #tpu.pipeline_mode<synchronous>, transform_indices = @transform_3, window_bounds = array<i64: 128, 512>}, {transform_indices = @transform_4, window_bounds = array<i64: 8, 2, 128>}, {transform_indices = @transform_5, window_bounds = array<i64: 8, 2, 128>}]} {
    %c0_i32 = arith.constant 0 : i32
    %0 = arith.cmpi eq, %arg0, %c0_i32 : i32
    %1 = arith.extui %0 : i1 to i32
    %c0_i32_0 = arith.constant 0 : i32
    %2 = arith.cmpi ne, %1, %c0_i32_0 : i32
    scf.if %2 {
      %cst_276 = arith.constant 0.000000e+00 : f32
      %645 = vector.broadcast %cst_276 : f32 to vector<2x128xf32>
      %c0_277 = arith.constant 0 : index
      %c0_278 = arith.constant 0 : index
      %646 = vector.load %arg7[%c0_277, %c0_278] : memref<2x128xf32, #tpu.memory_space<vmem>>, vector<2x128xf32>
      tpu.vector_store %arg7[%c0_277, %c0_278], %645 {strides = array<i32>} : memref<2x128xf32, #tpu.memory_space<vmem>>, vector<2x128xf32>,
      %cst_279 = arith.constant 0.000000e+00 : f32
      %647 = vector.broadcast %cst_279 : f32 to vector<2x128xf32>
      %c0_280 = arith.constant 0 : index
      %c0_281 = arith.constant 0 : index
      %648 = vector.load %arg8[%c0_280, %c0_281] : memref<2x128xf32, #tpu.memory_space<vmem>>, vector<2x128xf32>
      tpu.vector_store %arg8[%c0_280, %c0_281], %647 {strides = array<i32>} : memref<2x128xf32, #tpu.memory_space<vmem>>, vector<2x128xf32>,
      %cst_282 = arith.constant 0.000000e+00 : f32
      %649 = vector.broadcast %cst_282 : f32 to vector<2x128xf32>
      %c0_283 = arith.constant 0 : index
      %c0_284 = arith.constant 0 : index
      %650 = vector.load %arg9[%c0_283, %c0_284] : memref<2x128xf32, #tpu.memory_space<vmem>>, vector<2x128xf32>
      tpu.vector_store %arg9[%c0_283, %c0_284], %649 {strides = array<i32>} : memref<2x128xf32, #tpu.memory_space<vmem>>, vector<2x128xf32>,
      %cst_285 = arith.constant 0.000000e+00 : f32
      %651 = vector.broadcast %cst_285 : f32 to vector<2x128xf32>
      %c0_286 = arith.constant 0 : index
      %c0_287 = arith.constant 0 : index
      %652 = vector.load %arg10[%c0_286, %c0_287] : memref<2x128xf32, #tpu.memory_space<vmem>>, vector<2x128xf32>
      tpu.vector_store %arg10[%c0_286, %c0_287], %651 {strides = array<i32>} : memref<2x128xf32, #tpu.memory_space<vmem>>, vector<2x128xf32>,
    } else {
    }
    %c0 = arith.constant 0 : index
    %c0_1 = arith.constant 0 : index
    %3 = vector.load %arg3[%c0, %c0_1] : memref<128x512xbf16, #tpu.memory_space<vmem>>, vector<128x512xbf16>
    %c0_2 = arith.constant 0 : index
    %c0_3 = arith.constant 0 : index
    %4 = vector.load %arg4[%c0_2, %c0_3] : memref<128x512xbf16, #tpu.memory_space<vmem>>, vector<128x512xbf16>
    %c0_i32_4 = arith.constant 0 : i32
    %5 = arith.index_cast %c0_i32_4 : i32 to index
    %c0_5 = arith.constant 0 : index
    %c0_6 = arith.constant 0 : index
    %6 = vector.load %arg1[%5, %c0_5, %c0_6] : memref<8x2x512xf32, #tpu.memory_space<vmem>>, vector<1x2x512xf32>
    %7 = vector.shape_cast %6 : vector<1x2x512xf32> to vector<2x512xf32>
    %c0_7 = arith.constant 0 : index
    %c0_8 = arith.constant 0 : index
    %8 = vector.load %arg7[%c0_7, %c0_8] : memref<2x128xf32, #tpu.memory_space<vmem>>, vector<2x128xf32>
    %9 = arith.truncf %8 : vector<2x128xf32> to vector<2x128xbf16>
    %cst = arith.constant dense<0.000000e+00> : vector<2x512xf32>
    %10 = tpu.matmul %9, %3, %cst {dimension_numbers = #tpu.dot_dimension_numbers<[1], [0], [0], [1], [0, 0, 1, 1], [], []>} : vector<2x128xbf16>, vector<128x512xbf16>, vector<2x512xf32> -> vector<2x512xf32>
    %11 = arith.addf %7, %10 : vector<2x512xf32>
    %c7_i32 = arith.constant 7 : i32
    %12 = arith.subi %c7_i32, %c0_i32_4 : i32
    %13 = arith.index_cast %12 : i32 to index
    %c0_9 = arith.constant 0 : index
    %c0_10 = arith.constant 0 : index
    %14 = vector.load %arg2[%13, %c0_9, %c0_10] : memref<8x2x512xf32, #tpu.memory_space<vmem>>, vector<1x2x512xf32>
    %15 = vector.shape_cast %14 : vector<1x2x512xf32> to vector<2x512xf32>
    %c0_11 = arith.constant 0 : index
    %c0_12 = arith.constant 0 : index
    %16 = vector.load %arg9[%c0_11, %c0_12] : memref<2x128xf32, #tpu.memory_space<vmem>>, vector<2x128xf32>
    %17 = arith.truncf %16 : vector<2x128xf32> to vector<2x128xbf16>
    %cst_13 = arith.constant dense<0.000000e+00> : vector<2x512xf32>
    %18 = tpu.matmul %17, %4, %cst_13 {dimension_numbers = #tpu.dot_dimension_numbers<[1], [0], [0], [1], [0, 0, 1, 1], [], []>} : vector<2x128xbf16>, vector<128x512xbf16>, vector<2x512xf32> -> vector<2x512xf32>
    %19 = arith.addf %15, %18 : vector<2x512xf32>
    %c0_14 = arith.constant 0 : index
    %c0_15 = arith.constant 0 : index
    %20 = vector.load %arg8[%c0_14, %c0_15] : memref<2x128xf32, #tpu.memory_space<vmem>>, vector<2x128xf32>
    %21 = vector.extract_strided_slice %11 {offsets = [0, 0], sizes = [2, 128], strides = [1, 1]} : vector<2x512xf32> to vector<2x128xf32>
    %22 = arith.negf %21 : vector<2x128xf32>
    %23 = math.exp %22 : vector<2x128xf32>
    %cst_16 = arith.constant 1.000000e+00 : f32
    %24 = vector.broadcast %cst_16 : f32 to vector<2x128xf32>
    %25 = arith.addf %24, %23 : vector<2x128xf32>
    %26 = arith.divf %24, %25 : vector<2x128xf32>
    %27 = vector.extract_strided_slice %11 {offsets = [0, 128], sizes = [2, 128], strides = [1, 1]} : vector<2x512xf32> to vector<2x128xf32>
    %28 = arith.negf %27 : vector<2x128xf32>
    %29 = math.exp %28 : vector<2x128xf32>
    %cst_17 = arith.constant 1.000000e+00 : f32
    %30 = vector.broadcast %cst_17 : f32 to vector<2x128xf32>
    %31 = arith.addf %30, %29 : vector<2x128xf32>
    %32 = arith.divf %30, %31 : vector<2x128xf32>
    %33 = vector.extract_strided_slice %11 {offsets = [0, 256], sizes = [2, 128], strides = [1, 1]} : vector<2x512xf32> to vector<2x128xf32>
    %34 = math.tanh %33 : vector<2x128xf32>
    %35 = vector.extract_strided_slice %11 {offsets = [0, 384], sizes = [2, 128], strides = [1, 1]} : vector<2x512xf32> to vector<2x128xf32>
    %36 = arith.negf %35 : vector<2x128xf32>
    %37 = math.exp %36 : vector<2x128xf32>
    %cst_18 = arith.constant 1.000000e+00 : f32
    %38 = vector.broadcast %cst_18 : f32 to vector<2x128xf32>
    %39 = arith.addf %38, %37 : vector<2x128xf32>
    %40 = arith.divf %38, %39 : vector<2x128xf32>
    %41 = arith.mulf %32, %20 : vector<2x128xf32>
    %42 = arith.mulf %26, %34 : vector<2x128xf32>
    %43 = arith.addf %41, %42 : vector<2x128xf32>
    %44 = math.tanh %43 : vector<2x128xf32>
    %45 = arith.mulf %40, %44 : vector<2x128xf32>
    %c0_19 = arith.constant 0 : index
    %c0_20 = arith.constant 0 : index
    %46 = vector.load %arg10[%c0_19, %c0_20] : memref<2x128xf32, #tpu.memory_space<vmem>>, vector<2x128xf32>
    %47 = vector.extract_strided_slice %19 {offsets = [0, 0], sizes = [2, 128], strides = [1, 1]} : vector<2x512xf32> to vector<2x128xf32>
    %48 = arith.negf %47 : vector<2x128xf32>
    %49 = math.exp %48 : vector<2x128xf32>
    %cst_21 = arith.constant 1.000000e+00 : f32
    %50 = vector.broadcast %cst_21 : f32 to vector<2x128xf32>
    %51 = arith.addf %50, %49 : vector<2x128xf32>
    %52 = arith.divf %50, %51 : vector<2x128xf32>
    %53 = vector.extract_strided_slice %19 {offsets = [0, 128], sizes = [2, 128], strides = [1, 1]} : vector<2x512xf32> to vector<2x128xf32>
    %54 = arith.negf %53 : vector<2x128xf32>
    %55 = math.exp %54 : vector<2x128xf32>
    %cst_22 = arith.constant 1.000000e+00 : f32
    %56 = vector.broadcast %cst_22 : f32 to vector<2x128xf32>
    %57 = arith.addf %56, %55 : vector<2x128xf32>
    %58 = arith.divf %56, %57 : vector<2x128xf32>
    %59 = vector.extract_strided_slice %19 {offsets = [0, 256], sizes = [2, 128], strides = [1, 1]} : vector<2x512xf32> to vector<2x128xf32>
    %60 = math.tanh %59 : vector<2x128xf32>
    %61 = vector.extract_strided_slice %19 {offsets = [0, 384], sizes = [2, 128], strides = [1, 1]} : vector<2x512xf32> to vector<2x128xf32>
    %62 = arith.negf %61 : vector<2x128xf32>
    %63 = math.exp %62 : vector<2x128xf32>
    %cst_23 = arith.constant 1.000000e+00 : f32
    %64 = vector.broadcast %cst_23 : f32 to vector<2x128xf32>
    %65 = arith.addf %64, %63 : vector<2x128xf32>
    %66 = arith.divf %64, %65 : vector<2x128xf32>
    %67 = arith.mulf %58, %46 : vector<2x128xf32>
    %68 = arith.mulf %52, %60 : vector<2x128xf32>
    %69 = arith.addf %67, %68 : vector<2x128xf32>
    %70 = math.tanh %69 : vector<2x128xf32>
    %71 = arith.mulf %66, %70 : vector<2x128xf32>
    %c0_24 = arith.constant 0 : index
    %c0_25 = arith.constant 0 : index
    %72 = vector.load %arg7[%c0_24, %c0_25] : memref<2x128xf32, #tpu.memory_space<vmem>>, vector<2x128xf32>
    tpu.vector_store %arg7[%c0_24, %c0_25], %45 {strides = array<i32>} : memref<2x128xf32, #tpu.memory_space<vmem>>, vector<2x128xf32>,
    %c0_26 = arith.constant 0 : index
    %c0_27 = arith.constant 0 : index
    %73 = vector.load %arg8[%c0_26, %c0_27] : memref<2x128xf32, #tpu.memory_space<vmem>>, vector<2x128xf32>
    tpu.vector_store %arg8[%c0_26, %c0_27], %43 {strides = array<i32>} : memref<2x128xf32, #tpu.memory_space<vmem>>, vector<2x128xf32>,
    %c0_28 = arith.constant 0 : index
    %c0_29 = arith.constant 0 : index
    %74 = vector.load %arg9[%c0_28, %c0_29] : memref<2x128xf32, #tpu.memory_space<vmem>>, vector<2x128xf32>
    tpu.vector_store %arg9[%c0_28, %c0_29], %71 {strides = array<i32>} : memref<2x128xf32, #tpu.memory_space<vmem>>, vector<2x128xf32>,
    %c0_30 = arith.constant 0 : index
    %c0_31 = arith.constant 0 : index
    %75 = vector.load %arg10[%c0_30, %c0_31] : memref<2x128xf32, #tpu.memory_space<vmem>>, vector<2x128xf32>
    tpu.vector_store %arg10[%c0_30, %c0_31], %69 {strides = array<i32>} : memref<2x128xf32, #tpu.memory_space<vmem>>, vector<2x128xf32>,
    %76 = arith.index_cast %c0_i32_4 : i32 to index
    %c0_32 = arith.constant 0 : index
    %c0_33 = arith.constant 0 : index
    %77 = vector.load %arg5[%76, %c0_32, %c0_33] : memref<8x2x128xf32, #tpu.memory_space<vmem>>, vector<1x2x128xf32>
    %78 = vector.shape_cast %77 : vector<1x2x128xf32> to vector<2x128xf32>
    %79 = vector.shape_cast %45 : vector<2x128xf32> to vector<1x2x128xf32>
    tpu.vector_store %arg5[%76, %c0_32, %c0_33], %79 {strides = array<i32>} : memref<8x2x128xf32, #tpu.memory_space<vmem>>, vector<1x2x128xf32>,
    %c7_i32_34 = arith.constant 7 : i32
    %80 = arith.subi %c7_i32_34, %c0_i32_4 : i32
    %81 = arith.index_cast %80 : i32 to index
    %c0_35 = arith.constant 0 : index
    %c0_36 = arith.constant 0 : index
    %82 = vector.load %arg6[%81, %c0_35, %c0_36] : memref<8x2x128xf32, #tpu.memory_space<vmem>>, vector<1x2x128xf32>
    %83 = vector.shape_cast %82 : vector<1x2x128xf32> to vector<2x128xf32>
    %84 = vector.shape_cast %71 : vector<2x128xf32> to vector<1x2x128xf32>
    tpu.vector_store %arg6[%81, %c0_35, %c0_36], %84 {strides = array<i32>} : memref<8x2x128xf32, #tpu.memory_space<vmem>>, vector<1x2x128xf32>,
    %c1_i32 = arith.constant 1 : i32
    %85 = arith.index_cast %c1_i32 : i32 to index
    %c0_37 = arith.constant 0 : index
    %c0_38 = arith.constant 0 : index
    %86 = vector.load %arg1[%85, %c0_37, %c0_38] : memref<8x2x512xf32, #tpu.memory_space<vmem>>, vector<1x2x512xf32>
    %87 = vector.shape_cast %86 : vector<1x2x512xf32> to vector<2x512xf32>
    %c0_39 = arith.constant 0 : index
    %c0_40 = arith.constant 0 : index
    %88 = vector.load %arg7[%c0_39, %c0_40] : memref<2x128xf32, #tpu.memory_space<vmem>>, vector<2x128xf32>
    %89 = arith.truncf %88 : vector<2x128xf32> to vector<2x128xbf16>
    %cst_41 = arith.constant dense<0.000000e+00> : vector<2x512xf32>
    %90 = tpu.matmul %89, %3, %cst_41 {dimension_numbers = #tpu.dot_dimension_numbers<[1], [0], [0], [1], [0, 0, 1, 1], [], []>} : vector<2x128xbf16>, vector<128x512xbf16>, vector<2x512xf32> -> vector<2x512xf32>
    %91 = arith.addf %87, %90 : vector<2x512xf32>
    %c7_i32_42 = arith.constant 7 : i32
    %92 = arith.subi %c7_i32_42, %c1_i32 : i32
    %93 = arith.index_cast %92 : i32 to index
    %c0_43 = arith.constant 0 : index
    %c0_44 = arith.constant 0 : index
    %94 = vector.load %arg2[%93, %c0_43, %c0_44] : memref<8x2x512xf32, #tpu.memory_space<vmem>>, vector<1x2x512xf32>
    %95 = vector.shape_cast %94 : vector<1x2x512xf32> to vector<2x512xf32>
    %c0_45 = arith.constant 0 : index
    %c0_46 = arith.constant 0 : index
    %96 = vector.load %arg9[%c0_45, %c0_46] : memref<2x128xf32, #tpu.memory_space<vmem>>, vector<2x128xf32>
    %97 = arith.truncf %96 : vector<2x128xf32> to vector<2x128xbf16>
    %cst_47 = arith.constant dense<0.000000e+00> : vector<2x512xf32>
    %98 = tpu.matmul %97, %4, %cst_47 {dimension_numbers = #tpu.dot_dimension_numbers<[1], [0], [0], [1], [0, 0, 1, 1], [], []>} : vector<2x128xbf16>, vector<128x512xbf16>, vector<2x512xf32> -> vector<2x512xf32>
    %99 = arith.addf %95, %98 : vector<2x512xf32>
    %c0_48 = arith.constant 0 : index
    %c0_49 = arith.constant 0 : index
    %100 = vector.load %arg8[%c0_48, %c0_49] : memref<2x128xf32, #tpu.memory_space<vmem>>, vector<2x128xf32>
    %101 = vector.extract_strided_slice %91 {offsets = [0, 0], sizes = [2, 128], strides = [1, 1]} : vector<2x512xf32> to vector<2x128xf32>
    %102 = arith.negf %101 : vector<2x128xf32>
    %103 = math.exp %102 : vector<2x128xf32>
    %cst_50 = arith.constant 1.000000e+00 : f32
    %104 = vector.broadcast %cst_50 : f32 to vector<2x128xf32>
    %105 = arith.addf %104, %103 : vector<2x128xf32>
    %106 = arith.divf %104, %105 : vector<2x128xf32>
    %107 = vector.extract_strided_slice %91 {offsets = [0, 128], sizes = [2, 128], strides = [1, 1]} : vector<2x512xf32> to vector<2x128xf32>
    %108 = arith.negf %107 : vector<2x128xf32>
    %109 = math.exp %108 : vector<2x128xf32>
    %cst_51 = arith.constant 1.000000e+00 : f32
    %110 = vector.broadcast %cst_51 : f32 to vector<2x128xf32>
    %111 = arith.addf %110, %109 : vector<2x128xf32>
    %112 = arith.divf %110, %111 : vector<2x128xf32>
    %113 = vector.extract_strided_slice %91 {offsets = [0, 256], sizes = [2, 128], strides = [1, 1]} : vector<2x512xf32> to vector<2x128xf32>
    %114 = math.tanh %113 : vector<2x128xf32>
    %115 = vector.extract_strided_slice %91 {offsets = [0, 384], sizes = [2, 128], strides = [1, 1]} : vector<2x512xf32> to vector<2x128xf32>
    %116 = arith.negf %115 : vector<2x128xf32>
    %117 = math.exp %116 : vector<2x128xf32>
    %cst_52 = arith.constant 1.000000e+00 : f32
    %118 = vector.broadcast %cst_52 : f32 to vector<2x128xf32>
    %119 = arith.addf %118, %117 : vector<2x128xf32>
    %120 = arith.divf %118, %119 : vector<2x128xf32>
    %121 = arith.mulf %112, %100 : vector<2x128xf32>
    %122 = arith.mulf %106, %114 : vector<2x128xf32>
    %123 = arith.addf %121, %122 : vector<2x128xf32>
    %124 = math.tanh %123 : vector<2x128xf32>
    %125 = arith.mulf %120, %124 : vector<2x128xf32>
    %c0_53 = arith.constant 0 : index
    %c0_54 = arith.constant 0 : index
    %126 = vector.load %arg10[%c0_53, %c0_54] : memref<2x128xf32, #tpu.memory_space<vmem>>, vector<2x128xf32>
    %127 = vector.extract_strided_slice %99 {offsets = [0, 0], sizes = [2, 128], strides = [1, 1]} : vector<2x512xf32> to vector<2x128xf32>
    %128 = arith.negf %127 : vector<2x128xf32>
    %129 = math.exp %128 : vector<2x128xf32>
    %cst_55 = arith.constant 1.000000e+00 : f32
    %130 = vector.broadcast %cst_55 : f32 to vector<2x128xf32>
    %131 = arith.addf %130, %129 : vector<2x128xf32>
    %132 = arith.divf %130, %131 : vector<2x128xf32>
    %133 = vector.extract_strided_slice %99 {offsets = [0, 128], sizes = [2, 128], strides = [1, 1]} : vector<2x512xf32> to vector<2x128xf32>
    %134 = arith.negf %133 : vector<2x128xf32>
    %135 = math.exp %134 : vector<2x128xf32>
    %cst_56 = arith.constant 1.000000e+00 : f32
    %136 = vector.broadcast %cst_56 : f32 to vector<2x128xf32>
    %137 = arith.addf %136, %135 : vector<2x128xf32>
    %138 = arith.divf %136, %137 : vector<2x128xf32>
    %139 = vector.extract_strided_slice %99 {offsets = [0, 256], sizes = [2, 128], strides = [1, 1]} : vector<2x512xf32> to vector<2x128xf32>
    %140 = math.tanh %139 : vector<2x128xf32>
    %141 = vector.extract_strided_slice %99 {offsets = [0, 384], sizes = [2, 128], strides = [1, 1]} : vector<2x512xf32> to vector<2x128xf32>
    %142 = arith.negf %141 : vector<2x128xf32>
    %143 = math.exp %142 : vector<2x128xf32>
    %cst_57 = arith.constant 1.000000e+00 : f32
    %144 = vector.broadcast %cst_57 : f32 to vector<2x128xf32>
    %145 = arith.addf %144, %143 : vector<2x128xf32>
    %146 = arith.divf %144, %145 : vector<2x128xf32>
    %147 = arith.mulf %138, %126 : vector<2x128xf32>
    %148 = arith.mulf %132, %140 : vector<2x128xf32>
    %149 = arith.addf %147, %148 : vector<2x128xf32>
    %150 = math.tanh %149 : vector<2x128xf32>
    %151 = arith.mulf %146, %150 : vector<2x128xf32>
    %c0_58 = arith.constant 0 : index
    %c0_59 = arith.constant 0 : index
    %152 = vector.load %arg7[%c0_58, %c0_59] : memref<2x128xf32, #tpu.memory_space<vmem>>, vector<2x128xf32>
    tpu.vector_store %arg7[%c0_58, %c0_59], %125 {strides = array<i32>} : memref<2x128xf32, #tpu.memory_space<vmem>>, vector<2x128xf32>,
    %c0_60 = arith.constant 0 : index
    %c0_61 = arith.constant 0 : index
    %153 = vector.load %arg8[%c0_60, %c0_61] : memref<2x128xf32, #tpu.memory_space<vmem>>, vector<2x128xf32>
    tpu.vector_store %arg8[%c0_60, %c0_61], %123 {strides = array<i32>} : memref<2x128xf32, #tpu.memory_space<vmem>>, vector<2x128xf32>,
    %c0_62 = arith.constant 0 : index
    %c0_63 = arith.constant 0 : index
    %154 = vector.load %arg9[%c0_62, %c0_63] : memref<2x128xf32, #tpu.memory_space<vmem>>, vector<2x128xf32>
    tpu.vector_store %arg9[%c0_62, %c0_63], %151 {strides = array<i32>} : memref<2x128xf32, #tpu.memory_space<vmem>>, vector<2x128xf32>,
    %c0_64 = arith.constant 0 : index
    %c0_65 = arith.constant 0 : index
    %155 = vector.load %arg10[%c0_64, %c0_65] : memref<2x128xf32, #tpu.memory_space<vmem>>, vector<2x128xf32>
    tpu.vector_store %arg10[%c0_64, %c0_65], %149 {strides = array<i32>} : memref<2x128xf32, #tpu.memory_space<vmem>>, vector<2x128xf32>,
    %156 = arith.index_cast %c1_i32 : i32 to index
    %c0_66 = arith.constant 0 : index
    %c0_67 = arith.constant 0 : index
    %157 = vector.load %arg5[%156, %c0_66, %c0_67] : memref<8x2x128xf32, #tpu.memory_space<vmem>>, vector<1x2x128xf32>
    %158 = vector.shape_cast %157 : vector<1x2x128xf32> to vector<2x128xf32>
    %159 = vector.shape_cast %125 : vector<2x128xf32> to vector<1x2x128xf32>
    tpu.vector_store %arg5[%156, %c0_66, %c0_67], %159 {strides = array<i32>} : memref<8x2x128xf32, #tpu.memory_space<vmem>>, vector<1x2x128xf32>,
    %c7_i32_68 = arith.constant 7 : i32
    %160 = arith.subi %c7_i32_68, %c1_i32 : i32
    %161 = arith.index_cast %160 : i32 to index
    %c0_69 = arith.constant 0 : index
    %c0_70 = arith.constant 0 : index
    %162 = vector.load %arg6[%161, %c0_69, %c0_70] : memref<8x2x128xf32, #tpu.memory_space<vmem>>, vector<1x2x128xf32>
    %163 = vector.shape_cast %162 : vector<1x2x128xf32> to vector<2x128xf32>
    %164 = vector.shape_cast %151 : vector<2x128xf32> to vector<1x2x128xf32>
    tpu.vector_store %arg6[%161, %c0_69, %c0_70], %164 {strides = array<i32>} : memref<8x2x128xf32, #tpu.memory_space<vmem>>, vector<1x2x128xf32>,
    %c2_i32 = arith.constant 2 : i32
    %165 = arith.index_cast %c2_i32 : i32 to index
    %c0_71 = arith.constant 0 : index
    %c0_72 = arith.constant 0 : index
    %166 = vector.load %arg1[%165, %c0_71, %c0_72] : memref<8x2x512xf32, #tpu.memory_space<vmem>>, vector<1x2x512xf32>
    %167 = vector.shape_cast %166 : vector<1x2x512xf32> to vector<2x512xf32>
    %c0_73 = arith.constant 0 : index
    %c0_74 = arith.constant 0 : index
    %168 = vector.load %arg7[%c0_73, %c0_74] : memref<2x128xf32, #tpu.memory_space<vmem>>, vector<2x128xf32>
    %169 = arith.truncf %168 : vector<2x128xf32> to vector<2x128xbf16>
    %cst_75 = arith.constant dense<0.000000e+00> : vector<2x512xf32>
    %170 = tpu.matmul %169, %3, %cst_75 {dimension_numbers = #tpu.dot_dimension_numbers<[1], [0], [0], [1], [0, 0, 1, 1], [], []>} : vector<2x128xbf16>, vector<128x512xbf16>, vector<2x512xf32> -> vector<2x512xf32>
    %171 = arith.addf %167, %170 : vector<2x512xf32>
    %c7_i32_76 = arith.constant 7 : i32
    %172 = arith.subi %c7_i32_76, %c2_i32 : i32
    %173 = arith.index_cast %172 : i32 to index
    %c0_77 = arith.constant 0 : index
    %c0_78 = arith.constant 0 : index
    %174 = vector.load %arg2[%173, %c0_77, %c0_78] : memref<8x2x512xf32, #tpu.memory_space<vmem>>, vector<1x2x512xf32>
    %175 = vector.shape_cast %174 : vector<1x2x512xf32> to vector<2x512xf32>
    %c0_79 = arith.constant 0 : index
    %c0_80 = arith.constant 0 : index
    %176 = vector.load %arg9[%c0_79, %c0_80] : memref<2x128xf32, #tpu.memory_space<vmem>>, vector<2x128xf32>
    %177 = arith.truncf %176 : vector<2x128xf32> to vector<2x128xbf16>
    %cst_81 = arith.constant dense<0.000000e+00> : vector<2x512xf32>
    %178 = tpu.matmul %177, %4, %cst_81 {dimension_numbers = #tpu.dot_dimension_numbers<[1], [0], [0], [1], [0, 0, 1, 1], [], []>} : vector<2x128xbf16>, vector<128x512xbf16>, vector<2x512xf32> -> vector<2x512xf32>
    %179 = arith.addf %175, %178 : vector<2x512xf32>
    %c0_82 = arith.constant 0 : index
    %c0_83 = arith.constant 0 : index
    %180 = vector.load %arg8[%c0_82, %c0_83] : memref<2x128xf32, #tpu.memory_space<vmem>>, vector<2x128xf32>
    %181 = vector.extract_strided_slice %171 {offsets = [0, 0], sizes = [2, 128], strides = [1, 1]} : vector<2x512xf32> to vector<2x128xf32>
    %182 = arith.negf %181 : vector<2x128xf32>
    %183 = math.exp %182 : vector<2x128xf32>
    %cst_84 = arith.constant 1.000000e+00 : f32
    %184 = vector.broadcast %cst_84 : f32 to vector<2x128xf32>
    %185 = arith.addf %184, %183 : vector<2x128xf32>
    %186 = arith.divf %184, %185 : vector<2x128xf32>
    %187 = vector.extract_strided_slice %171 {offsets = [0, 128], sizes = [2, 128], strides = [1, 1]} : vector<2x512xf32> to vector<2x128xf32>
    %188 = arith.negf %187 : vector<2x128xf32>
    %189 = math.exp %188 : vector<2x128xf32>
    %cst_85 = arith.constant 1.000000e+00 : f32
    %190 = vector.broadcast %cst_85 : f32 to vector<2x128xf32>
    %191 = arith.addf %190, %189 : vector<2x128xf32>
    %192 = arith.divf %190, %191 : vector<2x128xf32>
    %193 = vector.extract_strided_slice %171 {offsets = [0, 256], sizes = [2, 128], strides = [1, 1]} : vector<2x512xf32> to vector<2x128xf32>
    %194 = math.tanh %193 : vector<2x128xf32>
    %195 = vector.extract_strided_slice %171 {offsets = [0, 384], sizes = [2, 128], strides = [1, 1]} : vector<2x512xf32> to vector<2x128xf32>
    %196 = arith.negf %195 : vector<2x128xf32>
    %197 = math.exp %196 : vector<2x128xf32>
    %cst_86 = arith.constant 1.000000e+00 : f32
    %198 = vector.broadcast %cst_86 : f32 to vector<2x128xf32>
    %199 = arith.addf %198, %197 : vector<2x128xf32>
    %200 = arith.divf %198, %199 : vector<2x128xf32>
    %201 = arith.mulf %192, %180 : vector<2x128xf32>
    %202 = arith.mulf %186, %194 : vector<2x128xf32>
    %203 = arith.addf %201, %202 : vector<2x128xf32>
    %204 = math.tanh %203 : vector<2x128xf32>
    %205 = arith.mulf %200, %204 : vector<2x128xf32>
    %c0_87 = arith.constant 0 : index
    %c0_88 = arith.constant 0 : index
    %206 = vector.load %arg10[%c0_87, %c0_88] : memref<2x128xf32, #tpu.memory_space<vmem>>, vector<2x128xf32>
    %207 = vector.extract_strided_slice %179 {offsets = [0, 0], sizes = [2, 128], strides = [1, 1]} : vector<2x512xf32> to vector<2x128xf32>
    %208 = arith.negf %207 : vector<2x128xf32>
    %209 = math.exp %208 : vector<2x128xf32>
    %cst_89 = arith.constant 1.000000e+00 : f32
    %210 = vector.broadcast %cst_89 : f32 to vector<2x128xf32>
    %211 = arith.addf %210, %209 : vector<2x128xf32>
    %212 = arith.divf %210, %211 : vector<2x128xf32>
    %213 = vector.extract_strided_slice %179 {offsets = [0, 128], sizes = [2, 128], strides = [1, 1]} : vector<2x512xf32> to vector<2x128xf32>
    %214 = arith.negf %213 : vector<2x128xf32>
    %215 = math.exp %214 : vector<2x128xf32>
    %cst_90 = arith.constant 1.000000e+00 : f32
    %216 = vector.broadcast %cst_90 : f32 to vector<2x128xf32>
    %217 = arith.addf %216, %215 : vector<2x128xf32>
    %218 = arith.divf %216, %217 : vector<2x128xf32>
    %219 = vector.extract_strided_slice %179 {offsets = [0, 256], sizes = [2, 128], strides = [1, 1]} : vector<2x512xf32> to vector<2x128xf32>
    %220 = math.tanh %219 : vector<2x128xf32>
    %221 = vector.extract_strided_slice %179 {offsets = [0, 384], sizes = [2, 128], strides = [1, 1]} : vector<2x512xf32> to vector<2x128xf32>
    %222 = arith.negf %221 : vector<2x128xf32>
    %223 = math.exp %222 : vector<2x128xf32>
    %cst_91 = arith.constant 1.000000e+00 : f32
    %224 = vector.broadcast %cst_91 : f32 to vector<2x128xf32>
    %225 = arith.addf %224, %223 : vector<2x128xf32>
    %226 = arith.divf %224, %225 : vector<2x128xf32>
    %227 = arith.mulf %218, %206 : vector<2x128xf32>
    %228 = arith.mulf %212, %220 : vector<2x128xf32>
    %229 = arith.addf %227, %228 : vector<2x128xf32>
    %230 = math.tanh %229 : vector<2x128xf32>
    %231 = arith.mulf %226, %230 : vector<2x128xf32>
    %c0_92 = arith.constant 0 : index
    %c0_93 = arith.constant 0 : index
    %232 = vector.load %arg7[%c0_92, %c0_93] : memref<2x128xf32, #tpu.memory_space<vmem>>, vector<2x128xf32>
    tpu.vector_store %arg7[%c0_92, %c0_93], %205 {strides = array<i32>} : memref<2x128xf32, #tpu.memory_space<vmem>>, vector<2x128xf32>,
    %c0_94 = arith.constant 0 : index
    %c0_95 = arith.constant 0 : index
    %233 = vector.load %arg8[%c0_94, %c0_95] : memref<2x128xf32, #tpu.memory_space<vmem>>, vector<2x128xf32>
    tpu.vector_store %arg8[%c0_94, %c0_95], %203 {strides = array<i32>} : memref<2x128xf32, #tpu.memory_space<vmem>>, vector<2x128xf32>,
    %c0_96 = arith.constant 0 : index
    %c0_97 = arith.constant 0 : index
    %234 = vector.load %arg9[%c0_96, %c0_97] : memref<2x128xf32, #tpu.memory_space<vmem>>, vector<2x128xf32>
    tpu.vector_store %arg9[%c0_96, %c0_97], %231 {strides = array<i32>} : memref<2x128xf32, #tpu.memory_space<vmem>>, vector<2x128xf32>,
    %c0_98 = arith.constant 0 : index
    %c0_99 = arith.constant 0 : index
    %235 = vector.load %arg10[%c0_98, %c0_99] : memref<2x128xf32, #tpu.memory_space<vmem>>, vector<2x128xf32>
    tpu.vector_store %arg10[%c0_98, %c0_99], %229 {strides = array<i32>} : memref<2x128xf32, #tpu.memory_space<vmem>>, vector<2x128xf32>,
    %236 = arith.index_cast %c2_i32 : i32 to index
    %c0_100 = arith.constant 0 : index
    %c0_101 = arith.constant 0 : index
    %237 = vector.load %arg5[%236, %c0_100, %c0_101] : memref<8x2x128xf32, #tpu.memory_space<vmem>>, vector<1x2x128xf32>
    %238 = vector.shape_cast %237 : vector<1x2x128xf32> to vector<2x128xf32>
    %239 = vector.shape_cast %205 : vector<2x128xf32> to vector<1x2x128xf32>
    tpu.vector_store %arg5[%236, %c0_100, %c0_101], %239 {strides = array<i32>} : memref<8x2x128xf32, #tpu.memory_space<vmem>>, vector<1x2x128xf32>,
    %c7_i32_102 = arith.constant 7 : i32
    %240 = arith.subi %c7_i32_102, %c2_i32 : i32
    %241 = arith.index_cast %240 : i32 to index
    %c0_103 = arith.constant 0 : index
    %c0_104 = arith.constant 0 : index
    %242 = vector.load %arg6[%241, %c0_103, %c0_104] : memref<8x2x128xf32, #tpu.memory_space<vmem>>, vector<1x2x128xf32>
    %243 = vector.shape_cast %242 : vector<1x2x128xf32> to vector<2x128xf32>
    %244 = vector.shape_cast %231 : vector<2x128xf32> to vector<1x2x128xf32>
    tpu.vector_store %arg6[%241, %c0_103, %c0_104], %244 {strides = array<i32>} : memref<8x2x128xf32, #tpu.memory_space<vmem>>, vector<1x2x128xf32>,
    %c3_i32 = arith.constant 3 : i32
    %245 = arith.index_cast %c3_i32 : i32 to index
    %c0_105 = arith.constant 0 : index
    %c0_106 = arith.constant 0 : index
    %246 = vector.load %arg1[%245, %c0_105, %c0_106] : memref<8x2x512xf32, #tpu.memory_space<vmem>>, vector<1x2x512xf32>
    %247 = vector.shape_cast %246 : vector<1x2x512xf32> to vector<2x512xf32>
    %c0_107 = arith.constant 0 : index
    %c0_108 = arith.constant 0 : index
    %248 = vector.load %arg7[%c0_107, %c0_108] : memref<2x128xf32, #tpu.memory_space<vmem>>, vector<2x128xf32>
    %249 = arith.truncf %248 : vector<2x128xf32> to vector<2x128xbf16>
    %cst_109 = arith.constant dense<0.000000e+00> : vector<2x512xf32>
    %250 = tpu.matmul %249, %3, %cst_109 {dimension_numbers = #tpu.dot_dimension_numbers<[1], [0], [0], [1], [0, 0, 1, 1], [], []>} : vector<2x128xbf16>, vector<128x512xbf16>, vector<2x512xf32> -> vector<2x512xf32>
    %251 = arith.addf %247, %250 : vector<2x512xf32>
    %c7_i32_110 = arith.constant 7 : i32
    %252 = arith.subi %c7_i32_110, %c3_i32 : i32
    %253 = arith.index_cast %252 : i32 to index
    %c0_111 = arith.constant 0 : index
    %c0_112 = arith.constant 0 : index
    %254 = vector.load %arg2[%253, %c0_111, %c0_112] : memref<8x2x512xf32, #tpu.memory_space<vmem>>, vector<1x2x512xf32>
    %255 = vector.shape_cast %254 : vector<1x2x512xf32> to vector<2x512xf32>
    %c0_113 = arith.constant 0 : index
    %c0_114 = arith.constant 0 : index
    %256 = vector.load %arg9[%c0_113, %c0_114] : memref<2x128xf32, #tpu.memory_space<vmem>>, vector<2x128xf32>
    %257 = arith.truncf %256 : vector<2x128xf32> to vector<2x128xbf16>
    %cst_115 = arith.constant dense<0.000000e+00> : vector<2x512xf32>
    %258 = tpu.matmul %257, %4, %cst_115 {dimension_numbers = #tpu.dot_dimension_numbers<[1], [0], [0], [1], [0, 0, 1, 1], [], []>} : vector<2x128xbf16>, vector<128x512xbf16>, vector<2x512xf32> -> vector<2x512xf32>
    %259 = arith.addf %255, %258 : vector<2x512xf32>
    %c0_116 = arith.constant 0 : index
    %c0_117 = arith.constant 0 : index
    %260 = vector.load %arg8[%c0_116, %c0_117] : memref<2x128xf32, #tpu.memory_space<vmem>>, vector<2x128xf32>
    %261 = vector.extract_strided_slice %251 {offsets = [0, 0], sizes = [2, 128], strides = [1, 1]} : vector<2x512xf32> to vector<2x128xf32>
    %262 = arith.negf %261 : vector<2x128xf32>
    %263 = math.exp %262 : vector<2x128xf32>
    %cst_118 = arith.constant 1.000000e+00 : f32
    %264 = vector.broadcast %cst_118 : f32 to vector<2x128xf32>
    %265 = arith.addf %264, %263 : vector<2x128xf32>
    %266 = arith.divf %264, %265 : vector<2x128xf32>
    %267 = vector.extract_strided_slice %251 {offsets = [0, 128], sizes = [2, 128], strides = [1, 1]} : vector<2x512xf32> to vector<2x128xf32>
    %268 = arith.negf %267 : vector<2x128xf32>
    %269 = math.exp %268 : vector<2x128xf32>
    %cst_119 = arith.constant 1.000000e+00 : f32
    %270 = vector.broadcast %cst_119 : f32 to vector<2x128xf32>
    %271 = arith.addf %270, %269 : vector<2x128xf32>
    %272 = arith.divf %270, %271 : vector<2x128xf32>
    %273 = vector.extract_strided_slice %251 {offsets = [0, 256], sizes = [2, 128], strides = [1, 1]} : vector<2x512xf32> to vector<2x128xf32>
    %274 = math.tanh %273 : vector<2x128xf32>
    %275 = vector.extract_strided_slice %251 {offsets = [0, 384], sizes = [2, 128], strides = [1, 1]} : vector<2x512xf32> to vector<2x128xf32>
    %276 = arith.negf %275 : vector<2x128xf32>
    %277 = math.exp %276 : vector<2x128xf32>
    %cst_120 = arith.constant 1.000000e+00 : f32
    %278 = vector.broadcast %cst_120 : f32 to vector<2x128xf32>
    %279 = arith.addf %278, %277 : vector<2x128xf32>
    %280 = arith.divf %278, %279 : vector<2x128xf32>
    %281 = arith.mulf %272, %260 : vector<2x128xf32>
    %282 = arith.mulf %266, %274 : vector<2x128xf32>
    %283 = arith.addf %281, %282 : vector<2x128xf32>
    %284 = math.tanh %283 : vector<2x128xf32>
    %285 = arith.mulf %280, %284 : vector<2x128xf32>
    %c0_121 = arith.constant 0 : index
    %c0_122 = arith.constant 0 : index
    %286 = vector.load %arg10[%c0_121, %c0_122] : memref<2x128xf32, #tpu.memory_space<vmem>>, vector<2x128xf32>
    %287 = vector.extract_strided_slice %259 {offsets = [0, 0], sizes = [2, 128], strides = [1, 1]} : vector<2x512xf32> to vector<2x128xf32>
    %288 = arith.negf %287 : vector<2x128xf32>
    %289 = math.exp %288 : vector<2x128xf32>
    %cst_123 = arith.constant 1.000000e+00 : f32
    %290 = vector.broadcast %cst_123 : f32 to vector<2x128xf32>
    %291 = arith.addf %290, %289 : vector<2x128xf32>
    %292 = arith.divf %290, %291 : vector<2x128xf32>
    %293 = vector.extract_strided_slice %259 {offsets = [0, 128], sizes = [2, 128], strides = [1, 1]} : vector<2x512xf32> to vector<2x128xf32>
    %294 = arith.negf %293 : vector<2x128xf32>
    %295 = math.exp %294 : vector<2x128xf32>
    %cst_124 = arith.constant 1.000000e+00 : f32
    %296 = vector.broadcast %cst_124 : f32 to vector<2x128xf32>
    %297 = arith.addf %296, %295 : vector<2x128xf32>
    %298 = arith.divf %296, %297 : vector<2x128xf32>
    %299 = vector.extract_strided_slice %259 {offsets = [0, 256], sizes = [2, 128], strides = [1, 1]} : vector<2x512xf32> to vector<2x128xf32>
    %300 = math.tanh %299 : vector<2x128xf32>
    %301 = vector.extract_strided_slice %259 {offsets = [0, 384], sizes = [2, 128], strides = [1, 1]} : vector<2x512xf32> to vector<2x128xf32>
    %302 = arith.negf %301 : vector<2x128xf32>
    %303 = math.exp %302 : vector<2x128xf32>
    %cst_125 = arith.constant 1.000000e+00 : f32
    %304 = vector.broadcast %cst_125 : f32 to vector<2x128xf32>
    %305 = arith.addf %304, %303 : vector<2x128xf32>
    %306 = arith.divf %304, %305 : vector<2x128xf32>
    %307 = arith.mulf %298, %286 : vector<2x128xf32>
    %308 = arith.mulf %292, %300 : vector<2x128xf32>
    %309 = arith.addf %307, %308 : vector<2x128xf32>
    %310 = math.tanh %309 : vector<2x128xf32>
    %311 = arith.mulf %306, %310 : vector<2x128xf32>
    %c0_126 = arith.constant 0 : index
    %c0_127 = arith.constant 0 : index
    %312 = vector.load %arg7[%c0_126, %c0_127] : memref<2x128xf32, #tpu.memory_space<vmem>>, vector<2x128xf32>
    tpu.vector_store %arg7[%c0_126, %c0_127], %285 {strides = array<i32>} : memref<2x128xf32, #tpu.memory_space<vmem>>, vector<2x128xf32>,
    %c0_128 = arith.constant 0 : index
    %c0_129 = arith.constant 0 : index
    %313 = vector.load %arg8[%c0_128, %c0_129] : memref<2x128xf32, #tpu.memory_space<vmem>>, vector<2x128xf32>
    tpu.vector_store %arg8[%c0_128, %c0_129], %283 {strides = array<i32>} : memref<2x128xf32, #tpu.memory_space<vmem>>, vector<2x128xf32>,
    %c0_130 = arith.constant 0 : index
    %c0_131 = arith.constant 0 : index
    %314 = vector.load %arg9[%c0_130, %c0_131] : memref<2x128xf32, #tpu.memory_space<vmem>>, vector<2x128xf32>
    tpu.vector_store %arg9[%c0_130, %c0_131], %311 {strides = array<i32>} : memref<2x128xf32, #tpu.memory_space<vmem>>, vector<2x128xf32>,
    %c0_132 = arith.constant 0 : index
    %c0_133 = arith.constant 0 : index
    %315 = vector.load %arg10[%c0_132, %c0_133] : memref<2x128xf32, #tpu.memory_space<vmem>>, vector<2x128xf32>
    tpu.vector_store %arg10[%c0_132, %c0_133], %309 {strides = array<i32>} : memref<2x128xf32, #tpu.memory_space<vmem>>, vector<2x128xf32>,
    %316 = arith.index_cast %c3_i32 : i32 to index
    %c0_134 = arith.constant 0 : index
    %c0_135 = arith.constant 0 : index
    %317 = vector.load %arg5[%316, %c0_134, %c0_135] : memref<8x2x128xf32, #tpu.memory_space<vmem>>, vector<1x2x128xf32>
    %318 = vector.shape_cast %317 : vector<1x2x128xf32> to vector<2x128xf32>
    %319 = vector.shape_cast %285 : vector<2x128xf32> to vector<1x2x128xf32>
    tpu.vector_store %arg5[%316, %c0_134, %c0_135], %319 {strides = array<i32>} : memref<8x2x128xf32, #tpu.memory_space<vmem>>, vector<1x2x128xf32>,
    %c7_i32_136 = arith.constant 7 : i32
    %320 = arith.subi %c7_i32_136, %c3_i32 : i32
    %321 = arith.index_cast %320 : i32 to index
    %c0_137 = arith.constant 0 : index
    %c0_138 = arith.constant 0 : index
    %322 = vector.load %arg6[%321, %c0_137, %c0_138] : memref<8x2x128xf32, #tpu.memory_space<vmem>>, vector<1x2x128xf32>
    %323 = vector.shape_cast %322 : vector<1x2x128xf32> to vector<2x128xf32>
    %324 = vector.shape_cast %311 : vector<2x128xf32> to vector<1x2x128xf32>
    tpu.vector_store %arg6[%321, %c0_137, %c0_138], %324 {strides = array<i32>} : memref<8x2x128xf32, #tpu.memory_space<vmem>>, vector<1x2x128xf32>,
    %c4_i32 = arith.constant 4 : i32
    %325 = arith.index_cast %c4_i32 : i32 to index
    %c0_139 = arith.constant 0 : index
    %c0_140 = arith.constant 0 : index
    %326 = vector.load %arg1[%325, %c0_139, %c0_140] : memref<8x2x512xf32, #tpu.memory_space<vmem>>, vector<1x2x512xf32>
    %327 = vector.shape_cast %326 : vector<1x2x512xf32> to vector<2x512xf32>
    %c0_141 = arith.constant 0 : index
    %c0_142 = arith.constant 0 : index
    %328 = vector.load %arg7[%c0_141, %c0_142] : memref<2x128xf32, #tpu.memory_space<vmem>>, vector<2x128xf32>
    %329 = arith.truncf %328 : vector<2x128xf32> to vector<2x128xbf16>
    %cst_143 = arith.constant dense<0.000000e+00> : vector<2x512xf32>
    %330 = tpu.matmul %329, %3, %cst_143 {dimension_numbers = #tpu.dot_dimension_numbers<[1], [0], [0], [1], [0, 0, 1, 1], [], []>} : vector<2x128xbf16>, vector<128x512xbf16>, vector<2x512xf32> -> vector<2x512xf32>
    %331 = arith.addf %327, %330 : vector<2x512xf32>
    %c7_i32_144 = arith.constant 7 : i32
    %332 = arith.subi %c7_i32_144, %c4_i32 : i32
    %333 = arith.index_cast %332 : i32 to index
    %c0_145 = arith.constant 0 : index
    %c0_146 = arith.constant 0 : index
    %334 = vector.load %arg2[%333, %c0_145, %c0_146] : memref<8x2x512xf32, #tpu.memory_space<vmem>>, vector<1x2x512xf32>
    %335 = vector.shape_cast %334 : vector<1x2x512xf32> to vector<2x512xf32>
    %c0_147 = arith.constant 0 : index
    %c0_148 = arith.constant 0 : index
    %336 = vector.load %arg9[%c0_147, %c0_148] : memref<2x128xf32, #tpu.memory_space<vmem>>, vector<2x128xf32>
    %337 = arith.truncf %336 : vector<2x128xf32> to vector<2x128xbf16>
    %cst_149 = arith.constant dense<0.000000e+00> : vector<2x512xf32>
    %338 = tpu.matmul %337, %4, %cst_149 {dimension_numbers = #tpu.dot_dimension_numbers<[1], [0], [0], [1], [0, 0, 1, 1], [], []>} : vector<2x128xbf16>, vector<128x512xbf16>, vector<2x512xf32> -> vector<2x512xf32>
    %339 = arith.addf %335, %338 : vector<2x512xf32>
    %c0_150 = arith.constant 0 : index
    %c0_151 = arith.constant 0 : index
    %340 = vector.load %arg8[%c0_150, %c0_151] : memref<2x128xf32, #tpu.memory_space<vmem>>, vector<2x128xf32>
    %341 = vector.extract_strided_slice %331 {offsets = [0, 0], sizes = [2, 128], strides = [1, 1]} : vector<2x512xf32> to vector<2x128xf32>
    %342 = arith.negf %341 : vector<2x128xf32>
    %343 = math.exp %342 : vector<2x128xf32>
    %cst_152 = arith.constant 1.000000e+00 : f32
    %344 = vector.broadcast %cst_152 : f32 to vector<2x128xf32>
    %345 = arith.addf %344, %343 : vector<2x128xf32>
    %346 = arith.divf %344, %345 : vector<2x128xf32>
    %347 = vector.extract_strided_slice %331 {offsets = [0, 128], sizes = [2, 128], strides = [1, 1]} : vector<2x512xf32> to vector<2x128xf32>
    %348 = arith.negf %347 : vector<2x128xf32>
    %349 = math.exp %348 : vector<2x128xf32>
    %cst_153 = arith.constant 1.000000e+00 : f32
    %350 = vector.broadcast %cst_153 : f32 to vector<2x128xf32>
    %351 = arith.addf %350, %349 : vector<2x128xf32>
    %352 = arith.divf %350, %351 : vector<2x128xf32>
    %353 = vector.extract_strided_slice %331 {offsets = [0, 256], sizes = [2, 128], strides = [1, 1]} : vector<2x512xf32> to vector<2x128xf32>
    %354 = math.tanh %353 : vector<2x128xf32>
    %355 = vector.extract_strided_slice %331 {offsets = [0, 384], sizes = [2, 128], strides = [1, 1]} : vector<2x512xf32> to vector<2x128xf32>
    %356 = arith.negf %355 : vector<2x128xf32>
    %357 = math.exp %356 : vector<2x128xf32>
    %cst_154 = arith.constant 1.000000e+00 : f32
    %358 = vector.broadcast %cst_154 : f32 to vector<2x128xf32>
    %359 = arith.addf %358, %357 : vector<2x128xf32>
    %360 = arith.divf %358, %359 : vector<2x128xf32>
    %361 = arith.mulf %352, %340 : vector<2x128xf32>
    %362 = arith.mulf %346, %354 : vector<2x128xf32>
    %363 = arith.addf %361, %362 : vector<2x128xf32>
    %364 = math.tanh %363 : vector<2x128xf32>
    %365 = arith.mulf %360, %364 : vector<2x128xf32>
    %c0_155 = arith.constant 0 : index
    %c0_156 = arith.constant 0 : index
    %366 = vector.load %arg10[%c0_155, %c0_156] : memref<2x128xf32, #tpu.memory_space<vmem>>, vector<2x128xf32>
    %367 = vector.extract_strided_slice %339 {offsets = [0, 0], sizes = [2, 128], strides = [1, 1]} : vector<2x512xf32> to vector<2x128xf32>
    %368 = arith.negf %367 : vector<2x128xf32>
    %369 = math.exp %368 : vector<2x128xf32>
    %cst_157 = arith.constant 1.000000e+00 : f32
    %370 = vector.broadcast %cst_157 : f32 to vector<2x128xf32>
    %371 = arith.addf %370, %369 : vector<2x128xf32>
    %372 = arith.divf %370, %371 : vector<2x128xf32>
    %373 = vector.extract_strided_slice %339 {offsets = [0, 128], sizes = [2, 128], strides = [1, 1]} : vector<2x512xf32> to vector<2x128xf32>
    %374 = arith.negf %373 : vector<2x128xf32>
    %375 = math.exp %374 : vector<2x128xf32>
    %cst_158 = arith.constant 1.000000e+00 : f32
    %376 = vector.broadcast %cst_158 : f32 to vector<2x128xf32>
    %377 = arith.addf %376, %375 : vector<2x128xf32>
    %378 = arith.divf %376, %377 : vector<2x128xf32>
    %379 = vector.extract_strided_slice %339 {offsets = [0, 256], sizes = [2, 128], strides = [1, 1]} : vector<2x512xf32> to vector<2x128xf32>
    %380 = math.tanh %379 : vector<2x128xf32>
    %381 = vector.extract_strided_slice %339 {offsets = [0, 384], sizes = [2, 128], strides = [1, 1]} : vector<2x512xf32> to vector<2x128xf32>
    %382 = arith.negf %381 : vector<2x128xf32>
    %383 = math.exp %382 : vector<2x128xf32>
    %cst_159 = arith.constant 1.000000e+00 : f32
    %384 = vector.broadcast %cst_159 : f32 to vector<2x128xf32>
    %385 = arith.addf %384, %383 : vector<2x128xf32>
    %386 = arith.divf %384, %385 : vector<2x128xf32>
    %387 = arith.mulf %378, %366 : vector<2x128xf32>
    %388 = arith.mulf %372, %380 : vector<2x128xf32>
    %389 = arith.addf %387, %388 : vector<2x128xf32>
    %390 = math.tanh %389 : vector<2x128xf32>
    %391 = arith.mulf %386, %390 : vector<2x128xf32>
    %c0_160 = arith.constant 0 : index
    %c0_161 = arith.constant 0 : index
    %392 = vector.load %arg7[%c0_160, %c0_161] : memref<2x128xf32, #tpu.memory_space<vmem>>, vector<2x128xf32>
    tpu.vector_store %arg7[%c0_160, %c0_161], %365 {strides = array<i32>} : memref<2x128xf32, #tpu.memory_space<vmem>>, vector<2x128xf32>,
    %c0_162 = arith.constant 0 : index
    %c0_163 = arith.constant 0 : index
    %393 = vector.load %arg8[%c0_162, %c0_163] : memref<2x128xf32, #tpu.memory_space<vmem>>, vector<2x128xf32>
    tpu.vector_store %arg8[%c0_162, %c0_163], %363 {strides = array<i32>} : memref<2x128xf32, #tpu.memory_space<vmem>>, vector<2x128xf32>,
    %c0_164 = arith.constant 0 : index
    %c0_165 = arith.constant 0 : index
    %394 = vector.load %arg9[%c0_164, %c0_165] : memref<2x128xf32, #tpu.memory_space<vmem>>, vector<2x128xf32>
    tpu.vector_store %arg9[%c0_164, %c0_165], %391 {strides = array<i32>} : memref<2x128xf32, #tpu.memory_space<vmem>>, vector<2x128xf32>,
    %c0_166 = arith.constant 0 : index
    %c0_167 = arith.constant 0 : index
    %395 = vector.load %arg10[%c0_166, %c0_167] : memref<2x128xf32, #tpu.memory_space<vmem>>, vector<2x128xf32>
    tpu.vector_store %arg10[%c0_166, %c0_167], %389 {strides = array<i32>} : memref<2x128xf32, #tpu.memory_space<vmem>>, vector<2x128xf32>,
    %396 = arith.index_cast %c4_i32 : i32 to index
    %c0_168 = arith.constant 0 : index
    %c0_169 = arith.constant 0 : index
    %397 = vector.load %arg5[%396, %c0_168, %c0_169] : memref<8x2x128xf32, #tpu.memory_space<vmem>>, vector<1x2x128xf32>
    %398 = vector.shape_cast %397 : vector<1x2x128xf32> to vector<2x128xf32>
    %399 = vector.shape_cast %365 : vector<2x128xf32> to vector<1x2x128xf32>
    tpu.vector_store %arg5[%396, %c0_168, %c0_169], %399 {strides = array<i32>} : memref<8x2x128xf32, #tpu.memory_space<vmem>>, vector<1x2x128xf32>,
    %c7_i32_170 = arith.constant 7 : i32
    %400 = arith.subi %c7_i32_170, %c4_i32 : i32
    %401 = arith.index_cast %400 : i32 to index
    %c0_171 = arith.constant 0 : index
    %c0_172 = arith.constant 0 : index
    %402 = vector.load %arg6[%401, %c0_171, %c0_172] : memref<8x2x128xf32, #tpu.memory_space<vmem>>, vector<1x2x128xf32>
    %403 = vector.shape_cast %402 : vector<1x2x128xf32> to vector<2x128xf32>
    %404 = vector.shape_cast %391 : vector<2x128xf32> to vector<1x2x128xf32>
    tpu.vector_store %arg6[%401, %c0_171, %c0_172], %404 {strides = array<i32>} : memref<8x2x128xf32, #tpu.memory_space<vmem>>, vector<1x2x128xf32>,
    %c5_i32 = arith.constant 5 : i32
    %405 = arith.index_cast %c5_i32 : i32 to index
    %c0_173 = arith.constant 0 : index
    %c0_174 = arith.constant 0 : index
    %406 = vector.load %arg1[%405, %c0_173, %c0_174] : memref<8x2x512xf32, #tpu.memory_space<vmem>>, vector<1x2x512xf32>
    %407 = vector.shape_cast %406 : vector<1x2x512xf32> to vector<2x512xf32>
    %c0_175 = arith.constant 0 : index
    %c0_176 = arith.constant 0 : index
    %408 = vector.load %arg7[%c0_175, %c0_176] : memref<2x128xf32, #tpu.memory_space<vmem>>, vector<2x128xf32>
    %409 = arith.truncf %408 : vector<2x128xf32> to vector<2x128xbf16>
    %cst_177 = arith.constant dense<0.000000e+00> : vector<2x512xf32>
    %410 = tpu.matmul %409, %3, %cst_177 {dimension_numbers = #tpu.dot_dimension_numbers<[1], [0], [0], [1], [0, 0, 1, 1], [], []>} : vector<2x128xbf16>, vector<128x512xbf16>, vector<2x512xf32> -> vector<2x512xf32>
    %411 = arith.addf %407, %410 : vector<2x512xf32>
    %c7_i32_178 = arith.constant 7 : i32
    %412 = arith.subi %c7_i32_178, %c5_i32 : i32
    %413 = arith.index_cast %412 : i32 to index
    %c0_179 = arith.constant 0 : index
    %c0_180 = arith.constant 0 : index
    %414 = vector.load %arg2[%413, %c0_179, %c0_180] : memref<8x2x512xf32, #tpu.memory_space<vmem>>, vector<1x2x512xf32>
    %415 = vector.shape_cast %414 : vector<1x2x512xf32> to vector<2x512xf32>
    %c0_181 = arith.constant 0 : index
    %c0_182 = arith.constant 0 : index
    %416 = vector.load %arg9[%c0_181, %c0_182] : memref<2x128xf32, #tpu.memory_space<vmem>>, vector<2x128xf32>
    %417 = arith.truncf %416 : vector<2x128xf32> to vector<2x128xbf16>
    %cst_183 = arith.constant dense<0.000000e+00> : vector<2x512xf32>
    %418 = tpu.matmul %417, %4, %cst_183 {dimension_numbers = #tpu.dot_dimension_numbers<[1], [0], [0], [1], [0, 0, 1, 1], [], []>} : vector<2x128xbf16>, vector<128x512xbf16>, vector<2x512xf32> -> vector<2x512xf32>
    %419 = arith.addf %415, %418 : vector<2x512xf32>
    %c0_184 = arith.constant 0 : index
    %c0_185 = arith.constant 0 : index
    %420 = vector.load %arg8[%c0_184, %c0_185] : memref<2x128xf32, #tpu.memory_space<vmem>>, vector<2x128xf32>
    %421 = vector.extract_strided_slice %411 {offsets = [0, 0], sizes = [2, 128], strides = [1, 1]} : vector<2x512xf32> to vector<2x128xf32>
    %422 = arith.negf %421 : vector<2x128xf32>
    %423 = math.exp %422 : vector<2x128xf32>
    %cst_186 = arith.constant 1.000000e+00 : f32
    %424 = vector.broadcast %cst_186 : f32 to vector<2x128xf32>
    %425 = arith.addf %424, %423 : vector<2x128xf32>
    %426 = arith.divf %424, %425 : vector<2x128xf32>
    %427 = vector.extract_strided_slice %411 {offsets = [0, 128], sizes = [2, 128], strides = [1, 1]} : vector<2x512xf32> to vector<2x128xf32>
    %428 = arith.negf %427 : vector<2x128xf32>
    %429 = math.exp %428 : vector<2x128xf32>
    %cst_187 = arith.constant 1.000000e+00 : f32
    %430 = vector.broadcast %cst_187 : f32 to vector<2x128xf32>
    %431 = arith.addf %430, %429 : vector<2x128xf32>
    %432 = arith.divf %430, %431 : vector<2x128xf32>
    %433 = vector.extract_strided_slice %411 {offsets = [0, 256], sizes = [2, 128], strides = [1, 1]} : vector<2x512xf32> to vector<2x128xf32>
    %434 = math.tanh %433 : vector<2x128xf32>
    %435 = vector.extract_strided_slice %411 {offsets = [0, 384], sizes = [2, 128], strides = [1, 1]} : vector<2x512xf32> to vector<2x128xf32>
    %436 = arith.negf %435 : vector<2x128xf32>
    %437 = math.exp %436 : vector<2x128xf32>
    %cst_188 = arith.constant 1.000000e+00 : f32
    %438 = vector.broadcast %cst_188 : f32 to vector<2x128xf32>
    %439 = arith.addf %438, %437 : vector<2x128xf32>
    %440 = arith.divf %438, %439 : vector<2x128xf32>
    %441 = arith.mulf %432, %420 : vector<2x128xf32>
    %442 = arith.mulf %426, %434 : vector<2x128xf32>
    %443 = arith.addf %441, %442 : vector<2x128xf32>
    %444 = math.tanh %443 : vector<2x128xf32>
    %445 = arith.mulf %440, %444 : vector<2x128xf32>
    %c0_189 = arith.constant 0 : index
    %c0_190 = arith.constant 0 : index
    %446 = vector.load %arg10[%c0_189, %c0_190] : memref<2x128xf32, #tpu.memory_space<vmem>>, vector<2x128xf32>
    %447 = vector.extract_strided_slice %419 {offsets = [0, 0], sizes = [2, 128], strides = [1, 1]} : vector<2x512xf32> to vector<2x128xf32>
    %448 = arith.negf %447 : vector<2x128xf32>
    %449 = math.exp %448 : vector<2x128xf32>
    %cst_191 = arith.constant 1.000000e+00 : f32
    %450 = vector.broadcast %cst_191 : f32 to vector<2x128xf32>
    %451 = arith.addf %450, %449 : vector<2x128xf32>
    %452 = arith.divf %450, %451 : vector<2x128xf32>
    %453 = vector.extract_strided_slice %419 {offsets = [0, 128], sizes = [2, 128], strides = [1, 1]} : vector<2x512xf32> to vector<2x128xf32>
    %454 = arith.negf %453 : vector<2x128xf32>
    %455 = math.exp %454 : vector<2x128xf32>
    %cst_192 = arith.constant 1.000000e+00 : f32
    %456 = vector.broadcast %cst_192 : f32 to vector<2x128xf32>
    %457 = arith.addf %456, %455 : vector<2x128xf32>
    %458 = arith.divf %456, %457 : vector<2x128xf32>
    %459 = vector.extract_strided_slice %419 {offsets = [0, 256], sizes = [2, 128], strides = [1, 1]} : vector<2x512xf32> to vector<2x128xf32>
    %460 = math.tanh %459 : vector<2x128xf32>
    %461 = vector.extract_strided_slice %419 {offsets = [0, 384], sizes = [2, 128], strides = [1, 1]} : vector<2x512xf32> to vector<2x128xf32>
    %462 = arith.negf %461 : vector<2x128xf32>
    %463 = math.exp %462 : vector<2x128xf32>
    %cst_193 = arith.constant 1.000000e+00 : f32
    %464 = vector.broadcast %cst_193 : f32 to vector<2x128xf32>
    %465 = arith.addf %464, %463 : vector<2x128xf32>
    %466 = arith.divf %464, %465 : vector<2x128xf32>
    %467 = arith.mulf %458, %446 : vector<2x128xf32>
    %468 = arith.mulf %452, %460 : vector<2x128xf32>
    %469 = arith.addf %467, %468 : vector<2x128xf32>
    %470 = math.tanh %469 : vector<2x128xf32>
    %471 = arith.mulf %466, %470 : vector<2x128xf32>
    %c0_194 = arith.constant 0 : index
    %c0_195 = arith.constant 0 : index
    %472 = vector.load %arg7[%c0_194, %c0_195] : memref<2x128xf32, #tpu.memory_space<vmem>>, vector<2x128xf32>
    tpu.vector_store %arg7[%c0_194, %c0_195], %445 {strides = array<i32>} : memref<2x128xf32, #tpu.memory_space<vmem>>, vector<2x128xf32>,
    %c0_196 = arith.constant 0 : index
    %c0_197 = arith.constant 0 : index
    %473 = vector.load %arg8[%c0_196, %c0_197] : memref<2x128xf32, #tpu.memory_space<vmem>>, vector<2x128xf32>
    tpu.vector_store %arg8[%c0_196, %c0_197], %443 {strides = array<i32>} : memref<2x128xf32, #tpu.memory_space<vmem>>, vector<2x128xf32>,
    %c0_198 = arith.constant 0 : index
    %c0_199 = arith.constant 0 : index
    %474 = vector.load %arg9[%c0_198, %c0_199] : memref<2x128xf32, #tpu.memory_space<vmem>>, vector<2x128xf32>
    tpu.vector_store %arg9[%c0_198, %c0_199], %471 {strides = array<i32>} : memref<2x128xf32, #tpu.memory_space<vmem>>, vector<2x128xf32>,
    %c0_200 = arith.constant 0 : index
    %c0_201 = arith.constant 0 : index
    %475 = vector.load %arg10[%c0_200, %c0_201] : memref<2x128xf32, #tpu.memory_space<vmem>>, vector<2x128xf32>
    tpu.vector_store %arg10[%c0_200, %c0_201], %469 {strides = array<i32>} : memref<2x128xf32, #tpu.memory_space<vmem>>, vector<2x128xf32>,
    %476 = arith.index_cast %c5_i32 : i32 to index
    %c0_202 = arith.constant 0 : index
    %c0_203 = arith.constant 0 : index
    %477 = vector.load %arg5[%476, %c0_202, %c0_203] : memref<8x2x128xf32, #tpu.memory_space<vmem>>, vector<1x2x128xf32>
    %478 = vector.shape_cast %477 : vector<1x2x128xf32> to vector<2x128xf32>
    %479 = vector.shape_cast %445 : vector<2x128xf32> to vector<1x2x128xf32>
    tpu.vector_store %arg5[%476, %c0_202, %c0_203], %479 {strides = array<i32>} : memref<8x2x128xf32, #tpu.memory_space<vmem>>, vector<1x2x128xf32>,
    %c7_i32_204 = arith.constant 7 : i32
    %480 = arith.subi %c7_i32_204, %c5_i32 : i32
    %481 = arith.index_cast %480 : i32 to index
    %c0_205 = arith.constant 0 : index
    %c0_206 = arith.constant 0 : index
    %482 = vector.load %arg6[%481, %c0_205, %c0_206] : memref<8x2x128xf32, #tpu.memory_space<vmem>>, vector<1x2x128xf32>
    %483 = vector.shape_cast %482 : vector<1x2x128xf32> to vector<2x128xf32>
    %484 = vector.shape_cast %471 : vector<2x128xf32> to vector<1x2x128xf32>
    tpu.vector_store %arg6[%481, %c0_205, %c0_206], %484 {strides = array<i32>} : memref<8x2x128xf32, #tpu.memory_space<vmem>>, vector<1x2x128xf32>,
    %c6_i32 = arith.constant 6 : i32
    %485 = arith.index_cast %c6_i32 : i32 to index
    %c0_207 = arith.constant 0 : index
    %c0_208 = arith.constant 0 : index
    %486 = vector.load %arg1[%485, %c0_207, %c0_208] : memref<8x2x512xf32, #tpu.memory_space<vmem>>, vector<1x2x512xf32>
    %487 = vector.shape_cast %486 : vector<1x2x512xf32> to vector<2x512xf32>
    %c0_209 = arith.constant 0 : index
    %c0_210 = arith.constant 0 : index
    %488 = vector.load %arg7[%c0_209, %c0_210] : memref<2x128xf32, #tpu.memory_space<vmem>>, vector<2x128xf32>
    %489 = arith.truncf %488 : vector<2x128xf32> to vector<2x128xbf16>
    %cst_211 = arith.constant dense<0.000000e+00> : vector<2x512xf32>
    %490 = tpu.matmul %489, %3, %cst_211 {dimension_numbers = #tpu.dot_dimension_numbers<[1], [0], [0], [1], [0, 0, 1, 1], [], []>} : vector<2x128xbf16>, vector<128x512xbf16>, vector<2x512xf32> -> vector<2x512xf32>
    %491 = arith.addf %487, %490 : vector<2x512xf32>
    %c7_i32_212 = arith.constant 7 : i32
    %492 = arith.subi %c7_i32_212, %c6_i32 : i32
    %493 = arith.index_cast %492 : i32 to index
    %c0_213 = arith.constant 0 : index
    %c0_214 = arith.constant 0 : index
    %494 = vector.load %arg2[%493, %c0_213, %c0_214] : memref<8x2x512xf32, #tpu.memory_space<vmem>>, vector<1x2x512xf32>
    %495 = vector.shape_cast %494 : vector<1x2x512xf32> to vector<2x512xf32>
    %c0_215 = arith.constant 0 : index
    %c0_216 = arith.constant 0 : index
    %496 = vector.load %arg9[%c0_215, %c0_216] : memref<2x128xf32, #tpu.memory_space<vmem>>, vector<2x128xf32>
    %497 = arith.truncf %496 : vector<2x128xf32> to vector<2x128xbf16>
    %cst_217 = arith.constant dense<0.000000e+00> : vector<2x512xf32>
    %498 = tpu.matmul %497, %4, %cst_217 {dimension_numbers = #tpu.dot_dimension_numbers<[1], [0], [0], [1], [0, 0, 1, 1], [], []>} : vector<2x128xbf16>, vector<128x512xbf16>, vector<2x512xf32> -> vector<2x512xf32>
    %499 = arith.addf %495, %498 : vector<2x512xf32>
    %c0_218 = arith.constant 0 : index
    %c0_219 = arith.constant 0 : index
    %500 = vector.load %arg8[%c0_218, %c0_219] : memref<2x128xf32, #tpu.memory_space<vmem>>, vector<2x128xf32>
    %501 = vector.extract_strided_slice %491 {offsets = [0, 0], sizes = [2, 128], strides = [1, 1]} : vector<2x512xf32> to vector<2x128xf32>
    %502 = arith.negf %501 : vector<2x128xf32>
    %503 = math.exp %502 : vector<2x128xf32>
    %cst_220 = arith.constant 1.000000e+00 : f32
    %504 = vector.broadcast %cst_220 : f32 to vector<2x128xf32>
    %505 = arith.addf %504, %503 : vector<2x128xf32>
    %506 = arith.divf %504, %505 : vector<2x128xf32>
    %507 = vector.extract_strided_slice %491 {offsets = [0, 128], sizes = [2, 128], strides = [1, 1]} : vector<2x512xf32> to vector<2x128xf32>
    %508 = arith.negf %507 : vector<2x128xf32>
    %509 = math.exp %508 : vector<2x128xf32>
    %cst_221 = arith.constant 1.000000e+00 : f32
    %510 = vector.broadcast %cst_221 : f32 to vector<2x128xf32>
    %511 = arith.addf %510, %509 : vector<2x128xf32>
    %512 = arith.divf %510, %511 : vector<2x128xf32>
    %513 = vector.extract_strided_slice %491 {offsets = [0, 256], sizes = [2, 128], strides = [1, 1]} : vector<2x512xf32> to vector<2x128xf32>
    %514 = math.tanh %513 : vector<2x128xf32>
    %515 = vector.extract_strided_slice %491 {offsets = [0, 384], sizes = [2, 128], strides = [1, 1]} : vector<2x512xf32> to vector<2x128xf32>
    %516 = arith.negf %515 : vector<2x128xf32>
    %517 = math.exp %516 : vector<2x128xf32>
    %cst_222 = arith.constant 1.000000e+00 : f32
    %518 = vector.broadcast %cst_222 : f32 to vector<2x128xf32>
    %519 = arith.addf %518, %517 : vector<2x128xf32>
    %520 = arith.divf %518, %519 : vector<2x128xf32>
    %521 = arith.mulf %512, %500 : vector<2x128xf32>
    %522 = arith.mulf %506, %514 : vector<2x128xf32>
    %523 = arith.addf %521, %522 : vector<2x128xf32>
    %524 = math.tanh %523 : vector<2x128xf32>
    %525 = arith.mulf %520, %524 : vector<2x128xf32>
    %c0_223 = arith.constant 0 : index
    %c0_224 = arith.constant 0 : index
    %526 = vector.load %arg10[%c0_223, %c0_224] : memref<2x128xf32, #tpu.memory_space<vmem>>, vector<2x128xf32>
    %527 = vector.extract_strided_slice %499 {offsets = [0, 0], sizes = [2, 128], strides = [1, 1]} : vector<2x512xf32> to vector<2x128xf32>
    %528 = arith.negf %527 : vector<2x128xf32>
    %529 = math.exp %528 : vector<2x128xf32>
    %cst_225 = arith.constant 1.000000e+00 : f32
    %530 = vector.broadcast %cst_225 : f32 to vector<2x128xf32>
    %531 = arith.addf %530, %529 : vector<2x128xf32>
    %532 = arith.divf %530, %531 : vector<2x128xf32>
    %533 = vector.extract_strided_slice %499 {offsets = [0, 128], sizes = [2, 128], strides = [1, 1]} : vector<2x512xf32> to vector<2x128xf32>
    %534 = arith.negf %533 : vector<2x128xf32>
    %535 = math.exp %534 : vector<2x128xf32>
    %cst_226 = arith.constant 1.000000e+00 : f32
    %536 = vector.broadcast %cst_226 : f32 to vector<2x128xf32>
    %537 = arith.addf %536, %535 : vector<2x128xf32>
    %538 = arith.divf %536, %537 : vector<2x128xf32>
    %539 = vector.extract_strided_slice %499 {offsets = [0, 256], sizes = [2, 128], strides = [1, 1]} : vector<2x512xf32> to vector<2x128xf32>
    %540 = math.tanh %539 : vector<2x128xf32>
    %541 = vector.extract_strided_slice %499 {offsets = [0, 384], sizes = [2, 128], strides = [1, 1]} : vector<2x512xf32> to vector<2x128xf32>
    %542 = arith.negf %541 : vector<2x128xf32>
    %543 = math.exp %542 : vector<2x128xf32>
    %cst_227 = arith.constant 1.000000e+00 : f32
    %544 = vector.broadcast %cst_227 : f32 to vector<2x128xf32>
    %545 = arith.addf %544, %543 : vector<2x128xf32>
    %546 = arith.divf %544, %545 : vector<2x128xf32>
    %547 = arith.mulf %538, %526 : vector<2x128xf32>
    %548 = arith.mulf %532, %540 : vector<2x128xf32>
    %549 = arith.addf %547, %548 : vector<2x128xf32>
    %550 = math.tanh %549 : vector<2x128xf32>
    %551 = arith.mulf %546, %550 : vector<2x128xf32>
    %c0_228 = arith.constant 0 : index
    %c0_229 = arith.constant 0 : index
    %552 = vector.load %arg7[%c0_228, %c0_229] : memref<2x128xf32, #tpu.memory_space<vmem>>, vector<2x128xf32>
    tpu.vector_store %arg7[%c0_228, %c0_229], %525 {strides = array<i32>} : memref<2x128xf32, #tpu.memory_space<vmem>>, vector<2x128xf32>,
    %c0_230 = arith.constant 0 : index
    %c0_231 = arith.constant 0 : index
    %553 = vector.load %arg8[%c0_230, %c0_231] : memref<2x128xf32, #tpu.memory_space<vmem>>, vector<2x128xf32>
    tpu.vector_store %arg8[%c0_230, %c0_231], %523 {strides = array<i32>} : memref<2x128xf32, #tpu.memory_space<vmem>>, vector<2x128xf32>,
    %c0_232 = arith.constant 0 : index
    %c0_233 = arith.constant 0 : index
    %554 = vector.load %arg9[%c0_232, %c0_233] : memref<2x128xf32, #tpu.memory_space<vmem>>, vector<2x128xf32>
    tpu.vector_store %arg9[%c0_232, %c0_233], %551 {strides = array<i32>} : memref<2x128xf32, #tpu.memory_space<vmem>>, vector<2x128xf32>,
    %c0_234 = arith.constant 0 : index
    %c0_235 = arith.constant 0 : index
    %555 = vector.load %arg10[%c0_234, %c0_235] : memref<2x128xf32, #tpu.memory_space<vmem>>, vector<2x128xf32>
    tpu.vector_store %arg10[%c0_234, %c0_235], %549 {strides = array<i32>} : memref<2x128xf32, #tpu.memory_space<vmem>>, vector<2x128xf32>,
    %556 = arith.index_cast %c6_i32 : i32 to index
    %c0_236 = arith.constant 0 : index
    %c0_237 = arith.constant 0 : index
    %557 = vector.load %arg5[%556, %c0_236, %c0_237] : memref<8x2x128xf32, #tpu.memory_space<vmem>>, vector<1x2x128xf32>
    %558 = vector.shape_cast %557 : vector<1x2x128xf32> to vector<2x128xf32>
    %559 = vector.shape_cast %525 : vector<2x128xf32> to vector<1x2x128xf32>
    tpu.vector_store %arg5[%556, %c0_236, %c0_237], %559 {strides = array<i32>} : memref<8x2x128xf32, #tpu.memory_space<vmem>>, vector<1x2x128xf32>,
    %c7_i32_238 = arith.constant 7 : i32
    %560 = arith.subi %c7_i32_238, %c6_i32 : i32
    %561 = arith.index_cast %560 : i32 to index
    %c0_239 = arith.constant 0 : index
    %c0_240 = arith.constant 0 : index
    %562 = vector.load %arg6[%561, %c0_239, %c0_240] : memref<8x2x128xf32, #tpu.memory_space<vmem>>, vector<1x2x128xf32>
    %563 = vector.shape_cast %562 : vector<1x2x128xf32> to vector<2x128xf32>
    %564 = vector.shape_cast %551 : vector<2x128xf32> to vector<1x2x128xf32>
    tpu.vector_store %arg6[%561, %c0_239, %c0_240], %564 {strides = array<i32>} : memref<8x2x128xf32, #tpu.memory_space<vmem>>, vector<1x2x128xf32>,
    %c7_i32_241 = arith.constant 7 : i32
    %565 = arith.index_cast %c7_i32_241 : i32 to index
    %c0_242 = arith.constant 0 : index
    %c0_243 = arith.constant 0 : index
    %566 = vector.load %arg1[%565, %c0_242, %c0_243] : memref<8x2x512xf32, #tpu.memory_space<vmem>>, vector<1x2x512xf32>
    %567 = vector.shape_cast %566 : vector<1x2x512xf32> to vector<2x512xf32>
    %c0_244 = arith.constant 0 : index
    %c0_245 = arith.constant 0 : index
    %568 = vector.load %arg7[%c0_244, %c0_245] : memref<2x128xf32, #tpu.memory_space<vmem>>, vector<2x128xf32>
    %569 = arith.truncf %568 : vector<2x128xf32> to vector<2x128xbf16>
    %cst_246 = arith.constant dense<0.000000e+00> : vector<2x512xf32>
    %570 = tpu.matmul %569, %3, %cst_246 {dimension_numbers = #tpu.dot_dimension_numbers<[1], [0], [0], [1], [0, 0, 1, 1], [], []>} : vector<2x128xbf16>, vector<128x512xbf16>, vector<2x512xf32> -> vector<2x512xf32>
    %571 = arith.addf %567, %570 : vector<2x512xf32>
    %c7_i32_247 = arith.constant 7 : i32
    %572 = arith.subi %c7_i32_247, %c7_i32_241 : i32
    %573 = arith.index_cast %572 : i32 to index
    %c0_248 = arith.constant 0 : index
    %c0_249 = arith.constant 0 : index
    %574 = vector.load %arg2[%573, %c0_248, %c0_249] : memref<8x2x512xf32, #tpu.memory_space<vmem>>, vector<1x2x512xf32>
    %575 = vector.shape_cast %574 : vector<1x2x512xf32> to vector<2x512xf32>
    %c0_250 = arith.constant 0 : index
    %c0_251 = arith.constant 0 : index
    %576 = vector.load %arg9[%c0_250, %c0_251] : memref<2x128xf32, #tpu.memory_space<vmem>>, vector<2x128xf32>
    %577 = arith.truncf %576 : vector<2x128xf32> to vector<2x128xbf16>
    %cst_252 = arith.constant dense<0.000000e+00> : vector<2x512xf32>
    %578 = tpu.matmul %577, %4, %cst_252 {dimension_numbers = #tpu.dot_dimension_numbers<[1], [0], [0], [1], [0, 0, 1, 1], [], []>} : vector<2x128xbf16>, vector<128x512xbf16>, vector<2x512xf32> -> vector<2x512xf32>
    %579 = arith.addf %575, %578 : vector<2x512xf32>
    %c0_253 = arith.constant 0 : index
    %c0_254 = arith.constant 0 : index
    %580 = vector.load %arg8[%c0_253, %c0_254] : memref<2x128xf32, #tpu.memory_space<vmem>>, vector<2x128xf32>
    %581 = vector.extract_strided_slice %571 {offsets = [0, 0], sizes = [2, 128], strides = [1, 1]} : vector<2x512xf32> to vector<2x128xf32>
    %582 = arith.negf %581 : vector<2x128xf32>
    %583 = math.exp %582 : vector<2x128xf32>
    %cst_255 = arith.constant 1.000000e+00 : f32
    %584 = vector.broadcast %cst_255 : f32 to vector<2x128xf32>
    %585 = arith.addf %584, %583 : vector<2x128xf32>
    %586 = arith.divf %584, %585 : vector<2x128xf32>
    %587 = vector.extract_strided_slice %571 {offsets = [0, 128], sizes = [2, 128], strides = [1, 1]} : vector<2x512xf32> to vector<2x128xf32>
    %588 = arith.negf %587 : vector<2x128xf32>
    %589 = math.exp %588 : vector<2x128xf32>
    %cst_256 = arith.constant 1.000000e+00 : f32
    %590 = vector.broadcast %cst_256 : f32 to vector<2x128xf32>
    %591 = arith.addf %590, %589 : vector<2x128xf32>
    %592 = arith.divf %590, %591 : vector<2x128xf32>
    %593 = vector.extract_strided_slice %571 {offsets = [0, 256], sizes = [2, 128], strides = [1, 1]} : vector<2x512xf32> to vector<2x128xf32>
    %594 = math.tanh %593 : vector<2x128xf32>
    %595 = vector.extract_strided_slice %571 {offsets = [0, 384], sizes = [2, 128], strides = [1, 1]} : vector<2x512xf32> to vector<2x128xf32>
    %596 = arith.negf %595 : vector<2x128xf32>
    %597 = math.exp %596 : vector<2x128xf32>
    %cst_257 = arith.constant 1.000000e+00 : f32
    %598 = vector.broadcast %cst_257 : f32 to vector<2x128xf32>
    %599 = arith.addf %598, %597 : vector<2x128xf32>
    %600 = arith.divf %598, %599 : vector<2x128xf32>
    %601 = arith.mulf %592, %580 : vector<2x128xf32>
    %602 = arith.mulf %586, %594 : vector<2x128xf32>
    %603 = arith.addf %601, %602 : vector<2x128xf32>
    %604 = math.tanh %603 : vector<2x128xf32>
    %605 = arith.mulf %600, %604 : vector<2x128xf32>
    %c0_258 = arith.constant 0 : index
    %c0_259 = arith.constant 0 : index
    %606 = vector.load %arg10[%c0_258, %c0_259] : memref<2x128xf32, #tpu.memory_space<vmem>>, vector<2x128xf32>
    %607 = vector.extract_strided_slice %579 {offsets = [0, 0], sizes = [2, 128], strides = [1, 1]} : vector<2x512xf32> to vector<2x128xf32>
    %608 = arith.negf %607 : vector<2x128xf32>
    %609 = math.exp %608 : vector<2x128xf32>
    %cst_260 = arith.constant 1.000000e+00 : f32
    %610 = vector.broadcast %cst_260 : f32 to vector<2x128xf32>
    %611 = arith.addf %610, %609 : vector<2x128xf32>
    %612 = arith.divf %610, %611 : vector<2x128xf32>
    %613 = vector.extract_strided_slice %579 {offsets = [0, 128], sizes = [2, 128], strides = [1, 1]} : vector<2x512xf32> to vector<2x128xf32>
    %614 = arith.negf %613 : vector<2x128xf32>
    %615 = math.exp %614 : vector<2x128xf32>
    %cst_261 = arith.constant 1.000000e+00 : f32
    %616 = vector.broadcast %cst_261 : f32 to vector<2x128xf32>
    %617 = arith.addf %616, %615 : vector<2x128xf32>
    %618 = arith.divf %616, %617 : vector<2x128xf32>
    %619 = vector.extract_strided_slice %579 {offsets = [0, 256], sizes = [2, 128], strides = [1, 1]} : vector<2x512xf32> to vector<2x128xf32>
    %620 = math.tanh %619 : vector<2x128xf32>
    %621 = vector.extract_strided_slice %579 {offsets = [0, 384], sizes = [2, 128], strides = [1, 1]} : vector<2x512xf32> to vector<2x128xf32>
    %622 = arith.negf %621 : vector<2x128xf32>
    %623 = math.exp %622 : vector<2x128xf32>
    %cst_262 = arith.constant 1.000000e+00 : f32
    %624 = vector.broadcast %cst_262 : f32 to vector<2x128xf32>
    %625 = arith.addf %624, %623 : vector<2x128xf32>
    %626 = arith.divf %624, %625 : vector<2x128xf32>
    %627 = arith.mulf %618, %606 : vector<2x128xf32>
    %628 = arith.mulf %612, %620 : vector<2x128xf32>
    %629 = arith.addf %627, %628 : vector<2x128xf32>
    %630 = math.tanh %629 : vector<2x128xf32>
    %631 = arith.mulf %626, %630 : vector<2x128xf32>
    %c0_263 = arith.constant 0 : index
    %c0_264 = arith.constant 0 : index
    %632 = vector.load %arg7[%c0_263, %c0_264] : memref<2x128xf32, #tpu.memory_space<vmem>>, vector<2x128xf32>
    tpu.vector_store %arg7[%c0_263, %c0_264], %605 {strides = array<i32>} : memref<2x128xf32, #tpu.memory_space<vmem>>, vector<2x128xf32>,
    %c0_265 = arith.constant 0 : index
    %c0_266 = arith.constant 0 : index
    %633 = vector.load %arg8[%c0_265, %c0_266] : memref<2x128xf32, #tpu.memory_space<vmem>>, vector<2x128xf32>
    tpu.vector_store %arg8[%c0_265, %c0_266], %603 {strides = array<i32>} : memref<2x128xf32, #tpu.memory_space<vmem>>, vector<2x128xf32>,
    %c0_267 = arith.constant 0 : index
    %c0_268 = arith.constant 0 : index
    %634 = vector.load %arg9[%c0_267, %c0_268] : memref<2x128xf32, #tpu.memory_space<vmem>>, vector<2x128xf32>
    tpu.vector_store %arg9[%c0_267, %c0_268], %631 {strides = array<i32>} : memref<2x128xf32, #tpu.memory_space<vmem>>, vector<2x128xf32>,
    %c0_269 = arith.constant 0 : index
    %c0_270 = arith.constant 0 : index
    %635 = vector.load %arg10[%c0_269, %c0_270] : memref<2x128xf32, #tpu.memory_space<vmem>>, vector<2x128xf32>
    tpu.vector_store %arg10[%c0_269, %c0_270], %629 {strides = array<i32>} : memref<2x128xf32, #tpu.memory_space<vmem>>, vector<2x128xf32>,
    %636 = arith.index_cast %c7_i32_241 : i32 to index
    %c0_271 = arith.constant 0 : index
    %c0_272 = arith.constant 0 : index
    %637 = vector.load %arg5[%636, %c0_271, %c0_272] : memref<8x2x128xf32, #tpu.memory_space<vmem>>, vector<1x2x128xf32>
    %638 = vector.shape_cast %637 : vector<1x2x128xf32> to vector<2x128xf32>
    %639 = vector.shape_cast %605 : vector<2x128xf32> to vector<1x2x128xf32>
    tpu.vector_store %arg5[%636, %c0_271, %c0_272], %639 {strides = array<i32>} : memref<8x2x128xf32, #tpu.memory_space<vmem>>, vector<1x2x128xf32>,
    %c7_i32_273 = arith.constant 7 : i32
    %640 = arith.subi %c7_i32_273, %c7_i32_241 : i32
    %641 = arith.index_cast %640 : i32 to index
    %c0_274 = arith.constant 0 : index
    %c0_275 = arith.constant 0 : index
    %642 = vector.load %arg6[%641, %c0_274, %c0_275] : memref<8x2x128xf32, #tpu.memory_space<vmem>>, vector<1x2x128xf32>
    %643 = vector.shape_cast %642 : vector<1x2x128xf32> to vector<2x128xf32>
    %644 = vector.shape_cast %631 : vector<2x128xf32> to vector<1x2x128xf32>
    tpu.vector_store %arg6[%641, %c0_274, %c0_275], %644 {strides = array<i32>} : memref<8x2x128xf32, #tpu.memory_space<vmem>>, vector<1x2x128xf32>,
    %c8_i32 = arith.constant 8 : i32
    return
  }
  func.func @transform_0(%arg0: i32) -> (i32, i32, i32) {
    %c0_i32 = arith.constant 0 : i32
    %c0_i32_0 = arith.constant 0 : i32
    %c0_i32_1 = arith.constant 0 : i32
    return %arg0, %c0_i32, %c0_i32_0 : i32, i32, i32
  }
  func.func @transform_1(%arg0: i32) -> (i32, i32, i32) {
    %c0_i32 = arith.constant 0 : i32
    %0 = arith.subi %c0_i32, %arg0 : i32
    %c0_i32_0 = arith.constant 0 : i32
    %c0_i32_1 = arith.constant 0 : i32
    %c0_i32_2 = arith.constant 0 : i32
    return %0, %c0_i32_0, %c0_i32_1 : i32, i32, i32
  }
  func.func @transform_2(%arg0: i32) -> (i32, i32) {
    %c0_i32 = arith.constant 0 : i32
    %c0_i32_0 = arith.constant 0 : i32
    %c0_i32_1 = arith.constant 0 : i32
    return %c0_i32, %c0_i32_0 : i32, i32
  }
  func.func @transform_3(%arg0: i32) -> (i32, i32) {
    %c0_i32 = arith.constant 0 : i32
    %c0_i32_0 = arith.constant 0 : i32
    %c0_i32_1 = arith.constant 0 : i32
    return %c0_i32, %c0_i32_0 : i32, i32
  }
  func.func @transform_4(%arg0: i32) -> (i32, i32, i32) {
    %c0_i32 = arith.constant 0 : i32
    %c0_i32_0 = arith.constant 0 : i32
    %c0_i32_1 = arith.constant 0 : i32
    return %arg0, %c0_i32, %c0_i32_0 : i32, i32, i32
  }
  func.func @transform_5(%arg0: i32) -> (i32, i32, i32) {
    %c0_i32 = arith.constant 0 : i32
    %0 = arith.subi %c0_i32, %arg0 : i32
    %c0_i32_0 = arith.constant 0 : i32
    %c0_i32_1 = arith.constant 0 : i32
    %c0_i32_2 = arith.constant 0 : i32
    return %0, %c0_i32_0, %c0_i32_1 : i32, i32, i32
  }
}

</mosaic_0001>

<bundles_post_ra>
// kernel: tpu_custom_call.1
= control target key start
LH: loop header
LB: loop body
LE: loop exit
PB: predicated region body
PF: predicated region fallthrough
CT: control target
= control target key end

     0   :  { %6 = vsyncpa [#allocation3], 0  ;;  %s482_s0 = inlined_call_operand.hbm [shape: f32[8,128], index: 0, kind: input, shape index: {}]   ;;  %s483_s1 = inlined_call_operand.hbm [shape: f32[16,128], index: 1, kind: output, shape index: {}]  }
   0x1   :  { %7 = vsyncpa [#allocation4], 0 }
   0x2   :  { %9 = vsyncpa [#allocation4 + $0x1], 0  ;;  %s352_s6 = smov 0   ;;  %s354_s7 = smov 0  }
   0x3   :  { %s356_s8 = smov 0   ;;  %s358_s9 = smov 0  }
   0x4 LB: > { %s373_s10 = sadd.s32 4294967295, %s338_s9   ;;  %s184_s11 = sadd.s32 4294967294, %s338_s9   ;;  %s338_s9 = sphi %s358_s9, %s499_s9   ;;  %s334_s8 = sphi %s356_s8, %s498_s8   ;;  %s330_s7 = sphi %s354_s7, %s497_s7   ;;  %s326_s6 = sphi %s352_s6, %s496_s6  }
   0x5   : > { %s377_s12 = sadd.s32 1, %s338_s9   ;;  %s43_s13 = sadd.s32 1, %s334_s8 }
   0x6   : > { %s40_s14 = ssub.s32 %s338_s9, %s377_s12  ;;  %p53_p0 = scmp.ne.s32.totalorder %s334_s8, %s330_s7 }
   0x7   : > { %p41_p1 = scmp.eq.s32.totalorder %s40_s14, 0  ;;  %p54_p2 = scmp.eq.s32.totalorder %s373_s10, 1 }
   0x8   : > { %p59_p3 = scmp.ne.s32.totalorder %s330_s7, %s326_s6  ;;  %p60_p4 = scmp.eq.s32.totalorder %s184_s11, 1 }
   0x9   : > { %s388_s15 = scalar_select %p41_p1, %s334_s8, %s43_s13  }
   0xa   : > { %p390_p5 = por %p54_p2, %p53_p0  ;;  %p394_p6 = por %p60_p4, %p59_p3 }
   0xb   : > { %p185_p7 = scmp.ge.s32.totalorder %s338_s9, 1  ;;  %p67_p8 = scmp.lt.s32.totalorder %s338_s9, 3 }
   0xc   : > { %s487_s16 = scalar_select %p390_p5, 1, 0 }
   0xd   : > { %s488_s17 = scalar_select %p394_p6, 1, 0 }
   0xe   : > { %p484_p9 = scmp.eq.s32.totalorder %s373_s10, 0  ;;  %p401_p10 = pnand %p185_p7, %p67_p8 }
   0xf   : > { %s340_s19 = smov [#allocation2]   ;;  %s244_s24 = scalar_lea.hbm %s482_s0, 128 }
  0x10   : > { %s489_s18 = scalar_select %p401_p10, 1, 0 }
  0x11   : > { %s80_s20 = sshll.u32 %s340_s19, 4  ;;  %p200_p11 = pneg %p401_p10  ;;  %s81_s20 = int_to_ptr.vmem [resolvable:$true] %s80_s20 }
  0x12   : > { %p245_p13 = scmp.ne.s32.totalorder %s482_s0, %s244_s24  ;;  %p251_p3 = scmp.lt.u32.totalorder %s244_s24, %s482_s0 }
  0x13   : > { %p409_p12 = pnand %p484_p9, %p200_p11 }
  0x15   : > { %p246_p0 = pneg %p409_p12 }
  0x17   : > { %p247_p1 = pnand %p246_p0, %p245_p13 }
  0x19   : > { %p248_p2 = pneg %p247_p1 }
  0x1b   : > { %p253_p4 = pnand %p251_p3, %p248_p2 }
  0x1d   : > { %256 = shalt.err (!%p253_p4)
}
  0x1e   : > { %s257_s29 = scalar_lea.vmem %s81_s20, 128  ;;  %p265_p9 = scmp.lt.s32.totalorder %s81_s20, %s81_s20 }
  0x1f   : > { %p258_p7 = scmp.ne.s32.totalorder %s81_s20, %s257_s29  ;;  %p266_p6 = scmp.lt.s32.totalorder %s257_s29, %s257_s29 }
  0x21   : > { %p260_p8 = pnand %p258_p7, %p246_p0  ;;  %p267_p5 = por %p266_p6, %p265_p9 }
  0x23   : > { %p261_p11 = pneg %p260_p8 }
  0x25   : > { %p268_p10 = pnand %p267_p5, %p261_p11 }
  0x27   : > { %271 = shalt.err (!%p268_p10)
}
  0x28   : > { %203 = dma.hbm_to_vmem [thread:$0]  (!%p409_p12), %s482_s0, 128, %s81_s20, [#allocation3]  }
  0x29   : > { %p491_p13 = scmp.ne.s32.totalorder %s489_s18, 0 }
  0x2a   : > { %p492_p1 = scmp.eq.s32.totalorder (!%p491_p13), %s373_s10, 0 }
  0x2b   : > { %93 = sbr.rel (%p491_p13) target bundleno = 77 (0x4d), region = 24 }
  0x32   : > { %317 = dma.done.wait (%p492_p1), [#allocation3], 128   ;;  %p493_p0 = pmov %p492_p1 }
  0x33   : > { %s105_s3 = sand.u32 1, %s330_s7   ;;  %s191_s13 = sshll.u32 %s373_s10, 7  ;;  %v108_v0 = vld [vmem:[#allocation2] sm:$0xff] }
  0x34   : > { %319 = vsyncadd (%p493_p0), [#allocation3], 4294967168  ;;  %s189_s4 = sshll.u32 %s105_s3, 3  ;;  %v109_v1 = vadd.f32 1.0, %v108_v0  ;;  %s442_s19 = scalar_lea.hbm %s483_s1, %s191_s13 }
  0x35   : > { %s107_s5 = scalar_lea.vmem [#allocation5], %s189_s4  ;;  %s112_s20 = scalar_lea.sflag [#allocation4], %s105_s3 }
  0x36   : > { %s125_s11 = sshll.u32 %s107_s5, 4  ;;  %110 = vst [vmem:[%s107_s5] sm:$0xff] %v109_v1  ;;  %p494_p6 = scmp.ne.s32.totalorder %s487_s16, 0  ;;  %s437_s11 = int_to_ptr.vmem [resolvable:$true] %s125_s11 }
  0x37   : > { %s272_s21 = scalar_lea.vmem %s437_s11, 128  ;;  %s341_s10 = smov [#allocation5]  }
  0x38   : > { %p273_p5 = scmp.ne.s32.totalorder %s437_s11, %s272_s21  ;;  %s276_s22 = sshll.u32 %s341_s10, 4  ;;  %s277_s22 = int_to_ptr.vmem [resolvable:$false] %s276_s22 }
  0x39   : > { %s278_s23 = scalar_lea.vmem %s277_s22, 256  ;;  %p279_p12 = scmp.lt.s32.totalorder %s437_s11, %s277_s22 }
  0x3a   : > { %p274_p9 = pnand %p273_p5, %p494_p6  ;;  %p280_p2 = scmp.lt.s32.totalorder %s278_s23, %s272_s21 }
  0x3c   : > { %p275_p10 = pneg %p274_p9  ;;  %p281_p3 = por %p280_p2, %p279_p12 }
  0x3e   : > { %p282_p4 = pnand %p281_p3, %p275_p10 }
  0x40   : > { %285 = shalt.err (!%p282_p4)
}
  0x41   : > { %s286_s24 = scalar_lea.hbm %s442_s19, 128  ;;  %s290_s27 = scalar_lea.hbm %s483_s1, 256 }
  0x42   : > { %p287_p7 = scmp.ne.s32.totalorder %s442_s19, %s286_s24  ;;  %p291_p13 = scmp.lt.u32.totalorder %s442_s19, %s483_s1 }
  0x43   : > { %p292_p1 = scmp.lt.u32.totalorder %s290_s27, %s286_s24  ;;  %p294_p5 = scmp.lt.u32.totalorder %s286_s24, %s442_s19 }
  0x44   : > { %p288_p8 = pnand %p287_p7, %p494_p6 }
  0x45   : > { %p293_p0 = por %p292_p1, %p291_p13 }
  0x46   : > { %p289_p11 = pneg %p288_p8 }
  0x47   : > { %p295_p9 = por %p294_p5, %p293_p0 }
  0x49   : > { %p296_p10 = pnand %p295_p9, %p289_p11 }
  0x4b   : > { %299 = shalt.err (!%p296_p10)
}
  0x4c   : > { %198 = dma.vmem_to_hbm [thread:$0]  (%p494_p6), %s437_s11, 128, %s442_s19, %s112_s20  }
  0x4d PF: > { %p210_p12 = scmp.ge.s32.totalorder %s338_s9, 2  ;;  %s137_s30 = sand.u32 1, %s326_s6  }
  0x4e   : > { %p495_p2 = scmp.ne.s32.totalorder %s488_s17, 0  ;;  %s138_s2 = scalar_lea.sflag [#allocation4], %s137_s30 }
  0x50   : > { %p205_p3 = pnand %p210_p12, %p495_p2 }
  0x52   : > { %321 = dma.done.wait (!%p205_p3), %s138_s2, 128  }
  0x53   : > { %323 = vsyncadd (!%p205_p3), %s138_s2, 4294967168  ;;  %p12_p4 = scmp.ge.s32.totalorder %s377_s12, 4   ;;  %s496_s6 = smov %s330_s7 }
  0x54   : > { %s497_s7 = smov %s334_s8  ;;  %s498_s8 = smov %s388_s15 }
  0x55   : > { %s499_s9 = smov %s377_s12  ;;  %14 = sbr.rel (!%p12_p4) target bundleno = 4 (0x4), region = 61 }
  0x5c   :  { %143 = vsyncpa [#allocation3], 1 }
  0x5d   :  { %145 = vsyncpa [#allocation3 + $0x1], 1 }
  0x5e   :  { %146 = vsyncpa [#allocation4], 1 }
  0x5f   :  { %148 = vsyncpa [#allocation4 + $0x1], 1 }

// kernel: fgn_forward.2
= control target key start
LH: loop header
LB: loop body
LE: loop exit
PB: predicated region body
PF: predicated region fallthrough
CT: control target
= control target key end

     0   :  { %vm77_vm0 = vcmask 1043456   ;;  %v4042_v1 = vmov 0   ;;  %vm64_vm1 = vcmask 64512   ;;  %vm339_vm2 = vcmask 523264   ;;  %s5857_s2 = inlined_call_operand.vmem [shape: bf16[8,512], index: 2, kind: input, shape index: {}]   ;;  %s5858_s0 = inlined_call_operand.vmem [shape: bf16[64,8], index: 0, kind: input, shape index: {}]   ;;  %s5859_s3 = inlined_call_operand.vmem [shape: bf16[64,512], index: 3, kind: input, shape index: {}]   ;;  %s5860_s1 = inlined_call_operand.vmem [shape: bf16[16,64], index: 1, kind: input, shape index: {}]   ;;  %s5861_s4 = inlined_call_operand.vmem [shape: bf16[512,1024], index: 4, kind: input, shape index: {}]   ;;  %s5862_s5 = inlined_call_operand.vmem [shape: f32[1,1024], index: 5, kind: input, shape index: {}]   ;;  %s5863_s6 = inlined_call_operand.vmem [shape: f32[16,16], index: 6, kind: output, shape index: {}]  }
   0x1   :  { %v32_v0 = vld [vmem:[%s5857_s2] sm:$0xff]  ;;  %122 = vmatprep.mubr.bf16.mxu0 %v4042_v1  ;;  %195 = vmatprep.mubr.bf16.mxu1 %v4042_v1  ;;  %v33_v11 = vld [vmem:[%s5857_s2 + $0x8] sm:$0xff]  ;;  %v3763_v26 = vld [vmem:[%s5858_s0 + $0x10] sm:$0xff]   ;;  %vm2979_vm3 = vcmask 7168   ;;  %vm3002_vm4 = vcmask 15368   ;;  %vm3025_vm5 = vcmask 23568  }
   0x2   :  { %v3336_v2 = vcombine.high %v32_v0, %v32_v0  ;;  %v3335_v3 = vcombine.low %v32_v0, %v32_v0  ;;  %v3758_v4 = vld [vmem:[%s5859_s3 + $0x4] ss:$16 sps:$4 sm:$0xff]   ;;  %v3756_v7 = vld [vmem:[%s5859_s3] ss:$16 sps:$4 sm:$0xff]   ;;  %v3759_v12 = vld [vmem:[%s5858_s0 + $0x8] sm:$0xff]   ;;  %v3338_v13 = vcombine.high %v33_v11, %v33_v11  ;;  %v3337_v14 = vcombine.low %v33_v11, %v33_v11 }
   0x3   :  { %v3755_v6 = vld [vmem:[%s5858_s0] sm:$0xff]   ;;  %v3776_v17 = vld [vmem:[%s5859_s3 + $0xc] ss:$16 sps:$4 sm:$0xff]   ;;  %v3774_v19 = vld [vmem:[%s5859_s3 + $0x8] ss:$16 sps:$4 sm:$0xff]   ;;  %vm3048_vm6 = vcmask 31768  }
   0x4   :  { %3339 = vmatprep.subr.msk.bf16.mxu0 %vm77_vm0, %v3336_v2  ;;  %v79_v5 = vsel %vm77_vm0, %v3335_v3, 0  ;;  %v3762_v8 = vld [vmem:[%s5859_s3 + $0x24] ss:$16 sps:$4 sm:$0xff]   ;;  %v3760_v9 = vld [vmem:[%s5859_s3 + $0x20] ss:$16 sps:$4 sm:$0xff]   ;;  %3344 = vmatprep.subr.msk.bf16.mxu1 %vm77_vm0, %v3338_v13  ;;  %v85_v16 = vsel %vm77_vm0, %v3337_v14, 0 }
   0x5   :  { %91 = vmatpush1.bf16.msra.mxu0 %v79_v5  ;;  %v3766_v10 = vld [vmem:[%s5859_s3 + $0x44] ss:$16 sps:$4 sm:$0xff]   ;;  %v3764_v15 = vld [vmem:[%s5859_s3 + $0x40] ss:$16 sps:$4 sm:$0xff]   ;;  %164 = vmatpush1.bf16.msra.mxu1 %v85_v16  ;;  %v3779_v20 = vld [vmem:[%s5859_s3 + $0x2c] ss:$16 sps:$4 sm:$0xff]  }
   0x6   :  { %343 = vmatprep.subr.bf16.mxu0 %v3758_v4  ;;  %v3770_v18 = vld [vmem:[%s5859_s3 + $0x64] ss:$16 sps:$4 sm:$0xff]   ;;  %386 = vmatprep.subr.bf16.mxu1 %v3776_v17  ;;  %v3768_v21 = vld [vmem:[%s5859_s3 + $0x60] ss:$16 sps:$4 sm:$0xff]   ;;  %v3777_v25 = vld [vmem:[%s5859_s3 + $0x28] ss:$16 sps:$4 sm:$0xff]  }
   0x7   :  { %v477_v22 = vld [vmem:[%s5861_s4] sm:$0xff]  ;;  %v3782_v27 = vld [vmem:[%s5859_s3 + $0x4c] ss:$16 sps:$4 sm:$0xff]   ;;  %v3780_v28 = vld [vmem:[%s5859_s3 + $0x48] ss:$16 sps:$4 sm:$0xff]   ;;  %vm3071_vm7 = vcmask 39968  }
   0x8   :  { %3340 = vmatmul.mubr.msk.bf16.vlgmr.msra.gmra.mrb[0].mxu0 %vm64_vm1, %v3755_v6  ;;  %v481_v23 = vld [vmem:[%s5861_s4 + $0x20] sm:$0xff]  ;;  %3345 = vmatmul.mubr.msk.bf16.vlgmr.msra.gmra.mrb[0].mxu1 %vm64_vm1, %v3755_v6  ;;  %v3785_v29 = vld [vmem:[%s5859_s3 + $0x6c] ss:$16 sps:$4 sm:$0xff]   ;;  %v3783_v32 = vld [vmem:[%s5859_s3 + $0x68] ss:$16 sps:$4 sm:$0xff]   ;;  %vm3094_vm8 = vcmask 48168  }
   0x9   :  { %344 = vmatpush1.bf16.msra.mxu0 %v3756_v7  ;;  %132 = vmatprep.mubr.bf16.mxu0 %v4042_v1  ;;  %v3369_v24 = vcombine.high %v477_v22, %v481_v23  ;;  %v478_v30 = vld [vmem:[%s5861_s4 + $0x8] sm:$0xff]  ;;  %v3767_v33 = vld [vmem:[%s5858_s0 + $0x18] sm:$0xff]   ;;  %v485_v35 = vld [vmem:[%s5861_s4 + $0x40] sm:$0xff]  ;;  %v3368_v38 = vcombine.low %v477_v22, %v481_v23  ;;  %vm3117_vm9 = vcmask 56368   ;;  %vm3140_vm10 = vcmask 64568  }
   0xa   :  { %345 = vmatprep.subr.bf16.mxu0 %v3762_v8  ;;  %205 = vmatprep.mubr.bf16.mxu1 %v4042_v1  ;;  %v482_v31 = vld [vmem:[%s5861_s4 + $0x28] sm:$0xff]  ;;  %v489_v36 = vld [vmem:[%s5861_s4 + $0x60] sm:$0xff]  ;;  %vm3163_vm11 = vcmask 72768   ;;  %vm3186_vm12 = vcmask 80968   ;;  %vm3209_vm13 = vcmask 89168   ;;  %vm3232_vm14 = vcmask 97368  }
   0xb   :  { %387 = vmatpush1.bf16.msra.mxu1 %v3774_v19  ;;  %v3371_v34 = vcombine.high %v478_v30, %v482_v31  ;;  %v3773_v37 = vld [vmem:[%s5860_s1] sm:$0xff]   ;;  %v3377_v39 = vcombine.high %v485_v35, %v489_v36  ;;  %v3376_v42 = vcombine.low %v485_v35, %v489_v36  ;;  %v486_v46 = vld [vmem:[%s5861_s4 + $0x48] sm:$0xff]  ;;  %v3370_v50 = vcombine.low %v478_v30, %v482_v31 }
   0xc   :  { %388 = vmatprep.subr.bf16.mxu1 %v3779_v20  ;;  %v493_v40 = vld [vmem:[%s5861_s4 + $0x80] sm:$0xff]  ;;  %v490_v47 = vld [vmem:[%s5861_s4 + $0x68] sm:$0xff]  ;;  %vm3255_vm15 = vcmask 105568   ;;  %vm3278_vm0 = vcmask 113768  }
   0xd   :  { %346 = vmatpush1.bf16.msra.mxu0 %v3760_v9  ;;  %v497_v41 = vld [vmem:[%s5861_s4 + $0xa0] sm:$0xff]  ;;  %v3379_v53 = vcombine.high %v486_v46, %v490_v47  ;;  %v494_v54 = vld [vmem:[%s5861_s4 + $0x88] sm:$0xff]  ;;  %v3378_v58 = vcombine.low %v486_v46, %v490_v47 }
   0xe   :  { %347 = vmatprep.subr.bf16.mxu0 %v3766_v10  ;;  %v3385_v43 = vcombine.high %v493_v40, %v497_v41  ;;  %v501_v44 = vld [vmem:[%s5861_s4 + $0xc0] sm:$0xff]  ;;  %v3384_v48 = vcombine.low %v493_v40, %v497_v41  ;;  %v498_v55 = vld [vmem:[%s5861_s4 + $0xa8] sm:$0xff] }
   0xf   :  { %389 = vmatpush1.bf16.msra.mxu1 %v3777_v25  ;;  %v505_v45 = vld [vmem:[%s5861_s4 + $0xe0] sm:$0xff]  ;;  %v3387_v61 = vcombine.high %v494_v54, %v498_v55  ;;  %v502_v62 = vld [vmem:[%s5861_s4 + $0xc8] sm:$0xff]  ;;  %v3386_v2 = vcombine.low %v494_v54, %v498_v55 }
  0x10   :  { %3341 = vmatmul.mubr.msk.bf16.gmra.mrb[4].mxu0 %vm64_vm1, %v3759_v12  ;;  %390 = vmatprep.subr.bf16.mxu1 %v3782_v27  ;;  %v3393_v49 = vcombine.high %v501_v44, %v505_v45  ;;  %v509_v51 = vld [vmem:[%s5861_s4 + $0x100] sm:$0xff]  ;;  %v3392_v56 = vcombine.low %v501_v44, %v505_v45  ;;  %v506_v63 = vld [vmem:[%s5861_s4 + $0xe8] sm:$0xff] }
  0x11   :  { %142 = vmatprep.mubr.bf16.mxu0 %v4042_v1  ;;  %348 = vmatpush1.bf16.msra.mxu0 %v3764_v15  ;;  %v513_v52 = vld [vmem:[%s5861_s4 + $0x120] sm:$0xff]  ;;  %v3395_v3 = vcombine.high %v502_v62, %v506_v63  ;;  %v510_v4 = vld [vmem:[%s5861_s4 + $0x108] sm:$0xff]  ;;  %v3394_v7 = vcombine.low %v502_v62, %v506_v63 }
  0x12   :  { %349 = vmatprep.subr.bf16.mxu0 %v3770_v18  ;;  %3346 = vmatmul.mubr.msk.bf16.gmra.mrb[4].mxu1 %vm64_vm1, %v3759_v12  ;;  %v3401_v57 = vcombine.high %v509_v51, %v513_v52  ;;  %v517_v59 = vld [vmem:[%s5861_s4 + $0x140] sm:$0xff]  ;;  %v3400_v0 = vcombine.low %v509_v51, %v513_v52  ;;  %v514_v5 = vld [vmem:[%s5861_s4 + $0x128] sm:$0xff] }
  0x13   :  { %215 = vmatprep.mubr.bf16.mxu1 %v4042_v1  ;;  %391 = vmatpush1.bf16.msra.mxu1 %v3780_v28  ;;  %v521_v60 = vld [vmem:[%s5861_s4 + $0x160] sm:$0xff]  ;;  %v3403_v8 = vcombine.high %v510_v4, %v514_v5  ;;  %v518_v9 = vld [vmem:[%s5861_s4 + $0x148] sm:$0xff]  ;;  %v3402_v11 = vcombine.low %v510_v4, %v514_v5 }
  0x14   :  { %392 = vmatprep.subr.bf16.mxu1 %v3785_v29  ;;  %v3408_v6 = vcombine.low %v517_v59, %v521_v60  ;;  %v522_v10 = vld [vmem:[%s5861_s4 + $0x168] sm:$0xff]  ;;  %v525_v14 = vld [vmem:[%s5861_s4 + $0x180] sm:$0xff] }
  0x15   :  { %350 = vmatpush1.bf16.msra.mxu0 %v3768_v21  ;;  %v3411_v12 = vcombine.high %v518_v9, %v522_v10  ;;  %v3410_v13 = vcombine.low %v518_v9, %v522_v10  ;;  %v529_v15 = vld [vmem:[%s5861_s4 + $0x1a0] sm:$0xff]  ;;  %v526_v16 = vld [vmem:[%s5861_s4 + $0x188] sm:$0xff] }
  0x16   :  { %2055 = vmatprep.subr.bf16.mxu0 %v3369_v24  ;;  %v3417_v17 = vcombine.high %v525_v14, %v529_v15  ;;  %v530_v18 = vld [vmem:[%s5861_s4 + $0x1a8] sm:$0xff]  ;;  %v3416_v19 = vcombine.low %v525_v14, %v529_v15  ;;  %v533_v22 = vld [vmem:[%s5861_s4 + $0x1c0] sm:$0xff] }
  0x17   :  { %393 = vmatpush1.bf16.msra.mxu1 %v3783_v32  ;;  %v3418_v20 = vcombine.low %v526_v16, %v530_v18  ;;  %v3419_v21 = vcombine.high %v526_v16, %v530_v18  ;;  %v537_v23 = vld [vmem:[%s5861_s4 + $0x1e0] sm:$0xff]  ;;  %v534_v24 = vld [vmem:[%s5861_s4 + $0x1c8] sm:$0xff] }
  0x18   :  { %3342 = vmatmul.mubr.msk.bf16.gmra.mrb[8].mxu0 %vm64_vm1, %v3763_v26  ;;  %2201 = vmatprep.subr.bf16.mxu1 %v3371_v34  ;;  %v3425_v25 = vcombine.high %v533_v22, %v537_v23  ;;  %v3424_v27 = vcombine.low %v533_v22, %v537_v23  ;;  %v541_v30 = vld [vmem:[%s5861_s4 + $0x200] sm:$0xff]  ;;  %v542_v32 = vld [vmem:[%s5861_s4 + $0x208] sm:$0xff] }
  0x19   :  { %152 = vmatprep.mubr.bf16.mxu0 %v4042_v1  ;;  %v545_v31 = vld [vmem:[%s5861_s4 + $0x220] sm:$0xff]  ;;  %v546_v34 = vld [vmem:[%s5861_s4 + $0x228] sm:$0xff] }
  0x1a   :  { %3347 = vmatmul.mubr.msk.bf16.gmra.mrb[8].mxu1 %vm64_vm1, %v3763_v26  ;;  %v538_v26 = vld [vmem:[%s5861_s4 + $0x1e8] sm:$0xff]  ;;  %v3432_v35 = vcombine.low %v541_v30, %v545_v31  ;;  %v3434_v36 = vcombine.low %v542_v32, %v546_v34  ;;  %v557_v46 = vld [vmem:[%s5861_s4 + $0x280] sm:$0xff] }
  0x1b   :  { %225 = vmatprep.mubr.bf16.mxu1 %v4042_v1  ;;  %v3426_v28 = vcombine.low %v534_v24, %v538_v26  ;;  %v3427_v29 = vcombine.high %v534_v24, %v538_v26  ;;  %v550_v40 = vld [vmem:[%s5861_s4 + $0x248] sm:$0xff]  ;;  %v561_v47 = vld [vmem:[%s5861_s4 + $0x2a0] sm:$0xff] }
  0x1c   :  { %v3448_v51 = vcombine.low %v557_v46, %v561_v47  ;;  %v565_v54 = vld [vmem:[%s5861_s4 + $0x2c0] sm:$0xff]  ;;  %v586_v10 = vld [vmem:[%s5861_s4 + $0x368] sm:$0xff] }
  0x1d   :  { %v569_v55 = vld [vmem:[%s5861_s4 + $0x2e0] sm:$0xff]  ;;  %v590_v16 = vld [vmem:[%s5861_s4 + $0x388] sm:$0xff] }
  0x1e   :  { %v573_v62 = vld [vmem:[%s5861_s4 + $0x300] sm:$0xff]  ;;  %v594_v18 = vld [vmem:[%s5861_s4 + $0x3a8] sm:$0xff] }
  0x1f   :  { %v577_v63 = vld [vmem:[%s5861_s4 + $0x320] sm:$0xff]  ;;  %v598_v24 = vld [vmem:[%s5861_s4 + $0x3c8] sm:$0xff] }
  0x20   :  { %3343 = vmatmul.mubr.msk.bf16.gmra.mrb[12].mxu0 %vm64_vm1, %v3767_v33  ;;  %v589_v14 = vld [vmem:[%s5861_s4 + $0x380] sm:$0xff]  ;;  %v602_v26 = vld [vmem:[%s5861_s4 + $0x3e8] sm:$0xff] }
  0x21   :  { %375 = vmatprep.mubr.bf16.mxu0 %v4042_v1  ;;  %v593_v15 = vld [vmem:[%s5861_s4 + $0x3a0] sm:$0xff] }
  0x22   :  { %3348 = vmatmul.mubr.msk.bf16.gmra.mrb[12].mxu1 %vm64_vm1, %v3767_v33  ;;  %v3433_v33 = vcombine.high %v541_v30, %v545_v31  ;;  %v597_v22 = vld [vmem:[%s5861_s4 + $0x3c0] sm:$0xff]  ;;  %vm3301_vm1 = vcmask 121968  }
  0x23   :  { %418 = vmatprep.mubr.bf16.mxu1 %v4042_v1  ;;  %v3409_v1 = vcombine.high %v517_v59, %v521_v60  ;;  %v3456_v59 = vcombine.low %v565_v54, %v569_v55  ;;  %v601_v23 = vld [vmem:[%s5861_s4 + $0x3e0] sm:$0xff] }
  0x24   :  { %v4366_v30 = vld [vmem:[%s5861_s4 + $0x400] sm:$0xff] }
  0x25   :  { %v4371_v31 = vld [vmem:[%s5861_s4 + $0x420] sm:$0xff] }
  0x28   :  { %3366 = vmatmul.mubr.msk.bf16.vlgmr.msra.gmra.mrb[16].mxu0 %vm339_vm2, %v3773_v37 }
  0x29   :  { %2056 = vmatpush1.bf16.msra.mxu0 %v3368_v38  ;;  %v549_v38 = vld [vmem:[%s5861_s4 + $0x240] sm:$0xff] }
  0x2a   :  { %2057 = vmatprep.subr.bf16.mxu0 %v3377_v39  ;;  %3367 = vmatmul.mubr.msk.bf16.vlgmr.msra.gmra.mrb[16].mxu1 %vm339_vm2, %v3773_v37  ;;  %v3435_v37 = vcombine.high %v542_v32, %v546_v34  ;;  %v553_v39 = vld [vmem:[%s5861_s4 + $0x260] sm:$0xff]  ;;  %v4376_v32 = vld [vmem:[%s5861_s4 + $0x408] sm:$0xff]  ;;  %vm3324_vm2 = vcmask 130168  }
  0x2b   :  { %2202 = vmatpush1.bf16.msra.mxu1 %v3370_v50  ;;  %v3441_v41 = vcombine.high %v549_v38, %v553_v39  ;;  %v562_v50 = vld [vmem:[%s5861_s4 + $0x2a8] sm:$0xff] }
  0x2c   :  { %2203 = vmatprep.subr.bf16.mxu1 %v3379_v53  ;;  %v4383_v34 = vld [vmem:[%s5861_s4 + $0x428] sm:$0xff] }
  0x2d   :  { %2058 = vmatpush1.bf16.msra.mxu0 %v3376_v42  ;;  %v554_v42 = vld [vmem:[%s5861_s4 + $0x268] sm:$0xff] }
  0x2e   :  { %2059 = vmatprep.subr.bf16.mxu0 %v3385_v43  ;;  %v3440_v43 = vcombine.low %v549_v38, %v553_v39  ;;  %v3442_v44 = vcombine.low %v550_v40, %v554_v42  ;;  %v3443_v45 = vcombine.high %v550_v40, %v554_v42 }
  0x2f   :  { %2204 = vmatpush1.bf16.msra.mxu1 %v3378_v58  ;;  %v570_v58 = vld [vmem:[%s5861_s4 + $0x2e8] sm:$0xff] }
  0x30   :  { %2205 = vmatprep.subr.bf16.mxu1 %v3387_v61 }
  0x31   :  { %2060 = vmatpush1.bf16.msra.mxu0 %v3384_v48  ;;  %v558_v48 = vld [vmem:[%s5861_s4 + $0x288] sm:$0xff] }
  0x32   :  { %2061 = vmatprep.subr.bf16.mxu0 %v3393_v49  ;;  %v3449_v49 = vcombine.high %v557_v46, %v561_v47  ;;  %v3450_v52 = vcombine.low %v558_v48, %v562_v50  ;;  %v3451_v53 = vcombine.high %v558_v48, %v562_v50 }
  0x33   :  { %2206 = vmatpush1.bf16.msra.mxu1 %v3386_v2  ;;  %v578_v2 = vld [vmem:[%s5861_s4 + $0x328] sm:$0xff] }
  0x34   :  { %2207 = vmatprep.subr.bf16.mxu1 %v3395_v3  ;;  %v3464_v3 = vcombine.low %v573_v62, %v577_v63 }
  0x35   :  { %2062 = vmatpush1.bf16.msra.mxu0 %v3392_v56  ;;  %v566_v56 = vld [vmem:[%s5861_s4 + $0x2c8] sm:$0xff] }
  0x36   :  { %2063 = vmatprep.subr.bf16.mxu0 %v3401_v57  ;;  %v3457_v57 = vcombine.high %v565_v54, %v569_v55  ;;  %v3458_v60 = vcombine.low %v566_v56, %v570_v58  ;;  %v3459_v61 = vcombine.high %v566_v56, %v570_v58 }
  0x37   :  { %2208 = vmatpush1.bf16.msra.mxu1 %v3394_v7  ;;  %v585_v7 = vld [vmem:[%s5861_s4 + $0x360] sm:$0xff] }
  0x38   :  { %2209 = vmatprep.subr.bf16.mxu1 %v3403_v8  ;;  %v582_v8 = vld [vmem:[%s5861_s4 + $0x348] sm:$0xff] }
  0x39   :  { %2064 = vmatpush1.bf16.msra.mxu0 %v3400_v0  ;;  %v574_v0 = vld [vmem:[%s5861_s4 + $0x308] sm:$0xff] }
  0x3a   :  { %2065 = vmatprep.subr.bf16.mxu0 %v3409_v1  ;;  %v3465_v1 = vcombine.high %v573_v62, %v577_v63  ;;  %v3466_v4 = vcombine.low %v574_v0, %v578_v2  ;;  %v3467_v5 = vcombine.high %v574_v0, %v578_v2 }
  0x3b   :  { %2210 = vmatpush1.bf16.msra.mxu1 %v3402_v11 }
  0x3c   :  { %2211 = vmatprep.subr.bf16.mxu1 %v3411_v12  ;;  %v3474_v12 = vcombine.low %v582_v8, %v586_v10 }
  0x3d   :  { %2066 = vmatpush1.bf16.msra.mxu0 %v3408_v6  ;;  %v581_v6 = vld [vmem:[%s5861_s4 + $0x340] sm:$0xff] }
  0x3e   :  { %2067 = vmatprep.subr.bf16.mxu0 %v3417_v17  ;;  %v3473_v9 = vcombine.high %v581_v6, %v585_v7  ;;  %v3472_v11 = vcombine.low %v581_v6, %v585_v7  ;;  %v3481_v17 = vcombine.high %v589_v14, %v593_v15 }
  0x3f   :  { %2212 = vmatpush1.bf16.msra.mxu1 %v3410_v13  ;;  %v3475_v13 = vcombine.high %v582_v8, %v586_v10 }
  0x40   :  { %2213 = vmatprep.subr.bf16.mxu1 %v3419_v21  ;;  %v3483_v21 = vcombine.high %v590_v16, %v594_v18 }
  0x41   :  { %2068 = vmatpush1.bf16.msra.mxu0 %v3416_v19  ;;  %v3480_v19 = vcombine.low %v589_v14, %v593_v15 }
  0x42   :  { %2069 = vmatprep.subr.bf16.mxu0 %v3425_v25  ;;  %v3489_v25 = vcombine.high %v597_v22, %v601_v23 }
  0x43   :  { %2214 = vmatpush1.bf16.msra.mxu1 %v3418_v20  ;;  %v3482_v20 = vcombine.low %v590_v16, %v594_v18 }
  0x44   :  { %2215 = vmatprep.subr.bf16.mxu1 %v3427_v29  ;;  %v3491_v29 = vcombine.high %v598_v24, %v602_v26 }
  0x45   :  { %2070 = vmatpush1.bf16.msra.mxu0 %v3424_v27  ;;  %v3488_v27 = vcombine.low %v597_v22, %v601_v23 }
  0x46   :  { %2071 = vmatprep.subr.bf16.mxu0 %v3433_v33  ;;  %v3497_v33 = vcombine.high %v4366_v30, %v4371_v31 }
  0x47   :  { %2216 = vmatpush1.bf16.msra.mxu1 %v3426_v28  ;;  %v3490_v28 = vcombine.low %v598_v24, %v602_v26  ;;  %v613_v24 = vld [vmem:[%s5861_s4 + $0x440] sm:$0xff]  ;;  %v614_v26 = vld [vmem:[%s5861_s4 + $0x448] sm:$0xff] }
  0x48   :  { %2217 = vmatprep.subr.bf16.mxu1 %v3435_v37  ;;  %v3499_v37 = vcombine.high %v4376_v32, %v4383_v34 }
  0x49   :  { %2072 = vmatpush1.bf16.msra.mxu0 %v3432_v35  ;;  %v3496_v35 = vcombine.low %v4366_v30, %v4371_v31 }
  0x4a   :  { %2073 = vmatprep.subr.bf16.mxu0 %v3441_v41 }
  0x4b   :  { %2218 = vmatpush1.bf16.msra.mxu1 %v3434_v36  ;;  %v3498_v36 = vcombine.low %v4376_v32, %v4383_v34 }
  0x4c   :  { %2219 = vmatprep.subr.bf16.mxu1 %v3443_v45 }
  0x4d   :  { %2074 = vmatpush1.bf16.msra.mxu0 %v3440_v43 }
  0x4e   :  { %2075 = vmatprep.subr.bf16.mxu0 %v3449_v49 }
  0x4f   :  { %2220 = vmatpush1.bf16.msra.mxu1 %v3442_v44 }
  0x50   :  { %2221 = vmatprep.subr.bf16.mxu1 %v3451_v53 }
  0x51   :  { %2076 = vmatpush1.bf16.msra.mxu0 %v3448_v51 }
  0x52   :  { %2077 = vmatprep.subr.bf16.mxu0 %v3457_v57 }
  0x53   :  { %2222 = vmatpush1.bf16.msra.mxu1 %v3450_v52 }
  0x54   :  { %2223 = vmatprep.subr.bf16.mxu1 %v3459_v61 }
  0x55   :  { %2078 = vmatpush1.bf16.msra.mxu0 %v3456_v59 }
  0x56   :  { %2079 = vmatprep.subr.bf16.mxu0 %v3465_v1 }
  0x57   :  { %2224 = vmatpush1.bf16.msra.mxu1 %v3458_v60 }
  0x58   :  { %2225 = vmatprep.subr.bf16.mxu1 %v3467_v5 }
  0x59   :  { %2080 = vmatpush1.bf16.msra.mxu0 %v3464_v3 }
  0x5a   :  { %2081 = vmatprep.subr.bf16.mxu0 %v3473_v9 }
  0x5b   :  { %2226 = vmatpush1.bf16.msra.mxu1 %v3466_v4 }
  0x5c   :  { %2227 = vmatprep.subr.bf16.mxu1 %v3475_v13 }
  0x5d   :  { %2082 = vmatpush1.bf16.msra.mxu0 %v3472_v11 }
  0x5e   :  { %2083 = vmatprep.subr.bf16.mxu0 %v3481_v17 }
  0x5f   :  { %2228 = vmatpush1.bf16.msra.mxu1 %v3474_v12 }
  0x60   :  { %2229 = vmatprep.subr.bf16.mxu1 %v3483_v21 }
  0x61   :  { %2084 = vmatpush1.bf16.msra.mxu0 %v3480_v19 }
  0x62   :  { %2085 = vmatprep.subr.bf16.mxu0 %v3489_v25  ;;  %v617_v25 = vld [vmem:[%s5861_s4 + $0x460] sm:$0xff] }
  0x63   :  { %2230 = vmatpush1.bf16.msra.mxu1 %v3482_v20 }
  0x64   :  { %2231 = vmatprep.subr.bf16.mxu1 %v3491_v29  ;;  %v618_v29 = vld [vmem:[%s5861_s4 + $0x468] sm:$0xff] }
  0x65   :  { %2086 = vmatpush1.bf16.msra.mxu0 %v3488_v27 }
  0x66   :  { %2128 = vmatprep.subr.bf16.mxu0 %v3497_v33  ;;  %v4432_v33 = vld [vmem:[%s5861_s4 + $0x480] sm:$0xff] }
  0x67   :  { %2232 = vmatpush1.bf16.msra.mxu1 %v3490_v28 }
  0x68   :  { %2274 = vmatprep.subr.bf16.mxu1 %v3499_v37  ;;  %v4437_v37 = vld [vmem:[%s5861_s4 + $0x4a0] sm:$0xff] }
  0xdb   :  { %v124_v38 = vpop.f32.mrb[0].mxu0  ;;  %v4391_v45 = vpop.f32.mrb[0].mxu1 }
  0xdc   :  { %v126_v39 = vpop.f32.mrb[1].mxu0  ;;  %v4393_v47 = vpop.f32.mrb[1].mxu1 }
  0xdd   :  { %v128_v40 = vpop.f32.mrb[2].mxu0  ;;  %v4395_v48 = vpop.f32.mrb[2].mxu1 }
  0xde   :  { %v130_v41 = vpop.f32.mrb[3].mxu0  ;;  %v4397_v49 = vpop.f32.mrb[3].mxu1 }
  0xe3   :  { %v134_v42 = vpop.f32.mrb[4].mxu0 }
  0xe4   :  { %v136_v43 = vpop.f32.mrb[5].mxu0 }
  0xe5   :  { %v138_v44 = vpop.f32.mrb[6].mxu0  ;;  %v4399_v53 = vpop.f32.mrb[4].mxu1 }
  0xe6   :  { %v140_v46 = vpop.f32.mrb[7].mxu0  ;;  %v4401_v55 = vpop.f32.mrb[5].mxu1 }
  0xe7   :  { %v4403_v56 = vpop.f32.mrb[6].mxu1 }
  0xe8   :  { %v4405_v57 = vpop.f32.mrb[7].mxu1 }
  0xeb   :  { %v144_v50 = vpop.f32.mrb[8].mxu0 }
  0xec   :  { %v146_v51 = vpop.f32.mrb[9].mxu0 }
  0xed   :  { %v148_v52 = vpop.f32.mrb[10].mxu0  ;;  %v4407_v61 = vpop.f32.mrb[8].mxu1 }
  0xee   :  { %v150_v54 = vpop.f32.mrb[11].mxu0  ;;  %v4409_v63 = vpop.f32.mrb[9].mxu1 }
  0xef   :  { %v4411_v0 = vpop.f32.mrb[10].mxu1 }
  0xf0   :  { %v4413_v1 = vpop.f32.mrb[11].mxu1 }
  0xf3   :  { %v154_v58 = vpop.f32.mrb[12].mxu0 }
  0xf4   :  { %v156_v59 = vpop.f32.mrb[13].mxu0 }
  0xf5   :  { %v158_v60 = vpop.f32.mrb[14].mxu0  ;;  %v227_v13 = vpop.f32.mrb[12].mxu1 }
  0xf6   :  { %v160_v62 = vpop.f32.mrb[15].mxu0  ;;  %v229_v19 = vpop.f32.mrb[13].mxu1 }
  0xf7   :  { %v231_v27 = vpop.f32.mrb[14].mxu1 }
  0xfb   :  { %v377_v2 = vpop.f32.mrb[16].mxu0 }
  0xfc   :  { %v429_v3 = vmul.f32 %v377_v2, %v124_v38  ;;  %v437_v4 = vmul.f32 %v377_v2, %v134_v42  ;;  %v445_v5 = vmul.f32 %v377_v2, %v144_v50  ;;  %v453_v6 = vmul.f32 %v377_v2, %v154_v58  ;;  %v379_v7 = vpop.f32.mrb[17].mxu0  ;;  %v4471_v58 = vld [vmem:[%s5861_s4 + $0x4e0] sm:$0xff] }
  0xfd   :  { %v430_v8 = vmul.f32 %v379_v7, %v126_v39  ;;  %v438_v9 = vmul.f32 %v379_v7, %v136_v43  ;;  %v446_v10 = vmul.f32 %v379_v7, %v146_v51  ;;  %v454_v11 = vmul.f32 %v379_v7, %v156_v59  ;;  %v381_v12 = vpop.f32.mrb[18].mxu0  ;;  %v4464_v51 = vld [vmem:[%s5861_s4 + $0x4c0] sm:$0xff]  ;;  %v4476_v59 = vld [vmem:[%s5861_s4 + $0x4c8] sm:$0xff] }
  0xfe   :  { %v433_v14 = vmul.f32 %v381_v12, %v128_v40  ;;  %v441_v15 = vmul.f32 %v381_v12, %v138_v44  ;;  %v449_v16 = vmul.f32 %v381_v12, %v148_v52  ;;  %v457_v17 = vmul.f32 %v381_v12, %v158_v60  ;;  %v383_v18 = vpop.f32.mrb[19].mxu0  ;;  %v233_v40 = vpop.f32.mrb[15].mxu1  ;;  %v4452_v44 = vld [vmem:[%s5861_s4 + $0x488] sm:$0xff] }
  0xff   :  { %v434_v20 = vmul.f32 %v383_v18, %v130_v41  ;;  %v442_v21 = vmul.f32 %v383_v18, %v140_v46  ;;  %v450_v22 = vmul.f32 %v383_v18, %v150_v54  ;;  %v458_v23 = vmul.f32 %v383_v18, %v160_v62  ;;  %v4457_v46 = vld [vmem:[%s5861_s4 + $0x4a8] sm:$0xff] }
 0x100   :  { %v4424_v28 = vpack.c.bf16 %v433_v14, %v429_v3  ;;  %v4439_v38 = vpack.c.bf16 %v441_v15, %v437_v4  ;;  %v4441_v39 = vpack.c.bf16 %v449_v16, %v445_v5  ;;  %v4443_v41 = vpack.c.bf16 %v457_v17, %v453_v6  ;;  %v4481_v60 = vld [vmem:[%s5861_s4 + $0x4e8] sm:$0xff] }
 0x101   :  { %v4445_v42 = vpack.c.bf16 %v434_v20, %v430_v8  ;;  %v4447_v43 = vpack.c.bf16 %v442_v21, %v438_v9  ;;  %v4459_v50 = vpack.c.bf16 %v450_v22, %v446_v10  ;;  %v4466_v52 = vpack.c.bf16 %v458_v23, %v454_v11  ;;  %v420_v10 = vpop.f32.mrb[16].mxu1 }
 0x102   :  { %v3504_v54 = vcombine.low %v613_v24, %v617_v25  ;;  %v3505_v62 = vcombine.high %v613_v24, %v617_v25  ;;  %v3506_v2 = vcombine.low %v614_v26, %v618_v29  ;;  %v3507_v3 = vcombine.high %v614_v26, %v618_v29  ;;  %v422_v34 = vpop.f32.mrb[17].mxu1  ;;  %v645_v29 = vld [vmem:[%s5861_s4 + $0x540] sm:$0xff] }
 0x103   :  { %2087 = vmatprep.mubr.bf16.mxu0 %v4445_v42  ;;  %2233 = vmatprep.mubr.bf16.mxu1 %v4445_v42  ;;  %v3512_v4 = vcombine.low %v4432_v33, %v4437_v37  ;;  %v3513_v5 = vcombine.high %v4432_v33, %v4437_v37  ;;  %v3514_v6 = vcombine.low %v4452_v44, %v4457_v46  ;;  %v424_v12 = vpop.f32.mrb[18].mxu1  ;;  %v649_v33 = vld [vmem:[%s5861_s4 + $0x560] sm:$0xff]  ;;  %v646_v37 = vld [vmem:[%s5861_s4 + $0x548] sm:$0xff] }
 0x104   :  { %2088 = vmatmul.mubr.bf16.vlgmr.msra.gmra.mrb[20].mxu0 %v4424_v28  ;;  %2234 = vmatmul.mubr.bf16.vlgmr.msra.gmra.mrb[20].mxu1 %v4424_v28  ;;  %v3515_v7 = vcombine.high %v4452_v44, %v4457_v46  ;;  %v3521_v8 = vcombine.high %v4464_v51, %v4471_v58  ;;  %v3523_v9 = vcombine.high %v4476_v59, %v4481_v60  ;;  %v426_v17 = vpop.f32.mrb[19].mxu1 }
 0x105   :  { %2129 = vmatpush1.bf16.msra.mxu0 %v3496_v35  ;;  %2275 = vmatpush1.bf16.msra.mxu1 %v3498_v36  ;;  %v431_v30 = vmul.f32 %v420_v10, %v4391_v45  ;;  %v439_v31 = vmul.f32 %v420_v10, %v4399_v53  ;;  %v447_v32 = vmul.f32 %v420_v10, %v4407_v61 }
 0x106   :  { %2097 = vmatprep.mubr.bf16.mxu0 %v4447_v43  ;;  %2243 = vmatprep.mubr.bf16.mxu1 %v4447_v43  ;;  %v455_v35 = vmul.f32 %v420_v10, %v227_v13  ;;  %v432_v36 = vmul.f32 %v422_v34, %v4393_v47  ;;  %v440_v11 = vmul.f32 %v422_v34, %v4401_v55  ;;  %v637_v47 = vld [vmem:[%s5861_s4 + $0x500] sm:$0xff] }
 0x107   :  { %2130 = vmatprep.subr.bf16.mxu0 %v3505_v62  ;;  %2276 = vmatprep.subr.bf16.mxu1 %v3507_v3  ;;  %v448_v14 = vmul.f32 %v422_v34, %v4409_v63  ;;  %v456_v15 = vmul.f32 %v422_v34, %v229_v19  ;;  %v435_v16 = vmul.f32 %v424_v12, %v4395_v48  ;;  %v641_v63 = vld [vmem:[%s5861_s4 + $0x520] sm:$0xff]  ;;  %v658_v62 = vld [vmem:[%s5861_s4 + $0x5a8] sm:$0xff] }
 0x108   :  { %v443_v45 = vmul.f32 %v424_v12, %v4403_v56  ;;  %v451_v53 = vmul.f32 %v424_v12, %v4411_v0  ;;  %v459_v61 = vmul.f32 %v424_v12, %v231_v27  ;;  %v436_v13 = vmul.f32 %v426_v17, %v4397_v49  ;;  %v638_v49 = vld [vmem:[%s5861_s4 + $0x508] sm:$0xff]  ;;  %v669_v34 = vld [vmem:[%s5861_s4 + $0x600] sm:$0xff] }
 0x109   :  { %2131 = vmatpush1.bf16.msra.mxu0 %v3504_v54  ;;  %2277 = vmatpush1.bf16.msra.mxu1 %v3506_v2  ;;  %v4520_v55 = vpack.c.bf16 %v435_v16, %v431_v30  ;;  %v444_v48 = vmul.f32 %v426_v17, %v4405_v57  ;;  %v452_v56 = vmul.f32 %v426_v17, %v4413_v1  ;;  %v642_v0 = vld [vmem:[%s5861_s4 + $0x528] sm:$0xff] }
 0x10a   :  { %2132 = vmatprep.subr.bf16.mxu0 %v3513_v5  ;;  %2278 = vmatprep.subr.bf16.mxu1 %v3515_v7  ;;  %v460_v18 = vmul.f32 %v426_v17, %v233_v40  ;;  %v4533_v19 = vpack.c.bf16 %v436_v13, %v432_v36  ;;  %v4535_v20 = vpack.c.bf16 %v443_v45, %v439_v31  ;;  %v650_v40 = vld [vmem:[%s5861_s4 + $0x568] sm:$0xff]  ;;  %v665_v7 = vld [vmem:[%s5861_s4 + $0x5e0] sm:$0xff] }
 0x10b   :  { %v4537_v57 = vpack.c.bf16 %v451_v53, %v447_v32  ;;  %v4541_v1 = vpack.c.bf16 %v444_v48, %v440_v11  ;;  %v4543_v21 = vpack.c.bf16 %v452_v56, %v448_v14  ;;  %v4545_v22 = vpack.c.bf16 %v459_v61, %v455_v35  ;;  %v673_v35 = vld [vmem:[%s5861_s4 + $0x620] sm:$0xff]  ;;  %v670_v36 = vld [vmem:[%s5861_s4 + $0x608] sm:$0xff] }
 0x10c   :  { %2098 = vmatmul.mubr.bf16.gmra.mrb[24].mxu0 %v4439_v38  ;;  %2244 = vmatmul.mubr.bf16.gmra.mrb[24].mxu1 %v4439_v38  ;;  %v3520_v23 = vcombine.low %v4464_v51, %v4471_v58  ;;  %v3522_v24 = vcombine.low %v4476_v59, %v4481_v60  ;;  %v4551_v25 = vpack.c.bf16 %v460_v18, %v456_v15  ;;  %v653_v51 = vld [vmem:[%s5861_s4 + $0x580] sm:$0xff]  ;;  %v654_v60 = vld [vmem:[%s5861_s4 + $0x588] sm:$0xff] }
 0x10d   :  { %2133 = vmatpush1.bf16.msra.mxu0 %v3512_v4  ;;  %2279 = vmatpush1.bf16.msra.mxu1 %v3514_v6  ;;  %v3529_v26 = vcombine.high %v637_v47, %v641_v63  ;;  %v3531_v27 = vcombine.high %v638_v49, %v642_v0  ;;  %v3528_v44 = vcombine.low %v637_v47, %v641_v63  ;;  %v657_v59 = vld [vmem:[%s5861_s4 + $0x5a0] sm:$0xff]  ;;  %v674_v11 = vld [vmem:[%s5861_s4 + $0x628] sm:$0xff] }
 0x10e   :  { %2107 = vmatprep.mubr.bf16.mxu0 %v4459_v50  ;;  %2253 = vmatprep.mubr.bf16.mxu1 %v4459_v50  ;;  %v3530_v46 = vcombine.low %v638_v49, %v642_v0  ;;  %v3537_v54 = vcombine.high %v645_v29, %v649_v33  ;;  %v3539_v58 = vcombine.high %v646_v37, %v650_v40  ;;  %v661_v6 = vld [vmem:[%s5861_s4 + $0x5c0] sm:$0xff]  ;;  %v678_v53 = vld [vmem:[%s5861_s4 + $0x648] sm:$0xff] }
 0x10f   :  { %2134 = vmatprep.subr.bf16.mxu0 %v3521_v8  ;;  %2280 = vmatprep.subr.bf16.mxu1 %v3523_v9  ;;  %v3536_v2 = vcombine.low %v645_v29, %v649_v33  ;;  %v3538_v3 = vcombine.low %v646_v37, %v650_v40  ;;  %v3545_v4 = vcombine.high %v653_v51, %v657_v59  ;;  %v662_v8 = vld [vmem:[%s5861_s4 + $0x5c8] sm:$0xff]  ;;  %v677_v45 = vld [vmem:[%s5861_s4 + $0x640] sm:$0xff] }
 0x110   :  { %v3547_v5 = vcombine.high %v654_v60, %v658_v62  ;;  %v666_v9 = vld [vmem:[%s5861_s4 + $0x5e8] sm:$0xff]  ;;  %v3544_v10 = vcombine.low %v653_v51, %v657_v59  ;;  %v3546_v30 = vcombine.low %v654_v60, %v658_v62  ;;  %v3553_v31 = vcombine.high %v661_v6, %v665_v7  ;;  %v681_v17 = vld [vmem:[%s5861_s4 + $0x660] sm:$0xff] }
 0x111   :  { %2135 = vmatpush1.bf16.msra.mxu0 %v3520_v23  ;;  %2281 = vmatpush1.bf16.msra.mxu1 %v3522_v24  ;;  %v3555_v32 = vcombine.high %v662_v8, %v666_v9  ;;  %v3552_v12 = vcombine.low %v661_v6, %v665_v7  ;;  %v3554_v14 = vcombine.low %v662_v8, %v666_v9  ;;  %v682_v61 = vld [vmem:[%s5861_s4 + $0x668] sm:$0xff]  ;;  %v685_v63 = vld [vmem:[%s5861_s4 + $0x680] sm:$0xff] }
 0x112   :  { %2136 = vmatprep.subr.bf16.mxu0 %v3529_v26  ;;  %2282 = vmatprep.subr.bf16.mxu1 %v3531_v27  ;;  %v3561_v15 = vcombine.high %v669_v34, %v673_v35  ;;  %v3563_v16 = vcombine.high %v670_v36, %v674_v11  ;;  %v3560_v13 = vcombine.low %v669_v34, %v673_v35  ;;  %v689_v49 = vld [vmem:[%s5861_s4 + $0x6a0] sm:$0xff]  ;;  %v686_v0 = vld [vmem:[%s5861_s4 + $0x688] sm:$0xff] }
 0x113   :  { %v3562_v47 = vcombine.low %v670_v36, %v674_v11  ;;  %v3569_v48 = vcombine.high %v677_v45, %v681_v17  ;;  %v3571_v56 = vcombine.high %v678_v53, %v682_v61  ;;  %v690_v18 = vld [vmem:[%s5861_s4 + $0x6a8] sm:$0xff]  ;;  %v3568_v23 = vcombine.low %v677_v45, %v681_v17  ;;  %v693_v29 = vld [vmem:[%s5861_s4 + $0x6c0] sm:$0xff] }
 0x114   :  { %2108 = vmatmul.mubr.bf16.gmra.mrb[28].mxu0 %v4441_v39  ;;  %2254 = vmatmul.mubr.bf16.gmra.mrb[28].mxu1 %v4441_v39  ;;  %v3570_v24 = vcombine.low %v678_v53, %v682_v61  ;;  %v3577_v26 = vcombine.high %v685_v63, %v689_v49  ;;  %v3579_v27 = vcombine.high %v686_v0, %v690_v18  ;;  %v697_v33 = vld [vmem:[%s5861_s4 + $0x6e0] sm:$0xff]  ;;  %v694_v37 = vld [vmem:[%s5861_s4 + $0x6c8] sm:$0xff] }
 0x115   :  { %2137 = vmatpush1.bf16.msra.mxu0 %v3528_v44  ;;  %2283 = vmatpush1.bf16.msra.mxu1 %v3530_v46  ;;  %v698_v40 = vld [vmem:[%s5861_s4 + $0x6e8] sm:$0xff]  ;;  %v3576_v44 = vcombine.low %v685_v63, %v689_v49  ;;  %v3578_v46 = vcombine.low %v686_v0, %v690_v18  ;;  %v3585_v51 = vcombine.high %v693_v29, %v697_v33  ;;  %v705_v59 = vld [vmem:[%s5861_s4 + $0x720] sm:$0xff]  ;;  %v479_v63 = vld [vmem:[%s5861_s4 + $0x10] sm:$0xff] }
 0x116   :  { %2117 = vmatprep.mubr.bf16.mxu0 %v4466_v52  ;;  %2263 = vmatprep.mubr.bf16.mxu1 %v4466_v52  ;;  %v702_v60 = vld [vmem:[%s5861_s4 + $0x708] sm:$0xff]  ;;  %v709_v6 = vld [vmem:[%s5861_s4 + $0x740] sm:$0xff]  ;;  %v483_v49 = vld [vmem:[%s5861_s4 + $0x30] sm:$0xff] }
 0x117   :  { %2138 = vmatprep.subr.bf16.mxu0 %v3537_v54  ;;  %2284 = vmatprep.subr.bf16.mxu1 %v3539_v58  ;;  %v3587_v54 = vcombine.high %v694_v37, %v698_v40  ;;  %v701_v58 = vld [vmem:[%s5861_s4 + $0x700] sm:$0xff]  ;;  %v706_v62 = vld [vmem:[%s5861_s4 + $0x728] sm:$0xff]  ;;  %v480_v0 = vld [vmem:[%s5861_s4 + $0x18] sm:$0xff] }
 0x118   :  { %v713_v7 = vld [vmem:[%s5861_s4 + $0x760] sm:$0xff]  ;;  %v710_v8 = vld [vmem:[%s5861_s4 + $0x748] sm:$0xff]  ;;  %v484_v18 = vld [vmem:[%s5861_s4 + $0x38] sm:$0xff] }
 0x119   :  { %2139 = vmatpush1.bf16.msra.mxu0 %v3536_v2  ;;  %2285 = vmatpush1.bf16.msra.mxu1 %v3538_v3  ;;  %v3584_v2 = vcombine.low %v693_v29, %v697_v33  ;;  %v3586_v3 = vcombine.low %v694_v37, %v698_v40  ;;  %v714_v9 = vld [vmem:[%s5861_s4 + $0x768] sm:$0xff]  ;;  %v717_v34 = vld [vmem:[%s5861_s4 + $0x780] sm:$0xff]  ;;  %v487_v29 = vld [vmem:[%s5861_s4 + $0x50] sm:$0xff] }
 0x11a   :  { %2140 = vmatprep.subr.bf16.mxu0 %v3545_v4  ;;  %2286 = vmatprep.subr.bf16.mxu1 %v3547_v5  ;;  %v3593_v4 = vcombine.high %v701_v58, %v705_v59  ;;  %v3595_v5 = vcombine.high %v702_v60, %v706_v62  ;;  %v721_v35 = vld [vmem:[%s5861_s4 + $0x7a0] sm:$0xff]  ;;  %v718_v36 = vld [vmem:[%s5861_s4 + $0x788] sm:$0xff]  ;;  %v491_v33 = vld [vmem:[%s5861_s4 + $0x70] sm:$0xff] }
 0x11b   :  { %v722_v11 = vld [vmem:[%s5861_s4 + $0x7a8] sm:$0xff]  ;;  %v725_v45 = vld [vmem:[%s5861_s4 + $0x7c0] sm:$0xff]  ;;  %v488_v37 = vld [vmem:[%s5861_s4 + $0x58] sm:$0xff] }
 0x11c   :  { %2118 = vmatmul.mubr.bf16.gmra.mrb[32].mxu0 %v4443_v41  ;;  %2264 = vmatmul.mubr.bf16.gmra.mrb[32].mxu1 %v4443_v41  ;;  %v729_v17 = vld [vmem:[%s5861_s4 + $0x7e0] sm:$0xff]  ;;  %v726_v53 = vld [vmem:[%s5861_s4 + $0x7c8] sm:$0xff]  ;;  %v492_v40 = vld [vmem:[%s5861_s4 + $0x78] sm:$0xff] }
 0x11d   :  { %2141 = vmatpush1.bf16.msra.mxu0 %v3544_v10  ;;  %2287 = vmatpush1.bf16.msra.mxu1 %v3546_v30  ;;  %v3592_v10 = vcombine.low %v701_v58, %v705_v59  ;;  %v3594_v30 = vcombine.low %v702_v60, %v706_v62  ;;  %v730_v61 = vld [vmem:[%s5861_s4 + $0x7e8] sm:$0xff]  ;;  %v495_v58 = vld [vmem:[%s5861_s4 + $0x90] sm:$0xff]  ;;  %v496_v60 = vld [vmem:[%s5861_s4 + $0x98] sm:$0xff] }
 0x11e   :  { %2142 = vmatprep.subr.bf16.mxu0 %v3553_v31  ;;  %2288 = vmatprep.subr.bf16.mxu1 %v3555_v32  ;;  %v3601_v31 = vcombine.high %v709_v6, %v713_v7  ;;  %v3603_v32 = vcombine.high %v710_v8, %v714_v9  ;;  %v499_v59 = vld [vmem:[%s5861_s4 + $0xb0] sm:$0xff]  ;;  %v500_v62 = vld [vmem:[%s5861_s4 + $0xb8] sm:$0xff] }
 0x11f   :  { %2160 = vmatprep.mubr.bf16.mxu0 %v4533_v19  ;;  %2306 = vmatprep.mubr.bf16.mxu1 %v4533_v19 }
 0x121   :  { %2143 = vmatpush1.bf16.msra.mxu0 %v3552_v12  ;;  %2289 = vmatpush1.bf16.msra.mxu1 %v3554_v14  ;;  %v3600_v12 = vcombine.low %v709_v6, %v713_v7  ;;  %v3602_v14 = vcombine.low %v710_v8, %v714_v9  ;;  %v503_v6 = vld [vmem:[%s5861_s4 + $0xd0] sm:$0xff]  ;;  %v504_v8 = vld [vmem:[%s5861_s4 + $0xd8] sm:$0xff] }
 0x122   :  { %2144 = vmatprep.subr.bf16.mxu0 %v3561_v15  ;;  %2290 = vmatprep.subr.bf16.mxu1 %v3563_v16  ;;  %v3609_v15 = vcombine.high %v717_v34, %v721_v35  ;;  %v3611_v16 = vcombine.high %v718_v36, %v722_v11  ;;  %v507_v7 = vld [vmem:[%s5861_s4 + $0xf0] sm:$0xff]  ;;  %v508_v9 = vld [vmem:[%s5861_s4 + $0xf8] sm:$0xff] }
 0x125   :  { %2145 = vmatpush1.bf16.msra.mxu0 %v3560_v13  ;;  %2291 = vmatpush1.bf16.msra.mxu1 %v3562_v47  ;;  %v3608_v13 = vcombine.low %v717_v34, %v721_v35  ;;  %v3610_v47 = vcombine.low %v718_v36, %v722_v11  ;;  %v511_v34 = vld [vmem:[%s5861_s4 + $0x110] sm:$0xff]  ;;  %v512_v36 = vld [vmem:[%s5861_s4 + $0x118] sm:$0xff] }
 0x126   :  { %2146 = vmatprep.subr.bf16.mxu0 %v3569_v48  ;;  %2292 = vmatprep.subr.bf16.mxu1 %v3571_v56  ;;  %v3617_v48 = vcombine.high %v725_v45, %v729_v17  ;;  %v3619_v56 = vcombine.high %v726_v53, %v730_v61  ;;  %v515_v35 = vld [vmem:[%s5861_s4 + $0x130] sm:$0xff]  ;;  %v516_v11 = vld [vmem:[%s5861_s4 + $0x138] sm:$0xff] }
 0x129   :  { %2147 = vmatpush1.bf16.msra.mxu0 %v3568_v23  ;;  %2293 = vmatpush1.bf16.msra.mxu1 %v3570_v24  ;;  %v3616_v23 = vcombine.low %v725_v45, %v729_v17  ;;  %v3618_v24 = vcombine.low %v726_v53, %v730_v61  ;;  %v519_v45 = vld [vmem:[%s5861_s4 + $0x150] sm:$0xff]  ;;  %v520_v53 = vld [vmem:[%s5861_s4 + $0x158] sm:$0xff] }
 0x12a   :  { %2148 = vmatprep.subr.bf16.mxu0 %v3577_v26  ;;  %2294 = vmatprep.subr.bf16.mxu1 %v3579_v27  ;;  %v3373_v26 = vcombine.high %v479_v63, %v483_v49  ;;  %v3375_v27 = vcombine.high %v480_v0, %v484_v18  ;;  %v523_v17 = vld [vmem:[%s5861_s4 + $0x170] sm:$0xff]  ;;  %v524_v61 = vld [vmem:[%s5861_s4 + $0x178] sm:$0xff] }
 0x12d   :  { %2149 = vmatpush1.bf16.msra.mxu0 %v3576_v44  ;;  %2295 = vmatpush1.bf16.msra.mxu1 %v3578_v46  ;;  %v3372_v44 = vcombine.low %v479_v63, %v483_v49  ;;  %v3374_v46 = vcombine.low %v480_v0, %v484_v18  ;;  %v527_v63 = vld [vmem:[%s5861_s4 + $0x190] sm:$0xff]  ;;  %v528_v0 = vld [vmem:[%s5861_s4 + $0x198] sm:$0xff] }
 0x12e   :  { %2150 = vmatprep.subr.bf16.mxu0 %v3585_v51  ;;  %2296 = vmatprep.subr.bf16.mxu1 %v3587_v54  ;;  %v3381_v51 = vcombine.high %v487_v29, %v491_v33  ;;  %v3383_v54 = vcombine.high %v488_v37, %v492_v40  ;;  %v531_v49 = vld [vmem:[%s5861_s4 + $0x1b0] sm:$0xff]  ;;  %v532_v18 = vld [vmem:[%s5861_s4 + $0x1b8] sm:$0xff] }
 0x131   :  { %2151 = vmatpush1.bf16.msra.mxu0 %v3584_v2  ;;  %2297 = vmatpush1.bf16.msra.mxu1 %v3586_v3  ;;  %v3380_v2 = vcombine.low %v487_v29, %v491_v33  ;;  %v3382_v3 = vcombine.low %v488_v37, %v492_v40  ;;  %v535_v29 = vld [vmem:[%s5861_s4 + $0x1d0] sm:$0xff]  ;;  %v536_v37 = vld [vmem:[%s5861_s4 + $0x1d8] sm:$0xff] }
 0x132   :  { %2152 = vmatprep.subr.bf16.mxu0 %v3593_v4  ;;  %2298 = vmatprep.subr.bf16.mxu1 %v3595_v5  ;;  %v3389_v4 = vcombine.high %v495_v58, %v499_v59  ;;  %v3391_v5 = vcombine.high %v496_v60, %v500_v62  ;;  %v539_v33 = vld [vmem:[%s5861_s4 + $0x1f0] sm:$0xff]  ;;  %v540_v40 = vld [vmem:[%s5861_s4 + $0x1f8] sm:$0xff] }
 0x135   :  { %2153 = vmatpush1.bf16.msra.mxu0 %v3592_v10  ;;  %2299 = vmatpush1.bf16.msra.mxu1 %v3594_v30  ;;  %v3388_v10 = vcombine.low %v495_v58, %v499_v59  ;;  %v3390_v30 = vcombine.low %v496_v60, %v500_v62  ;;  %v543_v58 = vld [vmem:[%s5861_s4 + $0x210] sm:$0xff]  ;;  %v544_v60 = vld [vmem:[%s5861_s4 + $0x218] sm:$0xff] }
 0x136   :  { %2154 = vmatprep.subr.bf16.mxu0 %v3601_v31  ;;  %2300 = vmatprep.subr.bf16.mxu1 %v3603_v32  ;;  %v3397_v31 = vcombine.high %v503_v6, %v507_v7  ;;  %v3399_v32 = vcombine.high %v504_v8, %v508_v9  ;;  %v547_v59 = vld [vmem:[%s5861_s4 + $0x230] sm:$0xff]  ;;  %v548_v62 = vld [vmem:[%s5861_s4 + $0x238] sm:$0xff] }
 0x139   :  { %2155 = vmatpush1.bf16.msra.mxu0 %v3600_v12  ;;  %2301 = vmatpush1.bf16.msra.mxu1 %v3602_v14  ;;  %v3396_v12 = vcombine.low %v503_v6, %v507_v7  ;;  %v3398_v14 = vcombine.low %v504_v8, %v508_v9  ;;  %v551_v6 = vld [vmem:[%s5861_s4 + $0x250] sm:$0xff]  ;;  %v556_v8 = vld [vmem:[%s5861_s4 + $0x278] sm:$0xff]  ;;  %v3436_v9 = vcombine.low %v543_v58, %v547_v59 }
 0x13a   :  { %2156 = vmatprep.subr.bf16.mxu0 %v3609_v15  ;;  %2302 = vmatprep.subr.bf16.mxu1 %v3611_v16  ;;  %v3405_v15 = vcombine.high %v511_v34, %v515_v35  ;;  %v3407_v16 = vcombine.high %v512_v36, %v516_v11  ;;  %v555_v7 = vld [vmem:[%s5861_s4 + $0x270] sm:$0xff] }
 0x13d   :  { %2157 = vmatpush1.bf16.msra.mxu0 %v3608_v13  ;;  %2303 = vmatpush1.bf16.msra.mxu1 %v3610_v47  ;;  %v3404_v13 = vcombine.low %v511_v34, %v515_v35  ;;  %v3406_v47 = vcombine.low %v512_v36, %v516_v11  ;;  %v563_v34 = vld [vmem:[%s5861_s4 + $0x2b0] sm:$0xff]  ;;  %v560_v35 = vld [vmem:[%s5861_s4 + $0x298] sm:$0xff]  ;;  %v3444_v11 = vcombine.low %v551_v6, %v555_v7 }
 0x13e   :  { %2158 = vmatprep.subr.bf16.mxu0 %v3617_v48  ;;  %2304 = vmatprep.subr.bf16.mxu1 %v3619_v56  ;;  %v3413_v48 = vcombine.high %v519_v45, %v523_v17  ;;  %v3415_v56 = vcombine.high %v520_v53, %v524_v61  ;;  %v564_v36 = vld [vmem:[%s5861_s4 + $0x2b8] sm:$0xff] }
 0x141   :  { %2159 = vmatpush1.bf16.msra.mxu0 %v3616_v23  ;;  %2305 = vmatpush1.bf16.msra.mxu1 %v3618_v24  ;;  %v3412_v23 = vcombine.low %v519_v45, %v523_v17  ;;  %v3414_v24 = vcombine.low %v520_v53, %v524_v61  ;;  %v571_v45 = vld [vmem:[%s5861_s4 + $0x2f0] sm:$0xff]  ;;  %v568_v17 = vld [vmem:[%s5861_s4 + $0x2d8] sm:$0xff] }
 0x142   :  { %2347 = vmatprep.subr.bf16.mxu0 %v3373_v26  ;;  %2493 = vmatprep.subr.bf16.mxu1 %v3375_v27  ;;  %v3421_v26 = vcombine.high %v527_v63, %v531_v49  ;;  %v3423_v27 = vcombine.high %v528_v0, %v532_v18  ;;  %v572_v53 = vld [vmem:[%s5861_s4 + $0x2f8] sm:$0xff] }
 0x144   :  { %2161 = vmatmul.mubr.bf16.vlgmr.msra.gmra.mrb[20].mxu0 %v4520_v55  ;;  %2307 = vmatmul.mubr.bf16.vlgmr.msra.gmra.mrb[20].mxu1 %v4520_v55 }
 0x145   :  { %2170 = vmatprep.mubr.bf16.mxu0 %v4541_v1  ;;  %2316 = vmatprep.mubr.bf16.mxu1 %v4541_v1 }
 0x146   :  { %2348 = vmatpush1.bf16.msra.mxu0 %v3372_v44  ;;  %2494 = vmatpush1.bf16.msra.mxu1 %v3374_v46  ;;  %v3420_v44 = vcombine.low %v527_v63, %v531_v49  ;;  %v3422_v46 = vcombine.low %v528_v0, %v532_v18  ;;  %v579_v63 = vld [vmem:[%s5861_s4 + $0x330] sm:$0xff]  ;;  %v576_v49 = vld [vmem:[%s5861_s4 + $0x318] sm:$0xff] }
 0x147   :  { %2349 = vmatprep.subr.bf16.mxu0 %v3381_v51  ;;  %2495 = vmatprep.subr.bf16.mxu1 %v3383_v54  ;;  %v3429_v51 = vcombine.high %v535_v29, %v539_v33  ;;  %v3431_v54 = vcombine.high %v536_v37, %v540_v40  ;;  %v580_v0 = vld [vmem:[%s5861_s4 + $0x338] sm:$0xff] }
 0x14a   :  { %2350 = vmatpush1.bf16.msra.mxu0 %v3380_v2  ;;  %2496 = vmatpush1.bf16.msra.mxu1 %v3382_v3  ;;  %v3428_v2 = vcombine.low %v535_v29, %v539_v33  ;;  %v3430_v3 = vcombine.low %v536_v37, %v540_v40  ;;  %v587_v29 = vld [vmem:[%s5861_s4 + $0x370] sm:$0xff]  ;;  %v584_v33 = vld [vmem:[%s5861_s4 + $0x358] sm:$0xff] }
 0x14b   :  { %2351 = vmatprep.subr.bf16.mxu0 %v3389_v4  ;;  %2497 = vmatprep.subr.bf16.mxu1 %v3391_v5  ;;  %v3437_v4 = vcombine.high %v543_v58, %v547_v59  ;;  %v3439_v5 = vcombine.high %v544_v60, %v548_v62  ;;  %v588_v37 = vld [vmem:[%s5861_s4 + $0x378] sm:$0xff]  ;;  %v595_v58 = vld [vmem:[%s5861_s4 + $0x3b0] sm:$0xff] }
 0x14c   :  { %2171 = vmatmul.mubr.bf16.gmra.mrb[24].mxu0 %v4535_v20  ;;  %2317 = vmatmul.mubr.bf16.gmra.mrb[24].mxu1 %v4535_v20  ;;  %v592_v59 = vld [vmem:[%s5861_s4 + $0x398] sm:$0xff] }
 0x14d   :  { %2180 = vmatprep.mubr.bf16.mxu0 %v4543_v21  ;;  %2326 = vmatprep.mubr.bf16.mxu1 %v4543_v21 }
 0x14e   :  { %2352 = vmatpush1.bf16.msra.mxu0 %v3388_v10  ;;  %2498 = vmatpush1.bf16.msra.mxu1 %v3390_v30  ;;  %v3438_v10 = vcombine.low %v544_v60, %v548_v62  ;;  %v3445_v30 = vcombine.high %v551_v6, %v555_v7  ;;  %v596_v60 = vld [vmem:[%s5861_s4 + $0x3b8] sm:$0xff]  ;;  %v603_v6 = vld [vmem:[%s5861_s4 + $0x3f0] sm:$0xff] }
 0x14f   :  { %2353 = vmatprep.subr.bf16.mxu0 %v3397_v31  ;;  %2499 = vmatprep.subr.bf16.mxu1 %v3399_v32  ;;  %v559_v32 = vld [vmem:[%s5861_s4 + $0x290] sm:$0xff]  ;;  %v600_v7 = vld [vmem:[%s5861_s4 + $0x3d8] sm:$0xff] }
 0x150   :  { %v3452_v61 = vcombine.low %v559_v32, %v563_v34 }
 0x152   :  { %2354 = vmatpush1.bf16.msra.mxu0 %v3396_v12  ;;  %2500 = vmatpush1.bf16.msra.mxu1 %v3398_v14  ;;  %v3453_v14 = vcombine.high %v559_v32, %v563_v34  ;;  %v611_v32 = vld [vmem:[%s5861_s4 + $0x430] sm:$0xff]  ;;  %v608_v34 = vld [vmem:[%s5861_s4 + $0x418] sm:$0xff] }
 0x153   :  { %2355 = vmatprep.subr.bf16.mxu0 %v3405_v15  ;;  %2501 = vmatprep.subr.bf16.mxu1 %v3407_v16  ;;  %v3455_v15 = vcombine.high %v560_v35, %v564_v36  ;;  %v567_v16 = vld [vmem:[%s5861_s4 + $0x2d0] sm:$0xff] }
 0x154   :  { %2181 = vmatmul.mubr.bf16.gmra.mrb[28].mxu0 %v4537_v57  ;;  %2327 = vmatmul.mubr.bf16.gmra.mrb[28].mxu1 %v4537_v57  ;;  %v3460_v18 = vcombine.low %v567_v16, %v571_v45 }
 0x155   :  { %2190 = vmatprep.mubr.bf16.mxu0 %v4551_v25  ;;  %2336 = vmatprep.mubr.bf16.mxu1 %v4551_v25 }
 0x156   :  { %2356 = vmatpush1.bf16.msra.mxu0 %v3404_v13  ;;  %2502 = vmatpush1.bf16.msra.mxu1 %v3406_v47  ;;  %v3454_v13 = vcombine.low %v560_v35, %v564_v36  ;;  %v3461_v47 = vcombine.high %v567_v16, %v571_v45  ;;  %v612_v35 = vld [vmem:[%s5861_s4 + $0x438] sm:$0xff]  ;;  %v619_v16 = vld [vmem:[%s5861_s4 + $0x470] sm:$0xff] }
 0x157   :  { %2357 = vmatprep.subr.bf16.mxu0 %v3413_v48  ;;  %2503 = vmatprep.subr.bf16.mxu1 %v3415_v56  ;;  %v3463_v48 = vcombine.high %v568_v17, %v572_v53  ;;  %v575_v56 = vld [vmem:[%s5861_s4 + $0x310] sm:$0xff]  ;;  %v616_v45 = vld [vmem:[%s5861_s4 + $0x458] sm:$0xff] }
 0x158   :  { %v3468_v40 = vcombine.low %v575_v56, %v579_v63 }
 0x15a   :  { %2358 = vmatpush1.bf16.msra.mxu0 %v3412_v23  ;;  %2504 = vmatpush1.bf16.msra.mxu1 %v3414_v24  ;;  %v3462_v23 = vcombine.low %v568_v17, %v572_v53  ;;  %v3469_v24 = vcombine.high %v575_v56, %v579_v63  ;;  %v620_v17 = vld [vmem:[%s5861_s4 + $0x478] sm:$0xff]  ;;  %v627_v56 = vld [vmem:[%s5861_s4 + $0x4b0] sm:$0xff] }
 0x15b   :  { %2359 = vmatprep.subr.bf16.mxu0 %v3421_v26  ;;  %2505 = vmatprep.subr.bf16.mxu1 %v3423_v27  ;;  %v3471_v26 = vcombine.high %v576_v49, %v580_v0  ;;  %v583_v27 = vld [vmem:[%s5861_s4 + $0x350] sm:$0xff]  ;;  %v624_v63 = vld [vmem:[%s5861_s4 + $0x498] sm:$0xff] }
 0x15c   :  { %2191 = vmatmul.mubr.bf16.gmra.mrb[32].mxu0 %v4545_v22  ;;  %2337 = vmatmul.mubr.bf16.gmra.mrb[32].mxu1 %v4545_v22  ;;  %v3476_v62 = vcombine.low %v583_v27, %v587_v29 }
 0x15d   :  { %2379 = vmatprep.mubr.bf16.mxu0 %v4445_v42  ;;  %2525 = vmatprep.mubr.bf16.mxu1 %v4445_v42  ;;  %v552_v42 = vld [vmem:[%s5861_s4 + $0x258] sm:$0xff] }
 0x15e   :  { %2360 = vmatpush1.bf16.msra.mxu0 %v3420_v44  ;;  %2506 = vmatpush1.bf16.msra.mxu1 %v3422_v46  ;;  %v3447_v31 = vcombine.high %v552_v42, %v556_v8  ;;  %v3446_v12 = vcombine.low %v552_v42, %v556_v8  ;;  %v3470_v44 = vcombine.low %v576_v49, %v580_v0  ;;  %v604_v42 = vld [vmem:[%s5861_s4 + $0x3f8] sm:$0xff] }
 0x15f   :  { %2361 = vmatprep.subr.bf16.mxu0 %v3429_v51  ;;  %2507 = vmatprep.subr.bf16.mxu1 %v3431_v54  ;;  %v3477_v46 = vcombine.high %v583_v27, %v587_v29  ;;  %v3479_v51 = vcombine.high %v584_v33, %v588_v37  ;;  %v591_v54 = vld [vmem:[%s5861_s4 + $0x390] sm:$0xff]  ;;  %v628_v49 = vld [vmem:[%s5861_s4 + $0x4b8] sm:$0xff] }
 0x160   :  { %v3484_v8 = vcombine.low %v591_v54, %v595_v58  ;;  %v632_v27 = vld [vmem:[%s5861_s4 + $0x4d8] sm:$0xff] }
 0x162   :  { %2362 = vmatpush1.bf16.msra.mxu0 %v3428_v2  ;;  %2508 = vmatpush1.bf16.msra.mxu1 %v3430_v3  ;;  %v3478_v2 = vcombine.low %v584_v33, %v588_v37  ;;  %v3485_v3 = vcombine.high %v591_v54, %v595_v58  ;;  %v3518_v33 = vcombine.low %v624_v63, %v628_v49  ;;  %v644_v54 = vld [vmem:[%s5861_s4 + $0x538] sm:$0xff] }
 0x163   :  { %2363 = vmatprep.subr.bf16.mxu0 %v3437_v4  ;;  %2509 = vmatprep.subr.bf16.mxu1 %v3439_v5  ;;  %v3487_v4 = vcombine.high %v592_v59, %v596_v60  ;;  %v599_v5 = vld [vmem:[%s5861_s4 + $0x3d0] sm:$0xff] }
 0x164   :  { %v3492_v36 = vcombine.low %v599_v5, %v603_v6 }
 0x166   :  { %2364 = vmatpush1.bf16.msra.mxu0 %v3436_v9  ;;  %2510 = vmatpush1.bf16.msra.mxu1 %v3438_v10  ;;  %v3486_v9 = vcombine.low %v592_v59, %v596_v60  ;;  %v3493_v10 = vcombine.high %v599_v5, %v603_v6 }
 0x167   :  { %2365 = vmatprep.subr.bf16.mxu0 %v3445_v30  ;;  %2511 = vmatprep.subr.bf16.mxu1 %v3447_v31  ;;  %v3495_v30 = vcombine.high %v600_v7, %v604_v42  ;;  %v607_v31 = vld [vmem:[%s5861_s4 + $0x410] sm:$0xff] }
 0x168   :  { %v3500_v53 = vcombine.low %v607_v31, %v611_v32 }
 0x16a   :  { %2366 = vmatpush1.bf16.msra.mxu0 %v3444_v11  ;;  %2512 = vmatpush1.bf16.msra.mxu1 %v3446_v12  ;;  %v3494_v11 = vcombine.low %v600_v7, %v604_v42  ;;  %v3501_v12 = vcombine.high %v607_v31, %v611_v32  ;;  %v655_v42 = vld [vmem:[%s5861_s4 + $0x590] sm:$0xff] }
 0x16b   :  { %2367 = vmatprep.subr.bf16.mxu0 %v3453_v14  ;;  %2513 = vmatprep.subr.bf16.mxu1 %v3455_v15  ;;  %v3503_v14 = vcombine.high %v608_v34, %v612_v35  ;;  %v615_v15 = vld [vmem:[%s5861_s4 + $0x450] sm:$0xff] }
 0x16c   :  { %v3508_v0 = vcombine.low %v615_v15, %v619_v16 }
 0x16e   :  { %2368 = vmatpush1.bf16.msra.mxu0 %v3452_v61  ;;  %2514 = vmatpush1.bf16.msra.mxu1 %v3454_v13  ;;  %v3502_v61 = vcombine.low %v608_v34, %v612_v35  ;;  %v3509_v13 = vcombine.high %v615_v15, %v619_v16  ;;  %v663_v34 = vld [vmem:[%s5861_s4 + $0x5d0] sm:$0xff] }
 0x16f   :  { %2369 = vmatprep.subr.bf16.mxu0 %v3461_v47  ;;  %2515 = vmatprep.subr.bf16.mxu1 %v3463_v48  ;;  %v3511_v47 = vcombine.high %v616_v45, %v620_v17  ;;  %v623_v48 = vld [vmem:[%s5861_s4 + $0x490] sm:$0xff] }
 0x170   :  { %v3516_v29 = vcombine.low %v623_v48, %v627_v56  ;;  %v667_v35 = vld [vmem:[%s5861_s4 + $0x5f0] sm:$0xff] }
 0x171   :  { %v671_v16 = vld [vmem:[%s5861_s4 + $0x610] sm:$0xff] }
 0x172   :  { %2370 = vmatpush1.bf16.msra.mxu0 %v3460_v18  ;;  %2516 = vmatpush1.bf16.msra.mxu1 %v3462_v23  ;;  %v3510_v18 = vcombine.low %v616_v45, %v620_v17  ;;  %v3517_v23 = vcombine.high %v623_v48, %v627_v56  ;;  %v675_v45 = vld [vmem:[%s5861_s4 + $0x630] sm:$0xff]  ;;  %v672_v17 = vld [vmem:[%s5861_s4 + $0x618] sm:$0xff] }
 0x173   :  { %2371 = vmatprep.subr.bf16.mxu0 %v3469_v24  ;;  %2517 = vmatprep.subr.bf16.mxu1 %v3471_v26  ;;  %v631_v24 = vld [vmem:[%s5861_s4 + $0x4d0] sm:$0xff] }
 0x174   :  { %v635_v26 = vld [vmem:[%s5861_s4 + $0x4f0] sm:$0xff] }
 0x175   :  { %v3525_v37 = vcombine.high %v631_v24, %v635_v26  ;;  %v3524_v58 = vcombine.low %v631_v24, %v635_v26  ;;  %v679_v48 = vld [vmem:[%s5861_s4 + $0x650] sm:$0xff]  ;;  %v688_v26 = vld [vmem:[%s5861_s4 + $0x698] sm:$0xff] }
 0x176   :  { %2372 = vmatpush1.bf16.msra.mxu0 %v3468_v40  ;;  %2518 = vmatpush1.bf16.msra.mxu1 %v3470_v44  ;;  %v639_v44 = vld [vmem:[%s5861_s4 + $0x510] sm:$0xff] }
 0x177   :  { %2373 = vmatprep.subr.bf16.mxu0 %v3477_v46  ;;  %2519 = vmatprep.subr.bf16.mxu1 %v3479_v51  ;;  %v643_v46 = vld [vmem:[%s5861_s4 + $0x530] sm:$0xff]  ;;  %v640_v51 = vld [vmem:[%s5861_s4 + $0x518] sm:$0xff] }
 0x178   :  { %v3533_v60 = vcombine.high %v639_v44, %v643_v46  ;;  %v3534_v5 = vcombine.low %v640_v51, %v644_v54  ;;  %v683_v56 = vld [vmem:[%s5861_s4 + $0x670] sm:$0xff] }
 0x179   :  { %v691_v24 = vld [vmem:[%s5861_s4 + $0x6b0] sm:$0xff] }
 0x17a   :  { %2374 = vmatpush1.bf16.msra.mxu0 %v3476_v62  ;;  %2520 = vmatpush1.bf16.msra.mxu1 %v3478_v2  ;;  %v647_v62 = vld [vmem:[%s5861_s4 + $0x550] sm:$0xff] }
 0x17b   :  { %2375 = vmatprep.subr.bf16.mxu0 %v3485_v3  ;;  %2521 = vmatprep.subr.bf16.mxu1 %v3487_v4  ;;  %v651_v2 = vld [vmem:[%s5861_s4 + $0x570] sm:$0xff]  ;;  %v648_v3 = vld [vmem:[%s5861_s4 + $0x558] sm:$0xff]  ;;  %v3532_v4 = vcombine.low %v639_v44, %v643_v46 }
 0x17c   :  { %v3541_v6 = vcombine.high %v647_v62, %v651_v2  ;;  %v699_v44 = vld [vmem:[%s5861_s4 + $0x6f0] sm:$0xff]  ;;  %v696_v46 = vld [vmem:[%s5861_s4 + $0x6d8] sm:$0xff] }
 0x17e   :  { %2376 = vmatpush1.bf16.msra.mxu0 %v3484_v8  ;;  %2522 = vmatpush1.bf16.msra.mxu1 %v3486_v9  ;;  %v659_v8 = vld [vmem:[%s5861_s4 + $0x5b0] sm:$0xff]  ;;  %v656_v9 = vld [vmem:[%s5861_s4 + $0x598] sm:$0xff] }
 0x17f   :  { %2377 = vmatprep.subr.bf16.mxu0 %v3493_v10  ;;  %2523 = vmatprep.subr.bf16.mxu1 %v3495_v30  ;;  %v660_v10 = vld [vmem:[%s5861_s4 + $0x5b8] sm:$0xff]  ;;  %v3540_v30 = vcombine.low %v647_v62, %v651_v2  ;;  %v3549_v32 = vcombine.high %v655_v42, %v659_v8  ;;  %v707_v62 = vld [vmem:[%s5861_s4 + $0x730] sm:$0xff] }
 0x180   :  { %v704_v2 = vld [vmem:[%s5861_s4 + $0x718] sm:$0xff] }
 0x182   :  { %2378 = vmatpush1.bf16.msra.mxu0 %v3492_v36  ;;  %2524 = vmatpush1.bf16.msra.mxu1 %v3494_v11  ;;  %v664_v36 = vld [vmem:[%s5861_s4 + $0x5d8] sm:$0xff]  ;;  %v3548_v11 = vcombine.low %v655_v42, %v659_v8  ;;  %v715_v42 = vld [vmem:[%s5861_s4 + $0x770] sm:$0xff] }
 0x183   :  { %2420 = vmatprep.subr.bf16.mxu0 %v3501_v12  ;;  %2566 = vmatprep.subr.bf16.mxu1 %v3503_v14  ;;  %v3550_v12 = vcombine.low %v656_v9, %v660_v10  ;;  %v3557_v14 = vcombine.high %v663_v34, %v667_v35  ;;  %v712_v8 = vld [vmem:[%s5861_s4 + $0x758] sm:$0xff] }
 0x185   :  { %2380 = vmatmul.mubr.bf16.vlgmr.msra.gmra.mrb[36].mxu0 %v4424_v28  ;;  %2526 = vmatmul.mubr.bf16.vlgmr.msra.gmra.mrb[36].mxu1 %v4424_v28  ;;  %v3519_v28 = vcombine.high %v624_v63, %v628_v49  ;;  %v680_v63 = vld [vmem:[%s5861_s4 + $0x658] sm:$0xff]  ;;  %v3564_v49 = vcombine.low %v671_v16, %v675_v45 }
 0x186   :  { %2389 = vmatprep.mubr.bf16.mxu0 %v4447_v43  ;;  %2421 = vmatpush1.bf16.msra.mxu0 %v3500_v53  ;;  %v676_v53 = vld [vmem:[%s5861_s4 + $0x638] sm:$0xff] }
 0x187   :  { %2535 = vmatprep.mubr.bf16.mxu1 %v4447_v43  ;;  %2567 = vmatpush1.bf16.msra.mxu1 %v3502_v61  ;;  %v636_v43 = vld [vmem:[%s5861_s4 + $0x4f8] sm:$0xff]  ;;  %v3556_v61 = vcombine.low %v663_v34, %v667_v35  ;;  %v723_v34 = vld [vmem:[%s5861_s4 + $0x7b0] sm:$0xff] }
 0x188   :  { %2422 = vmatprep.subr.bf16.mxu0 %v3509_v13  ;;  %2568 = vmatprep.subr.bf16.mxu1 %v3511_v47  ;;  %v3527_v40 = vcombine.high %v632_v27, %v636_v43  ;;  %v3526_v59 = vcombine.low %v632_v27, %v636_v43  ;;  %v3565_v47 = vcombine.high %v671_v16, %v675_v45  ;;  %v692_v27 = vld [vmem:[%s5861_s4 + $0x6b8] sm:$0xff]  ;;  %v731_v16 = vld [vmem:[%s5861_s4 + $0x7f0] sm:$0xff] }
 0x189   :  { %v3572_v43 = vcombine.low %v679_v48, %v683_v56  ;;  %v720_v35 = vld [vmem:[%s5861_s4 + $0x798] sm:$0xff] }
 0x18a   :  { %2423 = vmatpush1.bf16.msra.mxu0 %v3508_v0  ;;  %v3566_v0 = vcombine.low %v672_v17, %v676_v53  ;;  %v728_v45 = vld [vmem:[%s5861_s4 + $0x7d8] sm:$0xff] }
 0x18b   :  { %2569 = vmatpush1.bf16.msra.mxu1 %v3510_v18  ;;  %2424 = vmatprep.subr.bf16.mxu0 %v3517_v23  ;;  %v3573_v18 = vcombine.high %v679_v48, %v683_v56 }
 0x18c   :  { %2570 = vmatprep.subr.bf16.mxu1 %v3519_v28  ;;  %v687_v28 = vld [vmem:[%s5861_s4 + $0x690] sm:$0xff] }
 0x18d   :  { %2390 = vmatmul.mubr.bf16.gmra.mrb[40].mxu0 %v4439_v38  ;;  %2536 = vmatmul.mubr.bf16.gmra.mrb[40].mxu1 %v4439_v38  ;;  %v3535_v38 = vcombine.high %v640_v51, %v644_v54  ;;  %v700_v51 = vld [vmem:[%s5861_s4 + $0x6f8] sm:$0xff]  ;;  %v3580_v54 = vcombine.low %v687_v28, %v691_v24 }
 0x18e   :  { %2399 = vmatprep.mubr.bf16.mxu0 %v4459_v50  ;;  %2425 = vmatpush1.bf16.msra.mxu0 %v3516_v29 }
 0x18f   :  { %2545 = vmatprep.mubr.bf16.mxu1 %v4459_v50  ;;  %2571 = vmatpush1.bf16.msra.mxu1 %v3518_v33  ;;  %v652_v50 = vld [vmem:[%s5861_s4 + $0x578] sm:$0xff]  ;;  %v3581_v33 = vcombine.high %v687_v28, %v691_v24 }
 0x190   :  { %2426 = vmatprep.subr.bf16.mxu0 %v3525_v37  ;;  %2572 = vmatprep.subr.bf16.mxu1 %v3527_v40  ;;  %v3543_v7 = vcombine.high %v648_v3, %v652_v50  ;;  %v3542_v31 = vcombine.low %v648_v3, %v652_v50  ;;  %v3583_v37 = vcombine.high %v688_v26, %v692_v27  ;;  %v695_v40 = vld [vmem:[%s5861_s4 + $0x6d0] sm:$0xff]  ;;  %v708_v3 = vld [vmem:[%s5861_s4 + $0x738] sm:$0xff] }
 0x191   :  { %v3588_v50 = vcombine.low %v695_v40, %v699_v44 }
 0x192   :  { %2427 = vmatpush1.bf16.msra.mxu0 %v3524_v58  ;;  %v3582_v58 = vcombine.low %v688_v26, %v692_v27 }
 0x193   :  { %2573 = vmatpush1.bf16.msra.mxu1 %v3526_v59  ;;  %2428 = vmatprep.subr.bf16.mxu0 %v3533_v60  ;;  %v3589_v59 = vcombine.high %v695_v40, %v699_v44  ;;  %v3591_v60 = vcombine.high %v696_v46, %v700_v51 }
 0x194   :  { %2574 = vmatprep.subr.bf16.mxu1 %v3535_v38  ;;  %v703_v38 = vld [vmem:[%s5861_s4 + $0x710] sm:$0xff] }
 0x195   :  { %2400 = vmatmul.mubr.bf16.gmra.mrb[44].mxu0 %v4441_v39  ;;  %2546 = vmatmul.mubr.bf16.gmra.mrb[44].mxu1 %v4441_v39  ;;  %v3551_v39 = vcombine.high %v656_v9, %v660_v10  ;;  %v716_v9 = vld [vmem:[%s5861_s4 + $0x778] sm:$0xff]  ;;  %v3596_v10 = vcombine.low %v703_v38, %v707_v62 }
 0x196   :  { %2409 = vmatprep.mubr.bf16.mxu0 %v4466_v52  ;;  %2429 = vmatpush1.bf16.msra.mxu0 %v3532_v4  ;;  %v3590_v4 = vcombine.low %v696_v46, %v700_v51 }
 0x197   :  { %2555 = vmatprep.mubr.bf16.mxu1 %v4466_v52  ;;  %2575 = vmatpush1.bf16.msra.mxu1 %v3534_v5  ;;  %v668_v52 = vld [vmem:[%s5861_s4 + $0x5f8] sm:$0xff]  ;;  %v3597_v5 = vcombine.high %v703_v38, %v707_v62 }
 0x198   :  { %2430 = vmatprep.subr.bf16.mxu0 %v3541_v6  ;;  %2576 = vmatprep.subr.bf16.mxu1 %v3543_v7  ;;  %v3559_v15 = vcombine.high %v664_v36, %v668_v52  ;;  %v3558_v13 = vcombine.low %v664_v36, %v668_v52  ;;  %v3599_v6 = vcombine.high %v704_v2, %v708_v3  ;;  %v711_v7 = vld [vmem:[%s5861_s4 + $0x750] sm:$0xff]  ;;  %v724_v36 = vld [vmem:[%s5861_s4 + $0x7b8] sm:$0xff] }
 0x199   :  { %v3604_v52 = vcombine.low %v711_v7, %v715_v42 }
 0x19a   :  { %2431 = vmatpush1.bf16.msra.mxu0 %v3540_v30  ;;  %v3598_v30 = vcombine.low %v704_v2, %v708_v3  ;;  %v735_v2 = vlaneseq }
 0x19b   :  { %2577 = vmatpush1.bf16.msra.mxu1 %v3542_v31  ;;  %2432 = vmatprep.subr.bf16.mxu0 %v3549_v32  ;;  %v3605_v31 = vcombine.high %v711_v7, %v715_v42  ;;  %v3607_v32 = vcombine.high %v712_v8, %v716_v9 }
 0x19c   :  { %2578 = vmatprep.subr.bf16.mxu1 %v3551_v39  ;;  %v719_v39 = vld [vmem:[%s5861_s4 + $0x790] sm:$0xff]  ;;  %v5165_v3 = vshrl.u32 %v735_v2, 7 }
 0x19d   :  { %2410 = vmatmul.mubr.bf16.gmra.mrb[48].mxu0 %v4443_v41  ;;  %2556 = vmatmul.mubr.bf16.gmra.mrb[48].mxu1 %v4443_v41  ;;  %v3567_v41 = vcombine.high %v672_v17, %v676_v53  ;;  %v732_v17 = vld [vmem:[%s5861_s4 + $0x7f8] sm:$0xff]  ;;  %v3612_v53 = vcombine.low %v719_v39, %v723_v34 }
 0x19e   :  { %2433 = vmatpush1.bf16.msra.mxu0 %v3548_v11  ;;  %2452 = vmatprep.mubr.bf16.mxu0 %v4533_v19  ;;  %v3606_v11 = vcombine.low %v712_v8, %v716_v9  ;;  %v3622_v48 = vcombine.low %v728_v45, %v732_v17  ;;  %v749_v7 = vsub.s32 3, %v5165_v3 }
 0x19f   :  { %2579 = vmatpush1.bf16.msra.mxu1 %v3550_v12  ;;  %2598 = vmatprep.mubr.bf16.mxu1 %v4533_v19  ;;  %v684_v19 = vld [vmem:[%s5861_s4 + $0x678] sm:$0xff]  ;;  %v3613_v12 = vcombine.high %v719_v39, %v723_v34 }
 0x1a0   :  { %2434 = vmatprep.subr.bf16.mxu0 %v3557_v14  ;;  %2580 = vmatprep.subr.bf16.mxu1 %v3559_v15  ;;  %v3575_v23 = vcombine.high %v680_v63, %v684_v19  ;;  %v3574_v29 = vcombine.low %v680_v63, %v684_v19  ;;  %v3615_v14 = vcombine.high %v720_v35, %v724_v36  ;;  %v727_v15 = vld [vmem:[%s5861_s4 + $0x7d0] sm:$0xff] }
 0x1a2   :  { %2435 = vmatpush1.bf16.msra.mxu0 %v3556_v61  ;;  %v3614_v61 = vcombine.low %v720_v35, %v724_v36 }
 0x1a3   :  { %2581 = vmatpush1.bf16.msra.mxu1 %v3558_v13  ;;  %2436 = vmatprep.subr.bf16.mxu0 %v3565_v47  ;;  %v3621_v13 = vcombine.high %v727_v15, %v731_v16  ;;  %v3623_v47 = vcombine.high %v728_v45, %v732_v17 }
 0x1a4   :  { %2582 = vmatprep.subr.bf16.mxu1 %v3567_v41  ;;  %v3620_v41 = vcombine.low %v727_v15, %v731_v16 }
 0x1a6   :  { %2437 = vmatpush1.bf16.msra.mxu0 %v3564_v49 }
 0x1a7   :  { %2583 = vmatpush1.bf16.msra.mxu1 %v3566_v0  ;;  %2438 = vmatprep.subr.bf16.mxu0 %v3573_v18 }
 0x1a8   :  { %2584 = vmatprep.subr.bf16.mxu1 %v3575_v23 }
 0x1aa   :  { %2439 = vmatpush1.bf16.msra.mxu0 %v3572_v43 }
 0x1ab   :  { %2585 = vmatpush1.bf16.msra.mxu1 %v3574_v29  ;;  %2440 = vmatprep.subr.bf16.mxu0 %v3581_v33 }
 0x1ac   :  { %2586 = vmatprep.subr.bf16.mxu1 %v3583_v37 }
 0x1ae   :  { %2441 = vmatpush1.bf16.msra.mxu0 %v3580_v54 }
 0x1af   :  { %2587 = vmatpush1.bf16.msra.mxu1 %v3582_v58  ;;  %2442 = vmatprep.subr.bf16.mxu0 %v3589_v59 }
 0x1b0   :  { %2588 = vmatprep.subr.bf16.mxu1 %v3591_v60 }
 0x1b2   :  { %2443 = vmatpush1.bf16.msra.mxu0 %v3588_v50  ;;  %v737_v50 = vsub.s32 0, %v5165_v3 }
 0x1b3   :  { %2589 = vmatpush1.bf16.msra.mxu1 %v3590_v4  ;;  %2444 = vmatprep.subr.bf16.mxu0 %v3597_v5  ;;  %v5171_v4 = vld [vmem:[%s5862_s5] sm:$0xff]  ;;  %v745_v5 = vsub.s32 2, %v5165_v3 }
 0x1b4   :  { %2590 = vmatprep.subr.bf16.mxu1 %v3599_v6  ;;  %v741_v6 = vsub.s32 1, %v5165_v3  ;;  %v5177_v42 = vrot.slane %v5171_v4, %v737_v50 }
 0x1b5   :  { %v5180_v8 = vrot.slane %v5171_v4, %v745_v5 }
 0x1b6   :  { %2445 = vmatpush1.bf16.msra.mxu0 %v3596_v10  ;;  %v5183_v9 = vrot.slane %v5171_v4, %v741_v6  ;;  %v5186_v10 = vrot.slane %v5171_v4, %v749_v7 }
 0x1b7   :  { %2591 = vmatpush1.bf16.msra.mxu1 %v3598_v30  ;;  %2446 = vmatprep.subr.bf16.mxu0 %v3605_v31 }
 0x1b8   :  { %2592 = vmatprep.subr.bf16.mxu1 %v3607_v32 }
 0x1ba   :  { %2447 = vmatpush1.bf16.msra.mxu0 %v3604_v52 }
 0x1bb   :  { %2593 = vmatpush1.bf16.msra.mxu1 %v3606_v11  ;;  %2448 = vmatprep.subr.bf16.mxu0 %v3613_v12 }
 0x1bc   :  { %2594 = vmatprep.subr.bf16.mxu1 %v3615_v14 }
 0x1be   :  { %2449 = vmatpush1.bf16.msra.mxu0 %v3612_v53 }
 0x1bf   :  { %2595 = vmatpush1.bf16.msra.mxu1 %v3614_v61  ;;  %2450 = vmatprep.subr.bf16.mxu0 %v3621_v13 }
 0x1c0   :  { %2596 = vmatprep.subr.bf16.mxu1 %v3623_v47 }
 0x1c2   :  { %2451 = vmatpush1.bf16.msra.mxu0 %v3620_v41 }
 0x1c3   :  { %2597 = vmatpush1.bf16.msra.mxu1 %v3622_v48 }
 0x1c5   :  { %2453 = vmatmul.mubr.bf16.vlgmr.msra.gmra.mrb[36].mxu0 %v4520_v55 }
 0x1c6   :  { %2599 = vmatmul.mubr.bf16.vlgmr.msra.gmra.mrb[36].mxu1 %v4520_v55  ;;  %2462 = vmatprep.mubr.bf16.mxu0 %v4541_v1 }
 0x1c7   :  { %2608 = vmatprep.mubr.bf16.mxu1 %v4541_v1 }
 0x1cd   :  { %2463 = vmatmul.mubr.bf16.gmra.mrb[40].mxu0 %v4535_v20 }
 0x1ce   :  { %2609 = vmatmul.mubr.bf16.gmra.mrb[40].mxu1 %v4535_v20  ;;  %2472 = vmatprep.mubr.bf16.mxu0 %v4543_v21 }
 0x1cf   :  { %2618 = vmatprep.mubr.bf16.mxu1 %v4543_v21 }
 0x1d5   :  { %2473 = vmatmul.mubr.bf16.gmra.mrb[44].mxu0 %v4537_v57 }
 0x1d6   :  { %2619 = vmatmul.mubr.bf16.gmra.mrb[44].mxu1 %v4537_v57  ;;  %2482 = vmatprep.mubr.bf16.mxu0 %v4551_v25 }
 0x1d7   :  { %2628 = vmatprep.mubr.bf16.mxu1 %v4551_v25 }
 0x1dd   :  { %2483 = vmatmul.mubr.bf16.gmra.mrb[48].mxu0 %v4545_v22 }
 0x1de   :  { %2629 = vmatmul.mubr.bf16.gmra.mrb[48].mxu1 %v4545_v22 }
 0x217   :  { %v2162_v55 = vpop.f32.mrb[20].mxu0  ;;  %v2308_v1 = vpop.f32.mrb[20].mxu1 }
 0x218   :  { %v2164_v56 = vpop.f32.mrb[21].mxu0  ;;  %v2310_v20 = vpop.f32.mrb[21].mxu1  ;;  %v3624_v30 = vadd.f32 %v2162_v55, %v5177_v42  ;;  %v3640_v31 = vadd.f32 %v2308_v1, %v5180_v8 }
 0x219   :  { %v2166_v63 = vpop.f32.mrb[22].mxu0  ;;  %v2312_v19 = vpop.f32.mrb[22].mxu1  ;;  %v3625_v32 = vadd.f32 %v2164_v56, %v5183_v9  ;;  %v3641_v39 = vadd.f32 %v2310_v20, %v5186_v10 }
 0x21a   :  { %v2168_v49 = vpop.f32.mrb[23].mxu0  ;;  %v2314_v21 = vpop.f32.mrb[23].mxu1  ;;  %v2639_v34 = vsub.f32 0.0, %v3624_v30  ;;  %v3626_v35 = vadd.f32 %v2166_v63, %v5177_v42  ;;  %v2641_v36 = vsub.f32 0.0, %v3640_v31  ;;  %v3642_v52 = vadd.f32 %v2312_v19, %v5180_v8 }
 0x21b   :  { %v2640_v11 = vsub.f32 0.0, %v3625_v32  ;;  %v3627_v12 = vadd.f32 %v2168_v49, %v5183_v9  ;;  %v2642_v14 = vsub.f32 0.0, %v3641_v39  ;;  %v3643_v15 = vadd.f32 %v2314_v21, %v5186_v10 }
 0x21c   :  { %v2703_v16 = vmul.f32 1.442695, %v2639_v34  ;;  %v2647_v45 = vsub.f32 0.0, %v3626_v35  ;;  %v2707_v53 = vmul.f32 1.442695, %v2641_v36  ;;  %v2649_v61 = vsub.f32 0.0, %v3642_v52 }
 0x21d   :  { %v2705_v13 = vmul.f32 1.442695, %v2640_v11  ;;  %v2648_v47 = vsub.f32 0.0, %v3627_v12  ;;  %v2709_v41 = vmul.f32 1.442695, %v2642_v14  ;;  %v2650_v48 = vsub.f32 0.0, %v3643_v15 }
 0x21e   :  { %3786 = vpow2.f32 %v2703_v16  ;;  %v2719_v1 = vmul.f32 1.442695, %v2647_v45  ;;  %v2723_v63 = vmul.f32 1.442695, %v2649_v61 }
 0x21f   :  { %v2172_v0 = vpop.f32.mrb[24].mxu0  ;;  %v2318_v18 = vpop.f32.mrb[24].mxu1  ;;  %3788 = vpow2.f32 %v2707_v53  ;;  %v2721_v49 = vmul.f32 1.442695, %v2648_v47 }
 0x220   :  { %v2174_v23 = vpop.f32.mrb[25].mxu0  ;;  %v2320_v57 = vpop.f32.mrb[25].mxu1  ;;  %v3628_v17 = vadd.f32 %v2172_v0, %v5177_v42  ;;  %v3644_v55 = vadd.f32 %v2318_v18, %v5180_v8  ;;  %3790 = vpow2.f32 %v2705_v13  ;;  %v2725_v0 = vmul.f32 1.442695, %v2650_v48 }
 0x221   :  { %v5125_v28 = vpop.f32.mrb[26].mxu0  ;;  %v5127_v24 = vpop.f32.mrb[26].mxu1  ;;  %v3629_v20 = vadd.f32 %v2174_v23, %v5183_v9  ;;  %v3645_v19 = vadd.f32 %v2320_v57, %v5186_v10  ;;  %3792 = vpow2.f32 %v2709_v41 }
 0x222   :  { %v5129_v25 = vpop.f32.mrb[27].mxu0  ;;  %v5131_v26 = vpop.f32.mrb[27].mxu1  ;;  %v2655_v56 = vsub.f32 0.0, %v3628_v17  ;;  %v3630_v21 = vadd.f32 %v5125_v28, %v5177_v42  ;;  %v2657_v2 = vsub.f32 0.0, %v3644_v55  ;;  %3794 = vpow2.f32 %v2719_v1 }
 0x223   :  { %v2656_v18 = vsub.f32 0.0, %v3629_v20  ;;  %3796 = vpow2.f32 %v2723_v63  ;;  %v2658_v5 = vsub.f32 0.0, %v3645_v19  ;;  %v3646_v52 = vadd.f32 %v5127_v24, %v5180_v8 }
 0x224   :  { %v2735_v50 = vmul.f32 1.442695, %v2655_v56  ;;  %3798 = vpow2.f32 %v2721_v49  ;;  %v2663_v6 = vsub.f32 0.0, %v3630_v21  ;;  %v2739_v23 = vmul.f32 1.442695, %v2657_v2 }
 0x225   :  { %3800 = vpow2.f32 %v2725_v0  ;;  %v2737_v7 = vmul.f32 1.442695, %v2656_v18  ;;  %v2741_v57 = vmul.f32 1.442695, %v2658_v5  ;;  %v3631_v14 = vadd.f32 %v5129_v25, %v5183_v9 }
 0x226   :  { %3802 = vpow2.f32 %v2735_v50  ;;  %v2751_v31 = vmul.f32 1.442695, %v2663_v6  ;;  %v2665_v13 = vsub.f32 0.0, %v3646_v52  ;;  %v3647_v24 = vadd.f32 %v5131_v26, %v5186_v10 }
 0x227   :  { %v5133_v22 = vpop.f32.mrb[28].mxu0  ;;  %v5135_v27 = vpop.f32.mrb[28].mxu1  ;;  %3804 = vpow2.f32 %v2739_v23  ;;  %v2664_v41 = vsub.f32 0.0, %v3631_v14 }
 0x228   :  { %v5137_v43 = vpop.f32.mrb[29].mxu0  ;;  %v5139_v29 = vpop.f32.mrb[29].mxu1  ;;  %3806 = vpow2.f32 %v2737_v7  ;;  %v3632_v1 = vadd.f32 %v5133_v22, %v5177_v42  ;;  %v2755_v20 = vmul.f32 1.442695, %v2665_v13  ;;  %v3648_v63 = vadd.f32 %v5135_v27, %v5180_v8 }
 0x229   :  { %v5141_v33 = vpop.f32.mrb[30].mxu0  ;;  %v5143_v37 = vpop.f32.mrb[30].mxu1  ;;  %3808 = vpow2.f32 %v2741_v57  ;;  %v2753_v49 = vmul.f32 1.442695, %v2664_v41  ;;  %v3633_v21 = vadd.f32 %v5137_v43, %v5183_v9  ;;  %v2666_v2 = vsub.f32 0.0, %v3647_v24 }
 0x22a   :  { %v5145_v40 = vpop.f32.mrb[31].mxu0  ;;  %v5147_v44 = vpop.f32.mrb[31].mxu1  ;;  %3810 = vpow2.f32 %v2751_v31  ;;  %v3649_v50 = vadd.f32 %v5139_v29, %v5186_v10  ;;  %v2671_v18 = vsub.f32 0.0, %v3632_v1  ;;  %v3634_v5 = vadd.f32 %v5141_v33, %v5177_v42 }
 0x22b   :  { %v3787_v30 = vpop.eup %3786  ;;  %v2673_v6 = vsub.f32 0.0, %v3648_v63  ;;  %v3650_v23 = vadd.f32 %v5143_v37, %v5180_v8  ;;  %v2672_v57 = vsub.f32 0.0, %v3633_v21  ;;  %v3635_v29 = vadd.f32 %v5145_v40, %v5183_v9 }
 0x22c   :  { %v3789_v32 = vpop.eup %3788  ;;  %v2831_v34 = vadd.f32 1.0, %v3787_v30  ;;  %v2757_v31 = vmul.f32 1.442695, %v2666_v2  ;;  %v3651_v33 = vadd.f32 %v5147_v44, %v5186_v10  ;;  %v2767_v37 = vmul.f32 1.442695, %v2671_v18 }
 0x22d   :  { %v3791_v28 = vpop.eup %3790  ;;  %v2833_v36 = vadd.f32 1.0, %v3789_v32  ;;  %v2674_v32 = vsub.f32 0.0, %v3649_v50  ;;  %v2771_v40 = vmul.f32 1.442695, %v2673_v6  ;;  %v2769_v44 = vmul.f32 1.442695, %v2672_v57 }
 0x22e   :  { %v3793_v39 = vpop.eup %3792  ;;  %v2832_v12 = vadd.f32 1.0, %v3791_v28  ;;  %3812 = vrcp.f32 %v2831_v34 }
 0x22f   :  { %v5149_v46 = vpop.f32.mrb[32].mxu0  ;;  %v5151_v51 = vpop.f32.mrb[32].mxu1  ;;  %v2834_v16 = vadd.f32 1.0, %v3793_v39  ;;  %3814 = vrcp.f32 %v2833_v36  ;;  %v2679_v39 = vsub.f32 0.0, %v3634_v5  ;;  %v2681_v36 = vsub.f32 0.0, %v3650_v23 }
 0x230   :  { %v5153_v54 = vpop.f32.mrb[33].mxu0  ;;  %v5155_v58 = vpop.f32.mrb[33].mxu1  ;;  %3816 = vrcp.f32 %v2832_v12  ;;  %v3636_v34 = vadd.f32 %v5149_v46, %v5177_v42  ;;  %v3652_v52 = vadd.f32 %v5151_v51, %v5180_v8  ;;  %v2680_v12 = vsub.f32 0.0, %v3635_v29 }
 0x231   :  { %v5157_v59 = vpop.f32.mrb[34].mxu0  ;;  %v5159_v60 = vpop.f32.mrb[34].mxu1  ;;  %3818 = vrcp.f32 %v2834_v16  ;;  %v2682_v16 = vsub.f32 0.0, %v3651_v33  ;;  %v2783_v46 = vmul.f32 1.442695, %v2679_v39 }
 0x232   :  { %v5161_v38 = vpop.f32.mrb[35].mxu0  ;;  %v5163_v62 = vpop.f32.mrb[35].mxu1  ;;  %v2787_v51 = vmul.f32 1.442695, %v2681_v36  ;;  %v2689_v13 = vsub.f32 0.0, %v3652_v52  ;;  %v3638_v24 = vadd.f32 %v5157_v59, %v5177_v42 }
 0x233   :  { %v3795_v35 = vpop.eup %3794  ;;  %v3655_v59 = vadd.f32 %v5163_v62, %v5186_v10 }
 0x234   :  { %v3797_v11 = vpop.eup %3796  ;;  %v2839_v17 = vadd.f32 1.0, %v3795_v35 }
 0x235   :  { %v3799_v15 = vpop.eup %3798  ;;  %v2841_v61 = vadd.f32 1.0, %v3797_v11  ;;  %v2698_v18 = vsub.f32 0.0, %v3655_v59 }
 0x236   :  { %v3801_v45 = vpop.eup %3800  ;;  %v2840_v47 = vadd.f32 1.0, %v3799_v15  ;;  %3820 = vrcp.f32 %v2839_v17  ;;  %v2773_v15 = vmul.f32 1.442695, %v2674_v32  ;;  %v2687_v17 = vsub.f32 0.0, %v3636_v34 }
 0x237   :  { %v3803_v53 = vpop.eup %3802  ;;  %v2842_v48 = vadd.f32 1.0, %v3801_v45  ;;  %3822 = vrcp.f32 %v2841_v61  ;;  %v2821_v57 = vmul.f32 1.442695, %v2698_v18 }
 0x238   :  { %v3805_v55 = vpop.eup %3804  ;;  %v2847_v25 = vadd.f32 1.0, %v3803_v53  ;;  %3824 = vrcp.f32 %v2840_v47  ;;  %v3637_v53 = vadd.f32 %v5153_v54, %v5183_v9  ;;  %v3653_v47 = vadd.f32 %v5155_v58, %v5186_v10 }
 0x239   :  { %v3807_v56 = vpop.eup %3806  ;;  %3826 = vrcp.f32 %v2842_v48  ;;  %v2849_v26 = vadd.f32 1.0, %v3805_v55  ;;  %v2785_v48 = vmul.f32 1.442695, %v2680_v12  ;;  %v3654_v54 = vadd.f32 %v5159_v60, %v5180_v8 }
 0x23a   :  { %v3809_v19 = vpop.eup %3808  ;;  %3828 = vrcp.f32 %v2847_v25  ;;  %v2848_v22 = vadd.f32 1.0, %v3807_v56  ;;  %v2789_v25 = vmul.f32 1.442695, %v2682_v16  ;;  %v2799_v56 = vmul.f32 1.442695, %v2687_v17 }
 0x23b   :  { %v3811_v0 = vpop.eup %3810  ;;  %v2850_v27 = vadd.f32 1.0, %v3809_v19  ;;  %3830 = vpow2.f32 %v2755_v20  ;;  %v2688_v20 = vsub.f32 0.0, %v3637_v53  ;;  %v3639_v58 = vadd.f32 %v5161_v38, %v5183_v9 }
 0x23c   :  { %v5220_v43 = vpop.eup %3812  ;;  %v2855_v7 = vadd.f32 1.0, %v3811_v0  ;;  %3832 = vpow2.f32 %v2753_v49  ;;  %v2803_v19 = vmul.f32 1.442695, %v2689_v13  ;;  %v2690_v49 = vsub.f32 0.0, %v3653_v47 }
 0x23d   :  { %v5224_v30 = vpop.eup %3814  ;;  %3834 = vrcp.f32 %v2849_v26  ;;  %v2695_v60 = vsub.f32 0.0, %v3638_v24  ;;  %v2697_v26 = vsub.f32 0.0, %v3654_v54  ;;  %v2801_v38 = vmul.f32 1.442695, %v2688_v20 }
 0x23e   :  { %v5228_v28 = vpop.eup %3816  ;;  %3836 = vrcp.f32 %v2848_v22  ;;  %v2696_v9 = vsub.f32 0.0, %v3639_v58  ;;  %v2805_v22 = vmul.f32 1.442695, %v2690_v49 }
 0x23f   :  { %v5232_v35 = vpop.eup %3818  ;;  %3838 = vrcp.f32 %v2850_v27  ;;  %v2815_v10 = vmul.f32 1.442695, %v2695_v60  ;;  %v2819_v27 = vmul.f32 1.442695, %v2697_v26 }
 0x240   :  { %v5236_v11 = vpop.eup %3820  ;;  %3840 = vrcp.f32 %v2855_v7  ;;  %v2817_v23 = vmul.f32 1.442695, %v2696_v9 }
 0x241   :  { %5893 = vst [vmem:[#allocation2_spill] sm:$0xff] %v5236_v11  ;;  %v5238_v14 = vpop.eup %3822  ;;  %3842 = vpow2.f32 %v2757_v31 }
 0x242   :  { %5894 = vst [vmem:[#allocation3_spill] sm:$0xff] %v5238_v14  ;;  %v5240_v45 = vpop.eup %3824  ;;  %3844 = vpow2.f32 %v2767_v37 }
 0x243   :  { %5895 = vst [vmem:[#allocation4_spill] sm:$0xff] %v5240_v45  ;;  %v5244_v61 = vpop.eup %3826  ;;  %3846 = vpow2.f32 %v2771_v40 }
 0x244   :  { %5896 = vst [vmem:[#allocation5_spill] sm:$0xff] %v5244_v61  ;;  %v5248_v41 = vpop.eup %3828  ;;  %3848 = vpow2.f32 %v2769_v44 }
 0x245   :  { %5897 = vst [vmem:[#allocation6_spill] sm:$0xff] %v5248_v41  ;;  %v3831_v55 = vpop.eup %3830  ;;  %3850 = vpow2.f32 %v2773_v15 }
 0x246   :  { %v3833_v1 = vpop.eup %3832  ;;  %3852 = vpow2.f32 %v2783_v46  ;;  %v2857_v21 = vadd.f32 1.0, %v3831_v55  ;;  %v753_v55 = vsub.s32 4, %v5165_v3 }
 0x247   :  { %v5256_v63 = vpop.eup %3834  ;;  %3854 = vpow2.f32 %v2787_v51  ;;  %v2856_v0 = vadd.f32 1.0, %v3833_v1  ;;  %v761_v1 = vsub.s32 6, %v5165_v3 }
 0x248   :  { %5898 = vst [vmem:[#allocation7_spill] sm:$0xff] %v5256_v63  ;;  %v5260_v42 = vpop.eup %3836  ;;  %3856 = vpow2.f32 %v2785_v48 }
 0x249   :  { %5899 = vst [vmem:[#allocation8_spill] sm:$0xff] %v5260_v42  ;;  %v5262_v8 = vpop.eup %3838  ;;  %3858 = vpow2.f32 %v2789_v25  ;;  %v5282_v9 = vrot.slane %v5171_v4, %v761_v1 }
 0x24a   :  { %5900 = vst [vmem:[#allocation9_spill] sm:$0xff] %v5262_v8  ;;  %v5264_v2 = vpop.eup %3840  ;;  %3860 = vpow2.f32 %v2799_v56  ;;  %v757_v56 = vsub.s32 5, %v5165_v3 }
 0x24b   :  { %5901 = vst [vmem:[#allocation10_spill] sm:$0xff] %v5264_v2  ;;  %v3843_v50 = vpop.eup %3842  ;;  %3862 = vpow2.f32 %v2803_v19  ;;  %v765_v19 = vsub.s32 7, %v5165_v3 }
 0x24c   :  { %v3845_v62 = vpop.eup %3844  ;;  %3864 = vrcp.f32 %v2857_v21  ;;  %v2858_v31 = vadd.f32 1.0, %v3843_v50  ;;  %v5285_v50 = vrot.slane %v5171_v4, %v757_v56 }
 0x24d   :  { %v3847_v5 = vpop.eup %3846  ;;  %3866 = vrcp.f32 %v2856_v0  ;;  %v2863_v33 = vadd.f32 1.0, %v3845_v62  ;;  %v5277_v0 = vrot.slane %v5171_v4, %v753_v55  ;;  %v5290_v18 = vrot.slane %v5171_v4, %v765_v19 }
 0x24e   :  { %v3849_v6 = vpop.eup %3848  ;;  %3868 = vpow2.f32 %v2801_v38  ;;  %v2865_v39 = vadd.f32 1.0, %v3847_v5 }
 0x24f   :  { %v3851_v7 = vpop.eup %3850  ;;  %3870 = vpow2.f32 %v2805_v22  ;;  %v2864_v40 = vadd.f32 1.0, %v3849_v6 }
 0x250   :  { %v3853_v29 = vpop.eup %3852  ;;  %3872 = vpow2.f32 %v2815_v10  ;;  %v2866_v52 = vadd.f32 1.0, %v3851_v7 }
 0x251   :  { %v3855_v32 = vpop.eup %3854  ;;  %3874 = vpow2.f32 %v2819_v27  ;;  %v2871_v12 = vadd.f32 1.0, %v3853_v29 }
 0x252   :  { %v3857_v37 = vpop.eup %3856  ;;  %3876 = vpow2.f32 %v2817_v23  ;;  %v2873_v16 = vadd.f32 1.0, %v3855_v32 }
 0x253   :  { %v3859_v34 = vpop.eup %3858  ;;  %3878 = vpow2.f32 %v2821_v57  ;;  %v2872_v17 = vadd.f32 1.0, %v3857_v37 }
 0x254   :  { %v3861_v36 = vpop.eup %3860  ;;  %3880 = vrcp.f32 %v2858_v31  ;;  %v2874_v51 = vadd.f32 1.0, %v3859_v34 }
 0x255   :  { %v3863_v44 = vpop.eup %3862  ;;  %3882 = vrcp.f32 %v2863_v33  ;;  %v2879_v47 = vadd.f32 1.0, %v3861_v36 }
 0x256   :  { %v5266_v15 = vpop.eup %3864  ;;  %3884 = vrcp.f32 %v2865_v39  ;;  %v2881_v24 = vadd.f32 1.0, %v3863_v44 }
 0x257   :  { %5902 = vst [vmem:[#allocation11_spill] sm:$0xff] %v5266_v15  ;;  %v5268_v46 = vpop.eup %3866  ;;  %3886 = vrcp.f32 %v2864_v40 }
 0x258   :  { %5903 = vst [vmem:[#allocation12_spill] sm:$0xff] %v5268_v46  ;;  %v3869_v53 = vpop.eup %3868  ;;  %3888 = vrcp.f32 %v2866_v52 }
 0x259   :  { %v3871_v13 = vpop.eup %3870  ;;  %3890 = vrcp.f32 %v2871_v12  ;;  %v2880_v54 = vadd.f32 1.0, %v3869_v53 }
 0x25a   :  { %v3873_v48 = vpop.eup %3872  ;;  %3892 = vrcp.f32 %v2873_v16  ;;  %v2882_v58 = vadd.f32 1.0, %v3871_v13 }
 0x25b   :  { %v3875_v25 = vpop.eup %3874  ;;  %3894 = vrcp.f32 %v2872_v17  ;;  %v2887_v59 = vadd.f32 1.0, %v3873_v48 }
 0x25c   :  { %v3877_v20 = vpop.eup %3876  ;;  %3896 = vrcp.f32 %v2874_v51  ;;  %v2889_v60 = vadd.f32 1.0, %v3875_v25 }
 0x25d   :  { %v3879_v49 = vpop.eup %3878  ;;  %3898 = vrcp.f32 %v2879_v47  ;;  %v2888_v38 = vadd.f32 1.0, %v3877_v20 }
 0x25e   :  { %v5274_v21 = vpop.eup %3880  ;;  %3900 = vrcp.f32 %v2881_v24  ;;  %v2890_v22 = vadd.f32 1.0, %v3879_v49 }
 0x25f   :  { %5904 = vst [vmem:[#allocation13_spill] sm:$0xff] %v5274_v21  ;;  %v5279_v26 = vpop.eup %3882  ;;  %3902 = vrcp.f32 %v2880_v54 }
 0x260   :  { %5905 = vst [vmem:[#allocation14_spill] sm:$0xff] %v5279_v26  ;;  %v5287_v3 = vpop.eup %3884  ;;  %3904 = vrcp.f32 %v2882_v58 }
 0x261   :  { %v5292_v62 = vpop.eup %3886  ;;  %3906 = vrcp.f32 %v2887_v59 }
 0x262   :  { %5906 = vst [vmem:[#allocation15_spill] sm:$0xff] %v5292_v62  ;;  %v5294_v5 = vpop.eup %3888  ;;  %3908 = vrcp.f32 %v2889_v60 }
 0x263   :  { %v5297_v7 = vpop.eup %3890  ;;  %3910 = vrcp.f32 %v2888_v38 }
 0x264   :  { %v5301_v32 = vpop.eup %3892  ;;  %3912 = vrcp.f32 %v2890_v22 }
 0x265   :  { %v5305_v36 = vpop.eup %3894 }
 0x266   :  { %v5309_v53 = vpop.eup %3896 }
 0x267   :  { %v5312_v24 = vpop.eup %3898 }
 0x268   :  { %v5314_v56 = vpop.eup %3900 }
 0x269   :  { %5907 = vst [vmem:[#allocation16_spill] sm:$0xff] %v5314_v56  ;;  %v5316_v49 = vpop.eup %3902 }
 0x26a   :  { %5908 = vst [vmem:[#allocation17_spill] sm:$0xff] %v5316_v49  ;;  %v5318_v38 = vpop.eup %3904 }
 0x26b   :  { %5909 = vst [vmem:[#allocation18_spill] sm:$0xff] %v5318_v38 }
 0x298   :  { %v2454_v10 = vpop.f32.mrb[36].mxu0 }
 0x299   :  { %v3656_v27 = vadd.f32 %v2454_v10, %v5277_v0  ;;  %v2600_v6 = vpop.f32.mrb[36].mxu1  ;;  %v2456_v23 = vpop.f32.mrb[37].mxu0 }
 0x29a   :  { %v3672_v57 = vadd.f32 %v2600_v6, %v5282_v9  ;;  %v3657_v29 = vadd.f32 %v2456_v23, %v5285_v50  ;;  %v2602_v4 = vpop.f32.mrb[37].mxu1  ;;  %v2458_v31 = vpop.f32.mrb[38].mxu0 }
 0x29b   :  { %v2643_v33 = vsub.f32 0.0, %v3656_v27  ;;  %v3673_v37 = vadd.f32 %v2602_v4, %v5290_v18  ;;  %v3658_v39 = vadd.f32 %v2458_v31, %v5277_v0  ;;  %v2604_v34 = vpop.f32.mrb[38].mxu1  ;;  %v2460_v40 = vpop.f32.mrb[39].mxu0 }
 0x29c   :  { %v2645_v52 = vsub.f32 0.0, %v3672_v57  ;;  %v2644_v44 = vsub.f32 0.0, %v3657_v29  ;;  %v3674_v12 = vadd.f32 %v2604_v34, %v5282_v9  ;;  %v3659_v16 = vadd.f32 %v2460_v40, %v5285_v50  ;;  %v2606_v17 = vpop.f32.mrb[39].mxu1  ;;  %v5321_v23 = vpop.eup %3906 }
 0x29d   :  { %v2711_v51 = vmul.f32 1.442695, %v2643_v33  ;;  %v2646_v13 = vsub.f32 0.0, %v3673_v37  ;;  %v2651_v47 = vsub.f32 0.0, %v3658_v39  ;;  %v3675_v48 = vadd.f32 %v2606_v17, %v5290_v18  ;;  %v5325_v37 = vpop.eup %3908 }
 0x29e   :  { %v2715_v55 = vmul.f32 1.442695, %v2645_v52  ;;  %v2713_v25 = vmul.f32 1.442695, %v2644_v44  ;;  %v2653_v54 = vsub.f32 0.0, %v3674_v12  ;;  %v2652_v1 = vsub.f32 0.0, %v3659_v16  ;;  %v5329_v12 = vpop.eup %3910 }
 0x29f   :  { %3914 = vpow2.f32 %v2711_v51  ;;  %v2717_v20 = vmul.f32 1.442695, %v2646_v13  ;;  %v2727_v58 = vmul.f32 1.442695, %v2651_v47  ;;  %v2654_v19 = vsub.f32 0.0, %v3675_v48  ;;  %v5332_v47 = vpop.eup %3912 }
 0x2a0   :  { %3916 = vpow2.f32 %v2715_v55  ;;  %v2731_v59 = vmul.f32 1.442695, %v2653_v54  ;;  %v2464_v60 = vpop.f32.mrb[40].mxu0  ;;  %v2729_v22 = vmul.f32 1.442695, %v2652_v1 }
 0x2a1   :  { %3918 = vpow2.f32 %v2713_v25  ;;  %v3660_v10 = vadd.f32 %v2464_v60, %v5277_v0  ;;  %v2610_v27 = vpop.f32.mrb[40].mxu1  ;;  %v2466_v6 = vpop.f32.mrb[41].mxu0  ;;  %v2733_v57 = vmul.f32 1.442695, %v2654_v19 }
 0x2a2   :  { %3920 = vpow2.f32 %v2717_v20  ;;  %v3676_v29 = vadd.f32 %v2610_v27, %v5282_v9  ;;  %v3661_v4 = vadd.f32 %v2466_v6, %v5285_v50  ;;  %v2612_v31 = vpop.f32.mrb[41].mxu1  ;;  %v2468_v33 = vpop.f32.mrb[42].mxu0 }
 0x2a3   :  { %3922 = vpow2.f32 %v2727_v58  ;;  %v2659_v39 = vsub.f32 0.0, %v3660_v10  ;;  %v3677_v34 = vadd.f32 %v2612_v31, %v5290_v18  ;;  %v3662_v40 = vadd.f32 %v2468_v33, %v5277_v0  ;;  %v2614_v52 = vpop.f32.mrb[42].mxu1  ;;  %v2470_v44 = vpop.f32.mrb[43].mxu0 }
 0x2a4   :  { %3924 = vpow2.f32 %v2731_v59  ;;  %v2661_v16 = vsub.f32 0.0, %v3676_v29  ;;  %v2660_v17 = vsub.f32 0.0, %v3661_v4  ;;  %v3678_v51 = vadd.f32 %v2614_v52, %v5282_v9  ;;  %v2616_v13 = vpop.f32.mrb[43].mxu1 }
 0x2a5   :  { %3926 = vpow2.f32 %v2729_v22  ;;  %v2743_v48 = vmul.f32 1.442695, %v2659_v39  ;;  %v2662_v55 = vsub.f32 0.0, %v3677_v34  ;;  %v2667_v25 = vsub.f32 0.0, %v3662_v40 }
 0x2a6   :  { %3928 = vpow2.f32 %v2733_v57  ;;  %v2747_v54 = vmul.f32 1.442695, %v2661_v16  ;;  %v2745_v1 = vmul.f32 1.442695, %v2660_v17  ;;  %v2669_v20 = vsub.f32 0.0, %v3678_v51 }
 0x2a7   :  { %3930 = vpow2.f32 %v2743_v48  ;;  %v2749_v58 = vmul.f32 1.442695, %v2662_v55  ;;  %v2759_v19 = vmul.f32 1.442695, %v2667_v25  ;;  %v3663_v59 = vadd.f32 %v2470_v44, %v5285_v50 }
 0x2a8   :  { %3932 = vpow2.f32 %v2747_v54  ;;  %v3679_v60 = vadd.f32 %v2616_v13, %v5290_v18  ;;  %v2474_v10 = vpop.f32.mrb[44].mxu0  ;;  %v5336_v6 = vmul.f32 1.442695, %v2669_v20 }
 0x2a9   :  { %v3915_v27 = vpop.eup %3914  ;;  %3934 = vpow2.f32 %v2745_v1  ;;  %v2668_v22 = vsub.f32 0.0, %v3663_v59  ;;  %v3664_v29 = vadd.f32 %v2474_v10, %v5277_v0  ;;  %v2620_v57 = vpop.f32.mrb[44].mxu1 }
 0x2aa   :  { %v2476_v4 = vpop.f32.mrb[45].mxu0  ;;  %v3917_v31 = vpop.eup %3916  ;;  %v2835_v33 = vadd.f32 1.0, %v3915_v27  ;;  %3936 = vpow2.f32 %v2749_v58  ;;  %v2670_v39 = vsub.f32 0.0, %v3679_v60  ;;  %v3680_v34 = vadd.f32 %v2620_v57, %v5282_v9 }
 0x2ab   :  { %v2622_v40 = vpop.f32.mrb[45].mxu1  ;;  %v2478_v52 = vpop.f32.mrb[46].mxu0  ;;  %v2837_v16 = vadd.f32 1.0, %v3917_v31  ;;  %3938 = vpow2.f32 %v2759_v19  ;;  %v5340_v17 = vmul.f32 1.442695, %v2668_v22  ;;  %v2675_v51 = vsub.f32 0.0, %v3664_v29 }
 0x2ac   :  { %v3919_v44 = vpop.eup %3918  ;;  %v2624_v13 = vpop.f32.mrb[46].mxu1  ;;  %3940 = vrcp.f32 %v2835_v33  ;;  %v5342_v54 = vmul.f32 1.442695, %v2670_v39  ;;  %v2677_v1 = vsub.f32 0.0, %v3680_v34  ;;  %v3665_v10 = vadd.f32 %v2476_v4, %v5285_v50 }
 0x2ad   :  { %v2480_v48 = vpop.f32.mrb[47].mxu0  ;;  %v3921_v55 = vpop.eup %3920  ;;  %v2836_v25 = vadd.f32 1.0, %v3919_v44  ;;  %3942 = vrcp.f32 %v2837_v16  ;;  %v5344_v60 = vmul.f32 1.442695, %v2675_v51  ;;  %v3681_v29 = vadd.f32 %v2622_v40, %v5290_v18 }
 0x2ae   :  { %v2626_v20 = vpop.f32.mrb[47].mxu1  ;;  %v3923_v58 = vpop.eup %3922  ;;  %v2838_v59 = vadd.f32 1.0, %v3921_v55  ;;  %v5347_v22 = vmul.f32 1.442695, %v2677_v1  ;;  %v2676_v33 = vsub.f32 0.0, %v3665_v10  ;;  %v3666_v39 = vadd.f32 %v2478_v52, %v5277_v0 }
 0x2af   :  { %v3925_v19 = vpop.eup %3924  ;;  %3944 = vrcp.f32 %v2836_v25  ;;  %v2843_v27 = vadd.f32 1.0, %v3923_v58  ;;  %v2678_v16 = vsub.f32 0.0, %v3681_v29  ;;  %v3682_v51 = vadd.f32 %v2624_v13, %v5282_v9 }
 0x2b0   :  { %v3927_v57 = vpop.eup %3926  ;;  %3946 = vrcp.f32 %v2838_v59  ;;  %v2845_v31 = vadd.f32 1.0, %v3925_v19  ;;  %v2484_v4 = vpop.f32.mrb[48].mxu0  ;;  %v5352_v1 = vmul.f32 1.442695, %v2676_v33  ;;  %v2683_v58 = vsub.f32 0.0, %v3666_v39 }
 0x2b1   :  { %v3929_v34 = vpop.eup %3928  ;;  %3948 = vrcp.f32 %v2843_v27  ;;  %v2844_v44 = vadd.f32 1.0, %v3927_v57  ;;  %v2630_v40 = vpop.f32.mrb[48].mxu1  ;;  %v5354_v19 = vmul.f32 1.442695, %v2678_v16  ;;  %v2685_v52 = vsub.f32 0.0, %v3682_v51 }
 0x2b2   :  { %v3931_v55 = vpop.eup %3930  ;;  %3950 = vrcp.f32 %v2845_v31  ;;  %v2846_v25 = vadd.f32 1.0, %v3929_v34  ;;  %v2486_v61 = vpop.f32.mrb[49].mxu0  ;;  %v5356_v14 = vmul.f32 1.442695, %v2683_v58  ;;  %v3667_v31 = vadd.f32 %v2480_v48, %v5285_v50 }
 0x2b3   :  { %v3933_v59 = vpop.eup %3932  ;;  %3952 = vrcp.f32 %v2844_v44  ;;  %v2851_v10 = vadd.f32 1.0, %v3931_v55  ;;  %v2632_v27 = vpop.f32.mrb[49].mxu1  ;;  %v5359_v11 = vmul.f32 1.442695, %v2685_v52  ;;  %v3683_v44 = vadd.f32 %v2626_v20, %v5290_v18 }
 0x2b4   :  { %v2488_v57 = vpop.f32.mrb[50].mxu0  ;;  %v3935_v29 = vpop.eup %3934  ;;  %3954 = vrcp.f32 %v2846_v25  ;;  %v2853_v13 = vadd.f32 1.0, %v3933_v59  ;;  %v2684_v38 = vsub.f32 0.0, %v3667_v31  ;;  %v3668_v25 = vadd.f32 %v2484_v4, %v5277_v0 }
 0x2b5   :  { %v2634_v33 = vpop.f32.mrb[50].mxu1  ;;  %v2490_v34 = vpop.f32.mrb[51].mxu0  ;;  %3956 = vrcp.f32 %v2851_v10  ;;  %v2852_v45 = vadd.f32 1.0, %v3935_v29  ;;  %v2686_v59 = vsub.f32 0.0, %v3683_v44  ;;  %v3684_v56 = vadd.f32 %v2630_v40, %v5282_v9 }
 0x2b6   :  { %v3937_v39 = vpop.eup %3936  ;;  %v2636_v16 = vpop.f32.mrb[51].mxu1  ;;  %3958 = vrcp.f32 %v2853_v13  ;;  %v2793_v52 = vmul.f32 1.442695, %v2684_v38  ;;  %v2691_v29 = vsub.f32 0.0, %v3668_v25  ;;  %v3669_v20 = vadd.f32 %v2486_v61, %v5285_v50 }
 0x2b7   :  { %v3939_v51 = vpop.eup %3938  ;;  %v2854_v55 = vadd.f32 1.0, %v3937_v39  ;;  %3960 = vrcp.f32 %v2852_v45  ;;  %v2797_v13 = vmul.f32 1.442695, %v2686_v59  ;;  %v2693_v31 = vsub.f32 0.0, %v3684_v56 }
 0x2b8   :  { %v5363_v58 = vpop.eup %3940  ;;  %v2859_v48 = vadd.f32 1.0, %v3939_v51  ;;  %v3685_v4 = vadd.f32 %v2632_v27, %v5290_v18  ;;  %v2807_v45 = vmul.f32 1.442695, %v2691_v29  ;;  %v2692_v40 = vsub.f32 0.0, %v3669_v20 }
 0x2b9   :  { %v5366_v10 = vpop.eup %3942  ;;  %3962 = vrcp.f32 %v2854_v55  ;;  %v3670_v44 = vadd.f32 %v2488_v57, %v5277_v0  ;;  %v2811_v61 = vmul.f32 1.442695, %v2693_v31  ;;  %v3686_v55 = vadd.f32 %v2634_v33, %v5282_v9 }
 0x2ba   :  { %v5369_v49 = vpop.eup %3944  ;;  %3964 = vrcp.f32 %v2859_v48  ;;  %v2694_v38 = vsub.f32 0.0, %v3685_v4  ;;  %v5383_v56 = vmul.f32 1.442695, %v2692_v40  ;;  %v3687_v57 = vadd.f32 %v2636_v16, %v5290_v18 }
 0x2bb   :  { %v5372_v39 = vpop.eup %3946  ;;  %3966 = vpow2.f32 %v5336_v6  ;;  %v2699_v27 = vsub.f32 0.0, %v3670_v44  ;;  %v3671_v6 = vadd.f32 %v2490_v34, %v5285_v50  ;;  %v2959_v33 = vmul.f32 %v5363_v58, %v5220_v43 }
 0x2bc   :  { %v5376_v51 = vpop.eup %3948  ;;  %3968 = vpow2.f32 %v5340_v17  ;;  %v5389_v0 = vmul.f32 1.442695, %v2694_v38  ;;  %v2701_v17 = vsub.f32 0.0, %v3686_v55  ;;  %v2702_v34 = vsub.f32 0.0, %v3687_v57 }
 0x2bd   :  { %v5380_v25 = vpop.eup %3950  ;;  %3970 = vpow2.f32 %v5342_v54  ;;  %v5395_v9 = vmul.f32 1.442695, %v2699_v27  ;;  %v2700_v54 = vsub.f32 0.0, %v3671_v6  ;;  %v2960_v18 = vmul.f32 %v5369_v49, %v5228_v28 }
 0x2be   :  { %v5386_v48 = vpop.eup %3952  ;;  %3972 = vpow2.f32 %v5344_v60  ;;  %v5402_v60 = vmul.f32 1.442695, %v2701_v17  ;;  %v2961_v29 = vmul.f32 %v5366_v10, %v5224_v30  ;;  %v2962_v20 = vmul.f32 %v5372_v39, %v5232_v35 }
 0x2bf   :  { %v5392_v59 = vpop.eup %3954  ;;  %3974 = vpow2.f32 %v5347_v22  ;;  %v5409_v22 = vmul.f32 1.442695, %v2700_v54  ;;  %v2967_v4 = vadd.f32 %v2960_v18, %v2959_v33  ;;  %v3055_v40 = vmul.f32 %v5376_v51, %v5264_v2 }
 0x2c0   :  { %v5399_v50 = vpop.eup %3956  ;;  %3976 = vpow2.f32 %v5352_v1  ;;  %v5418_v1 = vmul.f32 1.442695, %v2702_v34  ;;  %v3057_v38 = vmul.f32 %v5380_v25, %v5266_v15  ;;  %v3058_v55 = vmul.f32 %v5392_v59, %v5274_v21 }
 0x2c1   :  { %v5406_v16 = vpop.eup %3958  ;;  %3978 = vpow2.f32 %v5354_v19  ;;  %v3056_v19 = vmul.f32 %v5386_v48, %v5268_v46  ;;  %v2968_v27 = vadd.f32 %v2967_v4, %v2961_v29  ;;  %v3051_v6 = vmul.f32 %v5363_v58, %v5248_v41 }
 0x2c2   :  { %v5415_v31 = vpop.eup %3960  ;;  %3980 = vpow2.f32 %v5356_v14  ;;  %v3052_v17 = vmul.f32 %v5369_v49, %v5260_v42  ;;  %v3053_v54 = vmul.f32 %v5366_v10, %v5256_v63  ;;  %v3054_v33 = vmul.f32 %v5372_v39, %v5262_v8 }
 0x2c3   :  { %v5422_v44 = vpop.eup %3962  ;;  %3982 = vpow2.f32 %v5359_v11  ;;  %v3064_v57 = vadd.f32 %v3056_v19, %v3055_v40  ;;  %v3147_v46 = vmul.f32 %v5376_v51, %v5297_v7  ;;  %v3148_v2 = vmul.f32 %v5386_v48, %v5305_v36 }
 0x2c4   :  { %v5431_v14 = vpop.eup %3964  ;;  %3984 = vpow2.f32 %v2793_v52  ;;  %v2969_v52 = vadd.f32 %v2968_v27, %v2962_v20  ;;  %v3059_v29 = vadd.f32 %v3052_v17, %v3051_v6  ;;  %v3149_v27 = vmul.f32 %v5380_v25, %v5301_v32 }
 0x2c5   :  { %v3967_v11 = vpop.eup %3966  ;;  %3986 = vpow2.f32 %v2797_v13  ;;  %v3065_v15 = vadd.f32 %v3064_v57, %v3057_v38  ;;  %v3150_v17 = vmul.f32 %v5392_v59, %v5309_v53 }
 0x2c6   :  { %v3969_v34 = vpop.eup %3968  ;;  %v2861_v18 = vadd.f32 1.0, %v3967_v11  ;;  %3988 = vpow2.f32 %v2807_v45  ;;  %2970 = vadd.xlane.f32.xlu0 %v2969_v52  ;;  %v3060_v19 = vadd.f32 %v3059_v29, %v3053_v54  ;;  %v3156_v54 = vadd.f32 %v3148_v2, %v3147_v46 }
 0x2c7   :  { %v3971_v4 = vpop.eup %3970  ;;  %v2860_v21 = vadd.f32 1.0, %v3969_v34  ;;  %3990 = vpow2.f32 %v2811_v61  ;;  %v3066_v20 = vadd.f32 %v3065_v15, %v3058_v55  ;;  %v3144_v55 = vmul.f32 %v5369_v49, %v5292_v62 }
 0x2c8   :  { %v3973_v13 = vpop.eup %3972  ;;  %3992 = vrcp.f32 %v2861_v18  ;;  %v2862_v40 = vadd.f32 1.0, %v3971_v4  ;;  %v3061_v6 = vadd.f32 %v3060_v19, %v3054_v33  ;;  %v3157_v52 = vadd.f32 %v3156_v54, %v3149_v27 }
 0x2c9   :  { %v3975_v8 = vpop.eup %3974  ;;  %3994 = vrcp.f32 %v2860_v21  ;;  %v2867_v45 = vadd.f32 1.0, %v3973_v13  ;;  %3067 = vadd.xlane.f32.xlu1 %v3066_v20  ;;  %v3143_v21 = vmul.f32 %v5363_v58, %v5279_v26  ;;  %v3146_v2 = vmul.f32 %v5372_v39, %v5294_v5 }
 0x2ca   :  { %v3977_v61 = vpop.eup %3976  ;;  %3996 = vrcp.f32 %v2862_v40  ;;  %v2869_v38 = vadd.f32 1.0, %v3975_v8  ;;  %3062 = vadd.xlane.f32.xlu0 %v3061_v6  ;;  %v3145_v8 = vmul.f32 %v5366_v10, %v5287_v3  ;;  %v3239_v13 = vmul.f32 %v5376_v51, %v5321_v23 }
 0x2cb   :  { %v3979_v11 = vpop.eup %3978  ;;  %3998 = vrcp.f32 %v2867_v45  ;;  %v2868_v57 = vadd.f32 1.0, %v3977_v61  ;;  %v3151_v4 = vadd.f32 %v3144_v55, %v3143_v21  ;;  %v3158_v45 = vadd.f32 %v3157_v52, %v3150_v17 }
 0x2cc   :  { %v3981_v34 = vpop.eup %3980  ;;  %4000 = vrcp.f32 %v2869_v38  ;;  %v2870_v15 = vadd.f32 1.0, %v3979_v11  ;;  %v3240_v20 = vmul.f32 %v5386_v48, %v5329_v12  ;;  %v3241_v6 = vmul.f32 %v5380_v25, %v5325_v37 }
 0x2cd   :  { %v3983_v33 = vpop.eup %3982  ;;  %4002 = vrcp.f32 %v2868_v57  ;;  %v2875_v18 = vadd.f32 1.0, %v3981_v34  ;;  %v3152_v38 = vadd.f32 %v3151_v4, %v3145_v8  ;;  %3159 = vadd.xlane.f32.xlu1 %v3158_v45  ;;  %v3242_v54 = vmul.f32 %v5392_v59, %v5332_v47 }
 0x2ce   :  { %v3985_v46 = vpop.eup %3984  ;;  %4004 = vrcp.f32 %v2870_v15  ;;  %v2877_v29 = vadd.f32 1.0, %v3983_v33  ;;  %v3248_v21 = vadd.f32 %v3240_v20, %v3239_v13  ;;  %v3235_v55 = vmul.f32 %v5363_v58, %v5312_v24  ;;  %v5912_v13 = vld [vmem:[#allocation18_spill] sm:$0xff] }
 0x2cf   :  { %v3987_v40 = vpop.eup %3986  ;;  %4006 = vrcp.f32 %v2875_v18  ;;  %v2876_v19 = vadd.f32 1.0, %v3985_v46  ;;  %v3153_v15 = vadd.f32 %v3152_v38, %v3146_v2  ;;  %v5910_v18 = vld [vmem:[#allocation17_spill] sm:$0xff]  ;;  %v5911_v46 = vld [vmem:[#allocation16_spill] sm:$0xff]  ;;  %v3238_v2 = vmul.f32 %v5372_v39, %v5912_v13 }
 0x2d0   :  { %v3989_v61 = vpop.eup %3988  ;;  %4008 = vrcp.f32 %v2877_v29  ;;  %v2878_v27 = vadd.f32 1.0, %v3987_v40  ;;  %v3249_v33 = vadd.f32 %v3248_v21, %v3241_v6  ;;  %v3236_v52 = vmul.f32 %v5369_v49, %v5910_v18 }
 0x2d1   :  { %v3991_v11 = vpop.eup %3990  ;;  %4010 = vrcp.f32 %v2876_v19  ;;  %v2883_v57 = vadd.f32 1.0, %v3989_v61  ;;  %v3237_v29 = vmul.f32 %v5366_v10, %v5911_v46  ;;  %3154 = vadd.xlane.f32.xlu0 %v3153_v15  ;;  %v2982_v58 = vmul.f32 %v5399_v50, %v5220_v43  ;;  %v5916_v15 = vld [vmem:[#allocation5_spill] sm:$0xff] }
 0x2d2   :  { %v5465_v34 = vpop.eup %3992  ;;  %4012 = vrcp.f32 %v2878_v27  ;;  %v2885_v17 = vadd.f32 1.0, %v3991_v11  ;;  %v2983_v40 = vmul.f32 %v5415_v31, %v5228_v28  ;;  %v3250_v49 = vadd.f32 %v3249_v33, %v3242_v54  ;;  %v5913_v27 = vld [vmem:[#allocation2_spill] sm:$0xff]  ;;  %v5914_v11 = vld [vmem:[#allocation4_spill] sm:$0xff]  ;;  %v5915_v54 = vld [vmem:[#allocation3_spill] sm:$0xff] }
 0x2d3   :  { %v5469_v8 = vpop.eup %3994  ;;  %4014 = vrcp.f32 %v2883_v57  ;;  %v3243_v45 = vadd.f32 %v3236_v52, %v3235_v55  ;;  %v2984_v10 = vmul.f32 %v5406_v16, %v5224_v30  ;;  %v2985_v39 = vmul.f32 %v5422_v44, %v5232_v35 }
 0x2d4   :  { %v5475_v4 = vpop.eup %3996  ;;  %4016 = vrcp.f32 %v2885_v17  ;;  %v2990_v61 = vadd.f32 %v2983_v40, %v2982_v58  ;;  %v2963_v38 = vmul.f32 %v5376_v51, %v5913_v27  ;;  %3251 = vadd.xlane.f32.xlu1 %v3250_v49  ;;  %v2964_v57 = vmul.f32 %v5386_v48, %v5914_v11 }
 0x2d5   :  { %v5483_v19 = vpop.eup %3998  ;;  %4018 = vpow2.f32 %v5383_v56  ;;  %v3244_v56 = vadd.f32 %v3243_v45, %v3237_v29  ;;  %v2965_v21 = vmul.f32 %v5380_v25, %v5915_v54  ;;  %v2966_v51 = vmul.f32 %v5392_v59, %v5916_v15 }
 0x2d6   :  { %v5488_v20 = vpop.eup %4000  ;;  %4020 = vpow2.f32 %v5389_v0  ;;  %v2991_v17 = vadd.f32 %v2990_v61, %v2984_v10  ;;  %v2986_v55 = vmul.f32 %v5431_v14, %v5913_v27  ;;  %v2972_v48 = vadd.f32 %v2964_v57, %v2963_v38  ;;  %v5917_v10 = vld [vmem:[#allocation9_spill] sm:$0xff]  ;;  %v5918_v61 = vld [vmem:[#allocation10_spill] sm:$0xff] }
 0x2d7   :  { %v5495_v6 = vpop.eup %4002  ;;  %4022 = vpow2.f32 %v5395_v9  ;;  %v3245_v33 = vadd.f32 %v3244_v56, %v3238_v2  ;;  %v2987_v25 = vmul.f32 %v5469_v8, %v5914_v11  ;;  %v2988_v59 = vmul.f32 %v5465_v34, %v5915_v54  ;;  %v5919_v56 = vld [vmem:[#allocation12_spill] sm:$0xff] }
 0x2d8   :  { %v5502_v0 = vpop.eup %4004  ;;  %4024 = vpow2.f32 %v5402_v60  ;;  %v2992_v60 = vadd.f32 %v2991_v17, %v2985_v39  ;;  %v2989_v29 = vmul.f32 %v5475_v4, %v5916_v15  ;;  %v3074_v40 = vmul.f32 %v5399_v50, %v5248_v41 }
 0x2d9   :  { %v5509_v9 = vpop.eup %4006  ;;  %4026 = vpow2.f32 %v5409_v22  ;;  %3246 = vadd.xlane.f32.xlu0 %v3245_v33  ;;  %v2973_v22 = vadd.f32 %v2972_v48, %v2965_v21  ;;  %v2995_v2 = vadd.f32 %v2987_v25, %v2986_v55  ;;  %v3075_v49 = vmul.f32 %v5415_v31, %v5260_v42  ;;  %v5921_v48 = vld [vmem:[#allocation11_spill] sm:$0xff] }
 0x2da   :  { %v5514_v52 = vpop.eup %4008  ;;  %4028 = vpow2.f32 %v5418_v1  ;;  %2993 = vadd.xlane.f32.xlu1 %v2992_v60  ;;  %v3076_v1 = vmul.f32 %v5406_v16, %v5256_v63  ;;  %v3077_v39 = vmul.f32 %v5422_v44, %v5917_v10  ;;  %v3078_v38 = vmul.f32 %v5431_v14, %v5918_v61  ;;  %v5923_v63 = vld [vmem:[#allocation13_spill] sm:$0xff] }
 0x2db   :  { %v5521_v58 = vpop.eup %4010  ;;  %v3079_v57 = vmul.f32 %v5469_v8, %v5919_v56  ;;  %v2974_v17 = vadd.f32 %v2973_v22, %v2966_v51  ;;  %v2996_v55 = vadd.f32 %v2995_v2, %v2988_v59  ;;  %v3082_v33 = vadd.f32 %v3075_v49, %v3074_v40 }
 0x2dc   :  { %v5527_v45 = vpop.eup %4012  ;;  %v3080_v25 = vmul.f32 %v5465_v34, %v5921_v48  ;;  %v3081_v42 = vmul.f32 %v5475_v4, %v5923_v63  ;;  %v3166_v61 = vmul.f32 %v5399_v50, %v5279_v26  ;;  %v3167_v56 = vmul.f32 %v5415_v31, %v5292_v62 }
 0x2dd   :  { %v5537_v21 = vpop.eup %4014  ;;  %v3087_v10 = vadd.f32 %v3079_v57, %v3078_v38  ;;  %2975 = vadd.xlane.f32.xlu0 %v2974_v17  ;;  %v2997_v51 = vadd.f32 %v2996_v55, %v2989_v29  ;;  %v3083_v59 = vadd.f32 %v3082_v33, %v3076_v1  ;;  %v3168_v22 = vmul.f32 %v5406_v16, %v5287_v3 }
 0x2de   :  { %5920 = vst [vmem:[#allocation17_spill] sm:$0xff] %v5537_v21  ;;  %v5541_v60 = vpop.eup %4016  ;;  %v3169_v2 = vmul.f32 %v5422_v44, %v5294_v5  ;;  %v3174_v38 = vadd.f32 %v3167_v56, %v3166_v61  ;;  %v3170_v57 = vmul.f32 %v5431_v14, %v5297_v7  ;;  %v3171_v29 = vmul.f32 %v5469_v8, %v5305_v36 }
 0x2df   :  { %5922 = vst [vmem:[#allocation16_spill] sm:$0xff] %v5541_v60  ;;  %v4019_v41 = vpop.eup %4018  ;;  %v3088_v60 = vadd.f32 %v3087_v10, %v3080_v25  ;;  %2998 = vadd.xlane.f32.xlu1 %v2997_v51  ;;  %v3084_v62 = vadd.f32 %v3083_v59, %v3077_v39  ;;  %v3172_v1 = vmul.f32 %v5465_v34, %v5301_v32 }
 0x2e0   :  { %v4021_v40 = vpop.eup %4020  ;;  %v2884_v49 = vadd.f32 1.0, %v4019_v41  ;;  %v3175_v41 = vadd.f32 %v3174_v38, %v3168_v22  ;;  %v3173_v56 = vmul.f32 %v5475_v4, %v5309_v53  ;;  %v3179_v25 = vadd.f32 %v3171_v29, %v3170_v57 }
 0x2e1   :  { %v4023_v21 = vpop.eup %4022  ;;  %v2886_v26 = vadd.f32 1.0, %v4021_v40  ;;  %v3089_v33 = vadd.f32 %v3088_v60, %v3081_v42  ;;  %3085 = vadd.xlane.f32.xlu0 %v3084_v62  ;;  %v3258_v40 = vmul.f32 %v5399_v50, %v5312_v24  ;;  %v3260_v62 = vmul.f32 %v5406_v16, %v5911_v46 }
 0x2e2   :  { %v4025_v17 = vpop.eup %4024  ;;  %4030 = vrcp.f32 %v2884_v49  ;;  %v2891_v55 = vadd.f32 1.0, %v4023_v21  ;;  %v3176_v59 = vadd.f32 %v3175_v41, %v3169_v2  ;;  %v3180_v42 = vadd.f32 %v3179_v25, %v3172_v1 }
 0x2e3   :  { %v4027_v10 = vpop.eup %4026  ;;  %4032 = vrcp.f32 %v2886_v26  ;;  %v2893_v61 = vadd.f32 1.0, %v4025_v17  ;;  %3090 = vadd.xlane.f32.xlu1 %v3089_v33  ;;  %v3259_v26 = vmul.f32 %v5415_v31, %v5910_v18  ;;  %v3261_v21 = vmul.f32 %v5422_v44, %v5912_v13 }
 0x2e4   :  { %v4029_v39 = vpop.eup %4028  ;;  %4034 = vrcp.f32 %v2891_v55  ;;  %v2892_v51 = vadd.f32 1.0, %v4027_v10  ;;  %v3262_v60 = vmul.f32 %v5431_v14, %v5321_v23  ;;  %v3181_v50 = vadd.f32 %v3180_v42, %v3173_v56  ;;  %v5924_v10 = vld [vmem:[#allocation6_spill] sm:$0xff] }
 0x2e5   :  { %4036 = vrcp.f32 %v2893_v61  ;;  %v2894_v49 = vadd.f32 1.0, %v4029_v39  ;;  %3177 = vadd.xlane.f32.xlu0 %v3176_v59  ;;  %v3266_v22 = vadd.f32 %v3259_v26, %v3258_v40  ;;  %v3263_v2 = vmul.f32 %v5469_v8, %v5329_v12  ;;  %v5926_v40 = vld [vmem:[#allocation7_spill] sm:$0xff] }
 0x2e6   :  { %4038 = vrcp.f32 %v2892_v51  ;;  %v3264_v31 = vmul.f32 %v5465_v34, %v5325_v37  ;;  %v3265_v38 = vmul.f32 %v5475_v4, %v5332_v47  ;;  %v3005_v16 = vmul.f32 %v5483_v19, %v5220_v43  ;;  %v5925_v51 = vld [vmem:[#allocation8_spill] sm:$0xff] }
 0x2e7   :  { %4040 = vrcp.f32 %v2894_v49  ;;  %v3006_v44 = vmul.f32 %v5495_v6, %v5228_v28  ;;  %3182 = vadd.xlane.f32.xlu1 %v3181_v50  ;;  %v3267_v14 = vadd.f32 %v3266_v22, %v3260_v62  ;;  %v3271_v57 = vadd.f32 %v3263_v2, %v3262_v60  ;;  %v5927_v62 = vld [vmem:[#allocation9_spill] sm:$0xff]  ;;  %v5928_v60 = vld [vmem:[#allocation10_spill] sm:$0xff]  ;;  %v5929_v22 = vld [vmem:[#allocation12_spill] sm:$0xff] }
 0x2e8   :  { %v3007_v29 = vmul.f32 %v5488_v20, %v5224_v30  ;;  %v3008_v8 = vmul.f32 %v5502_v0, %v5232_v35  ;;  %v3009_v34 = vmul.f32 %v5509_v9, %v5913_v27  ;;  %v3010_v4 = vmul.f32 %v5521_v58, %v5914_v11 }
 0x2e9   :  { %v3013_v1 = vadd.f32 %v3006_v44, %v3005_v16  ;;  %v3011_v17 = vmul.f32 %v5514_v52, %v5915_v54  ;;  %v3268_v55 = vadd.f32 %v3267_v14, %v3261_v21  ;;  %v3272_v33 = vadd.f32 %v3271_v57, %v3264_v31 }
 0x2ea   :  { %v3012_v41 = vmul.f32 %v5527_v45, %v5916_v15  ;;  %v3097_v61 = vmul.f32 %v5483_v19, %v5924_v10  ;;  %v3018_v39 = vadd.f32 %v3010_v4, %v3009_v34  ;;  %v3098_v59 = vmul.f32 %v5495_v6, %v5925_v51  ;;  %v5930_v34 = vld [vmem:[#allocation14_spill] sm:$0xff] }
 0x2eb   :  { %v3014_v25 = vadd.f32 %v3013_v1, %v3007_v29  ;;  %v3099_v49 = vmul.f32 %v5488_v20, %v5926_v40  ;;  %3269 = vadd.xlane.f32.xlu0 %v3268_v55  ;;  %v3273_v26 = vadd.f32 %v3272_v33, %v3265_v38  ;;  %v3100_v21 = vmul.f32 %v5502_v0, %v5927_v62  ;;  %v5931_v55 = vld [vmem:[#allocation15_spill] sm:$0xff] }
 0x2ec   :  { %v5595_v56 = vpop.eup %4030  ;;  %v3101_v50 = vmul.f32 %v5509_v9, %v5928_v60  ;;  %v3102_v2 = vmul.f32 %v5521_v58, %v5929_v22  ;;  %v3019_v44 = vadd.f32 %v3018_v39, %v3011_v17  ;;  %v3105_v14 = vadd.f32 %v3098_v59, %v3097_v61 }
 0x2ed   :  { %v5601_v42 = vpop.eup %4032  ;;  %v3015_v16 = vadd.f32 %v3014_v25, %v3008_v8  ;;  %v3103_v57 = vmul.f32 %v5514_v52, %v5921_v48  ;;  %3274 = vadd.xlane.f32.xlu1 %v3273_v26  ;;  %v3104_v38 = vmul.f32 %v5527_v45, %v5923_v63  ;;  %v3189_v4 = vmul.f32 %v5483_v19, %v5930_v34 }
 0x2ee   :  { %v5609_v31 = vpop.eup %4034  ;;  %v3110_v1 = vadd.f32 %v3102_v2, %v3101_v50  ;;  %v3190_v33 = vmul.f32 %v5495_v6, %v5931_v55  ;;  %v3020_v8 = vadd.f32 %v3019_v44, %v3012_v41  ;;  %v3106_v17 = vadd.f32 %v3105_v14, %v3099_v49 }
 0x2ef   :  { %v5613_v29 = vpop.eup %4036  ;;  %v3191_v61 = vmul.f32 %v5488_v20, %v5287_v3  ;;  %v3192_v25 = vmul.f32 %v5502_v0, %v5294_v5  ;;  %3016 = vadd.xlane.f32.xlu0 %v3015_v16  ;;  %v3193_v50 = vmul.f32 %v5509_v9, %v5297_v7  ;;  %v3194_v2 = vmul.f32 %v5521_v58, %v5305_v36 }
 0x2f0   :  { %v5621_v22 = vpop.eup %4038  ;;  %v3111_v59 = vadd.f32 %v3110_v1, %v3103_v57  ;;  %v3197_v26 = vadd.f32 %v3190_v33, %v3189_v4  ;;  %v3107_v55 = vadd.f32 %v3106_v17, %v3100_v21  ;;  %v3195_v41 = vmul.f32 %v5514_v52, %v5301_v32 }
 0x2f1   :  { %v5627_v39 = vpop.eup %4040  ;;  %v3196_v49 = vmul.f32 %v5527_v45, %v5309_v53  ;;  %v3281_v44 = vmul.f32 %v5483_v19, %v5312_v24  ;;  %3021 = vadd.xlane.f32.xlu1 %v3020_v8  ;;  %v3202_v57 = vadd.f32 %v3194_v2, %v3193_v50  ;;  %v3282_v1 = vmul.f32 %v5495_v6, %v5910_v18 }
 0x2f2   :  { %v3112_v16 = vadd.f32 %v3111_v59, %v3104_v38  ;;  %v3198_v14 = vadd.f32 %v3197_v26, %v3191_v61  ;;  %v3283_v4 = vmul.f32 %v5488_v20, %v5911_v46  ;;  %v3284_v21 = vmul.f32 %v5502_v0, %v5912_v13  ;;  %v5932_v59 = vld [vmem:[#allocation17_spill] sm:$0xff] }
 0x2f3   :  { %v3285_v33 = vmul.f32 %v5509_v9, %v5321_v23  ;;  %v3286_v17 = vmul.f32 %v5521_v58, %v5329_v12  ;;  %3108 = vadd.xlane.f32.xlu0 %v3107_v55  ;;  %v3203_v38 = vadd.f32 %v3202_v57, %v3195_v41  ;;  %v3289_v8 = vadd.f32 %v3282_v1, %v3281_v44  ;;  %v5933_v55 = vld [vmem:[#allocation16_spill] sm:$0xff] }
 0x2f4   :  { %v3199_v19 = vadd.f32 %v3198_v14, %v3192_v25  ;;  %v3287_v61 = vmul.f32 %v5514_v52, %v5325_v37  ;;  %v3288_v6 = vmul.f32 %v5527_v45, %v5332_v47  ;;  %v3028_v0 = vmul.f32 %v5932_v59, %v5220_v43 }
 0x2f5   :  { %v3294_v20 = vadd.f32 %v3286_v17, %v3285_v33  ;;  %v3029_v9 = vmul.f32 %v5595_v56, %v5228_v28  ;;  %3113 = vadd.xlane.f32.xlu1 %v3112_v16  ;;  %v3204_v26 = vadd.f32 %v3203_v38, %v3196_v49  ;;  %v3290_v58 = vadd.f32 %v3289_v8, %v3283_v4  ;;  %v5935_v33 = vld [vmem:[#allocation15_spill] sm:$0xff] }
 0x2f6   :  { %v3030_v25 = vmul.f32 %v5933_v55, %v5224_v30  ;;  %v3031_v50 = vmul.f32 %v5601_v42, %v5232_v35  ;;  %v3032_v45 = vmul.f32 %v5609_v31, %v5913_v27  ;;  %v3033_v43 = vmul.f32 %v5621_v22, %v5914_v11 }
 0x2f7   :  { %v3295_v52 = vadd.f32 %v3294_v20, %v3287_v61  ;;  %v3036_v2 = vadd.f32 %v3029_v9, %v3028_v0  ;;  %3200 = vadd.xlane.f32.xlu0 %v3199_v19  ;;  %v3291_v41 = vadd.f32 %v3290_v58, %v3284_v21  ;;  %v3034_v28 = vmul.f32 %v5613_v29, %v5915_v54 }
 0x2f8   :  { %v3035_v49 = vmul.f32 %v5627_v39, %v5916_v15  ;;  %v3120_v30 = vmul.f32 %v5932_v59, %v5924_v10  ;;  %v3041_v16 = vadd.f32 %v3033_v43, %v3032_v45  ;;  %v3121_v27 = vmul.f32 %v5595_v56, %v5925_v51  ;;  %v5934_v15 = vld [vmem:[#allocation12_spill] sm:$0xff] }
 0x2f9   :  { %v3296_v35 = vadd.f32 %v3295_v52, %v3288_v6  ;;  %v3037_v44 = vadd.f32 %v3036_v2, %v3030_v25  ;;  %3205 = vadd.xlane.f32.xlu1 %v3204_v26  ;;  %v3122_v11 = vmul.f32 %v5933_v55, %v5926_v40  ;;  %v3123_v14 = vmul.f32 %v5601_v42, %v5927_v62 }
 0x2fa   :  { %v3124_v54 = vmul.f32 %v5609_v31, %v5928_v60  ;;  %v3125_v57 = vmul.f32 %v5621_v22, %v5934_v15  ;;  %v3042_v1 = vadd.f32 %v3041_v16, %v3034_v28  ;;  %v3128_v4 = vadd.f32 %v3121_v27, %v3120_v30 }
 0x2fb   :  { %v3038_v10 = vadd.f32 %v3037_v44, %v3031_v50  ;;  %v3126_v21 = vmul.f32 %v5613_v29, %v5921_v48  ;;  %3292 = vadd.xlane.f32.xlu0 %v3291_v41  ;;  %v3127_v51 = vmul.f32 %v5627_v39, %v5923_v63  ;;  %v3212_v62 = vmul.f32 %v5932_v59, %v5930_v34 }
 0x2fc   :  { %v3133_v40 = vadd.f32 %v3125_v57, %v3124_v54  ;;  %v3213_v60 = vmul.f32 %v5595_v56, %v5935_v33  ;;  %v3043_v17 = vadd.f32 %v3042_v1, %v3035_v49  ;;  %v3129_v19 = vadd.f32 %v3128_v4, %v3122_v11 }
 0x2fd   :  { %v3214_v38 = vmul.f32 %v5933_v55, %v5287_v3  ;;  %v3215_v8 = vmul.f32 %v5601_v42, %v5294_v5  ;;  %3297 = vadd.xlane.f32.xlu1 %v3296_v35  ;;  %v3216_v63 = vmul.f32 %v5609_v31, %v5297_v7  ;;  %v3217_v34 = vmul.f32 %v5621_v22, %v5305_v36 }
 0x2fe   :  { %v3134_v48 = vadd.f32 %v3133_v40, %v3126_v21  ;;  %v3220_v61 = vadd.f32 %v3213_v60, %v3212_v62  ;;  %v3130_v6 = vadd.f32 %v3129_v19, %v3123_v14  ;;  %v3218_v20 = vmul.f32 %v5613_v29, %v5301_v32 }
 0x2ff   :  { %v3219_v0 = vmul.f32 %v5627_v39, %v5309_v53  ;;  %v3304_v3 = vmul.f32 %v5932_v59, %v5312_v24  ;;  %3039 = vadd.xlane.f32.xlu0 %v3038_v10  ;;  %v3225_v26 = vadd.f32 %v3217_v34, %v3216_v63  ;;  %v3305_v7 = vmul.f32 %v5595_v56, %v5910_v18 }
 0x300   :  { %v3135_v5 = vadd.f32 %v3134_v48, %v3127_v51  ;;  %v3221_v9 = vadd.f32 %v3220_v61, %v3214_v38  ;;  %v3306_v36 = vmul.f32 %v5933_v55, %v5911_v46  ;;  %v3307_v58 = vmul.f32 %v5601_v42, %v5912_v13 }
 0x301   :  { %v3308_v32 = vmul.f32 %v5609_v31, %v5321_v23  ;;  %v3309_v53 = vmul.f32 %v5621_v22, %v5329_v12  ;;  %3044 = vadd.xlane.f32.xlu1 %v3043_v17  ;;  %v3226_v59 = vadd.f32 %v3225_v26, %v3218_v20  ;;  %v3312_v25 = vadd.f32 %v3305_v7, %v3304_v3 }
 0x302   :  { %v3222_v24 = vadd.f32 %v3221_v9, %v3215_v8  ;;  %v3310_v50 = vmul.f32 %v5613_v29, %v5325_v37  ;;  %v3311_v18 = vmul.f32 %v5627_v39, %v5332_v47 }
 0x303   :  { %v3317_v46 = vadd.f32 %v3309_v53, %v3308_v32  ;;  %3131 = vadd.xlane.f32.xlu0 %v3130_v6  ;;  %v3227_v56 = vadd.f32 %v3226_v59, %v3219_v0  ;;  %v3313_v13 = vadd.f32 %v3312_v25, %v3306_v36 }
 0x305   :  { %v3318_v42 = vadd.f32 %v3317_v46, %v3310_v50  ;;  %3136 = vadd.xlane.f32.xlu1 %v3135_v5  ;;  %v3314_v23 = vadd.f32 %v3313_v13, %v3307_v58 }
 0x307   :  { %v3319_v31 = vadd.f32 %v3318_v42, %v3311_v18  ;;  %3223 = vadd.xlane.f32.xlu0 %v3222_v24 }
 0x309   :  { %3228 = vadd.xlane.f32.xlu1 %v3227_v56 }
 0x30b   :  { %3315 = vadd.xlane.f32.xlu0 %v3314_v23 }
 0x30d   :  { %3320 = vadd.xlane.f32.xlu1 %v3319_v31 }
 0x353   :  { %v2971_v12 = vpop.xlane.xlu0 %2970 }
 0x354   :  { %v2977_v22 = vmul.f32 0.13245323, %v2971_v12 }
 0x356   :  { %2980 = vst.msk [vmem:[%s5863_s6] sm:$0xff] %vm2979_vm3, %v2977_v22  ;;  %v3068_v37 = vpop.xlane.xlu1 %3067 }
 0x357   :  { %v3063_v47 = vpop.xlane.xlu0 %3062  ;;  %v3070_v8 = vmul.f32 0.13245323, %v3068_v37 }
 0x358   :  { %v3069_v60 = vmul.f32 0.13245323, %v3063_v47 }
 0x35a   :  { %v5721_v29 = vpop.xlane.xlu1 %3159 }
 0x35b   :  { %v3162_v9 = vmul.f32 0.13245323, %v5721_v29 }
 0x35e   :  { %v3155_v39 = vpop.xlane.xlu0 %3154 }
 0x35f   :  { %v3161_v6 = vmul.f32 0.13245323, %v3155_v39 }
 0x361   :  { %v5723_v55 = vpop.xlane.xlu1 %3251 }
 0x362   :  { %v3254_v50 = vmul.f32 0.13245323, %v5723_v55 }
 0x366   :  { %v5725_v52 = vpop.xlane.xlu0 %3246 }
 0x367   :  { %v2994_v2 = vpop.xlane.xlu1 %2993  ;;  %v3253_v32 = vmul.f32 0.13245323, %v5725_v52 }
 0x368   :  { %v3000_v45 = vmul.f32 0.13245323, %v2994_v2 }
 0x36a   :  { %3003 = vst.msk [vmem:[%s5863_s6] sm:$0xff] %vm3002_vm4, %v3000_v45  ;;  %v2976_v43 = vpop.xlane.xlu0 %2975 }
 0x36b   :  { %v2978_v41 = vmul.f32 0.13245323, %v2976_v43 }
 0x36c   :  { %v2999_v28 = vpop.xlane.xlu1 %2998 }
 0x36d   :  { %2981 = vst.msk [vmem:[%s5863_s6 + $0x8] sm:$0xff] %vm2979_vm3, %v2978_v41  ;;  %v3001_v49 = vmul.f32 0.13245323, %v2999_v28 }
 0x36e   :  { %v3086_v30 = vpop.xlane.xlu0 %3085 }
 0x36f   :  { %3004 = vst.msk [vmem:[%s5863_s6 + $0x8] sm:$0xff] %vm3002_vm4, %v3001_v49  ;;  %v3092_v19 = vmul.f32 0.13245323, %v3086_v30 }
 0x370   :  { %v3091_v35 = vpop.xlane.xlu1 %3090 }
 0x371   :  { %v3093_v63 = vmul.f32 0.13245323, %v3091_v35 }
 0x372   :  { %v3178_v44 = vpop.xlane.xlu0 %3177 }
 0x373   :  { %v3184_v3 = vmul.f32 0.13245323, %v3178_v44 }
 0x374   :  { %v3183_v16 = vpop.xlane.xlu1 %3182 }
 0x375   :  { %v3185_v36 = vmul.f32 0.13245323, %v3183_v16 }
 0x378   :  { %v5737_v27 = vpop.xlane.xlu0 %3269 }
 0x379   :  { %v3276_v59 = vmul.f32 0.13245323, %v5737_v27 }
 0x37a   :  { %v5739_v11 = vpop.xlane.xlu1 %3274 }
 0x37b   :  { %v3277_v56 = vmul.f32 0.13245323, %v5739_v11 }
 0x37c   :  { %v3017_v14 = vpop.xlane.xlu0 %3016 }
 0x37d   :  { %v3023_v54 = vmul.f32 0.13245323, %v3017_v14 }
 0x37e   :  { %v3022_v15 = vpop.xlane.xlu1 %3021 }
 0x37f   :  { %3026 = vst.msk [vmem:[%s5863_s6] sm:$0xff] %vm3025_vm5, %v3023_v54  ;;  %v3024_v57 = vmul.f32 0.13245323, %v3022_v15 }
 0x380   :  { %v3109_v10 = vpop.xlane.xlu0 %3108 }
 0x381   :  { %3027 = vst.msk [vmem:[%s5863_s6 + $0x8] sm:$0xff] %vm3025_vm5, %v3024_v57  ;;  %v3115_v48 = vmul.f32 0.13245323, %v3109_v10 }
 0x382   :  { %v3114_v1 = vpop.xlane.xlu1 %3113 }
 0x383   :  { %v3116_v20 = vmul.f32 0.13245323, %v3114_v1 }
 0x384   :  { %v3201_v4 = vpop.xlane.xlu0 %3200 }
 0x385   :  { %v3207_v26 = vmul.f32 0.13245323, %v3201_v4 }
 0x386   :  { %v3206_v21 = vpop.xlane.xlu1 %3205 }
 0x387   :  { %v3208_v53 = vmul.f32 0.13245323, %v3206_v21 }
 0x388   :  { %v3293_v51 = vpop.xlane.xlu0 %3292 }
 0x389   :  { %v3299_v18 = vmul.f32 0.13245323, %v3293_v51 }
 0x38a   :  { %v5747_v40 = vpop.xlane.xlu1 %3297 }
 0x38b   :  { %v3300_v42 = vmul.f32 0.13245323, %v5747_v40 }
 0x38c   :  { %v3040_v62 = vpop.xlane.xlu0 %3039 }
 0x38d   :  { %v3046_v33 = vmul.f32 0.13245323, %v3040_v62 }
 0x38e   :  { %v3045_v17 = vpop.xlane.xlu1 %3044 }
 0x38f   :  { %3049 = vst.msk [vmem:[%s5863_s6] sm:$0xff] %vm3048_vm6, %v3046_v33  ;;  %v3047_v38 = vmul.f32 0.13245323, %v3045_v17 }
 0x390   :  { %3072 = vst.msk [vmem:[%s5863_s6] sm:$0xff] %vm3071_vm7, %v3069_v60  ;;  %v3132_v61 = vpop.xlane.xlu0 %3131 }
 0x391   :  { %3050 = vst.msk [vmem:[%s5863_s6 + $0x8] sm:$0xff] %vm3048_vm6, %v3047_v38  ;;  %v3138_v34 = vmul.f32 0.13245323, %v3132_v61 }
 0x392   :  { %3095 = vst.msk [vmem:[%s5863_s6] sm:$0xff] %vm3094_vm8, %v3092_v19  ;;  %v3137_v0 = vpop.xlane.xlu1 %3136 }
 0x393   :  { %3073 = vst.msk [vmem:[%s5863_s6 + $0x8] sm:$0xff] %vm3071_vm7, %v3070_v8  ;;  %v3139_v5 = vmul.f32 0.13245323, %v3137_v0 }
 0x394   :  { %3118 = vst.msk [vmem:[%s5863_s6] sm:$0xff] %vm3117_vm9, %v3115_v48  ;;  %v3224_v7 = vpop.xlane.xlu0 %3223 }
 0x395   :  { %3141 = vst.msk [vmem:[%s5863_s6] sm:$0xff] %vm3140_vm10, %v3138_v34  ;;  %v3230_v58 = vmul.f32 0.13245323, %v3224_v7 }
 0x396   :  { %3096 = vst.msk [vmem:[%s5863_s6 + $0x8] sm:$0xff] %vm3094_vm8, %v3093_v63  ;;  %v3229_v24 = vpop.xlane.xlu1 %3228 }
 0x397   :  { %3164 = vst.msk [vmem:[%s5863_s6] sm:$0xff] %vm3163_vm11, %v3161_v6  ;;  %v3231_v25 = vmul.f32 0.13245323, %v3229_v24 }
 0x398   :  { %3119 = vst.msk [vmem:[%s5863_s6 + $0x8] sm:$0xff] %vm3117_vm9, %v3116_v20  ;;  %v3316_v46 = vpop.xlane.xlu0 %3315 }
 0x399   :  { %3142 = vst.msk [vmem:[%s5863_s6 + $0x8] sm:$0xff] %vm3140_vm10, %v3139_v5  ;;  %v3322_v13 = vmul.f32 0.13245323, %v3316_v46 }
 0x39a   :  { %3187 = vst.msk [vmem:[%s5863_s6] sm:$0xff] %vm3186_vm12, %v3184_v3  ;;  %v3321_v23 = vpop.xlane.xlu1 %3320 }
 0x39b   :  { %3165 = vst.msk [vmem:[%s5863_s6 + $0x8] sm:$0xff] %vm3163_vm11, %v3162_v9  ;;  %v3323_v31 = vmul.f32 0.13245323, %v3321_v23 }
 0x39c   :  { %3210 = vst.msk [vmem:[%s5863_s6] sm:$0xff] %vm3209_vm13, %v3207_v26 }
 0x39d   :  { %3233 = vst.msk [vmem:[%s5863_s6] sm:$0xff] %vm3232_vm14, %v3230_v58 }
 0x39e   :  { %3188 = vst.msk [vmem:[%s5863_s6 + $0x8] sm:$0xff] %vm3186_vm12, %v3185_v36 }
 0x39f   :  { %3256 = vst.msk [vmem:[%s5863_s6] sm:$0xff] %vm3255_vm15, %v3253_v32 }
 0x3a0   :  { %3211 = vst.msk [vmem:[%s5863_s6 + $0x8] sm:$0xff] %vm3209_vm13, %v3208_v53 }
 0x3a1   :  { %3234 = vst.msk [vmem:[%s5863_s6 + $0x8] sm:$0xff] %vm3232_vm14, %v3231_v25 }
 0x3a2   :  { %3279 = vst.msk [vmem:[%s5863_s6] sm:$0xff] %vm3278_vm0, %v3276_v59 }
 0x3a3   :  { %3257 = vst.msk [vmem:[%s5863_s6 + $0x8] sm:$0xff] %vm3255_vm15, %v3254_v50 }
 0x3a4   :  { %3302 = vst.msk [vmem:[%s5863_s6] sm:$0xff] %vm3301_vm1, %v3299_v18 }
 0x3a5   :  { %3325 = vst.msk [vmem:[%s5863_s6] sm:$0xff] %vm3324_vm2, %v3322_v13 }
 0x3a6   :  { %3280 = vst.msk [vmem:[%s5863_s6 + $0x8] sm:$0xff] %vm3278_vm0, %v3277_v56 }
 0x3a7   :  { %3303 = vst.msk [vmem:[%s5863_s6 + $0x8] sm:$0xff] %vm3301_vm1, %v3300_v42 }
 0x3a8   :  { %3326 = vst.msk [vmem:[%s5863_s6 + $0x8] sm:$0xff] %vm3324_vm2, %v3323_v31 }

// kernel: fgn_forward.3
= control target key start
LH: loop header
LB: loop body
LE: loop exit
PB: predicated region body
PF: predicated region fallthrough
CT: control target
= control target key end

     0   :  { %v5063_v1 = vmov 0   ;;  %v3427_v2 = vmov 0.0   ;;  %s5057_s2 = inlined_call_operand.vmem [shape: bf16[128,512], index: 2, kind: input, shape index: {}]   ;;  %s5058_s3 = inlined_call_operand.vmem [shape: bf16[128,512], index: 3, kind: input, shape index: {}]   ;;  %s5059_s0 = inlined_call_operand.vmem [shape: f32[8,2,512], index: 0, kind: input, shape index: {}]   ;;  %s5060_s1 = inlined_call_operand.vmem [shape: f32[8,2,512], index: 1, kind: input, shape index: {}]   ;;  %s5061_s4 = inlined_call_operand.vmem [shape: f32[8,2,128], index: 4, kind: output, shape index: {0}]   ;;  %s5062_s5 = inlined_call_operand.vmem [shape: f32[8,2,128], index: 5, kind: output, shape index: {1}]  }
   0x1   :  { %v3462_v0 = vld [vmem:[%s5057_s2 + $0x4] ss:$16 sps:$4 sm:$0xff]   ;;  %326 = vmatprep.mubr.bf16.mxu0 %v5063_v1  ;;  %367 = vmatprep.mubr.bf16.mxu1 %v5063_v1  ;;  %63 = vst [vmem:[#allocation2] sm:$0x3] %v3427_v2  ;;  %64 = vst [vmem:[#allocation3] sm:$0x3] %v3427_v2 }
   0x2   :  { %65 = vst [vmem:[#allocation4] sm:$0x3] %v3427_v2  ;;  %66 = vst [vmem:[#allocation5] sm:$0x3] %v3427_v2  ;;  %v3469_v3 = vld [vmem:[%s5057_s2 + $0xc] ss:$16 sps:$4 sm:$0xff]   ;;  %294 = vmatprep.subr.bf16.mxu0 %v3462_v0 }
   0x3   :  { %v3475_v4 = vld [vmem:[%s5057_s2] ss:$16 sps:$4 sm:$0xff]   ;;  %v3480_v5 = vld [vmem:[%s5057_s2 + $0x8] ss:$16 sps:$4 sm:$0xff]   ;;  %335 = vmatprep.subr.bf16.mxu1 %v3469_v3  ;;  %v3486_v6 = vld [vmem:[%s5057_s2 + $0x24] ss:$16 sps:$4 sm:$0xff]  }
   0x4   :  { %295 = vmatpush1.bf16.msra.mxu0 %v3475_v4  ;;  %336 = vmatpush1.bf16.msra.mxu1 %v3480_v5  ;;  %v3493_v7 = vld [vmem:[%s5057_s2 + $0x2c] ss:$16 sps:$4 sm:$0xff]   ;;  %v3498_v8 = vld [vmem:[%s5057_s2 + $0x20] ss:$16 sps:$4 sm:$0xff]   ;;  %v3504_v9 = vld [vmem:[%s5057_s2 + $0x28] ss:$16 sps:$4 sm:$0xff]  }
   0x5   :  { %296 = vmatprep.subr.bf16.mxu0 %v3486_v6  ;;  %337 = vmatprep.subr.bf16.mxu1 %v3493_v7  ;;  %v3510_v10 = vld [vmem:[%s5057_s2 + $0x44] ss:$16 sps:$4 sm:$0xff]   ;;  %v3515_v11 = vld [vmem:[%s5057_s2 + $0x4c] ss:$16 sps:$4 sm:$0xff]   ;;  %v3520_v12 = vld [vmem:[%s5057_s2 + $0x40] ss:$16 sps:$4 sm:$0xff]  }
   0x6   :  { %v3525_v13 = vld [vmem:[%s5057_s2 + $0x48] ss:$16 sps:$4 sm:$0xff]   ;;  %v3532_v14 = vld [vmem:[%s5057_s2 + $0x64] ss:$16 sps:$4 sm:$0xff]   ;;  %v3539_v15 = vld [vmem:[%s5057_s2 + $0x6c] ss:$16 sps:$4 sm:$0xff]  }
   0x7   :  { %5145 = vst [vmem:[#allocation6_spill] sm:$0xff] %v3539_v15  ;;  %v3544_v16 = vld [vmem:[%s5057_s2 + $0x60] ss:$16 sps:$4 sm:$0xff]   ;;  %v3551_v17 = vld [vmem:[%s5057_s2 + $0x68] ss:$16 sps:$4 sm:$0xff]  }
   0x8   :  { %297 = vmatpush1.bf16.msra.mxu0 %v3498_v8  ;;  %338 = vmatpush1.bf16.msra.mxu1 %v3504_v9  ;;  %5146 = vst [vmem:[#allocation7_spill] sm:$0xff] %v3544_v16  ;;  %5147 = vst [vmem:[#allocation8_spill] sm:$0xff] %v3551_v17  ;;  %v3556_v18 = vld [vmem:[%s5057_s2 + $0x84] ss:$16 sps:$4 sm:$0xff]   ;;  %v3563_v19 = vld [vmem:[%s5057_s2 + $0x8c] ss:$16 sps:$4 sm:$0xff]  }
   0x9   :  { %298 = vmatprep.subr.bf16.mxu0 %v3510_v10  ;;  %339 = vmatprep.subr.bf16.mxu1 %v3515_v11  ;;  %5148 = vst [vmem:[#allocation9_spill] sm:$0xff] %v3556_v18  ;;  %5149 = vst [vmem:[#allocation10_spill] sm:$0xff] %v3563_v19  ;;  %v3568_v20 = vld [vmem:[%s5057_s2 + $0x80] ss:$16 sps:$4 sm:$0xff]   ;;  %v3573_v21 = vld [vmem:[%s5057_s2 + $0x88] ss:$16 sps:$4 sm:$0xff]  }
   0xa   :  { %5150 = vst [vmem:[#allocation11_spill] sm:$0xff] %v3568_v20  ;;  %5151 = vst [vmem:[#allocation12_spill] sm:$0xff] %v3573_v21  ;;  %v3580_v22 = vld [vmem:[%s5057_s2 + $0xa4] ss:$16 sps:$4 sm:$0xff]   ;;  %v3587_v23 = vld [vmem:[%s5057_s2 + $0xac] ss:$16 sps:$4 sm:$0xff]  }
   0xb   :  { %5152 = vst [vmem:[#allocation13_spill] sm:$0xff] %v3580_v22  ;;  %5153 = vst [vmem:[#allocation14_spill] sm:$0xff] %v3587_v23  ;;  %v3594_v24 = vld [vmem:[%s5057_s2 + $0xa0] ss:$16 sps:$4 sm:$0xff]   ;;  %v3599_v25 = vld [vmem:[%s5057_s2 + $0xa8] ss:$16 sps:$4 sm:$0xff]  }
   0xc   :  { %299 = vmatpush1.bf16.msra.mxu0 %v3520_v12  ;;  %340 = vmatpush1.bf16.msra.mxu1 %v3525_v13  ;;  %5154 = vst [vmem:[#allocation15_spill] sm:$0xff] %v3594_v24  ;;  %5155 = vst [vmem:[#allocation16_spill] sm:$0xff] %v3599_v25  ;;  %v3606_v26 = vld [vmem:[%s5057_s2 + $0xc4] ss:$16 sps:$4 sm:$0xff]   ;;  %v3611_v27 = vld [vmem:[%s5057_s2 + $0xcc] ss:$16 sps:$4 sm:$0xff]  }
   0xd   :  { %300 = vmatprep.subr.bf16.mxu0 %v3532_v14  ;;  %341 = vmatprep.subr.bf16.mxu1 %v3539_v15  ;;  %5156 = vst [vmem:[#allocation17_spill] sm:$0xff] %v3606_v26  ;;  %5157 = vst [vmem:[#allocation18_spill] sm:$0xff] %v3611_v27  ;;  %v3616_v28 = vld [vmem:[%s5057_s2 + $0xc0] ss:$16 sps:$4 sm:$0xff]   ;;  %v3621_v29 = vld [vmem:[%s5057_s2 + $0xc8] ss:$16 sps:$4 sm:$0xff]  }
   0xe   :  { %5158 = vst [vmem:[#allocation19_spill] sm:$0xff] %v3616_v28  ;;  %5159 = vst [vmem:[#allocation20_spill] sm:$0xff] %v3621_v29  ;;  %v3628_v30 = vld [vmem:[%s5057_s2 + $0xe4] ss:$16 sps:$4 sm:$0xff]   ;;  %v3635_v31 = vld [vmem:[%s5057_s2 + $0xec] ss:$16 sps:$4 sm:$0xff]  }
   0xf   :  { %5160 = vst [vmem:[#allocation21_spill] sm:$0xff] %v3628_v30  ;;  %5161 = vst [vmem:[#allocation22_spill] sm:$0xff] %v3635_v31  ;;  %v3640_v32 = vld [vmem:[%s5057_s2 + $0xe0] ss:$16 sps:$4 sm:$0xff]   ;;  %v3645_v33 = vld [vmem:[%s5057_s2 + $0xe8] ss:$16 sps:$4 sm:$0xff]  }
  0x10   :  { %301 = vmatpush1.bf16.msra.mxu0 %v3544_v16  ;;  %342 = vmatpush1.bf16.msra.mxu1 %v3551_v17  ;;  %5162 = vst [vmem:[#allocation23_spill] sm:$0xff] %v3640_v32  ;;  %5163 = vst [vmem:[#allocation24_spill] sm:$0xff] %v3645_v33  ;;  %v132_v34 = vld [vmem:[#allocation2] sm:$0x3]  ;;  %v3654_v35 = vld [vmem:[%s5058_s3 + $0x4] ss:$16 sps:$4 sm:$0xff]  }
  0x11   :  { %302 = vmatprep.subr.bf16.mxu0 %v3556_v18  ;;  %343 = vmatprep.subr.bf16.mxu1 %v3563_v19  ;;  %5164 = vst [vmem:[#allocation25_spill] sm:$0xff] %v3654_v35  ;;  %v3659_v36 = vld [vmem:[%s5058_s3 + $0xc] ss:$16 sps:$4 sm:$0xff]   ;;  %v133_v37 = vpack.c.bf16 %v132_v34, %v132_v34  ;;  %v3664_v38 = vld [vmem:[%s5058_s3] ss:$16 sps:$4 sm:$0xff]  }
  0x12   :  { %5165 = vst [vmem:[#allocation26_spill] sm:$0xff] %v3659_v36  ;;  %v3669_v39 = vld [vmem:[%s5058_s3 + $0x8] ss:$16 sps:$4 sm:$0xff]   ;;  %v3676_v40 = vld [vmem:[%s5058_s3 + $0x24] ss:$16 sps:$4 sm:$0xff]  }
  0x13   :  { %v3683_v41 = vld [vmem:[%s5058_s3 + $0x2c] ss:$16 sps:$4 sm:$0xff]   ;;  %v3688_v42 = vld [vmem:[%s5058_s3 + $0x20] ss:$16 sps:$4 sm:$0xff]   ;;  %v3695_v43 = vld [vmem:[%s5058_s3 + $0x28] ss:$16 sps:$4 sm:$0xff]  }
  0x14   :  { %303 = vmatpush1.bf16.msra.mxu0 %v3568_v20  ;;  %344 = vmatpush1.bf16.msra.mxu1 %v3573_v21  ;;  %v3702_v44 = vld [vmem:[%s5058_s3 + $0x44] ss:$16 sps:$4 sm:$0xff]   ;;  %v3707_v45 = vld [vmem:[%s5058_s3 + $0x4c] ss:$16 sps:$4 sm:$0xff]   ;;  %v3714_v46 = vld [vmem:[%s5058_s3 + $0x40] ss:$16 sps:$4 sm:$0xff]  }
  0x15   :  { %304 = vmatprep.subr.bf16.mxu0 %v3580_v22  ;;  %345 = vmatprep.subr.bf16.mxu1 %v3587_v23  ;;  %v3719_v47 = vld [vmem:[%s5058_s3 + $0x48] ss:$16 sps:$4 sm:$0xff]   ;;  %v3726_v48 = vld [vmem:[%s5058_s3 + $0x64] ss:$16 sps:$4 sm:$0xff]   ;;  %v3733_v49 = vld [vmem:[%s5058_s3 + $0x6c] ss:$16 sps:$4 sm:$0xff]  }
  0x16   :  { %v3740_v50 = vld [vmem:[%s5058_s3 + $0x60] ss:$16 sps:$4 sm:$0xff]   ;;  %v3745_v51 = vld [vmem:[%s5058_s3 + $0x68] ss:$16 sps:$4 sm:$0xff]   ;;  %v3752_v52 = vld [vmem:[%s5058_s3 + $0x84] ss:$16 sps:$4 sm:$0xff]  }
  0x17   :  { %v3757_v53 = vld [vmem:[%s5058_s3 + $0x8c] ss:$16 sps:$4 sm:$0xff]   ;;  %v3764_v54 = vld [vmem:[%s5058_s3 + $0x80] ss:$16 sps:$4 sm:$0xff]   ;;  %v3769_v55 = vld [vmem:[%s5058_s3 + $0x88] ss:$16 sps:$4 sm:$0xff]  }
  0x18   :  { %305 = vmatpush1.bf16.msra.mxu0 %v3594_v24  ;;  %346 = vmatpush1.bf16.msra.mxu1 %v3599_v25  ;;  %v3776_v56 = vld [vmem:[%s5058_s3 + $0xa4] ss:$16 sps:$4 sm:$0xff]   ;;  %v3781_v57 = vld [vmem:[%s5058_s3 + $0xac] ss:$16 sps:$4 sm:$0xff]   ;;  %v3788_v58 = vld [vmem:[%s5058_s3 + $0xa0] ss:$16 sps:$4 sm:$0xff]  }
  0x19   :  { %306 = vmatprep.subr.bf16.mxu0 %v3606_v26  ;;  %347 = vmatprep.subr.bf16.mxu1 %v3611_v27  ;;  %v3793_v59 = vld [vmem:[%s5058_s3 + $0xa8] ss:$16 sps:$4 sm:$0xff]   ;;  %v3800_v60 = vld [vmem:[%s5058_s3 + $0xc4] ss:$16 sps:$4 sm:$0xff]   ;;  %v3805_v61 = vld [vmem:[%s5058_s3 + $0xcc] ss:$16 sps:$4 sm:$0xff]  }
  0x1a   :  { %5166 = vst [vmem:[#allocation27_spill] sm:$0xff] %v3800_v60  ;;  %5167 = vst [vmem:[#allocation28_spill] sm:$0xff] %v3805_v61  ;;  %v3812_v62 = vld [vmem:[%s5058_s3 + $0xc0] ss:$16 sps:$4 sm:$0xff]   ;;  %v3817_v63 = vld [vmem:[%s5058_s3 + $0xc8] ss:$16 sps:$4 sm:$0xff]  }
  0x1b   :  { %v3824_v2 = vld [vmem:[%s5058_s3 + $0xe4] ss:$16 sps:$4 sm:$0xff]   ;;  %v3829_v34 = vld [vmem:[%s5058_s3 + $0xec] ss:$16 sps:$4 sm:$0xff]  }
  0x1c   :  { %307 = vmatpush1.bf16.msra.mxu0 %v3616_v28  ;;  %348 = vmatpush1.bf16.msra.mxu1 %v3621_v29  ;;  %5168 = vst [vmem:[#allocation29_spill] sm:$0xff] %v3829_v34 }
  0x1d   :  { %308 = vmatprep.subr.bf16.mxu0 %v3628_v30  ;;  %349 = vmatprep.subr.bf16.mxu1 %v3635_v31 }
  0x20   :  { %309 = vmatpush1.bf16.msra.mxu0 %v3640_v32  ;;  %350 = vmatpush1.bf16.msra.mxu1 %v3645_v33 }
  0x21   :  { %563 = vmatprep.subr.bf16.mxu0 %v3654_v35  ;;  %604 = vmatprep.subr.bf16.mxu1 %v3659_v36 }
  0x23   :  { %327 = vmatmul.mubr.bf16.vlgmr.msra.gmra.mrb[0].mxu0 %v133_v37  ;;  %368 = vmatmul.mubr.bf16.vlgmr.msra.gmra.mrb[0].mxu1 %v133_v37  ;;  %v3836_v37 = vld [vmem:[%s5058_s3 + $0xe0] ss:$16 sps:$4 sm:$0xff]  }
  0x24   :  { %564 = vmatpush1.bf16.msra.mxu0 %v3664_v38  ;;  %605 = vmatpush1.bf16.msra.mxu1 %v3669_v39 }
  0x25   :  { %565 = vmatprep.subr.bf16.mxu0 %v3676_v40  ;;  %606 = vmatprep.subr.bf16.mxu1 %v3683_v41 }
  0x26   :  { %595 = vmatprep.mubr.bf16.mxu0 %v5063_v1  ;;  %636 = vmatprep.mubr.bf16.mxu1 %v5063_v1  ;;  %v3841_v1 = vld [vmem:[%s5058_s3 + $0xe8] ss:$16 sps:$4 sm:$0xff]  }
  0x28   :  { %566 = vmatpush1.bf16.msra.mxu0 %v3688_v42  ;;  %607 = vmatpush1.bf16.msra.mxu1 %v3695_v43 }
  0x29   :  { %567 = vmatprep.subr.bf16.mxu0 %v3702_v44  ;;  %608 = vmatprep.subr.bf16.mxu1 %v3707_v45 }
  0x2c   :  { %568 = vmatpush1.bf16.msra.mxu0 %v3714_v46  ;;  %609 = vmatpush1.bf16.msra.mxu1 %v3719_v47 }
  0x2d   :  { %569 = vmatprep.subr.bf16.mxu0 %v3726_v48  ;;  %610 = vmatprep.subr.bf16.mxu1 %v3733_v49 }
  0x30   :  { %570 = vmatpush1.bf16.msra.mxu0 %v3740_v50  ;;  %611 = vmatpush1.bf16.msra.mxu1 %v3745_v51 }
  0x31   :  { %571 = vmatprep.subr.bf16.mxu0 %v3752_v52  ;;  %612 = vmatprep.subr.bf16.mxu1 %v3757_v53 }
  0x34   :  { %572 = vmatpush1.bf16.msra.mxu0 %v3764_v54  ;;  %613 = vmatpush1.bf16.msra.mxu1 %v3769_v55 }
  0x35   :  { %573 = vmatprep.subr.bf16.mxu0 %v3776_v56  ;;  %614 = vmatprep.subr.bf16.mxu1 %v3781_v57 }
  0x38   :  { %574 = vmatpush1.bf16.msra.mxu0 %v3788_v58  ;;  %615 = vmatpush1.bf16.msra.mxu1 %v3793_v59 }
  0x39   :  { %575 = vmatprep.subr.bf16.mxu0 %v3800_v60  ;;  %616 = vmatprep.subr.bf16.mxu1 %v3805_v61  ;;  %v401_v61 = vld [vmem:[#allocation4] sm:$0x3] }
  0x3a   :  { %v402_v60 = vpack.c.bf16 %v401_v61, %v401_v61 }
  0x3c   :  { %576 = vmatpush1.bf16.msra.mxu0 %v3812_v62  ;;  %617 = vmatpush1.bf16.msra.mxu1 %v3817_v63 }
  0x3d   :  { %577 = vmatprep.subr.bf16.mxu0 %v3824_v2  ;;  %618 = vmatprep.subr.bf16.mxu1 %v3829_v34  ;;  %v5169_v34 = vmov 0  }
  0x40   :  { %578 = vmatpush1.bf16.msra.mxu0 %v3836_v37  ;;  %619 = vmatpush1.bf16.msra.mxu1 %v3841_v1 }
  0x41   :  { %743 = vmatprep.subr.bf16.mxu0 %v3462_v0  ;;  %784 = vmatprep.subr.bf16.mxu1 %v3469_v3 }
  0x43   :  { %596 = vmatmul.mubr.bf16.vlgmr.msra.gmra.mrb[4].mxu0 %v402_v60  ;;  %637 = vmatmul.mubr.bf16.vlgmr.msra.gmra.mrb[4].mxu1 %v402_v60  ;;  %v3428_v60 = vmov 1983009808  }
  0x44   :  { %744 = vmatpush1.bf16.msra.mxu0 %v3475_v4  ;;  %785 = vmatpush1.bf16.msra.mxu1 %v3480_v5  ;;  %v383_v61 = vunpack.c.l.s4 %v3428_v60 }
  0x45   :  { %745 = vmatprep.subr.bf16.mxu0 %v3486_v6  ;;  %786 = vmatprep.subr.bf16.mxu1 %v3493_v7 }
  0x46   :  { %775 = vmatprep.mubr.bf16.mxu0 %v5169_v34  ;;  %816 = vmatprep.mubr.bf16.mxu1 %v5169_v34 }
  0x48   :  { %746 = vmatpush1.bf16.msra.mxu0 %v3498_v8  ;;  %787 = vmatpush1.bf16.msra.mxu1 %v3504_v9 }
  0x49   :  { %747 = vmatprep.subr.bf16.mxu0 %v3510_v10  ;;  %788 = vmatprep.subr.bf16.mxu1 %v3515_v11 }
  0x4c   :  { %748 = vmatpush1.bf16.msra.mxu0 %v3520_v12  ;;  %789 = vmatpush1.bf16.msra.mxu1 %v3525_v13 }
  0x4d   :  { %749 = vmatprep.subr.bf16.mxu0 %v3532_v14  ;;  %790 = vmatprep.subr.bf16.mxu1 %v3539_v15 }
  0x50   :  { %750 = vmatpush1.bf16.msra.mxu0 %v3544_v16  ;;  %791 = vmatpush1.bf16.msra.mxu1 %v3551_v17 }
  0x51   :  { %751 = vmatprep.subr.bf16.mxu0 %v3556_v18  ;;  %792 = vmatprep.subr.bf16.mxu1 %v3563_v19 }
  0x54   :  { %752 = vmatpush1.bf16.msra.mxu0 %v3568_v20  ;;  %793 = vmatpush1.bf16.msra.mxu1 %v3573_v21 }
  0x55   :  { %753 = vmatprep.subr.bf16.mxu0 %v3580_v22  ;;  %794 = vmatprep.subr.bf16.mxu1 %v3587_v23 }
  0x58   :  { %754 = vmatpush1.bf16.msra.mxu0 %v3594_v24  ;;  %795 = vmatpush1.bf16.msra.mxu1 %v3599_v25 }
  0x59   :  { %755 = vmatprep.subr.bf16.mxu0 %v3606_v26  ;;  %796 = vmatprep.subr.bf16.mxu1 %v3611_v27  ;;  %v385_v26 = vlaneseq  ;;  %v384_v27 = vunpack.c.0.s8 %v383_v61 }
  0x5b   :  { %v386_v25 = vshrl.u32 %v385_v26, 7  ;;  %v131_v26 = vld [vmem:[%s5059_s0] sm:$0xff] }
  0x5c   :  { %756 = vmatpush1.bf16.msra.mxu0 %v3616_v28  ;;  %797 = vmatpush1.bf16.msra.mxu1 %v3621_v29 }
  0x5d   :  { %757 = vmatprep.subr.bf16.mxu0 %v3628_v30  ;;  %798 = vmatprep.subr.bf16.mxu1 %v3635_v31  ;;  %v3883_v29 = vsub.s32 %v384_v27, %v386_v25 }
  0x5f   :  { %5170 = vst [vmem:[#allocation30_spill] sm:$0xff] %v3883_v29 }
  0x60   :  { %758 = vmatpush1.bf16.msra.mxu0 %v3640_v32  ;;  %799 = vmatpush1.bf16.msra.mxu1 %v3645_v33 }
  0x61   :  { %852 = vmatprep.subr.bf16.mxu0 %v3654_v35  ;;  %893 = vmatprep.subr.bf16.mxu1 %v3659_v36 }
  0xf6   :  { %v328_v28 = vpop.f32.mrb[0].mxu0  ;;  %v369_v24 = vpop.f32.mrb[0].mxu1 }
  0xf7   :  { %v330_v30 = vpop.f32.mrb[1].mxu0  ;;  %v371_v23 = vpop.f32.mrb[1].mxu1 }
  0xf8   :  { %v380_v31 = vcombine.low %v328_v28, %v330_v30  ;;  %v381_v22 = vcombine.low %v369_v24, %v371_v23  ;;  %v332_v32 = vpop.f32.mrb[2].mxu0  ;;  %v373_v21 = vpop.f32.mrb[2].mxu1 }
  0xf9   :  { %v333_v33 = vpop.f32.mrb[3].mxu0  ;;  %v374_v20 = vpop.f32.mrb[3].mxu1 }
  0xfa   :  { %v388_v35 = vrot.slane %v380_v31, %v3883_v29  ;;  %v395_v36 = vrot.slane %v381_v22, %v3883_v29 }
  0xfc   :  { %v396_v60 = vcombine.low %v388_v35, %v395_v36 }
  0xfe   :  { %v398_v61 = vadd.f32 %v396_v60, %v131_v26 }
 0x100   :  { %v2868_v25 = vmul.f32 -1.442695, %v398_v61  ;;  %v676_v27 = vrot.slane %v398_v61, 2  ;;  %v687_v23 = vrot.slane %v398_v61, 6  ;;  %v684_v28 = vrot.slane %v398_v61, 4 }
 0x102   :  { %3042 = vpow2.f32 %v2868_v25  ;;  %v2869_v19 = vmul.f32 -1.442695, %v676_v27  ;;  %v2870_v24 = vmul.f32 -1.442695, %v687_v23  ;;  %v668_v23 = vld [vmem:[#allocation3] sm:$0x3] }
 0x104   :  { %3044 = vpow2.f32 %v2869_v19 }
 0x105   :  { %3046 = vpow2.f32 %v2870_v24 }
 0x10c   :  { %v3043_v21 = vpop.eup %3042 }
 0x10d   :  { %v672_v20 = vadd.f32 1.0, %v3043_v21 }
 0x10e   :  { %v3045_v30 = vpop.eup %3044 }
 0x10f   :  { %3048 = vrcp.f32 %v672_v20  ;;  %v681_v22 = vadd.f32 1.0, %v3045_v30  ;;  %v3047_v36 = vpop.eup %3046 }
 0x110   :  { %3050 = vtanh.f32 %v684_v28  ;;  %v692_v30 = vadd.f32 1.0, %v3047_v36 }
 0x111   :  { %3052 = vrcp.f32 %v681_v22  ;;  %v2835_v22 = vld [vmem:[%s5060_s1 + $0x38] sm:$0xff] }
 0x112   :  { %3054 = vrcp.f32 %v692_v30  ;;  %v700_v30 = vld [vmem:[#allocation5] sm:$0x3] }
 0x116   :  { %v597_v31 = vpop.f32.mrb[4].mxu0  ;;  %v638_v32 = vpop.f32.mrb[4].mxu1 }
 0x117   :  { %v599_v33 = vpop.f32.mrb[5].mxu0  ;;  %v640_v35 = vpop.f32.mrb[5].mxu1 }
 0x118   :  { %v649_v26 = vcombine.low %v597_v31, %v599_v33  ;;  %v650_v60 = vcombine.low %v638_v32, %v640_v35  ;;  %v601_v25 = vpop.f32.mrb[6].mxu0  ;;  %v642_v19 = vpop.f32.mrb[6].mxu1 }
 0x119   :  { %v3049_v27 = vpop.eup %3048  ;;  %v602_v18 = vpop.f32.mrb[7].mxu0 }
 0x11a   :  { %v643_v61 = vpop.f32.mrb[7].mxu1  ;;  %v3051_v21 = vpop.eup %3050  ;;  %v657_v24 = vrot.slane %v649_v26, %v3883_v29  ;;  %v664_v20 = vrot.slane %v650_v60, %v3883_v29 }
 0x11b   :  { %v3053_v28 = vpop.eup %3052  ;;  %v696_v31 = vmul.f32 %v3051_v21, %v3049_v27 }
 0x11c   :  { %v695_v17 = vmul.f32 %v3053_v28, %v668_v23  ;;  %v665_v32 = vcombine.low %v657_v24, %v664_v20  ;;  %v3055_v19 = vpop.eup %3054 }
 0x11e   :  { %v697_v33 = vadd.f32 %v696_v31, %v695_v17  ;;  %v667_v35 = vadd.f32 %v2835_v22, %v665_v32 }
 0x120   :  { %3056 = vtanh.f32 %v697_v33  ;;  %733 = vst [vmem:[#allocation3] sm:$0x3] %v697_v33  ;;  %v2871_v18 = vmul.f32 -1.442695, %v667_v35  ;;  %v708_v25 = vrot.slane %v667_v35, 2  ;;  %v719_v60 = vrot.slane %v667_v35, 6 }
 0x121   :  { %v716_v15 = vrot.slane %v667_v35, 4 }
 0x122   :  { %3058 = vpow2.f32 %v2871_v18  ;;  %v2872_v26 = vmul.f32 -1.442695, %v708_v25  ;;  %v2873_v61 = vmul.f32 -1.442695, %v719_v60  ;;  %v5171_v25 = vld [vmem:[#allocation27_spill] sm:$0xff]  ;;  %v5173_v60 = vld [vmem:[#allocation29_spill] sm:$0xff] }
 0x124   :  { %3060 = vpow2.f32 %v2872_v26  ;;  %v5172_v26 = vld [vmem:[#allocation28_spill] sm:$0xff] }
 0x125   :  { %3062 = vpow2.f32 %v2873_v61  ;;  %v5187_v61 = vld [vmem:[#allocation19_spill] sm:$0xff] }
 0x12a   :  { %v3057_v36 = vpop.eup %3056 }
 0x12b   :  { %v699_v29 = vmul.f32 %v3057_v36, %v3055_v19 }
 0x12c   :  { %v3059_v16 = vpop.eup %3058 }
 0x12d   :  { %732 = vst [vmem:[#allocation2] sm:$0x3] %v699_v29  ;;  %736 = vst [vmem:[%s5061_s4] sm:$0x3] %v699_v29  ;;  %v704_v17 = vadd.f32 1.0, %v3059_v16 }
 0x12e   :  { %v3061_v27 = vpop.eup %3060 }
 0x12f   :  { %3064 = vrcp.f32 %v704_v17  ;;  %v713_v23 = vadd.f32 1.0, %v3061_v27  ;;  %v3063_v20 = vpop.eup %3062  ;;  %v5188_v17 = vld [vmem:[#allocation20_spill] sm:$0xff]  ;;  %v5189_v27 = vld [vmem:[#allocation21_spill] sm:$0xff] }
 0x130   :  { %3066 = vtanh.f32 %v716_v15  ;;  %v724_v29 = vadd.f32 1.0, %v3063_v20  ;;  %v5193_v20 = vld [vmem:[#allocation25_spill] sm:$0xff] }
 0x131   :  { %3068 = vrcp.f32 %v713_v23  ;;  %v5190_v23 = vld [vmem:[#allocation22_spill] sm:$0xff] }
 0x132   :  { %3070 = vrcp.f32 %v724_v29 }
 0x134   :  { %v741_v21 = vld [vmem:[#allocation2] sm:$0x3] }
 0x135   :  { %v742_v24 = vpack.c.bf16 %v741_v21, %v741_v21  ;;  %v5191_v21 = vld [vmem:[#allocation23_spill] sm:$0xff] }
 0x137   :  { %776 = vmatmul.mubr.bf16.vlgmr.msra.gmra.mrb[8].mxu0 %v742_v24  ;;  %817 = vmatmul.mubr.bf16.vlgmr.msra.gmra.mrb[8].mxu1 %v742_v24  ;;  %v5192_v24 = vld [vmem:[#allocation24_spill] sm:$0xff] }
 0x138   :  { %853 = vmatpush1.bf16.msra.mxu0 %v3664_v38  ;;  %894 = vmatpush1.bf16.msra.mxu1 %v3669_v39 }
 0x139   :  { %v3065_v28 = vpop.eup %3064  ;;  %854 = vmatprep.subr.bf16.mxu0 %v3676_v40  ;;  %895 = vmatprep.subr.bf16.mxu1 %v3683_v41 }
 0x13a   :  { %v3067_v16 = vpop.eup %3066  ;;  %884 = vmatprep.mubr.bf16.mxu0 %v5169_v34  ;;  %925 = vmatprep.mubr.bf16.mxu1 %v5169_v34 }
 0x13b   :  { %v3069_v15 = vpop.eup %3068  ;;  %v728_v31 = vmul.f32 %v3067_v16, %v3065_v28  ;;  %v5194_v28 = vld [vmem:[#allocation26_spill] sm:$0xff] }
 0x13c   :  { %v727_v22 = vmul.f32 %v3069_v15, %v700_v30  ;;  %855 = vmatpush1.bf16.msra.mxu0 %v3688_v42  ;;  %896 = vmatpush1.bf16.msra.mxu1 %v3695_v43  ;;  %v3071_v33 = vpop.eup %3070 }
 0x13d   :  { %856 = vmatprep.subr.bf16.mxu0 %v3702_v44  ;;  %897 = vmatprep.subr.bf16.mxu1 %v3707_v45 }
 0x13e   :  { %v729_v32 = vadd.f32 %v728_v31, %v727_v22 }
 0x140   :  { %3072 = vtanh.f32 %v729_v32  ;;  %735 = vst [vmem:[#allocation5] sm:$0x3] %v729_v32  ;;  %857 = vmatpush1.bf16.msra.mxu0 %v3714_v46  ;;  %898 = vmatpush1.bf16.msra.mxu1 %v3719_v47 }
 0x141   :  { %858 = vmatprep.subr.bf16.mxu0 %v3726_v48  ;;  %899 = vmatprep.subr.bf16.mxu1 %v3733_v49 }
 0x144   :  { %859 = vmatpush1.bf16.msra.mxu0 %v3740_v50  ;;  %900 = vmatpush1.bf16.msra.mxu1 %v3745_v51 }
 0x145   :  { %860 = vmatprep.subr.bf16.mxu0 %v3752_v52  ;;  %901 = vmatprep.subr.bf16.mxu1 %v3757_v53 }
 0x148   :  { %861 = vmatpush1.bf16.msra.mxu0 %v3764_v54  ;;  %902 = vmatpush1.bf16.msra.mxu1 %v3769_v55 }
 0x149   :  { %862 = vmatprep.subr.bf16.mxu0 %v3776_v56  ;;  %903 = vmatprep.subr.bf16.mxu1 %v3781_v57 }
 0x14a   :  { %v3073_v35 = vpop.eup %3072 }
 0x14b   :  { %v731_v18 = vmul.f32 %v3073_v35, %v3071_v33 }
 0x14c   :  { %863 = vmatpush1.bf16.msra.mxu0 %v3788_v58  ;;  %904 = vmatpush1.bf16.msra.mxu1 %v3793_v59 }
 0x14d   :  { %734 = vst [vmem:[#allocation4] sm:$0x3] %v731_v18  ;;  %2874 = vst [vmem:[%s5062_s5 + $0xe] sm:$0x3] %v731_v18  ;;  %864 = vmatprep.subr.bf16.mxu0 %v5171_v25  ;;  %905 = vmatprep.subr.bf16.mxu1 %v5172_v26 }
 0x150   :  { %865 = vmatpush1.bf16.msra.mxu0 %v3812_v62  ;;  %906 = vmatpush1.bf16.msra.mxu1 %v3817_v63 }
 0x151   :  { %866 = vmatprep.subr.bf16.mxu0 %v3824_v2  ;;  %907 = vmatprep.subr.bf16.mxu1 %v5173_v60 }
 0x154   :  { %867 = vmatpush1.bf16.msra.mxu0 %v3836_v37  ;;  %908 = vmatpush1.bf16.msra.mxu1 %v3841_v1  ;;  %v850_v19 = vld [vmem:[#allocation4] sm:$0x3] }
 0x155   :  { %v851_v36 = vpack.c.bf16 %v850_v19, %v850_v19  ;;  %1033 = vmatprep.subr.bf16.mxu0 %v3462_v0  ;;  %1074 = vmatprep.subr.bf16.mxu1 %v3469_v3  ;;  %v5174_v0 = vld [vmem:[#allocation6_spill] sm:$0xff]  ;;  %v5175_v3 = vld [vmem:[#allocation7_spill] sm:$0xff] }
 0x156   :  { %v5195_v19 = vld [vmem:[#allocation30_spill] sm:$0xff] }
 0x157   :  { %885 = vmatmul.mubr.bf16.vlgmr.msra.gmra.mrb[12].mxu0 %v851_v36  ;;  %926 = vmatmul.mubr.bf16.vlgmr.msra.gmra.mrb[12].mxu1 %v851_v36 }
 0x158   :  { %1034 = vmatpush1.bf16.msra.mxu0 %v3475_v4  ;;  %1075 = vmatpush1.bf16.msra.mxu1 %v3480_v5  ;;  %v5176_v4 = vld [vmem:[#allocation8_spill] sm:$0xff]  ;;  %v5177_v5 = vld [vmem:[#allocation9_spill] sm:$0xff] }
 0x159   :  { %1035 = vmatprep.subr.bf16.mxu0 %v3486_v6  ;;  %1076 = vmatprep.subr.bf16.mxu1 %v3493_v7  ;;  %v5178_v6 = vld [vmem:[#allocation10_spill] sm:$0xff]  ;;  %v5179_v7 = vld [vmem:[#allocation11_spill] sm:$0xff] }
 0x15a   :  { %1065 = vmatprep.mubr.bf16.mxu0 %v5169_v34  ;;  %1106 = vmatprep.mubr.bf16.mxu1 %v5169_v34 }
 0x15c   :  { %1036 = vmatpush1.bf16.msra.mxu0 %v3498_v8  ;;  %1077 = vmatpush1.bf16.msra.mxu1 %v3504_v9  ;;  %v5180_v8 = vld [vmem:[#allocation12_spill] sm:$0xff]  ;;  %v5181_v9 = vld [vmem:[#allocation13_spill] sm:$0xff] }
 0x15d   :  { %1037 = vmatprep.subr.bf16.mxu0 %v3510_v10  ;;  %1078 = vmatprep.subr.bf16.mxu1 %v3515_v11  ;;  %v5182_v10 = vld [vmem:[#allocation14_spill] sm:$0xff]  ;;  %v5183_v11 = vld [vmem:[#allocation15_spill] sm:$0xff] }
 0x160   :  { %1038 = vmatpush1.bf16.msra.mxu0 %v3520_v12  ;;  %1079 = vmatpush1.bf16.msra.mxu1 %v3525_v13  ;;  %v5184_v12 = vld [vmem:[#allocation16_spill] sm:$0xff]  ;;  %v5185_v13 = vld [vmem:[#allocation17_spill] sm:$0xff] }
 0x161   :  { %1039 = vmatprep.subr.bf16.mxu0 %v3532_v14  ;;  %1080 = vmatprep.subr.bf16.mxu1 %v5174_v0  ;;  %v5186_v14 = vld [vmem:[#allocation18_spill] sm:$0xff] }
 0x164   :  { %1040 = vmatpush1.bf16.msra.mxu0 %v5175_v3  ;;  %1081 = vmatpush1.bf16.msra.mxu1 %v5176_v4  ;;  %v2875_v3 = vld [vmem:[%s5059_s0 + $0x8] sm:$0xff] }
 0x165   :  { %1041 = vmatprep.subr.bf16.mxu0 %v5177_v5  ;;  %1082 = vmatprep.subr.bf16.mxu1 %v5178_v6 }
 0x168   :  { %1042 = vmatpush1.bf16.msra.mxu0 %v5179_v7  ;;  %1083 = vmatpush1.bf16.msra.mxu1 %v5180_v8 }
 0x169   :  { %1043 = vmatprep.subr.bf16.mxu0 %v5181_v9  ;;  %1084 = vmatprep.subr.bf16.mxu1 %v5182_v10 }
 0x16c   :  { %1044 = vmatpush1.bf16.msra.mxu0 %v5183_v11  ;;  %1085 = vmatpush1.bf16.msra.mxu1 %v5184_v12 }
 0x16d   :  { %1045 = vmatprep.subr.bf16.mxu0 %v5185_v13  ;;  %1086 = vmatprep.subr.bf16.mxu1 %v5186_v14 }
 0x170   :  { %1046 = vmatpush1.bf16.msra.mxu0 %v5187_v61  ;;  %1087 = vmatpush1.bf16.msra.mxu1 %v5188_v17 }
 0x171   :  { %1047 = vmatprep.subr.bf16.mxu0 %v5189_v27  ;;  %1088 = vmatprep.subr.bf16.mxu1 %v5190_v23 }
 0x174   :  { %1048 = vmatpush1.bf16.msra.mxu0 %v5191_v21  ;;  %1089 = vmatpush1.bf16.msra.mxu1 %v5192_v24 }
 0x175   :  { %1142 = vmatprep.subr.bf16.mxu0 %v5193_v20  ;;  %1183 = vmatprep.subr.bf16.mxu1 %v5194_v28 }
 0x20a   :  { %v777_v30 = vpop.f32.mrb[8].mxu0  ;;  %v818_v16 = vpop.f32.mrb[8].mxu1 }
 0x20b   :  { %v779_v15 = vpop.f32.mrb[9].mxu0  ;;  %v820_v29 = vpop.f32.mrb[9].mxu1 }
 0x20c   :  { %v829_v22 = vcombine.low %v777_v30, %v779_v15  ;;  %v830_v31 = vcombine.low %v818_v16, %v820_v29  ;;  %v781_v32 = vpop.f32.mrb[10].mxu0  ;;  %v822_v33 = vpop.f32.mrb[10].mxu1 }
 0x20d   :  { %v782_v35 = vpop.f32.mrb[11].mxu0  ;;  %v823_v18 = vpop.f32.mrb[11].mxu1 }
 0x20e   :  { %v837_v36 = vrot.slane %v829_v22, %v5195_v19  ;;  %v844_v0 = vrot.slane %v830_v31, %v5195_v19 }
 0x210   :  { %v845_v4 = vcombine.low %v837_v36, %v844_v0 }
 0x212   :  { %v847_v5 = vadd.f32 %v2875_v3, %v845_v4 }
 0x214   :  { %v2877_v6 = vmul.f32 -1.442695, %v847_v5  ;;  %v965_v7 = vrot.slane %v847_v5, 2  ;;  %v976_v9 = vrot.slane %v847_v5, 6  ;;  %v973_v16 = vrot.slane %v847_v5, 4 }
 0x216   :  { %3074 = vpow2.f32 %v2877_v6  ;;  %v2878_v8 = vmul.f32 -1.442695, %v965_v7  ;;  %v2879_v10 = vmul.f32 -1.442695, %v976_v9 }
 0x218   :  { %3076 = vpow2.f32 %v2878_v8 }
 0x219   :  { %3078 = vpow2.f32 %v2879_v10 }
 0x220   :  { %v3075_v30 = vpop.eup %3074 }
 0x221   :  { %v961_v15 = vadd.f32 1.0, %v3075_v30 }
 0x222   :  { %v3077_v29 = vpop.eup %3076 }
 0x223   :  { %3080 = vrcp.f32 %v961_v15  ;;  %v970_v22 = vadd.f32 1.0, %v3077_v29  ;;  %v3079_v18 = vpop.eup %3078  ;;  %v2876_v29 = vld [vmem:[%s5060_s1 + $0x30] sm:$0xff] }
 0x224   :  { %3082 = vtanh.f32 %v973_v16  ;;  %v957_v16 = vld [vmem:[#allocation3] sm:$0x3]  ;;  %v981_v15 = vadd.f32 1.0, %v3079_v18 }
 0x225   :  { %3084 = vrcp.f32 %v970_v22 }
 0x226   :  { %3086 = vrcp.f32 %v981_v15 }
 0x22a   :  { %v886_v31 = vpop.f32.mrb[12].mxu0  ;;  %v927_v32 = vpop.f32.mrb[12].mxu1 }
 0x22b   :  { %v888_v33 = vpop.f32.mrb[13].mxu0  ;;  %v929_v35 = vpop.f32.mrb[13].mxu1 }
 0x22c   :  { %v938_v36 = vcombine.low %v886_v31, %v888_v33  ;;  %v939_v0 = vcombine.low %v927_v32, %v929_v35  ;;  %v890_v3 = vpop.f32.mrb[14].mxu0  ;;  %v931_v4 = vpop.f32.mrb[14].mxu1 }
 0x22d   :  { %v3081_v6 = vpop.eup %3080  ;;  %v891_v7 = vpop.f32.mrb[15].mxu0 }
 0x22e   :  { %v932_v8 = vpop.f32.mrb[15].mxu1  ;;  %v3083_v5 = vpop.eup %3082  ;;  %v946_v9 = vrot.slane %v938_v36, %v5195_v19  ;;  %v953_v10 = vrot.slane %v939_v0, %v5195_v19 }
 0x22f   :  { %v3085_v30 = vpop.eup %3084  ;;  %v985_v31 = vmul.f32 %v3083_v5, %v3081_v6 }
 0x230   :  { %v984_v22 = vmul.f32 %v3085_v30, %v957_v16  ;;  %v954_v32 = vcombine.low %v946_v9, %v953_v10  ;;  %v3087_v7 = vpop.eup %3086 }
 0x232   :  { %v986_v33 = vadd.f32 %v985_v31, %v984_v22  ;;  %v956_v35 = vadd.f32 %v2876_v29, %v954_v32 }
 0x234   :  { %3088 = vtanh.f32 %v986_v33  ;;  %1022 = vst [vmem:[#allocation3] sm:$0x3] %v986_v33  ;;  %v2880_v3 = vmul.f32 -1.442695, %v956_v35  ;;  %v997_v4 = vrot.slane %v956_v35, 2  ;;  %v1008_v0 = vrot.slane %v956_v35, 6 }
 0x235   :  { %v1005_v20 = vrot.slane %v956_v35, 4 }
 0x236   :  { %3090 = vpow2.f32 %v2880_v3  ;;  %v2881_v36 = vmul.f32 -1.442695, %v997_v4  ;;  %v2882_v8 = vmul.f32 -1.442695, %v1008_v0  ;;  %v5210_v3 = vld [vmem:[#allocation30_spill] sm:$0xff] }
 0x238   :  { %3092 = vpow2.f32 %v2881_v36 }
 0x239   :  { %3094 = vpow2.f32 %v2882_v8 }
 0x23e   :  { %v3089_v18 = vpop.eup %3088 }
 0x23f   :  { %v988_v19 = vmul.f32 %v3089_v18, %v3087_v7 }
 0x240   :  { %v3091_v28 = vpop.eup %3090 }
 0x241   :  { %1021 = vst [vmem:[#allocation2] sm:$0x3] %v988_v19  ;;  %2883 = vst [vmem:[%s5061_s4 + $0x2] sm:$0x3] %v988_v19  ;;  %v993_v6 = vadd.f32 1.0, %v3091_v28 }
 0x242   :  { %v3093_v5 = vpop.eup %3092  ;;  %v989_v19 = vld [vmem:[#allocation5] sm:$0x3] }
 0x243   :  { %3096 = vrcp.f32 %v993_v6  ;;  %v1002_v9 = vadd.f32 1.0, %v3093_v5  ;;  %v3095_v16 = vpop.eup %3094 }
 0x244   :  { %3098 = vtanh.f32 %v1005_v20  ;;  %v1013_v29 = vadd.f32 1.0, %v3095_v16 }
 0x245   :  { %3100 = vrcp.f32 %v1002_v9 }
 0x246   :  { %3102 = vrcp.f32 %v1013_v29 }
 0x248   :  { %v1031_v10 = vld [vmem:[#allocation2] sm:$0x3] }
 0x249   :  { %v1032_v30 = vpack.c.bf16 %v1031_v10, %v1031_v10 }
 0x24b   :  { %1066 = vmatmul.mubr.bf16.vlgmr.msra.gmra.mrb[16].mxu0 %v1032_v30  ;;  %1107 = vmatmul.mubr.bf16.vlgmr.msra.gmra.mrb[16].mxu1 %v1032_v30 }
 0x24c   :  { %1143 = vmatpush1.bf16.msra.mxu0 %v3664_v38  ;;  %1184 = vmatpush1.bf16.msra.mxu1 %v3669_v39 }
 0x24d   :  { %v3097_v15 = vpop.eup %3096  ;;  %1144 = vmatprep.subr.bf16.mxu0 %v3676_v40  ;;  %1185 = vmatprep.subr.bf16.mxu1 %v3683_v41 }
 0x24e   :  { %v3099_v28 = vpop.eup %3098  ;;  %1174 = vmatprep.mubr.bf16.mxu0 %v5169_v34  ;;  %1215 = vmatprep.mubr.bf16.mxu1 %v5169_v34 }
 0x24f   :  { %v3101_v20 = vpop.eup %3100  ;;  %v1017_v31 = vmul.f32 %v3099_v28, %v3097_v15 }
 0x250   :  { %v1016_v22 = vmul.f32 %v3101_v20, %v989_v19  ;;  %1145 = vmatpush1.bf16.msra.mxu0 %v3688_v42  ;;  %1186 = vmatpush1.bf16.msra.mxu1 %v3695_v43  ;;  %v3103_v39 = vpop.eup %3102 }
 0x251   :  { %1146 = vmatprep.subr.bf16.mxu0 %v3702_v44  ;;  %1187 = vmatprep.subr.bf16.mxu1 %v3707_v45  ;;  %v4020_v44 = vld [vmem:[%s5057_s2 + $0x4] ss:$16 sps:$4 sm:$0xff]   ;;  %v4026_v45 = vld [vmem:[%s5057_s2 + $0xc] ss:$16 sps:$4 sm:$0xff]  }
 0x252   :  { %v1018_v38 = vadd.f32 %v1017_v31, %v1016_v22 }
 0x254   :  { %3104 = vtanh.f32 %v1018_v38  ;;  %1024 = vst [vmem:[#allocation5] sm:$0x3] %v1018_v38  ;;  %1147 = vmatpush1.bf16.msra.mxu0 %v3714_v46  ;;  %1188 = vmatpush1.bf16.msra.mxu1 %v3719_v47  ;;  %v4038_v46 = vld [vmem:[%s5057_s2 + $0x8] ss:$16 sps:$4 sm:$0xff]   ;;  %v4044_v47 = vld [vmem:[%s5057_s2 + $0x24] ss:$16 sps:$4 sm:$0xff]  }
 0x255   :  { %1148 = vmatprep.subr.bf16.mxu0 %v3726_v48  ;;  %1189 = vmatprep.subr.bf16.mxu1 %v3733_v49  ;;  %v4050_v48 = vld [vmem:[%s5057_s2 + $0x2c] ss:$16 sps:$4 sm:$0xff]   ;;  %v4058_v49 = vld [vmem:[%s5057_s2 + $0x20] ss:$16 sps:$4 sm:$0xff]  }
 0x258   :  { %1149 = vmatpush1.bf16.msra.mxu0 %v3740_v50  ;;  %1190 = vmatpush1.bf16.msra.mxu1 %v3745_v51  ;;  %v4064_v50 = vld [vmem:[%s5057_s2 + $0x28] ss:$16 sps:$4 sm:$0xff]   ;;  %v4070_v51 = vld [vmem:[%s5057_s2 + $0x44] ss:$16 sps:$4 sm:$0xff]  }
 0x259   :  { %1150 = vmatprep.subr.bf16.mxu0 %v3752_v52  ;;  %1191 = vmatprep.subr.bf16.mxu1 %v3757_v53  ;;  %v4076_v52 = vld [vmem:[%s5057_s2 + $0x4c] ss:$16 sps:$4 sm:$0xff]   ;;  %v4082_v53 = vld [vmem:[%s5057_s2 + $0x40] ss:$16 sps:$4 sm:$0xff]  }
 0x25a   :  { %5196 = vst [vmem:[#allocation27_spill] sm:$0xff] %v4082_v53 }
 0x25c   :  { %1151 = vmatpush1.bf16.msra.mxu0 %v3764_v54  ;;  %1192 = vmatpush1.bf16.msra.mxu1 %v3769_v55  ;;  %v4088_v54 = vld [vmem:[%s5057_s2 + $0x48] ss:$16 sps:$4 sm:$0xff]   ;;  %v4094_v55 = vld [vmem:[%s5057_s2 + $0x64] ss:$16 sps:$4 sm:$0xff]  }
 0x25d   :  { %1152 = vmatprep.subr.bf16.mxu0 %v3776_v56  ;;  %1193 = vmatprep.subr.bf16.mxu1 %v3781_v57  ;;  %5197 = vst [vmem:[#allocation28_spill] sm:$0xff] %v4088_v54  ;;  %5198 = vst [vmem:[#allocation29_spill] sm:$0xff] %v4094_v55  ;;  %v4100_v56 = vld [vmem:[%s5057_s2 + $0x6c] ss:$16 sps:$4 sm:$0xff]   ;;  %v4106_v57 = vld [vmem:[%s5057_s2 + $0x60] ss:$16 sps:$4 sm:$0xff]  }
 0x25e   :  { %v3105_v40 = vpop.eup %3104  ;;  %5199 = vst [vmem:[#allocation6_spill] sm:$0xff] %v4100_v56  ;;  %5200 = vst [vmem:[#allocation7_spill] sm:$0xff] %v4106_v57 }
 0x25f   :  { %v1020_v41 = vmul.f32 %v3105_v40, %v3103_v39 }
 0x260   :  { %1153 = vmatpush1.bf16.msra.mxu0 %v3788_v58  ;;  %1194 = vmatpush1.bf16.msra.mxu1 %v3793_v59  ;;  %v4112_v58 = vld [vmem:[%s5057_s2 + $0x68] ss:$16 sps:$4 sm:$0xff]   ;;  %v4118_v59 = vld [vmem:[%s5057_s2 + $0x84] ss:$16 sps:$4 sm:$0xff]  }
 0x261   :  { %1023 = vst [vmem:[#allocation4] sm:$0x3] %v1020_v41  ;;  %2884 = vst [vmem:[%s5062_s5 + $0xc] sm:$0x3] %v1020_v41  ;;  %1154 = vmatprep.subr.bf16.mxu0 %v5171_v25  ;;  %1195 = vmatprep.subr.bf16.mxu1 %v5172_v26  ;;  %v4148_v25 = vld [vmem:[%s5057_s2 + $0xac] ss:$16 sps:$4 sm:$0xff]  }
 0x262   :  { %5201 = vst [vmem:[#allocation8_spill] sm:$0xff] %v4112_v58  ;;  %5202 = vst [vmem:[#allocation9_spill] sm:$0xff] %v4118_v59  ;;  %v5208_v26 = vld [vmem:[#allocation25_spill] sm:$0xff] }
 0x263   :  { %5207 = vst [vmem:[#allocation14_spill] sm:$0xff] %v4148_v25 }
 0x264   :  { %1155 = vmatpush1.bf16.msra.mxu0 %v3812_v62  ;;  %1196 = vmatpush1.bf16.msra.mxu1 %v3817_v63  ;;  %v4124_v62 = vld [vmem:[%s5057_s2 + $0x8c] ss:$16 sps:$4 sm:$0xff]   ;;  %v4130_v63 = vld [vmem:[%s5057_s2 + $0x80] ss:$16 sps:$4 sm:$0xff]  }
 0x265   :  { %1156 = vmatprep.subr.bf16.mxu0 %v3824_v2  ;;  %1197 = vmatprep.subr.bf16.mxu1 %v5173_v60  ;;  %5203 = vst [vmem:[#allocation10_spill] sm:$0xff] %v4124_v62  ;;  %5204 = vst [vmem:[#allocation11_spill] sm:$0xff] %v4130_v63  ;;  %v4136_v2 = vld [vmem:[%s5057_s2 + $0x88] ss:$16 sps:$4 sm:$0xff]  }
 0x266   :  { %5205 = vst [vmem:[#allocation12_spill] sm:$0xff] %v4136_v2  ;;  %v5209_v60 = vld [vmem:[#allocation26_spill] sm:$0xff] }
 0x268   :  { %1157 = vmatpush1.bf16.msra.mxu0 %v3836_v37  ;;  %1198 = vmatpush1.bf16.msra.mxu1 %v3841_v1  ;;  %v1140_v42 = vld [vmem:[#allocation4] sm:$0x3]  ;;  %v4032_v1 = vld [vmem:[%s5057_s2] ss:$16 sps:$4 sm:$0xff]  }
 0x269   :  { %v1141_v43 = vpack.c.bf16 %v1140_v42, %v1140_v42  ;;  %1323 = vmatprep.subr.bf16.mxu0 %v4020_v44  ;;  %1364 = vmatprep.subr.bf16.mxu1 %v4026_v45  ;;  %v4142_v37 = vld [vmem:[%s5057_s2 + $0xa4] ss:$16 sps:$4 sm:$0xff]  }
 0x26a   :  { %5206 = vst [vmem:[#allocation13_spill] sm:$0xff] %v4142_v37 }
 0x26b   :  { %1175 = vmatmul.mubr.bf16.vlgmr.msra.gmra.mrb[20].mxu0 %v1141_v43  ;;  %1216 = vmatmul.mubr.bf16.vlgmr.msra.gmra.mrb[20].mxu1 %v1141_v43 }
 0x26c   :  { %1324 = vmatpush1.bf16.msra.mxu0 %v4032_v1  ;;  %1365 = vmatpush1.bf16.msra.mxu1 %v4038_v46 }
 0x26d   :  { %1325 = vmatprep.subr.bf16.mxu0 %v4044_v47  ;;  %1366 = vmatprep.subr.bf16.mxu1 %v4050_v48 }
 0x26e   :  { %1355 = vmatprep.mubr.bf16.mxu0 %v5169_v34  ;;  %1396 = vmatprep.mubr.bf16.mxu1 %v5169_v34 }
 0x270   :  { %1326 = vmatpush1.bf16.msra.mxu0 %v4058_v49  ;;  %1367 = vmatpush1.bf16.msra.mxu1 %v4064_v50 }
 0x271   :  { %1327 = vmatprep.subr.bf16.mxu0 %v4070_v51  ;;  %1368 = vmatprep.subr.bf16.mxu1 %v4076_v52 }
 0x274   :  { %1328 = vmatpush1.bf16.msra.mxu0 %v4082_v53  ;;  %1369 = vmatpush1.bf16.msra.mxu1 %v4088_v54 }
 0x275   :  { %1329 = vmatprep.subr.bf16.mxu0 %v4094_v55  ;;  %1370 = vmatprep.subr.bf16.mxu1 %v4100_v56 }
 0x278   :  { %1330 = vmatpush1.bf16.msra.mxu0 %v4106_v57  ;;  %1371 = vmatpush1.bf16.msra.mxu1 %v4112_v58 }
 0x279   :  { %1331 = vmatprep.subr.bf16.mxu0 %v4118_v59  ;;  %1372 = vmatprep.subr.bf16.mxu1 %v4124_v62 }
 0x27c   :  { %1332 = vmatpush1.bf16.msra.mxu0 %v4130_v63  ;;  %1373 = vmatpush1.bf16.msra.mxu1 %v4136_v2 }
 0x27d   :  { %1333 = vmatprep.subr.bf16.mxu0 %v4142_v37  ;;  %1374 = vmatprep.subr.bf16.mxu1 %v4148_v25 }
 0x280   :  { %1334 = vmatpush1.bf16.msra.mxu0 %v5183_v11  ;;  %1375 = vmatpush1.bf16.msra.mxu1 %v5184_v12 }
 0x281   :  { %1335 = vmatprep.subr.bf16.mxu0 %v5185_v13  ;;  %1376 = vmatprep.subr.bf16.mxu1 %v5186_v14 }
 0x284   :  { %1336 = vmatpush1.bf16.msra.mxu0 %v5187_v61  ;;  %1377 = vmatpush1.bf16.msra.mxu1 %v5188_v17 }
 0x285   :  { %1337 = vmatprep.subr.bf16.mxu0 %v5189_v27  ;;  %1378 = vmatprep.subr.bf16.mxu1 %v5190_v23 }
 0x288   :  { %1338 = vmatpush1.bf16.msra.mxu0 %v5191_v21  ;;  %1379 = vmatpush1.bf16.msra.mxu1 %v5192_v24  ;;  %v2885_v24 = vld [vmem:[%s5059_s0 + $0x10] sm:$0xff] }
 0x289   :  { %1432 = vmatprep.subr.bf16.mxu0 %v5208_v26  ;;  %1473 = vmatprep.subr.bf16.mxu1 %v5209_v60 }
 0x31e   :  { %v1067_v11 = vpop.f32.mrb[16].mxu0  ;;  %v1108_v12 = vpop.f32.mrb[16].mxu1 }
 0x31f   :  { %v1069_v13 = vpop.f32.mrb[17].mxu0  ;;  %v1110_v14 = vpop.f32.mrb[17].mxu1 }
 0x320   :  { %v1119_v32 = vcombine.low %v1067_v11, %v1069_v13  ;;  %v1120_v61 = vcombine.low %v1108_v12, %v1110_v14  ;;  %v1071_v33 = vpop.f32.mrb[18].mxu0  ;;  %v1112_v17 = vpop.f32.mrb[18].mxu1  ;;  %v1247_v12 = vld [vmem:[#allocation3] sm:$0x3]  ;;  %v2886_v14 = vld [vmem:[%s5060_s1 + $0x28] sm:$0xff] }
 0x321   :  { %v1072_v35 = vpop.f32.mrb[19].mxu0  ;;  %v1113_v27 = vpop.f32.mrb[19].mxu1 }
 0x322   :  { %v1127_v23 = vrot.slane %v1119_v32, %v5210_v3  ;;  %v1134_v21 = vrot.slane %v1120_v61, %v5210_v3 }
 0x324   :  { %v1135_v4 = vcombine.low %v1127_v23, %v1134_v21 }
 0x326   :  { %v1137_v36 = vadd.f32 %v2885_v24, %v1135_v4 }
 0x328   :  { %v2887_v0 = vmul.f32 -1.442695, %v1137_v36  ;;  %v1255_v7 = vrot.slane %v1137_v36, 2  ;;  %v1266_v8 = vrot.slane %v1137_v36, 6  ;;  %v1263_v9 = vrot.slane %v1137_v36, 4 }
 0x32a   :  { %3106 = vpow2.f32 %v2887_v0  ;;  %v2888_v18 = vmul.f32 -1.442695, %v1255_v7  ;;  %v2889_v6 = vmul.f32 -1.442695, %v1266_v8 }
 0x32c   :  { %3108 = vpow2.f32 %v2888_v18 }
 0x32d   :  { %3110 = vpow2.f32 %v2889_v6 }
 0x334   :  { %v3107_v5 = vpop.eup %3106 }
 0x335   :  { %v1251_v10 = vadd.f32 1.0, %v3107_v5 }
 0x336   :  { %v3109_v30 = vpop.eup %3108 }
 0x337   :  { %3112 = vrcp.f32 %v1251_v10  ;;  %v1260_v16 = vadd.f32 1.0, %v3109_v30  ;;  %v3111_v29 = vpop.eup %3110 }
 0x338   :  { %3114 = vtanh.f32 %v1263_v9  ;;  %v1271_v13 = vadd.f32 1.0, %v3111_v29  ;;  %v4197_v29 = vld [vmem:[%s5058_s3 + $0x2c] ss:$16 sps:$4 sm:$0xff]  }
 0x339   :  { %3116 = vrcp.f32 %v1260_v16 }
 0x33a   :  { %3118 = vrcp.f32 %v1271_v13  ;;  %v4235_v13 = vld [vmem:[%s5058_s3 + $0x48] ss:$16 sps:$4 sm:$0xff]  }
 0x33e   :  { %v1176_v15 = vpop.f32.mrb[20].mxu0  ;;  %v1217_v28 = vpop.f32.mrb[20].mxu1 }
 0x33f   :  { %v1178_v20 = vpop.f32.mrb[21].mxu0  ;;  %v1219_v19 = vpop.f32.mrb[21].mxu1 }
 0x340   :  { %v1228_v22 = vcombine.low %v1176_v15, %v1178_v20  ;;  %v1229_v31 = vcombine.low %v1217_v28, %v1219_v19  ;;  %v1180_v38 = vpop.f32.mrb[22].mxu0  ;;  %v1221_v39 = vpop.f32.mrb[22].mxu1  ;;  %v4179_v15 = vld [vmem:[%s5058_s3] ss:$16 sps:$4 sm:$0xff]   ;;  %v4185_v28 = vld [vmem:[%s5058_s3 + $0x8] ss:$16 sps:$4 sm:$0xff]  }
 0x341   :  { %v3113_v40 = vpop.eup %3112  ;;  %v1181_v41 = vpop.f32.mrb[23].mxu0  ;;  %v4191_v19 = vld [vmem:[%s5058_s3 + $0x24] ss:$16 sps:$4 sm:$0xff]  }
 0x342   :  { %v1222_v42 = vpop.f32.mrb[23].mxu1  ;;  %v3115_v43 = vpop.eup %3114  ;;  %v1236_v26 = vrot.slane %v1228_v22, %v5210_v3  ;;  %v1243_v60 = vrot.slane %v1229_v31, %v5210_v3  ;;  %v1279_v38 = vld [vmem:[#allocation5] sm:$0x3] }
 0x343   :  { %v3117_v11 = vpop.eup %3116  ;;  %v1275_v61 = vmul.f32 %v3115_v43, %v3113_v40  ;;  %v4205_v42 = vld [vmem:[%s5058_s3 + $0x20] ss:$16 sps:$4 sm:$0xff]   ;;  %v4211_v43 = vld [vmem:[%s5058_s3 + $0x28] ss:$16 sps:$4 sm:$0xff]  }
 0x344   :  { %v1274_v32 = vmul.f32 %v3117_v11, %v1247_v12  ;;  %v1244_v33 = vcombine.low %v1236_v26, %v1243_v60  ;;  %v3119_v4 = vpop.eup %3118  ;;  %v4217_v26 = vld [vmem:[%s5058_s3 + $0x44] ss:$16 sps:$4 sm:$0xff]   ;;  %v4223_v60 = vld [vmem:[%s5058_s3 + $0x4c] ss:$16 sps:$4 sm:$0xff]   ;;  %v4229_v12 = vld [vmem:[%s5058_s3 + $0x40] ss:$16 sps:$4 sm:$0xff]  }
 0x346   :  { %v1276_v17 = vadd.f32 %v1275_v61, %v1274_v32  ;;  %v1246_v35 = vadd.f32 %v2886_v14, %v1244_v33  ;;  %v4241_v14 = vld [vmem:[%s5058_s3 + $0x64] ss:$16 sps:$4 sm:$0xff]   ;;  %v4247_v32 = vld [vmem:[%s5058_s3 + $0x6c] ss:$16 sps:$4 sm:$0xff]   ;;  %v4253_v61 = vld [vmem:[%s5058_s3 + $0x60] ss:$16 sps:$4 sm:$0xff]  }
 0x347   :  { %v4259_v33 = vld [vmem:[%s5058_s3 + $0x68] ss:$16 sps:$4 sm:$0xff]  }
 0x348   :  { %3120 = vtanh.f32 %v1276_v17  ;;  %1312 = vst [vmem:[#allocation3] sm:$0x3] %v1276_v17  ;;  %v2890_v27 = vmul.f32 -1.442695, %v1246_v35  ;;  %v1287_v23 = vrot.slane %v1246_v35, 2  ;;  %v1298_v24 = vrot.slane %v1246_v35, 6 }
 0x349   :  { %v1295_v8 = vrot.slane %v1246_v35, 4  ;;  %v4265_v17 = vld [vmem:[%s5058_s3 + $0x84] ss:$16 sps:$4 sm:$0xff]   ;;  %v4271_v35 = vld [vmem:[%s5058_s3 + $0x8c] ss:$16 sps:$4 sm:$0xff]  }
 0x34a   :  { %3122 = vpow2.f32 %v2890_v27  ;;  %v2891_v21 = vmul.f32 -1.442695, %v1287_v23  ;;  %v2892_v0 = vmul.f32 -1.442695, %v1298_v24  ;;  %v4277_v27 = vld [vmem:[%s5058_s3 + $0x80] ss:$16 sps:$4 sm:$0xff]  }
 0x34b   :  { %v4283_v23 = vld [vmem:[%s5058_s3 + $0x88] ss:$16 sps:$4 sm:$0xff]   ;;  %v4289_v24 = vld [vmem:[%s5058_s3 + $0xa4] ss:$16 sps:$4 sm:$0xff]  }
 0x34c   :  { %3124 = vpow2.f32 %v2891_v21 }
 0x34d   :  { %3126 = vpow2.f32 %v2892_v0 }
 0x352   :  { %v3121_v36 = vpop.eup %3120 }
 0x353   :  { %v1278_v7 = vmul.f32 %v3121_v36, %v3119_v4  ;;  %v4295_v4 = vld [vmem:[%s5058_s3 + $0xac] ss:$16 sps:$4 sm:$0xff]  }
 0x354   :  { %v3123_v18 = vpop.eup %3122 }
 0x355   :  { %1311 = vst [vmem:[#allocation2] sm:$0x3] %v1278_v7  ;;  %2893 = vst [vmem:[%s5061_s4 + $0x4] sm:$0x3] %v1278_v7  ;;  %v1283_v6 = vadd.f32 1.0, %v3123_v18 }
 0x356   :  { %v3125_v5 = vpop.eup %3124  ;;  %v4301_v7 = vld [vmem:[%s5058_s3 + $0xa0] ss:$16 sps:$4 sm:$0xff]   ;;  %v4307_v18 = vld [vmem:[%s5058_s3 + $0xa8] ss:$16 sps:$4 sm:$0xff]  }
 0x357   :  { %3128 = vrcp.f32 %v1283_v6  ;;  %v1292_v9 = vadd.f32 1.0, %v3125_v5  ;;  %v3127_v16 = vpop.eup %3126  ;;  %v4322_v6 = vld [vmem:[%s5058_s3 + $0xcc] ss:$16 sps:$4 sm:$0xff]   ;;  %v4328_v5 = vld [vmem:[%s5058_s3 + $0xc0] ss:$16 sps:$4 sm:$0xff]  }
 0x358   :  { %3130 = vtanh.f32 %v1295_v8  ;;  %v1303_v39 = vadd.f32 1.0, %v3127_v16  ;;  %v4316_v8 = vld [vmem:[%s5058_s3 + $0xc4] ss:$16 sps:$4 sm:$0xff]   ;;  %v4352_v16 = vld [vmem:[%s5058_s3 + $0xe0] ss:$16 sps:$4 sm:$0xff]  }
 0x359   :  { %3132 = vrcp.f32 %v1292_v9  ;;  %v4334_v9 = vld [vmem:[%s5058_s3 + $0xc8] ss:$16 sps:$4 sm:$0xff]  }
 0x35a   :  { %3134 = vrcp.f32 %v1303_v39  ;;  %v4394_v39 = vld [vmem:[%s5057_s2 + $0xa8] ss:$16 sps:$4 sm:$0xff]  }
 0x35b   :  { %5212 = vst [vmem:[#allocation16_spill] sm:$0xff] %v4394_v39 }
 0x35c   :  { %v1321_v10 = vld [vmem:[#allocation2] sm:$0x3] }
 0x35d   :  { %v1322_v30 = vpack.c.bf16 %v1321_v10, %v1321_v10  ;;  %v4340_v10 = vld [vmem:[%s5058_s3 + $0xe4] ss:$16 sps:$4 sm:$0xff]  }
 0x35f   :  { %1356 = vmatmul.mubr.bf16.vlgmr.msra.gmra.mrb[24].mxu0 %v1322_v30  ;;  %1397 = vmatmul.mubr.bf16.vlgmr.msra.gmra.mrb[24].mxu1 %v1322_v30  ;;  %v4346_v30 = vld [vmem:[%s5058_s3 + $0xec] ss:$16 sps:$4 sm:$0xff]  }
 0x360   :  { %1433 = vmatpush1.bf16.msra.mxu0 %v4179_v15  ;;  %1474 = vmatpush1.bf16.msra.mxu1 %v4185_v28 }
 0x361   :  { %v3129_v20 = vpop.eup %3128  ;;  %1434 = vmatprep.subr.bf16.mxu0 %v4191_v19  ;;  %1475 = vmatprep.subr.bf16.mxu1 %v4197_v29 }
 0x362   :  { %v3131_v22 = vpop.eup %3130  ;;  %1464 = vmatprep.mubr.bf16.mxu0 %v5169_v34  ;;  %1505 = vmatprep.mubr.bf16.mxu1 %v5169_v34 }
 0x363   :  { %v3133_v31 = vpop.eup %3132  ;;  %v1307_v41 = vmul.f32 %v3131_v22, %v3129_v20  ;;  %v4358_v20 = vld [vmem:[%s5058_s3 + $0xe8] ss:$16 sps:$4 sm:$0xff]  }
 0x364   :  { %v1306_v40 = vmul.f32 %v3133_v31, %v1279_v38  ;;  %1435 = vmatpush1.bf16.msra.mxu0 %v4205_v42  ;;  %1476 = vmatpush1.bf16.msra.mxu1 %v4211_v43  ;;  %v3135_v21 = vpop.eup %3134  ;;  %v4388_v38 = vld [vmem:[%s5057_s2 + $0xa0] ss:$16 sps:$4 sm:$0xff]  }
 0x365   :  { %1436 = vmatprep.subr.bf16.mxu0 %v4217_v26  ;;  %1477 = vmatprep.subr.bf16.mxu1 %v4223_v60  ;;  %5211 = vst [vmem:[#allocation15_spill] sm:$0xff] %v4388_v38 }
 0x366   :  { %v1308_v11 = vadd.f32 %v1307_v41, %v1306_v40  ;;  %v4400_v40 = vld [vmem:[%s5057_s2 + $0xc4] ss:$16 sps:$4 sm:$0xff]   ;;  %v4406_v41 = vld [vmem:[%s5057_s2 + $0xcc] ss:$16 sps:$4 sm:$0xff]  }
 0x367   :  { %5213 = vst [vmem:[#allocation17_spill] sm:$0xff] %v4400_v40  ;;  %5214 = vst [vmem:[#allocation18_spill] sm:$0xff] %v4406_v41 }
 0x368   :  { %3136 = vtanh.f32 %v1308_v11  ;;  %1314 = vst [vmem:[#allocation5] sm:$0x3] %v1308_v11  ;;  %1437 = vmatpush1.bf16.msra.mxu0 %v4229_v12  ;;  %1478 = vmatpush1.bf16.msra.mxu1 %v4235_v13  ;;  %v4412_v11 = vld [vmem:[%s5057_s2 + $0xc0] ss:$16 sps:$4 sm:$0xff]  }
 0x369   :  { %1438 = vmatprep.subr.bf16.mxu0 %v4241_v14  ;;  %1479 = vmatprep.subr.bf16.mxu1 %v4247_v32  ;;  %5215 = vst [vmem:[#allocation19_spill] sm:$0xff] %v4412_v11 }
 0x36c   :  { %1439 = vmatpush1.bf16.msra.mxu0 %v4253_v61  ;;  %1480 = vmatpush1.bf16.msra.mxu1 %v4259_v33 }
 0x36d   :  { %1440 = vmatprep.subr.bf16.mxu0 %v4265_v17  ;;  %1481 = vmatprep.subr.bf16.mxu1 %v4271_v35 }
 0x370   :  { %1441 = vmatpush1.bf16.msra.mxu0 %v4277_v27  ;;  %1482 = vmatpush1.bf16.msra.mxu1 %v4283_v23 }
 0x371   :  { %1442 = vmatprep.subr.bf16.mxu0 %v4289_v24  ;;  %1483 = vmatprep.subr.bf16.mxu1 %v4295_v4 }
 0x372   :  { %v3137_v36 = vpop.eup %3136 }
 0x373   :  { %v1310_v0 = vmul.f32 %v3137_v36, %v3135_v21  ;;  %v4418_v21 = vld [vmem:[%s5057_s2 + $0xc8] ss:$16 sps:$4 sm:$0xff]   ;;  %v4424_v36 = vld [vmem:[%s5057_s2 + $0xe4] ss:$16 sps:$4 sm:$0xff]  }
 0x374   :  { %1443 = vmatpush1.bf16.msra.mxu0 %v4301_v7  ;;  %1484 = vmatpush1.bf16.msra.mxu1 %v4307_v18  ;;  %5216 = vst [vmem:[#allocation20_spill] sm:$0xff] %v4418_v21  ;;  %5217 = vst [vmem:[#allocation21_spill] sm:$0xff] %v4424_v36 }
 0x375   :  { %1313 = vst [vmem:[#allocation4] sm:$0x3] %v1310_v0  ;;  %2894 = vst [vmem:[%s5062_s5 + $0xa] sm:$0x3] %v1310_v0  ;;  %1444 = vmatprep.subr.bf16.mxu0 %v4316_v8  ;;  %1485 = vmatprep.subr.bf16.mxu1 %v4322_v6  ;;  %v4430_v0 = vld [vmem:[%s5057_s2 + $0xec] ss:$16 sps:$4 sm:$0xff]  }
 0x376   :  { %5218 = vst [vmem:[#allocation22_spill] sm:$0xff] %v4430_v0 }
 0x378   :  { %1445 = vmatpush1.bf16.msra.mxu0 %v4328_v5  ;;  %1486 = vmatpush1.bf16.msra.mxu1 %v4334_v9 }
 0x379   :  { %1446 = vmatprep.subr.bf16.mxu0 %v4340_v10  ;;  %1487 = vmatprep.subr.bf16.mxu1 %v4346_v30 }
 0x37c   :  { %1447 = vmatpush1.bf16.msra.mxu0 %v4352_v16  ;;  %1488 = vmatpush1.bf16.msra.mxu1 %v4358_v20  ;;  %v1430_v22 = vld [vmem:[#allocation4] sm:$0x3] }
 0x37d   :  { %v1431_v31 = vpack.c.bf16 %v1430_v22, %v1430_v22  ;;  %1613 = vmatprep.subr.bf16.mxu0 %v4020_v44  ;;  %1654 = vmatprep.subr.bf16.mxu1 %v4026_v45  ;;  %v4436_v22 = vld [vmem:[%s5057_s2 + $0xe0] ss:$16 sps:$4 sm:$0xff]  }
 0x37e   :  { %5219 = vst [vmem:[#allocation23_spill] sm:$0xff] %v4436_v22 }
 0x37f   :  { %1465 = vmatmul.mubr.bf16.vlgmr.msra.gmra.mrb[28].mxu0 %v1431_v31  ;;  %1506 = vmatmul.mubr.bf16.vlgmr.msra.gmra.mrb[28].mxu1 %v1431_v31  ;;  %v4442_v31 = vld [vmem:[%s5057_s2 + $0xe8] ss:$16 sps:$4 sm:$0xff]  }
 0x380   :  { %1614 = vmatpush1.bf16.msra.mxu0 %v4032_v1  ;;  %1655 = vmatpush1.bf16.msra.mxu1 %v4038_v46  ;;  %5220 = vst [vmem:[#allocation24_spill] sm:$0xff] %v4442_v31 }
 0x381   :  { %1615 = vmatprep.subr.bf16.mxu0 %v4044_v47  ;;  %1656 = vmatprep.subr.bf16.mxu1 %v4050_v48 }
 0x382   :  { %1645 = vmatprep.mubr.bf16.mxu0 %v5169_v34  ;;  %1686 = vmatprep.mubr.bf16.mxu1 %v5169_v34 }
 0x384   :  { %1616 = vmatpush1.bf16.msra.mxu0 %v4058_v49  ;;  %1657 = vmatpush1.bf16.msra.mxu1 %v4064_v50 }
 0x385   :  { %1617 = vmatprep.subr.bf16.mxu0 %v4070_v51  ;;  %1658 = vmatprep.subr.bf16.mxu1 %v4076_v52 }
 0x388   :  { %1618 = vmatpush1.bf16.msra.mxu0 %v4082_v53  ;;  %1659 = vmatpush1.bf16.msra.mxu1 %v4088_v54 }
 0x389   :  { %1619 = vmatprep.subr.bf16.mxu0 %v4094_v55  ;;  %1660 = vmatprep.subr.bf16.mxu1 %v4100_v56 }
 0x38c   :  { %1620 = vmatpush1.bf16.msra.mxu0 %v4106_v57  ;;  %1661 = vmatpush1.bf16.msra.mxu1 %v4112_v58 }
 0x38d   :  { %1621 = vmatprep.subr.bf16.mxu0 %v4118_v59  ;;  %1662 = vmatprep.subr.bf16.mxu1 %v4124_v62 }
 0x390   :  { %1622 = vmatpush1.bf16.msra.mxu0 %v4130_v63  ;;  %1663 = vmatpush1.bf16.msra.mxu1 %v4136_v2  ;;  %v2895_v63 = vld [vmem:[%s5059_s0 + $0x18] sm:$0xff] }
 0x391   :  { %1623 = vmatprep.subr.bf16.mxu0 %v4142_v37  ;;  %1664 = vmatprep.subr.bf16.mxu1 %v4148_v25 }
 0x394   :  { %1624 = vmatpush1.bf16.msra.mxu0 %v4388_v38  ;;  %1665 = vmatpush1.bf16.msra.mxu1 %v4394_v39 }
 0x395   :  { %1625 = vmatprep.subr.bf16.mxu0 %v4400_v40  ;;  %1666 = vmatprep.subr.bf16.mxu1 %v4406_v41 }
 0x398   :  { %1626 = vmatpush1.bf16.msra.mxu0 %v4412_v11  ;;  %1667 = vmatpush1.bf16.msra.mxu1 %v4418_v21 }
 0x399   :  { %1627 = vmatprep.subr.bf16.mxu0 %v4424_v36  ;;  %1668 = vmatprep.subr.bf16.mxu1 %v4430_v0  ;;  %v4448_v36 = vld [vmem:[%s5058_s3 + $0x4] ss:$16 sps:$4 sm:$0xff]   ;;  %v4454_v0 = vld [vmem:[%s5058_s3 + $0xc] ss:$16 sps:$4 sm:$0xff]  }
 0x39a   :  { %5221 = vst [vmem:[#allocation25_spill] sm:$0xff] %v4448_v36  ;;  %5222 = vst [vmem:[#allocation26_spill] sm:$0xff] %v4454_v0 }
 0x39c   :  { %1628 = vmatpush1.bf16.msra.mxu0 %v4436_v22  ;;  %1669 = vmatpush1.bf16.msra.mxu1 %v4442_v31 }
 0x39d   :  { %1722 = vmatprep.subr.bf16.mxu0 %v4448_v36  ;;  %1763 = vmatprep.subr.bf16.mxu1 %v4454_v0 }
 0x432   :  { %v1357_v22 = vpop.f32.mrb[24].mxu0  ;;  %v1398_v21 = vpop.f32.mrb[24].mxu1 }
 0x433   :  { %v1359_v11 = vpop.f32.mrb[25].mxu0  ;;  %v1400_v41 = vpop.f32.mrb[25].mxu1 }
 0x434   :  { %v1409_v40 = vcombine.low %v1357_v22, %v1359_v11  ;;  %v1410_v31 = vcombine.low %v1398_v21, %v1400_v41  ;;  %v1361_v39 = vpop.f32.mrb[26].mxu0  ;;  %v1402_v38 = vpop.f32.mrb[26].mxu1 }
 0x435   :  { %v1362_v25 = vpop.f32.mrb[27].mxu0  ;;  %v1403_v37 = vpop.f32.mrb[27].mxu1 }
 0x436   :  { %v1417_v2 = vrot.slane %v1409_v40, %v5210_v3  ;;  %v1424_v36 = vrot.slane %v1410_v31, %v5210_v3 }
 0x438   :  { %v1425_v62 = vcombine.low %v1417_v2, %v1424_v36 }
 0x43a   :  { %v1427_v0 = vadd.f32 %v2895_v63, %v1425_v62 }
 0x43c   :  { %v2897_v59 = vmul.f32 -1.442695, %v1427_v0  ;;  %v1545_v58 = vrot.slane %v1427_v0, 2  ;;  %v1556_v41 = vrot.slane %v1427_v0, 6  ;;  %v1553_v25 = vrot.slane %v1427_v0, 4 }
 0x43e   :  { %3138 = vpow2.f32 %v2897_v59  ;;  %v2898_v57 = vmul.f32 -1.442695, %v1545_v58  ;;  %v2899_v39 = vmul.f32 -1.442695, %v1556_v41 }
 0x440   :  { %3140 = vpow2.f32 %v2898_v57 }
 0x441   :  { %3142 = vpow2.f32 %v2899_v39 }
 0x448   :  { %v3139_v38 = vpop.eup %3138 }
 0x449   :  { %v1541_v37 = vadd.f32 1.0, %v3139_v38 }
 0x44a   :  { %v3141_v11 = vpop.eup %3140 }
 0x44b   :  { %3144 = vrcp.f32 %v1541_v37  ;;  %v1550_v40 = vadd.f32 1.0, %v3141_v11  ;;  %v3143_v63 = vpop.eup %3142 }
 0x44c   :  { %3146 = vtanh.f32 %v1553_v25  ;;  %v1537_v25 = vld [vmem:[#allocation3] sm:$0x3]  ;;  %v1561_v11 = vadd.f32 1.0, %v3143_v63 }
 0x44d   :  { %3148 = vrcp.f32 %v1550_v40  ;;  %v2896_v40 = vld [vmem:[%s5060_s1 + $0x20] sm:$0xff] }
 0x44e   :  { %3150 = vrcp.f32 %v1561_v11 }
 0x452   :  { %v1466_v21 = vpop.f32.mrb[28].mxu0  ;;  %v1507_v22 = vpop.f32.mrb[28].mxu1 }
 0x453   :  { %v1468_v2 = vpop.f32.mrb[29].mxu0  ;;  %v1509_v62 = vpop.f32.mrb[29].mxu1 }
 0x454   :  { %v1518_v36 = vcombine.low %v1466_v21, %v1468_v2  ;;  %v1519_v59 = vcombine.low %v1507_v22, %v1509_v62  ;;  %v1470_v58 = vpop.f32.mrb[30].mxu0  ;;  %v1511_v57 = vpop.f32.mrb[30].mxu1 }
 0x455   :  { %v3145_v31 = vpop.eup %3144  ;;  %v1471_v41 = vpop.f32.mrb[31].mxu0 }
 0x456   :  { %v1512_v56 = vpop.f32.mrb[31].mxu1  ;;  %v3147_v0 = vpop.eup %3146  ;;  %v1526_v38 = vrot.slane %v1518_v36, %v5210_v3  ;;  %v1533_v39 = vrot.slane %v1519_v59, %v5210_v3 }
 0x457   :  { %v3149_v37 = vpop.eup %3148  ;;  %v1565_v21 = vmul.f32 %v3147_v0, %v3145_v31 }
 0x458   :  { %v1564_v55 = vmul.f32 %v3149_v37, %v1537_v25  ;;  %v1534_v22 = vcombine.low %v1526_v38, %v1533_v39  ;;  %v3151_v57 = vpop.eup %3150 }
 0x45a   :  { %v1566_v2 = vadd.f32 %v1565_v21, %v1564_v55  ;;  %v1536_v62 = vadd.f32 %v2896_v40, %v1534_v22 }
 0x45c   :  { %3152 = vtanh.f32 %v1566_v2  ;;  %1602 = vst [vmem:[#allocation3] sm:$0x3] %v1566_v2  ;;  %v2900_v56 = vmul.f32 -1.442695, %v1536_v62  ;;  %v1577_v58 = vrot.slane %v1536_v62, 2  ;;  %v1588_v59 = vrot.slane %v1536_v62, 6 }
 0x45d   :  { %v1585_v53 = vrot.slane %v1536_v62, 4 }
 0x45e   :  { %3154 = vpow2.f32 %v2900_v56  ;;  %v2901_v36 = vmul.f32 -1.442695, %v1577_v58  ;;  %v2902_v41 = vmul.f32 -1.442695, %v1588_v59  ;;  %v5229_v59 = vld [vmem:[#allocation9_spill] sm:$0xff] }
 0x460   :  { %3156 = vpow2.f32 %v2901_v36 }
 0x461   :  { %3158 = vpow2.f32 %v2902_v41  ;;  %v5236_v41 = vld [vmem:[#allocation16_spill] sm:$0xff] }
 0x466   :  { %v3153_v63 = vpop.eup %3152 }
 0x467   :  { %v1568_v3 = vmul.f32 %v3153_v63, %v3151_v57  ;;  %v5234_v57 = vld [vmem:[#allocation14_spill] sm:$0xff]  ;;  %v5235_v63 = vld [vmem:[#allocation15_spill] sm:$0xff] }
 0x468   :  { %v3155_v54 = vpop.eup %3154 }
 0x469   :  { %2903 = vst [vmem:[%s5061_s4 + $0x6] sm:$0x3] %v1568_v3  ;;  %1601 = vst [vmem:[#allocation2] sm:$0x3] %v1568_v3  ;;  %v1573_v55 = vadd.f32 1.0, %v3155_v54 }
 0x46a   :  { %v3157_v31 = vpop.eup %3156  ;;  %v1569_v3 = vld [vmem:[#allocation5] sm:$0x3] }
 0x46b   :  { %3160 = vrcp.f32 %v1573_v55  ;;  %v1582_v0 = vadd.f32 1.0, %v3157_v31  ;;  %v3159_v37 = vpop.eup %3158  ;;  %v5237_v55 = vld [vmem:[#allocation17_spill] sm:$0xff]  ;;  %v5238_v31 = vld [vmem:[#allocation18_spill] sm:$0xff] }
 0x46c   :  { %3162 = vtanh.f32 %v1585_v53  ;;  %v1593_v11 = vadd.f32 1.0, %v3159_v37  ;;  %v5242_v37 = vld [vmem:[#allocation22_spill] sm:$0xff] }
 0x46d   :  { %3164 = vrcp.f32 %v1582_v0  ;;  %v5239_v0 = vld [vmem:[#allocation19_spill] sm:$0xff] }
 0x46e   :  { %3166 = vrcp.f32 %v1593_v11 }
 0x470   :  { %v1611_v38 = vld [vmem:[#allocation2] sm:$0x3] }
 0x471   :  { %v1612_v39 = vpack.c.bf16 %v1611_v38, %v1611_v38  ;;  %v5240_v38 = vld [vmem:[#allocation20_spill] sm:$0xff] }
 0x473   :  { %1646 = vmatmul.mubr.bf16.vlgmr.msra.gmra.mrb[32].mxu0 %v1612_v39  ;;  %1687 = vmatmul.mubr.bf16.vlgmr.msra.gmra.mrb[32].mxu1 %v1612_v39  ;;  %v5241_v39 = vld [vmem:[#allocation21_spill] sm:$0xff] }
 0x474   :  { %1723 = vmatpush1.bf16.msra.mxu0 %v4179_v15  ;;  %1764 = vmatpush1.bf16.msra.mxu1 %v4185_v28 }
 0x475   :  { %v3161_v25 = vpop.eup %3160  ;;  %1724 = vmatprep.subr.bf16.mxu0 %v4191_v19  ;;  %1765 = vmatprep.subr.bf16.mxu1 %v4197_v29 }
 0x476   :  { %v3163_v54 = vpop.eup %3162  ;;  %1754 = vmatprep.mubr.bf16.mxu0 %v5169_v34  ;;  %1795 = vmatprep.mubr.bf16.mxu1 %v5169_v34 }
 0x477   :  { %v3165_v53 = vpop.eup %3164  ;;  %v1597_v21 = vmul.f32 %v3163_v54, %v3161_v25  ;;  %v5243_v25 = vld [vmem:[#allocation23_spill] sm:$0xff]  ;;  %v5244_v54 = vld [vmem:[#allocation24_spill] sm:$0xff] }
 0x478   :  { %v1596_v40 = vmul.f32 %v3165_v53, %v1569_v3  ;;  %1725 = vmatpush1.bf16.msra.mxu0 %v4205_v42  ;;  %1766 = vmatpush1.bf16.msra.mxu1 %v4211_v43  ;;  %v3167_v2 = vpop.eup %3166  ;;  %v5245_v53 = vld [vmem:[#allocation25_spill] sm:$0xff]  ;;  %v5246_v3 = vld [vmem:[#allocation26_spill] sm:$0xff] }
 0x479   :  { %1726 = vmatprep.subr.bf16.mxu0 %v4217_v26  ;;  %1767 = vmatprep.subr.bf16.mxu1 %v4223_v60 }
 0x47a   :  { %v1598_v22 = vadd.f32 %v1597_v21, %v1596_v40 }
 0x47c   :  { %3168 = vtanh.f32 %v1598_v22  ;;  %1604 = vst [vmem:[#allocation5] sm:$0x3] %v1598_v22  ;;  %1727 = vmatpush1.bf16.msra.mxu0 %v4229_v12  ;;  %1768 = vmatpush1.bf16.msra.mxu1 %v4235_v13 }
 0x47d   :  { %1728 = vmatprep.subr.bf16.mxu0 %v4241_v14  ;;  %1769 = vmatprep.subr.bf16.mxu1 %v4247_v32 }
 0x480   :  { %1729 = vmatpush1.bf16.msra.mxu0 %v4253_v61  ;;  %1770 = vmatpush1.bf16.msra.mxu1 %v4259_v33 }
 0x481   :  { %1730 = vmatprep.subr.bf16.mxu0 %v4265_v17  ;;  %1771 = vmatprep.subr.bf16.mxu1 %v4271_v35 }
 0x484   :  { %1731 = vmatpush1.bf16.msra.mxu0 %v4277_v27  ;;  %1772 = vmatpush1.bf16.msra.mxu1 %v4283_v23 }
 0x485   :  { %1732 = vmatprep.subr.bf16.mxu0 %v4289_v24  ;;  %1773 = vmatprep.subr.bf16.mxu1 %v4295_v4 }
 0x486   :  { %v3169_v62 = vpop.eup %3168 }
 0x487   :  { %v1600_v56 = vmul.f32 %v3169_v62, %v3167_v2 }
 0x488   :  { %1733 = vmatpush1.bf16.msra.mxu0 %v4301_v7  ;;  %1774 = vmatpush1.bf16.msra.mxu1 %v4307_v18 }
 0x489   :  { %2904 = vst [vmem:[%s5062_s5 + $0x8] sm:$0x3] %v1600_v56  ;;  %1603 = vst [vmem:[#allocation4] sm:$0x3] %v1600_v56  ;;  %1734 = vmatprep.subr.bf16.mxu0 %v4316_v8  ;;  %1775 = vmatprep.subr.bf16.mxu1 %v4322_v6 }
 0x48c   :  { %1735 = vmatpush1.bf16.msra.mxu0 %v4328_v5  ;;  %1776 = vmatpush1.bf16.msra.mxu1 %v4334_v9 }
 0x48d   :  { %1736 = vmatprep.subr.bf16.mxu0 %v4340_v10  ;;  %1777 = vmatprep.subr.bf16.mxu1 %v4346_v30 }
 0x490   :  { %1737 = vmatpush1.bf16.msra.mxu0 %v4352_v16  ;;  %1778 = vmatpush1.bf16.msra.mxu1 %v4358_v20  ;;  %v1720_v58 = vld [vmem:[#allocation4] sm:$0x3] }
 0x491   :  { %v1721_v36 = vpack.c.bf16 %v1720_v58, %v1720_v58  ;;  %1903 = vmatprep.subr.bf16.mxu0 %v4020_v44  ;;  %1944 = vmatprep.subr.bf16.mxu1 %v4026_v45  ;;  %v5223_v44 = vld [vmem:[#allocation27_spill] sm:$0xff]  ;;  %v5224_v45 = vld [vmem:[#allocation28_spill] sm:$0xff] }
 0x493   :  { %1755 = vmatmul.mubr.bf16.vlgmr.msra.gmra.mrb[36].mxu0 %v1721_v36  ;;  %1796 = vmatmul.mubr.bf16.vlgmr.msra.gmra.mrb[36].mxu1 %v1721_v36 }
 0x494   :  { %1904 = vmatpush1.bf16.msra.mxu0 %v4032_v1  ;;  %1945 = vmatpush1.bf16.msra.mxu1 %v4038_v46  ;;  %v5225_v1 = vld [vmem:[#allocation29_spill] sm:$0xff]  ;;  %v5226_v46 = vld [vmem:[#allocation6_spill] sm:$0xff] }
 0x495   :  { %1905 = vmatprep.subr.bf16.mxu0 %v4044_v47  ;;  %1946 = vmatprep.subr.bf16.mxu1 %v4050_v48  ;;  %v5227_v47 = vld [vmem:[#allocation7_spill] sm:$0xff]  ;;  %v5228_v48 = vld [vmem:[#allocation8_spill] sm:$0xff] }
 0x496   :  { %1935 = vmatprep.mubr.bf16.mxu0 %v5169_v34  ;;  %1976 = vmatprep.mubr.bf16.mxu1 %v5169_v34 }
 0x498   :  { %1906 = vmatpush1.bf16.msra.mxu0 %v4058_v49  ;;  %1947 = vmatpush1.bf16.msra.mxu1 %v4064_v50  ;;  %v5230_v49 = vld [vmem:[#allocation10_spill] sm:$0xff]  ;;  %v5231_v50 = vld [vmem:[#allocation11_spill] sm:$0xff] }
 0x499   :  { %1907 = vmatprep.subr.bf16.mxu0 %v4070_v51  ;;  %1948 = vmatprep.subr.bf16.mxu1 %v4076_v52  ;;  %v5232_v51 = vld [vmem:[#allocation12_spill] sm:$0xff]  ;;  %v5233_v52 = vld [vmem:[#allocation13_spill] sm:$0xff] }
 0x49c   :  { %1908 = vmatpush1.bf16.msra.mxu0 %v5223_v44  ;;  %1949 = vmatpush1.bf16.msra.mxu1 %v5224_v45  ;;  %v5247_v45 = vld [vmem:[#allocation30_spill] sm:$0xff] }
 0x49d   :  { %1909 = vmatprep.subr.bf16.mxu0 %v5225_v1  ;;  %1950 = vmatprep.subr.bf16.mxu1 %v5226_v46 }
 0x4a0   :  { %1910 = vmatpush1.bf16.msra.mxu0 %v5227_v47  ;;  %1951 = vmatpush1.bf16.msra.mxu1 %v5228_v48  ;;  %v2905_v47 = vld [vmem:[%s5059_s0 + $0x20] sm:$0xff] }
 0x4a1   :  { %1911 = vmatprep.subr.bf16.mxu0 %v5229_v59  ;;  %1952 = vmatprep.subr.bf16.mxu1 %v5230_v49 }
 0x4a4   :  { %1912 = vmatpush1.bf16.msra.mxu0 %v5231_v50  ;;  %1953 = vmatpush1.bf16.msra.mxu1 %v5232_v51 }
 0x4a5   :  { %1913 = vmatprep.subr.bf16.mxu0 %v5233_v52  ;;  %1954 = vmatprep.subr.bf16.mxu1 %v5234_v57 }
 0x4a8   :  { %1914 = vmatpush1.bf16.msra.mxu0 %v5235_v63  ;;  %1955 = vmatpush1.bf16.msra.mxu1 %v5236_v41 }
 0x4a9   :  { %1915 = vmatprep.subr.bf16.mxu0 %v5237_v55  ;;  %1956 = vmatprep.subr.bf16.mxu1 %v5238_v31 }
 0x4ac   :  { %1916 = vmatpush1.bf16.msra.mxu0 %v5239_v0  ;;  %1957 = vmatpush1.bf16.msra.mxu1 %v5240_v38 }
 0x4ad   :  { %1917 = vmatprep.subr.bf16.mxu0 %v5241_v39  ;;  %1958 = vmatprep.subr.bf16.mxu1 %v5242_v37 }
 0x4b0   :  { %1918 = vmatpush1.bf16.msra.mxu0 %v5243_v25  ;;  %1959 = vmatpush1.bf16.msra.mxu1 %v5244_v54 }
 0x4b1   :  { %2012 = vmatprep.subr.bf16.mxu0 %v5245_v53  ;;  %2053 = vmatprep.subr.bf16.mxu1 %v5246_v3 }
 0x546   :  { %v1647_v11 = vpop.f32.mrb[32].mxu0  ;;  %v1688_v40 = vpop.f32.mrb[32].mxu1 }
 0x547   :  { %v1649_v21 = vpop.f32.mrb[33].mxu0  ;;  %v1690_v22 = vpop.f32.mrb[33].mxu1 }
 0x548   :  { %v1699_v2 = vcombine.low %v1647_v11, %v1649_v21  ;;  %v1700_v62 = vcombine.low %v1688_v40, %v1690_v22  ;;  %v1651_v56 = vpop.f32.mrb[34].mxu0  ;;  %v1692_v58 = vpop.f32.mrb[34].mxu1 }
 0x549   :  { %v1652_v36 = vpop.f32.mrb[35].mxu0  ;;  %v1693_v44 = vpop.f32.mrb[35].mxu1 }
 0x54a   :  { %v1707_v1 = vrot.slane %v1699_v2, %v5247_v45  ;;  %v1714_v46 = vrot.slane %v1700_v62, %v5247_v45 }
 0x54c   :  { %v1715_v48 = vcombine.low %v1707_v1, %v1714_v46 }
 0x54e   :  { %v1717_v59 = vadd.f32 %v2905_v47, %v1715_v48 }
 0x550   :  { %v2907_v49 = vmul.f32 -1.442695, %v1717_v59  ;;  %v1835_v50 = vrot.slane %v1717_v59, 2  ;;  %v1846_v52 = vrot.slane %v1717_v59, 6  ;;  %v1843_v40 = vrot.slane %v1717_v59, 4 }
 0x552   :  { %3170 = vpow2.f32 %v2907_v49  ;;  %v2908_v51 = vmul.f32 -1.442695, %v1835_v50  ;;  %v2909_v57 = vmul.f32 -1.442695, %v1846_v52 }
 0x554   :  { %3172 = vpow2.f32 %v2908_v51 }
 0x555   :  { %3174 = vpow2.f32 %v2909_v57 }
 0x55c   :  { %v3171_v11 = vpop.eup %3170 }
 0x55d   :  { %v1831_v21 = vadd.f32 1.0, %v3171_v11 }
 0x55e   :  { %v3173_v22 = vpop.eup %3172 }
 0x55f   :  { %3176 = vrcp.f32 %v1831_v21  ;;  %v1840_v2 = vadd.f32 1.0, %v3173_v22  ;;  %v3175_v44 = vpop.eup %3174  ;;  %v2906_v22 = vld [vmem:[%s5060_s1 + $0x18] sm:$0xff] }
 0x560   :  { %3178 = vtanh.f32 %v1843_v40  ;;  %v1827_v40 = vld [vmem:[#allocation3] sm:$0x3]  ;;  %v1851_v21 = vadd.f32 1.0, %v3175_v44 }
 0x561   :  { %3180 = vrcp.f32 %v1840_v2 }
 0x562   :  { %3182 = vrcp.f32 %v1851_v21 }
 0x566   :  { %v1756_v62 = vpop.f32.mrb[36].mxu0  ;;  %v1797_v56 = vpop.f32.mrb[36].mxu1 }
 0x567   :  { %v1758_v58 = vpop.f32.mrb[37].mxu0  ;;  %v1799_v36 = vpop.f32.mrb[37].mxu1 }
 0x568   :  { %v1808_v1 = vcombine.low %v1756_v62, %v1758_v58  ;;  %v1809_v46 = vcombine.low %v1797_v56, %v1799_v36  ;;  %v1760_v47 = vpop.f32.mrb[38].mxu0  ;;  %v1801_v48 = vpop.f32.mrb[38].mxu1 }
 0x569   :  { %v3177_v49 = vpop.eup %3176  ;;  %v1761_v50 = vpop.f32.mrb[39].mxu0 }
 0x56a   :  { %v1802_v51 = vpop.f32.mrb[39].mxu1  ;;  %v3179_v59 = vpop.eup %3178  ;;  %v1816_v52 = vrot.slane %v1808_v1, %v5247_v45  ;;  %v1823_v57 = vrot.slane %v1809_v46, %v5247_v45 }
 0x56b   :  { %v3181_v11 = vpop.eup %3180  ;;  %v1855_v62 = vmul.f32 %v3179_v59, %v3177_v49 }
 0x56c   :  { %v1854_v2 = vmul.f32 %v3181_v11, %v1827_v40  ;;  %v1824_v56 = vcombine.low %v1816_v52, %v1823_v57  ;;  %v3183_v50 = vpop.eup %3182 }
 0x56e   :  { %v1856_v58 = vadd.f32 %v1855_v62, %v1854_v2  ;;  %v1826_v36 = vadd.f32 %v2906_v22, %v1824_v56 }
 0x570   :  { %3184 = vtanh.f32 %v1856_v58  ;;  %1892 = vst [vmem:[#allocation3] sm:$0x3] %v1856_v58  ;;  %v2910_v47 = vmul.f32 -1.442695, %v1826_v36  ;;  %v1867_v48 = vrot.slane %v1826_v36, 2  ;;  %v1878_v46 = vrot.slane %v1826_v36, 6 }
 0x571   :  { %v1875_v53 = vrot.slane %v1826_v36, 4 }
 0x572   :  { %3186 = vpow2.f32 %v2910_v47  ;;  %v2911_v1 = vmul.f32 -1.442695, %v1867_v48  ;;  %v2912_v51 = vmul.f32 -1.442695, %v1878_v46  ;;  %v5250_v47 = vld [vmem:[#allocation30_spill] sm:$0xff] }
 0x574   :  { %3188 = vpow2.f32 %v2911_v1 }
 0x575   :  { %3190 = vpow2.f32 %v2912_v51 }
 0x57a   :  { %v3185_v44 = vpop.eup %3184 }
 0x57b   :  { %v1858_v45 = vmul.f32 %v3185_v44, %v3183_v50 }
 0x57c   :  { %v3187_v3 = vpop.eup %3186 }
 0x57d   :  { %2913 = vst [vmem:[%s5061_s4 + $0x8] sm:$0x3] %v1858_v45  ;;  %1891 = vst [vmem:[#allocation2] sm:$0x3] %v1858_v45  ;;  %v1863_v49 = vadd.f32 1.0, %v3187_v3 }
 0x57e   :  { %v3189_v59 = vpop.eup %3188  ;;  %v1859_v45 = vld [vmem:[#allocation5] sm:$0x3] }
 0x57f   :  { %3192 = vrcp.f32 %v1863_v49  ;;  %v1872_v52 = vadd.f32 1.0, %v3189_v59  ;;  %v3191_v40 = vpop.eup %3190 }
 0x580   :  { %3194 = vtanh.f32 %v1875_v53  ;;  %v1883_v22 = vadd.f32 1.0, %v3191_v40 }
 0x581   :  { %3196 = vrcp.f32 %v1872_v52 }
 0x582   :  { %3198 = vrcp.f32 %v1883_v22 }
 0x584   :  { %v1901_v57 = vld [vmem:[#allocation2] sm:$0x3] }
 0x585   :  { %v1902_v11 = vpack.c.bf16 %v1901_v57, %v1901_v57 }
 0x587   :  { %1936 = vmatmul.mubr.bf16.vlgmr.msra.gmra.mrb[40].mxu0 %v1902_v11  ;;  %1977 = vmatmul.mubr.bf16.vlgmr.msra.gmra.mrb[40].mxu1 %v1902_v11 }
 0x588   :  { %2013 = vmatpush1.bf16.msra.mxu0 %v4179_v15  ;;  %2054 = vmatpush1.bf16.msra.mxu1 %v4185_v28 }
 0x589   :  { %v3193_v21 = vpop.eup %3192  ;;  %2014 = vmatprep.subr.bf16.mxu0 %v4191_v19  ;;  %2055 = vmatprep.subr.bf16.mxu1 %v4197_v29 }
 0x58a   :  { %v3195_v3 = vpop.eup %3194  ;;  %2044 = vmatprep.mubr.bf16.mxu0 %v5169_v34  ;;  %2085 = vmatprep.mubr.bf16.mxu1 %v5169_v34 }
 0x58b   :  { %v3197_v53 = vpop.eup %3196  ;;  %v1887_v62 = vmul.f32 %v3195_v3, %v3193_v21 }
 0x58c   :  { %v1886_v2 = vmul.f32 %v3197_v53, %v1859_v45  ;;  %2015 = vmatpush1.bf16.msra.mxu0 %v4205_v42  ;;  %2056 = vmatpush1.bf16.msra.mxu1 %v4211_v43  ;;  %v3199_v28 = vpop.eup %3198 }
 0x58d   :  { %2016 = vmatprep.subr.bf16.mxu0 %v4217_v26  ;;  %2057 = vmatprep.subr.bf16.mxu1 %v4223_v60  ;;  %v4592_v26 = vld [vmem:[%s5057_s2 + $0x4] ss:$16 sps:$4 sm:$0xff]   ;;  %v4598_v60 = vld [vmem:[%s5057_s2 + $0xc] ss:$16 sps:$4 sm:$0xff]  }
 0x58e   :  { %v1888_v15 = vadd.f32 %v1887_v62, %v1886_v2 }
 0x590   :  { %3200 = vtanh.f32 %v1888_v15  ;;  %1894 = vst [vmem:[#allocation5] sm:$0x3] %v1888_v15  ;;  %2017 = vmatpush1.bf16.msra.mxu0 %v4229_v12  ;;  %2058 = vmatpush1.bf16.msra.mxu1 %v4235_v13  ;;  %v4604_v12 = vld [vmem:[%s5057_s2] ss:$16 sps:$4 sm:$0xff]   ;;  %v4610_v13 = vld [vmem:[%s5057_s2 + $0x8] ss:$16 sps:$4 sm:$0xff]  }
 0x591   :  { %2018 = vmatprep.subr.bf16.mxu0 %v4241_v14  ;;  %2059 = vmatprep.subr.bf16.mxu1 %v4247_v32  ;;  %v4616_v14 = vld [vmem:[%s5057_s2 + $0x24] ss:$16 sps:$4 sm:$0xff]   ;;  %v4622_v32 = vld [vmem:[%s5057_s2 + $0x2c] ss:$16 sps:$4 sm:$0xff]  }
 0x594   :  { %2019 = vmatpush1.bf16.msra.mxu0 %v4253_v61  ;;  %2060 = vmatpush1.bf16.msra.mxu1 %v4259_v33  ;;  %v4630_v61 = vld [vmem:[%s5057_s2 + $0x20] ss:$16 sps:$4 sm:$0xff]   ;;  %v4636_v33 = vld [vmem:[%s5057_s2 + $0x28] ss:$16 sps:$4 sm:$0xff]  }
 0x595   :  { %2020 = vmatprep.subr.bf16.mxu0 %v4265_v17  ;;  %2061 = vmatprep.subr.bf16.mxu1 %v4271_v35  ;;  %v4642_v17 = vld [vmem:[%s5057_s2 + $0x44] ss:$16 sps:$4 sm:$0xff]   ;;  %v4648_v35 = vld [vmem:[%s5057_s2 + $0x4c] ss:$16 sps:$4 sm:$0xff]  }
 0x598   :  { %2021 = vmatpush1.bf16.msra.mxu0 %v4277_v27  ;;  %2062 = vmatpush1.bf16.msra.mxu1 %v4283_v23  ;;  %v4654_v27 = vld [vmem:[%s5057_s2 + $0x40] ss:$16 sps:$4 sm:$0xff]   ;;  %v4660_v23 = vld [vmem:[%s5057_s2 + $0x48] ss:$16 sps:$4 sm:$0xff]  }
 0x599   :  { %2022 = vmatprep.subr.bf16.mxu0 %v4289_v24  ;;  %2063 = vmatprep.subr.bf16.mxu1 %v4295_v4  ;;  %v4666_v24 = vld [vmem:[%s5057_s2 + $0x64] ss:$16 sps:$4 sm:$0xff]   ;;  %v4672_v4 = vld [vmem:[%s5057_s2 + $0x6c] ss:$16 sps:$4 sm:$0xff]  }
 0x59a   :  { %v3201_v19 = vpop.eup %3200 }
 0x59b   :  { %v1890_v29 = vmul.f32 %v3201_v19, %v3199_v28 }
 0x59c   :  { %2023 = vmatpush1.bf16.msra.mxu0 %v4301_v7  ;;  %2064 = vmatpush1.bf16.msra.mxu1 %v4307_v18  ;;  %v4678_v7 = vld [vmem:[%s5057_s2 + $0x60] ss:$16 sps:$4 sm:$0xff]   ;;  %v4684_v18 = vld [vmem:[%s5057_s2 + $0x68] ss:$16 sps:$4 sm:$0xff]  }
 0x59d   :  { %2914 = vst [vmem:[%s5062_s5 + $0x6] sm:$0x3] %v1890_v29  ;;  %1893 = vst [vmem:[#allocation4] sm:$0x3] %v1890_v29  ;;  %2024 = vmatprep.subr.bf16.mxu0 %v4316_v8  ;;  %2065 = vmatprep.subr.bf16.mxu1 %v4322_v6  ;;  %v4690_v8 = vld [vmem:[%s5057_s2 + $0x84] ss:$16 sps:$4 sm:$0xff]  }
 0x59e   :  { %v4696_v6 = vld [vmem:[%s5057_s2 + $0x8c] ss:$16 sps:$4 sm:$0xff]  }
 0x5a0   :  { %2025 = vmatpush1.bf16.msra.mxu0 %v4328_v5  ;;  %2066 = vmatpush1.bf16.msra.mxu1 %v4334_v9  ;;  %v4702_v5 = vld [vmem:[%s5057_s2 + $0x80] ss:$16 sps:$4 sm:$0xff]   ;;  %v4708_v9 = vld [vmem:[%s5057_s2 + $0x88] ss:$16 sps:$4 sm:$0xff]  }
 0x5a1   :  { %2026 = vmatprep.subr.bf16.mxu0 %v4340_v10  ;;  %2067 = vmatprep.subr.bf16.mxu1 %v4346_v30  ;;  %v4714_v10 = vld [vmem:[%s5057_s2 + $0xa4] ss:$16 sps:$4 sm:$0xff]   ;;  %v4720_v30 = vld [vmem:[%s5057_s2 + $0xac] ss:$16 sps:$4 sm:$0xff]  }
 0x5a4   :  { %2027 = vmatpush1.bf16.msra.mxu0 %v4352_v16  ;;  %2068 = vmatpush1.bf16.msra.mxu1 %v4358_v20  ;;  %v2010_v42 = vld [vmem:[#allocation4] sm:$0x3]  ;;  %v5249_v20 = vld [vmem:[#allocation26_spill] sm:$0xff] }
 0x5a5   :  { %v2011_v43 = vpack.c.bf16 %v2010_v42, %v2010_v42  ;;  %2193 = vmatprep.subr.bf16.mxu0 %v4592_v26  ;;  %2234 = vmatprep.subr.bf16.mxu1 %v4598_v60  ;;  %v5248_v16 = vld [vmem:[#allocation25_spill] sm:$0xff] }
 0x5a7   :  { %2045 = vmatmul.mubr.bf16.vlgmr.msra.gmra.mrb[44].mxu0 %v2011_v43  ;;  %2086 = vmatmul.mubr.bf16.vlgmr.msra.gmra.mrb[44].mxu1 %v2011_v43 }
 0x5a8   :  { %2194 = vmatpush1.bf16.msra.mxu0 %v4604_v12  ;;  %2235 = vmatpush1.bf16.msra.mxu1 %v4610_v13 }
 0x5a9   :  { %2195 = vmatprep.subr.bf16.mxu0 %v4616_v14  ;;  %2236 = vmatprep.subr.bf16.mxu1 %v4622_v32 }
 0x5aa   :  { %2225 = vmatprep.mubr.bf16.mxu0 %v5169_v34  ;;  %2266 = vmatprep.mubr.bf16.mxu1 %v5169_v34 }
 0x5ac   :  { %2196 = vmatpush1.bf16.msra.mxu0 %v4630_v61  ;;  %2237 = vmatpush1.bf16.msra.mxu1 %v4636_v33 }
 0x5ad   :  { %2197 = vmatprep.subr.bf16.mxu0 %v4642_v17  ;;  %2238 = vmatprep.subr.bf16.mxu1 %v4648_v35 }
 0x5b0   :  { %2198 = vmatpush1.bf16.msra.mxu0 %v4654_v27  ;;  %2239 = vmatpush1.bf16.msra.mxu1 %v4660_v23 }
 0x5b1   :  { %2199 = vmatprep.subr.bf16.mxu0 %v4666_v24  ;;  %2240 = vmatprep.subr.bf16.mxu1 %v4672_v4 }
 0x5b4   :  { %2200 = vmatpush1.bf16.msra.mxu0 %v4678_v7  ;;  %2241 = vmatpush1.bf16.msra.mxu1 %v4684_v18 }
 0x5b5   :  { %2201 = vmatprep.subr.bf16.mxu0 %v4690_v8  ;;  %2242 = vmatprep.subr.bf16.mxu1 %v4696_v6 }
 0x5b8   :  { %2202 = vmatpush1.bf16.msra.mxu0 %v4702_v5  ;;  %2243 = vmatpush1.bf16.msra.mxu1 %v4708_v9 }
 0x5b9   :  { %2203 = vmatprep.subr.bf16.mxu0 %v4714_v10  ;;  %2244 = vmatprep.subr.bf16.mxu1 %v4720_v30 }
 0x5bc   :  { %2204 = vmatpush1.bf16.msra.mxu0 %v5235_v63  ;;  %2245 = vmatpush1.bf16.msra.mxu1 %v5236_v41 }
 0x5bd   :  { %2205 = vmatprep.subr.bf16.mxu0 %v5237_v55  ;;  %2246 = vmatprep.subr.bf16.mxu1 %v5238_v31 }
 0x5c0   :  { %2206 = vmatpush1.bf16.msra.mxu0 %v5239_v0  ;;  %2247 = vmatpush1.bf16.msra.mxu1 %v5240_v38 }
 0x5c1   :  { %2207 = vmatprep.subr.bf16.mxu0 %v5241_v39  ;;  %2248 = vmatprep.subr.bf16.mxu1 %v5242_v37 }
 0x5c4   :  { %2208 = vmatpush1.bf16.msra.mxu0 %v5243_v25  ;;  %2249 = vmatpush1.bf16.msra.mxu1 %v5244_v54  ;;  %v2915_v54 = vld [vmem:[%s5059_s0 + $0x28] sm:$0xff] }
 0x5c5   :  { %2302 = vmatprep.subr.bf16.mxu0 %v5248_v16  ;;  %2343 = vmatprep.subr.bf16.mxu1 %v5249_v20 }
 0x65a   :  { %v1937_v63 = vpop.f32.mrb[40].mxu0  ;;  %v1978_v41 = vpop.f32.mrb[40].mxu1 }
 0x65b   :  { %v1939_v55 = vpop.f32.mrb[41].mxu0  ;;  %v1980_v31 = vpop.f32.mrb[41].mxu1 }
 0x65c   :  { %v1989_v56 = vcombine.low %v1937_v63, %v1939_v55  ;;  %v1990_v0 = vcombine.low %v1978_v41, %v1980_v31  ;;  %v1941_v58 = vpop.f32.mrb[42].mxu0  ;;  %v1982_v38 = vpop.f32.mrb[42].mxu1  ;;  %v2117_v41 = vld [vmem:[#allocation3] sm:$0x3]  ;;  %v2916_v31 = vld [vmem:[%s5060_s1 + $0x10] sm:$0xff] }
 0x65d   :  { %v1942_v36 = vpop.f32.mrb[43].mxu0  ;;  %v1983_v39 = vpop.f32.mrb[43].mxu1 }
 0x65e   :  { %v1997_v37 = vrot.slane %v1989_v56, %v5250_v47  ;;  %v2004_v25 = vrot.slane %v1990_v0, %v5250_v47 }
 0x660   :  { %v2005_v48 = vcombine.low %v1997_v37, %v2004_v25 }
 0x662   :  { %v2007_v1 = vadd.f32 %v2915_v54, %v2005_v48 }
 0x664   :  { %v2917_v46 = vmul.f32 -1.442695, %v2007_v1  ;;  %v2125_v50 = vrot.slane %v2007_v1, 2  ;;  %v2136_v51 = vrot.slane %v2007_v1, 6  ;;  %v2133_v52 = vrot.slane %v2007_v1, 4 }
 0x666   :  { %3202 = vpow2.f32 %v2917_v46  ;;  %v2918_v44 = vmul.f32 -1.442695, %v2125_v50  ;;  %v2919_v49 = vmul.f32 -1.442695, %v2136_v51 }
 0x668   :  { %3204 = vpow2.f32 %v2918_v44 }
 0x669   :  { %3206 = vpow2.f32 %v2919_v49 }
 0x670   :  { %v3203_v59 = vpop.eup %3202 }
 0x671   :  { %v2121_v57 = vadd.f32 1.0, %v3203_v59 }
 0x672   :  { %v3205_v11 = vpop.eup %3204 }
 0x673   :  { %3208 = vrcp.f32 %v2121_v57  ;;  %v2130_v40 = vadd.f32 1.0, %v3205_v11  ;;  %v3207_v22 = vpop.eup %3206 }
 0x674   :  { %3210 = vtanh.f32 %v2133_v52  ;;  %v2141_v55 = vadd.f32 1.0, %v3207_v22  ;;  %v4769_v22 = vld [vmem:[%s5058_s3 + $0x2c] ss:$16 sps:$4 sm:$0xff]  }
 0x675   :  { %3212 = vrcp.f32 %v2130_v40 }
 0x676   :  { %3214 = vrcp.f32 %v2141_v55  ;;  %v4807_v55 = vld [vmem:[%s5058_s3 + $0x48] ss:$16 sps:$4 sm:$0xff]  }
 0x67a   :  { %v2046_v21 = vpop.f32.mrb[44].mxu0  ;;  %v2087_v3 = vpop.f32.mrb[44].mxu1 }
 0x67b   :  { %v2048_v53 = vpop.f32.mrb[45].mxu0  ;;  %v2089_v45 = vpop.f32.mrb[45].mxu1 }
 0x67c   :  { %v2098_v2 = vcombine.low %v2046_v21, %v2048_v53  ;;  %v2099_v62 = vcombine.low %v2087_v3, %v2089_v45  ;;  %v2050_v15 = vpop.f32.mrb[46].mxu0  ;;  %v2091_v28 = vpop.f32.mrb[46].mxu1  ;;  %v4751_v21 = vld [vmem:[%s5058_s3] ss:$16 sps:$4 sm:$0xff]   ;;  %v4757_v3 = vld [vmem:[%s5058_s3 + $0x8] ss:$16 sps:$4 sm:$0xff]  }
 0x67d   :  { %v3209_v19 = vpop.eup %3208  ;;  %v2051_v29 = vpop.f32.mrb[47].mxu0  ;;  %v4763_v45 = vld [vmem:[%s5058_s3 + $0x24] ss:$16 sps:$4 sm:$0xff]  }
 0x67e   :  { %v2092_v42 = vpop.f32.mrb[47].mxu1  ;;  %v3211_v43 = vpop.eup %3210  ;;  %v2106_v16 = vrot.slane %v2098_v2, %v5250_v47  ;;  %v2113_v20 = vrot.slane %v2099_v62, %v5250_v47  ;;  %v2149_v15 = vld [vmem:[#allocation5] sm:$0x3] }
 0x67f   :  { %v3213_v63 = vpop.eup %3212  ;;  %v2145_v0 = vmul.f32 %v3211_v43, %v3209_v19  ;;  %v4777_v42 = vld [vmem:[%s5058_s3 + $0x20] ss:$16 sps:$4 sm:$0xff]   ;;  %v4783_v43 = vld [vmem:[%s5058_s3 + $0x28] ss:$16 sps:$4 sm:$0xff]  }
 0x680   :  { %v2144_v56 = vmul.f32 %v3213_v63, %v2117_v41  ;;  %v2114_v58 = vcombine.low %v2106_v16, %v2113_v20  ;;  %v3215_v48 = vpop.eup %3214  ;;  %v4789_v16 = vld [vmem:[%s5058_s3 + $0x44] ss:$16 sps:$4 sm:$0xff]   ;;  %v4795_v20 = vld [vmem:[%s5058_s3 + $0x4c] ss:$16 sps:$4 sm:$0xff]   ;;  %v4801_v41 = vld [vmem:[%s5058_s3 + $0x40] ss:$16 sps:$4 sm:$0xff]  }
 0x682   :  { %v2146_v38 = vadd.f32 %v2145_v0, %v2144_v56  ;;  %v2116_v36 = vadd.f32 %v2916_v31, %v2114_v58  ;;  %v4813_v31 = vld [vmem:[%s5058_s3 + $0x64] ss:$16 sps:$4 sm:$0xff]   ;;  %v4819_v56 = vld [vmem:[%s5058_s3 + $0x6c] ss:$16 sps:$4 sm:$0xff]   ;;  %v4825_v0 = vld [vmem:[%s5058_s3 + $0x60] ss:$16 sps:$4 sm:$0xff]  }
 0x683   :  { %v4831_v58 = vld [vmem:[%s5058_s3 + $0x68] ss:$16 sps:$4 sm:$0xff]  }
 0x684   :  { %3216 = vtanh.f32 %v2146_v38  ;;  %2182 = vst [vmem:[#allocation3] sm:$0x3] %v2146_v38  ;;  %v2920_v39 = vmul.f32 -1.442695, %v2116_v36  ;;  %v2157_v37 = vrot.slane %v2116_v36, 2  ;;  %v2168_v54 = vrot.slane %v2116_v36, 6 }
 0x685   :  { %v2165_v51 = vrot.slane %v2116_v36, 4  ;;  %v4837_v38 = vld [vmem:[%s5058_s3 + $0x84] ss:$16 sps:$4 sm:$0xff]   ;;  %v4843_v36 = vld [vmem:[%s5058_s3 + $0x8c] ss:$16 sps:$4 sm:$0xff]  }
 0x686   :  { %3218 = vpow2.f32 %v2920_v39  ;;  %v2921_v25 = vmul.f32 -1.442695, %v2157_v37  ;;  %v2922_v46 = vmul.f32 -1.442695, %v2168_v54  ;;  %v4849_v39 = vld [vmem:[%s5058_s3 + $0x80] ss:$16 sps:$4 sm:$0xff]  }
 0x687   :  { %v4855_v37 = vld [vmem:[%s5058_s3 + $0x88] ss:$16 sps:$4 sm:$0xff]   ;;  %v4861_v54 = vld [vmem:[%s5058_s3 + $0xa4] ss:$16 sps:$4 sm:$0xff]  }
 0x688   :  { %3220 = vpow2.f32 %v2921_v25 }
 0x689   :  { %3222 = vpow2.f32 %v2922_v46 }
 0x68e   :  { %v3217_v1 = vpop.eup %3216 }
 0x68f   :  { %v2148_v50 = vmul.f32 %v3217_v1, %v3215_v48  ;;  %v4867_v48 = vld [vmem:[%s5058_s3 + $0xac] ss:$16 sps:$4 sm:$0xff]  }
 0x690   :  { %v3219_v44 = vpop.eup %3218 }
 0x691   :  { %2923 = vst [vmem:[%s5061_s4 + $0xa] sm:$0x3] %v2148_v50  ;;  %2181 = vst [vmem:[#allocation2] sm:$0x3] %v2148_v50  ;;  %v2153_v49 = vadd.f32 1.0, %v3219_v44 }
 0x692   :  { %v3221_v59 = vpop.eup %3220  ;;  %v4873_v50 = vld [vmem:[%s5058_s3 + $0xa0] ss:$16 sps:$4 sm:$0xff]   ;;  %v4879_v44 = vld [vmem:[%s5058_s3 + $0xa8] ss:$16 sps:$4 sm:$0xff]  }
 0x693   :  { %3224 = vrcp.f32 %v2153_v49  ;;  %v2162_v52 = vadd.f32 1.0, %v3221_v59  ;;  %v3223_v40 = vpop.eup %3222  ;;  %v4894_v49 = vld [vmem:[%s5058_s3 + $0xcc] ss:$16 sps:$4 sm:$0xff]   ;;  %v4900_v59 = vld [vmem:[%s5058_s3 + $0xc0] ss:$16 sps:$4 sm:$0xff]  }
 0x694   :  { %3226 = vtanh.f32 %v2165_v51  ;;  %v2173_v28 = vadd.f32 1.0, %v3223_v40  ;;  %v4888_v51 = vld [vmem:[%s5058_s3 + $0xc4] ss:$16 sps:$4 sm:$0xff]   ;;  %v4924_v40 = vld [vmem:[%s5058_s3 + $0xe0] ss:$16 sps:$4 sm:$0xff]  }
 0x695   :  { %3228 = vrcp.f32 %v2162_v52  ;;  %v4906_v52 = vld [vmem:[%s5058_s3 + $0xc8] ss:$16 sps:$4 sm:$0xff]  }
 0x696   :  { %3230 = vrcp.f32 %v2173_v28 }
 0x698   :  { %v2191_v57 = vld [vmem:[#allocation2] sm:$0x3] }
 0x699   :  { %v2192_v11 = vpack.c.bf16 %v2191_v57, %v2191_v57  ;;  %v4912_v57 = vld [vmem:[%s5058_s3 + $0xe4] ss:$16 sps:$4 sm:$0xff]  }
 0x69b   :  { %2226 = vmatmul.mubr.bf16.vlgmr.msra.gmra.mrb[48].mxu0 %v2192_v11  ;;  %2267 = vmatmul.mubr.bf16.vlgmr.msra.gmra.mrb[48].mxu1 %v2192_v11  ;;  %v4918_v11 = vld [vmem:[%s5058_s3 + $0xec] ss:$16 sps:$4 sm:$0xff]  }
 0x69c   :  { %2303 = vmatpush1.bf16.msra.mxu0 %v4751_v21  ;;  %2344 = vmatpush1.bf16.msra.mxu1 %v4757_v3 }
 0x69d   :  { %v3225_v53 = vpop.eup %3224  ;;  %2304 = vmatprep.subr.bf16.mxu0 %v4763_v45  ;;  %2345 = vmatprep.subr.bf16.mxu1 %v4769_v22 }
 0x69e   :  { %v3227_v2 = vpop.eup %3226  ;;  %2334 = vmatprep.mubr.bf16.mxu0 %v5169_v34  ;;  %2375 = vmatprep.mubr.bf16.mxu1 %v5169_v34 }
 0x69f   :  { %v3229_v62 = vpop.eup %3228  ;;  %v2177_v29 = vmul.f32 %v3227_v2, %v3225_v53  ;;  %v4930_v53 = vld [vmem:[%s5058_s3 + $0xe8] ss:$16 sps:$4 sm:$0xff]  }
 0x6a0   :  { %v2176_v19 = vmul.f32 %v3229_v62, %v2149_v15  ;;  %2305 = vmatpush1.bf16.msra.mxu0 %v4777_v42  ;;  %2346 = vmatpush1.bf16.msra.mxu1 %v4783_v43  ;;  %v3231_v25 = vpop.eup %3230 }
 0x6a1   :  { %2306 = vmatprep.subr.bf16.mxu0 %v4789_v16  ;;  %2347 = vmatprep.subr.bf16.mxu1 %v4795_v20 }
 0x6a2   :  { %v2178_v63 = vadd.f32 %v2177_v29, %v2176_v19  ;;  %v2925_v19 = vld [vmem:[%s5059_s0 + $0x30] sm:$0xff] }
 0x6a4   :  { %3232 = vtanh.f32 %v2178_v63  ;;  %2184 = vst [vmem:[#allocation5] sm:$0x3] %v2178_v63  ;;  %2307 = vmatpush1.bf16.msra.mxu0 %v4801_v41  ;;  %2348 = vmatpush1.bf16.msra.mxu1 %v4807_v55 }
 0x6a5   :  { %2308 = vmatprep.subr.bf16.mxu0 %v4813_v31  ;;  %2349 = vmatprep.subr.bf16.mxu1 %v4819_v56 }
 0x6a8   :  { %2309 = vmatpush1.bf16.msra.mxu0 %v4825_v0  ;;  %2350 = vmatpush1.bf16.msra.mxu1 %v4831_v58 }
 0x6a9   :  { %2310 = vmatprep.subr.bf16.mxu0 %v4837_v38  ;;  %2351 = vmatprep.subr.bf16.mxu1 %v4843_v36 }
 0x6ac   :  { %2311 = vmatpush1.bf16.msra.mxu0 %v4849_v39  ;;  %2352 = vmatpush1.bf16.msra.mxu1 %v4855_v37 }
 0x6ad   :  { %2312 = vmatprep.subr.bf16.mxu0 %v4861_v54  ;;  %2353 = vmatprep.subr.bf16.mxu1 %v4867_v48 }
 0x6ae   :  { %v3233_v1 = vpop.eup %3232 }
 0x6af   :  { %v2180_v46 = vmul.f32 %v3233_v1, %v3231_v25 }
 0x6b0   :  { %2313 = vmatpush1.bf16.msra.mxu0 %v4873_v50  ;;  %2354 = vmatpush1.bf16.msra.mxu1 %v4879_v44 }
 0x6b1   :  { %2924 = vst [vmem:[%s5062_s5 + $0x4] sm:$0x3] %v2180_v46  ;;  %2183 = vst [vmem:[#allocation4] sm:$0x3] %v2180_v46  ;;  %2314 = vmatprep.subr.bf16.mxu0 %v4888_v51  ;;  %2355 = vmatprep.subr.bf16.mxu1 %v4894_v49 }
 0x6b4   :  { %2315 = vmatpush1.bf16.msra.mxu0 %v4900_v59  ;;  %2356 = vmatpush1.bf16.msra.mxu1 %v4906_v52 }
 0x6b5   :  { %2316 = vmatprep.subr.bf16.mxu0 %v4912_v57  ;;  %2357 = vmatprep.subr.bf16.mxu1 %v4918_v11 }
 0x6b8   :  { %2317 = vmatpush1.bf16.msra.mxu0 %v4924_v40  ;;  %2358 = vmatpush1.bf16.msra.mxu1 %v4930_v53  ;;  %v2300_v2 = vld [vmem:[#allocation4] sm:$0x3] }
 0x6b9   :  { %v2301_v62 = vpack.c.bf16 %v2300_v2, %v2300_v2  ;;  %2483 = vmatprep.subr.bf16.mxu0 %v4592_v26  ;;  %2524 = vmatprep.subr.bf16.mxu1 %v4598_v60  ;;  %v3414_v26 = vld [vmem:[%s5057_s2 + $0xa0] ss:$16 sps:$4 sm:$0xff]   ;;  %v3415_v60 = vld [vmem:[%s5057_s2 + $0xa8] ss:$16 sps:$4 sm:$0xff]  }
 0x6bb   :  { %2335 = vmatmul.mubr.bf16.vlgmr.msra.gmra.mrb[52].mxu0 %v2301_v62  ;;  %2376 = vmatmul.mubr.bf16.vlgmr.msra.gmra.mrb[52].mxu1 %v2301_v62 }
 0x6bc   :  { %2484 = vmatpush1.bf16.msra.mxu0 %v4604_v12  ;;  %2525 = vmatpush1.bf16.msra.mxu1 %v4610_v13  ;;  %v3416_v12 = vld [vmem:[%s5057_s2 + $0xc4] ss:$16 sps:$4 sm:$0xff]   ;;  %v3417_v13 = vld [vmem:[%s5057_s2 + $0xcc] ss:$16 sps:$4 sm:$0xff]  }
 0x6bd   :  { %2485 = vmatprep.subr.bf16.mxu0 %v4616_v14  ;;  %2526 = vmatprep.subr.bf16.mxu1 %v4622_v32  ;;  %v3418_v14 = vld [vmem:[%s5057_s2 + $0xc0] ss:$16 sps:$4 sm:$0xff]   ;;  %v3419_v32 = vld [vmem:[%s5057_s2 + $0xc8] ss:$16 sps:$4 sm:$0xff]  }
 0x6be   :  { %2515 = vmatprep.mubr.bf16.mxu0 %v5169_v34  ;;  %2556 = vmatprep.mubr.bf16.mxu1 %v5169_v34 }
 0x6c0   :  { %2486 = vmatpush1.bf16.msra.mxu0 %v4630_v61  ;;  %2527 = vmatpush1.bf16.msra.mxu1 %v4636_v33  ;;  %v3420_v61 = vld [vmem:[%s5057_s2 + $0xe4] ss:$16 sps:$4 sm:$0xff]   ;;  %v3421_v33 = vld [vmem:[%s5057_s2 + $0xec] ss:$16 sps:$4 sm:$0xff]  }
 0x6c1   :  { %2487 = vmatprep.subr.bf16.mxu0 %v4642_v17  ;;  %2528 = vmatprep.subr.bf16.mxu1 %v4648_v35  ;;  %v3422_v17 = vld [vmem:[%s5057_s2 + $0xe0] ss:$16 sps:$4 sm:$0xff]   ;;  %v3423_v35 = vld [vmem:[%s5057_s2 + $0xe8] ss:$16 sps:$4 sm:$0xff]  }
 0x6c4   :  { %2488 = vmatpush1.bf16.msra.mxu0 %v4654_v27  ;;  %2529 = vmatpush1.bf16.msra.mxu1 %v4660_v23  ;;  %v3424_v27 = vld [vmem:[%s5058_s3 + $0x4] ss:$16 sps:$4 sm:$0xff]   ;;  %v3425_v23 = vld [vmem:[%s5058_s3 + $0xc] ss:$16 sps:$4 sm:$0xff]  }
 0x6c5   :  { %2489 = vmatprep.subr.bf16.mxu0 %v4666_v24  ;;  %2530 = vmatprep.subr.bf16.mxu1 %v4672_v4 }
 0x6c8   :  { %2490 = vmatpush1.bf16.msra.mxu0 %v4678_v7  ;;  %2531 = vmatpush1.bf16.msra.mxu1 %v4684_v18 }
 0x6c9   :  { %2491 = vmatprep.subr.bf16.mxu0 %v4690_v8  ;;  %2532 = vmatprep.subr.bf16.mxu1 %v4696_v6 }
 0x6cc   :  { %2492 = vmatpush1.bf16.msra.mxu0 %v4702_v5  ;;  %2533 = vmatpush1.bf16.msra.mxu1 %v4708_v9 }
 0x6cd   :  { %2493 = vmatprep.subr.bf16.mxu0 %v4714_v10  ;;  %2534 = vmatprep.subr.bf16.mxu1 %v4720_v30 }
 0x6d0   :  { %2494 = vmatpush1.bf16.msra.mxu0 %v3414_v26  ;;  %2535 = vmatpush1.bf16.msra.mxu1 %v3415_v60 }
 0x6d1   :  { %2495 = vmatprep.subr.bf16.mxu0 %v3416_v12  ;;  %2536 = vmatprep.subr.bf16.mxu1 %v3417_v13 }
 0x6d4   :  { %2496 = vmatpush1.bf16.msra.mxu0 %v3418_v14  ;;  %2537 = vmatpush1.bf16.msra.mxu1 %v3419_v32 }
 0x6d5   :  { %2497 = vmatprep.subr.bf16.mxu0 %v3420_v61  ;;  %2538 = vmatprep.subr.bf16.mxu1 %v3421_v33 }
 0x6d8   :  { %2498 = vmatpush1.bf16.msra.mxu0 %v3422_v17  ;;  %2539 = vmatpush1.bf16.msra.mxu1 %v3423_v35 }
 0x6d9   :  { %2591 = vmatprep.subr.bf16.mxu0 %v3424_v27  ;;  %2632 = vmatprep.subr.bf16.mxu1 %v3425_v23 }
 0x76e   :  { %v2227_v24 = vpop.f32.mrb[48].mxu0  ;;  %v2268_v4 = vpop.f32.mrb[48].mxu1 }
 0x76f   :  { %v2229_v7 = vpop.f32.mrb[49].mxu0  ;;  %v2270_v18 = vpop.f32.mrb[49].mxu1 }
 0x770   :  { %v2279_v8 = vcombine.low %v2227_v24, %v2229_v7  ;;  %v2280_v6 = vcombine.low %v2268_v4, %v2270_v18  ;;  %v2231_v5 = vpop.f32.mrb[50].mxu0  ;;  %v2272_v9 = vpop.f32.mrb[50].mxu1 }
 0x771   :  { %v2232_v10 = vpop.f32.mrb[51].mxu0  ;;  %v2273_v30 = vpop.f32.mrb[51].mxu1 }
 0x772   :  { %v2287_v15 = vrot.slane %v2279_v8, %v5250_v47  ;;  %v2294_v28 = vrot.slane %v2280_v6, %v5250_v47  ;;  %v2407_v30 = vld [vmem:[#allocation3] sm:$0x3] }
 0x774   :  { %v2295_v29 = vcombine.low %v2287_v15, %v2294_v28  ;;  %v2926_v28 = vld [vmem:[%s5060_s1 + $0x8] sm:$0xff] }
 0x776   :  { %v2297_v63 = vadd.f32 %v2925_v19, %v2295_v29 }
 0x778   :  { %v2927_v25 = vmul.f32 -1.442695, %v2297_v63  ;;  %v2415_v1 = vrot.slane %v2297_v63, 2  ;;  %v2426_v2 = vrot.slane %v2297_v63, 6  ;;  %v2423_v60 = vrot.slane %v2297_v63, 4 }
 0x77a   :  { %3234 = vpow2.f32 %v2927_v25  ;;  %v2928_v46 = vmul.f32 -1.442695, %v2415_v1  ;;  %v2929_v62 = vmul.f32 -1.442695, %v2426_v2 }
 0x77c   :  { %3236 = vpow2.f32 %v2928_v46 }
 0x77d   :  { %3238 = vpow2.f32 %v2929_v62 }
 0x784   :  { %v3235_v26 = vpop.eup %3234 }
 0x785   :  { %v2411_v12 = vadd.f32 1.0, %v3235_v26 }
 0x786   :  { %v3237_v13 = vpop.eup %3236 }
 0x787   :  { %3240 = vrcp.f32 %v2411_v12  ;;  %v2420_v14 = vadd.f32 1.0, %v3237_v13  ;;  %v3239_v35 = vpop.eup %3238 }
 0x788   :  { %3242 = vtanh.f32 %v2423_v60  ;;  %v2431_v15 = vadd.f32 1.0, %v3239_v35 }
 0x789   :  { %3244 = vrcp.f32 %v2420_v14 }
 0x78a   :  { %3246 = vrcp.f32 %v2431_v15 }
 0x78e   :  { %v2336_v32 = vpop.f32.mrb[52].mxu0  ;;  %v2377_v61 = vpop.f32.mrb[52].mxu1 }
 0x78f   :  { %v2338_v33 = vpop.f32.mrb[53].mxu0  ;;  %v2379_v17 = vpop.f32.mrb[53].mxu1 }
 0x790   :  { %v2388_v27 = vcombine.low %v2336_v32, %v2338_v33  ;;  %v2389_v23 = vcombine.low %v2377_v61, %v2379_v17  ;;  %v2340_v24 = vpop.f32.mrb[54].mxu0  ;;  %v2381_v4 = vpop.f32.mrb[54].mxu1 }
 0x791   :  { %v3241_v7 = vpop.eup %3240  ;;  %v2341_v18 = vpop.f32.mrb[55].mxu0 }
 0x792   :  { %v2382_v8 = vpop.f32.mrb[55].mxu1  ;;  %v3243_v6 = vpop.eup %3242  ;;  %v2396_v5 = vrot.slane %v2388_v27, %v5250_v47  ;;  %v2403_v9 = vrot.slane %v2389_v23, %v5250_v47 }
 0x793   :  { %v3245_v10 = vpop.eup %3244  ;;  %v2435_v29 = vmul.f32 %v3243_v6, %v3241_v7  ;;  %v2439_v8 = vld [vmem:[#allocation5] sm:$0x3] }
 0x794   :  { %v2434_v19 = vmul.f32 %v3245_v10, %v2407_v30  ;;  %v2404_v63 = vcombine.low %v2396_v5, %v2403_v9  ;;  %v3247_v60 = vpop.eup %3246 }
 0x796   :  { %v2436_v25 = vadd.f32 %v2435_v29, %v2434_v19  ;;  %v2406_v1 = vadd.f32 %v2926_v28, %v2404_v63 }
 0x798   :  { %3248 = vtanh.f32 %v2436_v25  ;;  %2472 = vst [vmem:[#allocation3] sm:$0x3] %v2436_v25  ;;  %v2930_v46 = vmul.f32 -1.442695, %v2406_v1  ;;  %v2447_v2 = vrot.slane %v2406_v1, 2  ;;  %v2458_v26 = vrot.slane %v2406_v1, 6 }
 0x799   :  { %v2455_v61 = vrot.slane %v2406_v1, 4 }
 0x79a   :  { %3250 = vpow2.f32 %v2930_v46  ;;  %v2931_v62 = vmul.f32 -1.442695, %v2447_v2  ;;  %v2932_v13 = vmul.f32 -1.442695, %v2458_v26 }
 0x79c   :  { %3252 = vpow2.f32 %v2931_v62 }
 0x79d   :  { %3254 = vpow2.f32 %v2932_v13 }
 0x7a2   :  { %v3249_v12 = vpop.eup %3248 }
 0x7a3   :  { %v2438_v14 = vmul.f32 %v3249_v12, %v3247_v60 }
 0x7a4   :  { %v3251_v32 = vpop.eup %3250 }
 0x7a5   :  { %2933 = vst [vmem:[%s5061_s4 + $0xc] sm:$0x3] %v2438_v14  ;;  %2471 = vst [vmem:[#allocation2] sm:$0x3] %v2438_v14  ;;  %v2443_v33 = vadd.f32 1.0, %v3251_v32 }
 0x7a6   :  { %v3253_v17 = vpop.eup %3252  ;;  %v2696_v14 = vld [vmem:[#allocation3] sm:$0x3] }
 0x7a7   :  { %3256 = vrcp.f32 %v2443_v33  ;;  %v2452_v35 = vadd.f32 1.0, %v3253_v17  ;;  %v3255_v24 = vpop.eup %3254 }
 0x7a8   :  { %3258 = vtanh.f32 %v2455_v61  ;;  %v2463_v6 = vadd.f32 1.0, %v3255_v24  ;;  %v2588_v61 = vld [vmem:[%s5060_s1] sm:$0xff] }
 0x7a9   :  { %3260 = vrcp.f32 %v2452_v35 }
 0x7aa   :  { %3262 = vrcp.f32 %v2463_v6 }
 0x7ac   :  { %v2481_v27 = vld [vmem:[#allocation2] sm:$0x3] }
 0x7ad   :  { %v2482_v23 = vpack.c.bf16 %v2481_v27, %v2481_v27 }
 0x7af   :  { %2516 = vmatmul.mubr.bf16.vlgmr.msra.gmra.mrb[56].mxu0 %v2482_v23  ;;  %2557 = vmatmul.mubr.bf16.vlgmr.msra.gmra.mrb[56].mxu1 %v2482_v23 }
 0x7b0   :  { %2592 = vmatpush1.bf16.msra.mxu0 %v4751_v21  ;;  %2633 = vmatpush1.bf16.msra.mxu1 %v4757_v3 }
 0x7b1   :  { %v3257_v4 = vpop.eup %3256  ;;  %2593 = vmatprep.subr.bf16.mxu0 %v4763_v45  ;;  %2634 = vmatprep.subr.bf16.mxu1 %v4769_v22 }
 0x7b2   :  { %v3259_v7 = vpop.eup %3258  ;;  %2623 = vmatprep.mubr.bf16.mxu0 %v5169_v34  ;;  %2664 = vmatprep.mubr.bf16.mxu1 %v5169_v34 }
 0x7b3   :  { %v3261_v18 = vpop.eup %3260  ;;  %v2467_v9 = vmul.f32 %v3259_v7, %v3257_v4 }
 0x7b4   :  { %v2466_v5 = vmul.f32 %v3261_v18, %v2439_v8  ;;  %2594 = vmatpush1.bf16.msra.mxu0 %v4777_v42  ;;  %2635 = vmatpush1.bf16.msra.mxu1 %v4783_v43  ;;  %v3263_v34 = vpop.eup %3262 }
 0x7b5   :  { %2595 = vmatprep.subr.bf16.mxu0 %v4789_v16  ;;  %2636 = vmatprep.subr.bf16.mxu1 %v4795_v20 }
 0x7b6   :  { %v2468_v21 = vadd.f32 %v2467_v9, %v2466_v5 }
 0x7b8   :  { %3264 = vtanh.f32 %v2468_v21  ;;  %2474 = vst [vmem:[#allocation5] sm:$0x3] %v2468_v21  ;;  %2596 = vmatpush1.bf16.msra.mxu0 %v4801_v41  ;;  %2637 = vmatpush1.bf16.msra.mxu1 %v4807_v55 }
 0x7b9   :  { %2597 = vmatprep.subr.bf16.mxu0 %v4813_v31  ;;  %2638 = vmatprep.subr.bf16.mxu1 %v4819_v56 }
 0x7bc   :  { %2598 = vmatpush1.bf16.msra.mxu0 %v4825_v0  ;;  %2639 = vmatpush1.bf16.msra.mxu1 %v4831_v58 }
 0x7bd   :  { %2599 = vmatprep.subr.bf16.mxu0 %v4837_v38  ;;  %2640 = vmatprep.subr.bf16.mxu1 %v4843_v36 }
 0x7c0   :  { %2600 = vmatpush1.bf16.msra.mxu0 %v4849_v39  ;;  %2641 = vmatpush1.bf16.msra.mxu1 %v4855_v37  ;;  %v2935_v37 = vld [vmem:[%s5059_s0 + $0x38] sm:$0xff] }
 0x7c1   :  { %2601 = vmatprep.subr.bf16.mxu0 %v4861_v54  ;;  %2642 = vmatprep.subr.bf16.mxu1 %v4867_v48 }
 0x7c2   :  { %v3265_v3 = vpop.eup %3264 }
 0x7c3   :  { %v2470_v45 = vmul.f32 %v3265_v3, %v3263_v34 }
 0x7c4   :  { %2602 = vmatpush1.bf16.msra.mxu0 %v4873_v50  ;;  %2643 = vmatpush1.bf16.msra.mxu1 %v4879_v44 }
 0x7c5   :  { %2934 = vst [vmem:[%s5062_s5 + $0x2] sm:$0x3] %v2470_v45  ;;  %2473 = vst [vmem:[#allocation4] sm:$0x3] %v2470_v45  ;;  %2603 = vmatprep.subr.bf16.mxu0 %v4888_v51  ;;  %2644 = vmatprep.subr.bf16.mxu1 %v4894_v49 }
 0x7c8   :  { %2604 = vmatpush1.bf16.msra.mxu0 %v4900_v59  ;;  %2645 = vmatpush1.bf16.msra.mxu1 %v4906_v52 }
 0x7c9   :  { %2605 = vmatprep.subr.bf16.mxu0 %v4912_v57  ;;  %2646 = vmatprep.subr.bf16.mxu1 %v4918_v11 }
 0x7cc   :  { %2606 = vmatpush1.bf16.msra.mxu0 %v4924_v40  ;;  %2647 = vmatpush1.bf16.msra.mxu1 %v4930_v53  ;;  %v2589_v22 = vld [vmem:[#allocation4] sm:$0x3] }
 0x7cd   :  { %v2590_v42 = vpack.c.bf16 %v2589_v22, %v2589_v22 }
 0x7cf   :  { %2624 = vmatmul.mubr.bf16.vlgmr.msra.gmra.mrb[60].mxu0 %v2590_v42  ;;  %2665 = vmatmul.mubr.bf16.vlgmr.msra.gmra.mrb[60].mxu1 %v2590_v42 }
 0x882   :  { %v2517_v43 = vpop.f32.mrb[56].mxu0  ;;  %v2558_v16 = vpop.f32.mrb[56].mxu1 }
 0x883   :  { %v2519_v20 = vpop.f32.mrb[57].mxu0  ;;  %v2560_v41 = vpop.f32.mrb[57].mxu1 }
 0x884   :  { %v2569_v55 = vcombine.low %v2517_v43, %v2519_v20  ;;  %v2570_v31 = vcombine.low %v2558_v16, %v2560_v41  ;;  %v2521_v56 = vpop.f32.mrb[58].mxu0  ;;  %v2562_v0 = vpop.f32.mrb[58].mxu1  ;;  %v2728_v20 = vld [vmem:[#allocation5] sm:$0x3] }
 0x885   :  { %v2522_v58 = vpop.f32.mrb[59].mxu0  ;;  %v2563_v38 = vpop.f32.mrb[59].mxu1 }
 0x886   :  { %v2577_v36 = vrot.slane %v2569_v55, %v5250_v47  ;;  %v2584_v39 = vrot.slane %v2570_v31, %v5250_v47 }
 0x888   :  { %v2585_v54 = vcombine.low %v2577_v36, %v2584_v39 }
 0x88a   :  { %v2587_v48 = vadd.f32 %v2935_v37, %v2585_v54 }
 0x88c   :  { %v2936_v50 = vmul.f32 -1.442695, %v2587_v48  ;;  %v2704_v44 = vrot.slane %v2587_v48, 2  ;;  %v2715_v49 = vrot.slane %v2587_v48, 6  ;;  %v2712_v57 = vrot.slane %v2587_v48, 4 }
 0x88e   :  { %3266 = vpow2.f32 %v2936_v50  ;;  %v2937_v51 = vmul.f32 -1.442695, %v2704_v44  ;;  %v2938_v59 = vmul.f32 -1.442695, %v2715_v49 }
 0x890   :  { %3268 = vpow2.f32 %v2937_v51 }
 0x891   :  { %3270 = vpow2.f32 %v2938_v59 }
 0x898   :  { %v3267_v52 = vpop.eup %3266 }
 0x899   :  { %v2700_v11 = vadd.f32 1.0, %v3267_v52 }
 0x89a   :  { %v3269_v40 = vpop.eup %3268 }
 0x89b   :  { %3272 = vrcp.f32 %v2700_v11  ;;  %v2709_v53 = vadd.f32 1.0, %v3269_v40  ;;  %v3271_v19 = vpop.eup %3270 }
 0x89c   :  { %3274 = vtanh.f32 %v2712_v57  ;;  %v2720_v32 = vadd.f32 1.0, %v3271_v19 }
 0x89d   :  { %3276 = vrcp.f32 %v2709_v53 }
 0x89e   :  { %3278 = vrcp.f32 %v2720_v32 }
 0x8a2   :  { %v2625_v10 = vpop.f32.mrb[60].mxu0  ;;  %v2666_v30 = vpop.f32.mrb[60].mxu1 }
 0x8a3   :  { %v2627_v15 = vpop.f32.mrb[61].mxu0  ;;  %v2668_v28 = vpop.f32.mrb[61].mxu1 }
 0x8a4   :  { %v2677_v29 = vcombine.low %v2625_v10, %v2627_v15  ;;  %v2678_v63 = vcombine.low %v2666_v30, %v2668_v28  ;;  %v2629_v25 = vpop.f32.mrb[62].mxu0  ;;  %v2670_v1 = vpop.f32.mrb[62].mxu1 }
 0x8a5   :  { %v3273_v46 = vpop.eup %3272  ;;  %v2630_v2 = vpop.f32.mrb[63].mxu0 }
 0x8a6   :  { %v2671_v62 = vpop.f32.mrb[63].mxu1  ;;  %v3275_v26 = vpop.eup %3274  ;;  %v2685_v60 = vrot.slane %v2677_v29, %v5250_v47  ;;  %v2692_v12 = vrot.slane %v2678_v63, %v5250_v47 }
 0x8a7   :  { %v3277_v13 = vpop.eup %3276  ;;  %v2724_v17 = vmul.f32 %v3275_v26, %v3273_v46 }
 0x8a8   :  { %v2723_v33 = vmul.f32 %v3277_v13, %v2696_v14  ;;  %v2693_v35 = vcombine.low %v2685_v60, %v2692_v12  ;;  %v3279_v18 = vpop.eup %3278 }
 0x8aa   :  { %v2725_v27 = vadd.f32 %v2724_v17, %v2723_v33  ;;  %v2695_v23 = vadd.f32 %v2693_v35, %v2588_v61 }
 0x8ac   :  { %3280 = vtanh.f32 %v2725_v27  ;;  %2761 = vst [vmem:[#allocation3] sm:$0x3] %v2725_v27  ;;  %v2939_v24 = vmul.f32 -1.442695, %v2695_v23  ;;  %v2736_v4 = vrot.slane %v2695_v23, 2  ;;  %v2747_v47 = vrot.slane %v2695_v23, 6 }
 0x8ad   :  { %v2744_v21 = vrot.slane %v2695_v23, 4 }
 0x8ae   :  { %3282 = vpow2.f32 %v2939_v24  ;;  %v2940_v7 = vmul.f32 -1.442695, %v2736_v4  ;;  %v2941_v6 = vmul.f32 -1.442695, %v2747_v47 }
 0x8b0   :  { %3284 = vpow2.f32 %v2940_v7 }
 0x8b1   :  { %3286 = vpow2.f32 %v2941_v6 }
 0x8b6   :  { %v3281_v8 = vpop.eup %3280 }
 0x8b7   :  { %v2727_v5 = vmul.f32 %v3281_v8, %v3279_v18 }
 0x8b8   :  { %v3283_v9 = vpop.eup %3282 }
 0x8b9   :  { %2760 = vst [vmem:[#allocation2] sm:$0x3] %v2727_v5  ;;  %2942 = vst [vmem:[%s5061_s4 + $0xe] sm:$0x3] %v2727_v5  ;;  %v2732_v34 = vadd.f32 1.0, %v3283_v9 }
 0x8ba   :  { %v3285_v3 = vpop.eup %3284 }
 0x8bb   :  { %3288 = vrcp.f32 %v2732_v34  ;;  %v2741_v45 = vadd.f32 1.0, %v3285_v3  ;;  %v3287_v22 = vpop.eup %3286 }
 0x8bc   :  { %3290 = vtanh.f32 %v2744_v21  ;;  %v2752_v41 = vadd.f32 1.0, %v3287_v22 }
 0x8bd   :  { %3292 = vrcp.f32 %v2741_v45 }
 0x8be   :  { %3294 = vrcp.f32 %v2752_v41 }
 0x8c5   :  { %v3289_v42 = vpop.eup %3288 }
 0x8c6   :  { %v3291_v43 = vpop.eup %3290 }
 0x8c7   :  { %v3293_v16 = vpop.eup %3292  ;;  %v2756_v31 = vmul.f32 %v3291_v43, %v3289_v42 }
 0x8c8   :  { %v2755_v55 = vmul.f32 %v3293_v16, %v2728_v20  ;;  %v3295_v0 = vpop.eup %3294 }
 0x8ca   :  { %v2757_v56 = vadd.f32 %v2756_v31, %v2755_v55 }
 0x8cc   :  { %3296 = vtanh.f32 %v2757_v56  ;;  %2763 = vst [vmem:[#allocation5] sm:$0x3] %v2757_v56 }
 0x8d6   :  { %v3297_v58 = vpop.eup %3296 }
 0x8d7   :  { %v2759_v38 = vmul.f32 %v3297_v58, %v3295_v0 }
 0x8d9   :  { %2762 = vst [vmem:[#allocation4] sm:$0x3] %v2759_v38  ;;  %2766 = vst [vmem:[%s5062_s5] sm:$0x3] %v2759_v38 }

</bundles_post_ra>
